<compile_context>
chip_gen: v6e
topology: v6e:2x2x1
jax: 0.10.0
libtpu: 0.0.40
codegen_flags: <defaults>
</compile_context>

<pallas_src>
import functools

import numpy as np
import jax
import jax.numpy as jnp
from jax import lax
from jax.experimental import pallas as pl
from jax.experimental.pallas import tpu as pltpu


# ----------------------------------------------------------------------------- #
# Config (small shapes consistent with the PyTorch module).
# ----------------------------------------------------------------------------- #
CFG = dict(
    num_leads=4,
    seq_length=64,
    net_filter_size=[8, 16, 16],
    net_downsample_factors=[1, 2, 2],
    kernel_size=5,
    se_reduction=4,
    age_sex_output_dim=16,
    num_outputs=5,
    num_ensembles=2,
)


def _padding(downsample, kernel_size):
    return max(0, int(np.floor((kernel_size - downsample + 1) / 2)))


def _block_plan(cfg):
    fs = cfg["net_filter_size"]
    ds = cfg["net_downsample_factors"]
    blocks = []
    n_in = fs[0]
    for i, (f, d) in enumerate(zip(fs[1:], ds[1:])):
        blocks.append(dict(idx=i, n_in=n_in, n_out=f, downsample=d,
                           first=(i == 0), skip_conv=(n_in != f)))
        n_in = f
    return blocks


def _param_order(cfg):
    order = ["conv1_w", "bn1_scale", "bn1_shift"]
    for blk in _block_plan(cfg):
        p = "b%d_" % blk["idx"]
        if not blk["first"]:
            order += [p + "bn1_scale", p + "bn1_shift"]
        order += [p + "conv1_w", p + "bn2_scale", p + "bn2_shift",
                  p + "conv2_w", p + "conv2_b", p + "se_w1", p + "se_w2"]
        if blk["skip_conv"]:
            order += [p + "skip_w", p + "skip_b"]
    order += ["bn2_scale", "bn2_shift",
              "age_w", "age_b", "pred_w_age", "pred_w_feat", "pred_b"]
    return order


# ----------------------------------------------------------------------------- #
# In-kernel helpers (operate on loaded values, channels-first (C, L)).
# ----------------------------------------------------------------------------- #
def _conv1d_cf(x, w_flat, K, stride, pad):
    """Conv1d, channels-first.  x: (Cin, L); w_flat: (Cout, K*Cin) where column
    k*Cin+ci == torch weight[co, ci, k].  Shift / zero-pad / stride are folded
    into an iota-built selection matrix, so the conv is 2*K small MXU matmuls."""
    Cin, L = x.shape
    Lout = (L + 2 * pad - K) // stride + 1
    li = lax.broadcasted_iota(jnp.int32, (L, Lout), 0)
    lo = lax.broadcasted_iota(jnp.int32, (L, Lout), 1)
    acc = None
    for k in range(K):
        # output position lo reads input position lo*stride + k - pad (zero outside)
        sel = (li == lo * stride + (k - pad)).astype(x.dtype)        # (L, Lout)
        xk = jnp.dot(x, sel, preferred_element_type=jnp.float32)     # (Cin, Lout)
        wk = w_flat[:, k * Cin:(k + 1) * Cin]                        # (Cout, Cin)
        t = jnp.dot(wk, xk, preferred_element_type=jnp.float32)
        acc = t if acc is None else acc + t
    return acc


def _maxpool1d_cf(x, d):
    """MaxPool1d(d, stride=d) over the lane (L) axis via selection matmuls."""
    if d == 1:
        return x
    _, L = x.shape
    Lout = L // d
    li = lax.broadcasted_iota(jnp.int32, (L, Lout), 0)
    lo = lax.broadcasted_iota(jnp.int32, (L, Lout), 1)
    out = None
    for r in range(d):
        sel = (li == d * lo + r).astype(x.dtype)
        v = jnp.dot(x, sel, preferred_element_type=jnp.float32)
        out = v if out is None else jnp.maximum(out, v)
    return out


def _bn_relu(x, scale, shift, relu=True):
    y = x * scale + shift
    return jnp.maximum(y, 0.0) if relu else y


def _se_gate(x, w1, w2):
    """Squeeze-and-Excitation: mean over L, FC-ReLU-FC-Sigmoid, channel gate.
    w1: (C//r, C), w2: (C, C//r) — PyTorch nn.Linear weight layout."""
    y = jnp.mean(x, axis=1, keepdims=True)                                    # (C, 1)
    h = jnp.maximum(jnp.dot(w1, y, preferred_element_type=jnp.float32), 0.0)  # (Cr, 1)
    z = jnp.dot(w2, h, preferred_element_type=jnp.float32)                    # (C, 1)
    s = 1.0 / (1.0 + jnp.exp(-z))
    return x * s


# ----------------------------------------------------------------------------- #
# Fused per-member forward kernel (whole network in one kernel body).
# ----------------------------------------------------------------------------- #
def _make_fused_kernel(cfg, names):
    K = cfg["kernel_size"]
    ds0 = cfg["net_downsample_factors"][0]
    blocks = _block_plan(cfg)

    def kernel(traces_ref, age_ref, *rest):
        out_ref = rest[-1]                               # (B, num_outputs)
        p = dict(zip(names, rest[:-1]))
        B = traces_ref.shape[0]

        # Age/sex embedding (Linear + ReLU) for the whole batch.
        emb = jnp.maximum(
            jnp.dot(age_ref[...], p["age_w"][...],
                    preferred_element_type=jnp.float32) + p["age_b"][...], 0.0)

        for b in range(B):                               # B=2: static unroll
            x = traces_ref[b]                            # (Cin, L) channels-first
            # --- ResNet1d stem ---
            x = _conv1d_cf(x, p["conv1_w"][...], K, ds0, _padding(ds0, K))
            x = _bn_relu(x, p["bn1_scale"][...], p["bn1_shift"][...])
            # --- residual blocks ---
            for blk in blocks:
                pre = "b%d_" % blk["idx"]
                d = blk["downsample"]
                x_skip = _maxpool1d_cf(x, d)
                if blk["skip_conv"]:                     # 1x1 conv on skip path
                    x_skip = (jnp.dot(p[pre + "skip_w"][...], x_skip,
                                      preferred_element_type=jnp.float32)
                              + p[pre + "skip_b"][...])
                h = x
                if not blk["first"]:
                    h = _bn_relu(h, p[pre + "bn1_scale"][...],
                                 p[pre + "bn1_shift"][...])
                # dropout1 / dropout2: identity (ensemble members run in eval mode)
                h = _conv1d_cf(h, p[pre + "conv1_w"][...], K, 1, _padding(1, K))
                h = _bn_relu(h, p[pre + "bn2_scale"][...], p[pre + "bn2_shift"][...])
                h = _conv1d_cf(h, p[pre + "conv2_w"][...], K, d, _padding(d, K))
                h = h + p[pre + "conv2_b"][...]
                h = _se_gate(h, p[pre + "se_w1"][...], p[pre + "se_w2"][...])
                x = h + x_skip
            x = _bn_relu(x, p["bn2_scale"][...], p["bn2_shift"][...])  # final BN+ReLU

            # --- prediction head: cat([emb_b, features.view(C*L)]) @ W + b ---
            row = jnp.dot(emb[b:b + 1, :], p["pred_w_age"][...],
                          preferred_element_type=jnp.float32)          # (1, O)
            C_last = x.shape[0]
            for c in range(C_last):                      # flatten order = c*L + l
                row = row + jnp.dot(x[c:c + 1, :], p["pred_w_feat"][c],
                                    preferred_element_type=jnp.float32)
            row = row + p["pred_b"][...]
            out_ref[b:b + 1, :] = row

    return kernel


def ensemble_forward(stacked_params, traces, age_sex, cfg):
    """traces: PyTorch NCL layout (B, num_leads, seq_length) — this is already
    the channels-first layout the kernel uses.  Returns (B, num_outputs)."""
    E = cfg["num_ensembles"]
    B = traces.shape[0]
    O = cfg["num_outputs"]
    names = _param_order(cfg)
    param_arrays = [stacked_params[n] for n in names]

    def shared_spec(shape):                 # same block for every ensemble member
        nd = len(shape)
        return pl.BlockSpec(tuple(int(s) for s in shape),
                            lambda e, _n=nd: (0,) * _n)

    def member_spec(shape):                 # leading E axis selected by grid index
        nd = len(shape)
        return pl.BlockSpec((None,) + tuple(int(s) for s in shape[1:]),
                            lambda e, _n=nd: (e,) + (0,) * (_n - 1))

    in_specs = ([shared_spec(traces.shape), shared_spec(age_sex.shape)]
                + [member_spec(a.shape) for a in param_arrays])
    out_spec = pl.BlockSpec((None, B, O), lambda e: (e, 0, 0))

    kernel = _make_fused_kernel(cfg, names)
    per_member = pl.pallas_call(
        kernel,
        out_shape=jax.ShapeDtypeStruct((E, B, O), jnp.float32),
        grid=(E,),
        in_specs=in_specs,
        out_specs=out_spec,
        compiler_params=pltpu.CompilerParams(
            dimension_semantics=("parallel",)),   # members -> separate TCs on v7x
    )(traces, age_sex, *param_arrays)

    # Ensemble mean over a (E, B, O) tensor is ~20 FLOPs: keep it in plain jnp.
    return jnp.mean(per_member, axis=0)


# ----------------------------------------------------------------------------- #
# Deterministic synthetic parameters (kernel layout).
# ----------------------------------------------------------------------------- #
def _bn_fold(key, C):
    k1, k2, k3, k4 = jax.random.split(key, 4)
    gamma = 1.0 + 0.1 * jax.random.normal(k1, (C, 1), jnp.float32)
    beta = 0.1 * jax.random.normal(k2, (C, 1), jnp.float32)
    mean = 0.1 * jax.random.normal(k3, (C, 1), jnp.float32)
    var = 0.5 + jax.random.uniform(k4, (C, 1))
    scale = gamma / jnp.sqrt(var + 1e-5)
    shift = beta - mean * scale
    return scale.astype(jnp.float32), shift.astype(jnp.float32)


def init_member_params(key, cfg):
    """Per-member synthetic parameters in kernel layout:
       conv:    (Cout, K*Cin), column k*Cin+ci == torch weight[co, ci, k]
       BN:      eval-mode running stats folded to (scale, shift) of shape (C, 1)
       1x1/SE:  PyTorch nn.Linear/Conv1x1 weight layout (out, in)
       age/pred: weight.T so that y = x @ W."""
    K = cfg["kernel_size"]
    fs = cfg["net_filter_size"]
    ki = iter(jax.random.split(key, 32))
    p = {}

    def conv_w(cout, cin):
        return (jax.random.normal(next(ki), (cout, K * cin), jnp.float32)
                / np.sqrt(K * cin))

    p["conv1_w"] = conv_w(fs[0], cfg["num_leads"])
    p["bn1_scale"], p["bn1_shift"] = _bn_fold(next(ki), fs[0])
    for blk in _block_plan(cfg):
        pre = "b%d_" % blk["idx"]
        n_in, n_out = blk["n_in"], blk["n_out"]
        if not blk["first"]:
            p[pre + "bn1_scale"], p[pre + "bn1_shift"] = _bn_fold(next(ki), n_in)
        p[pre + "conv1_w"] = conv_w(n_out, n_in)
        p[pre + "bn2_scale"], p[pre + "bn2_shift"] = _bn_fold(next(ki), n_out)
        p[pre + "conv2_w"] = conv_w(n_out, n_out)
        p[pre + "conv2_b"] = 0.01 * jax.random.normal(next(ki), (n_out, 1), jnp.float32)
        cr = n_out // cfg["se_reduction"]
        p[pre + "se_w1"] = (jax.random.normal(next(ki), (cr, n_out), jnp.float32)
                            / np.sqrt(n_out))
        p[pre + "se_w2"] = (jax.random.normal(next(ki), (n_out, cr), jnp.float32)
                            / np.sqrt(cr))
        if blk["skip_conv"]:
            p[pre + "skip_w"] = (jax.random.normal(next(ki), (n_out, n_in), jnp.float32)
                                 / np.sqrt(n_in))
            p[pre + "skip_b"] = 0.01 * jax.random.normal(next(ki), (n_out, 1), jnp.float32)
    p["bn2_scale"], p["bn2_shift"] = _bn_fold(next(ki), fs[-1])

    asd = cfg["age_sex_output_dim"]
    p["age_w"] = jax.random.normal(next(ki), (2, asd), jnp.float32) / np.sqrt(2)
    p["age_b"] = 0.01 * jax.random.normal(next(ki), (1, asd), jnp.float32)

    C_last = fs[-1]
    L_final = cfg["seq_length"] // int(np.prod(cfg["net_downsample_factors"]))
    comb = C_last * L_final + asd
    O = cfg["num_outputs"]
    pred_w = jax.random.normal(next(ki), (comb, O), jnp.float32) / np.sqrt(comb)
    p["pred_b"] = 0.01 * jax.random.normal(next(ki), (1, O), jnp.float32)
    # Split the prediction weight to match torch.cat([emb, features.view(B, C*L)]):
    # rows [:asd] multiply the age embedding, row asd + c*L_final + l multiplies
    # feature channel c at position l  -> pre-reshape to (C_last, L_final, O).
    p["pred_w_age"] = pred_w[:asd]
    p["pred_w_feat"] = pred_w[asd:].reshape(C_last, L_final, O)
    return p


def stack_members(member_params, cfg):
    names = _param_order(cfg)
    return {n: jnp.stack([m[n] for m in member_params], axis=0) for n in names}


# ----------------------------------------------------------------------------- #
if __name__ == "__main__":
    key = jax.random.PRNGKey(0)
    k_in, k_as, *k_members = jax.random.split(key, 2 + CFG["num_ensembles"])

    B = 2
    traces = jax.random.normal(
        k_in, (B, CFG["num_leads"], CFG["seq_length"]), jnp.float32)  # PyTorch NCL
    age_sex = jax.random.normal(k_as, (B, 2), jnp.float32)

    # TODO(synk): checkpoint loading (.pth / DDP state-dict conversion) and the
    # tqdm progress bar are host-side with no Pallas equivalent; ensemble members
    # use deterministic synthetic parameters instead.
    members = [init_member_params(k, CFG) for k in k_members]
    stacked = stack_members(members, CFG)

    fwd = jax.jit(functools.partial(ensemble_forward, cfg=CFG))
    logits = fwd(stacked, traces, age_sex)
    jax.block_until_ready(logits)
    assert logits.shape == (B, CFG["num_outputs"]), logits.shape
    assert bool(jnp.all(jnp.isfinite(logits)))
    print("KERNEL_OK")
</pallas_src>

<mosaic_0001>
module attributes {stable_mosaic.version = 11 : i64} {
  func.func @kernel(%arg0: i32, %arg1: memref<2x4x64xf32, #tpu.memory_space<vmem>>, %arg2: memref<2x2xf32, #tpu.memory_space<vmem>>, %arg3: memref<1x8x20xf32, #tpu.memory_space<vmem>>, %arg4: memref<1x8x1xf32, #tpu.memory_space<vmem>>, %arg5: memref<1x8x1xf32, #tpu.memory_space<vmem>>, %arg6: memref<1x16x40xf32, #tpu.memory_space<vmem>>, %arg7: memref<1x16x1xf32, #tpu.memory_space<vmem>>, %arg8: memref<1x16x1xf32, #tpu.memory_space<vmem>>, %arg9: memref<1x16x80xf32, #tpu.memory_space<vmem>>, %arg10: memref<1x16x1xf32, #tpu.memory_space<vmem>>, %arg11: memref<1x4x16xf32, #tpu.memory_space<vmem>>, %arg12: memref<1x16x4xf32, #tpu.memory_space<vmem>>, %arg13: memref<1x16x8xf32, #tpu.memory_space<vmem>>, %arg14: memref<1x16x1xf32, #tpu.memory_space<vmem>>, %arg15: memref<1x16x1xf32, #tpu.memory_space<vmem>>, %arg16: memref<1x16x1xf32, #tpu.memory_space<vmem>>, %arg17: memref<1x16x80xf32, #tpu.memory_space<vmem>>, %arg18: memref<1x16x1xf32, #tpu.memory_space<vmem>>, %arg19: memref<1x16x1xf32, #tpu.memory_space<vmem>>, %arg20: memref<1x16x80xf32, #tpu.memory_space<vmem>>, %arg21: memref<1x16x1xf32, #tpu.memory_space<vmem>>, %arg22: memref<1x4x16xf32, #tpu.memory_space<vmem>>, %arg23: memref<1x16x4xf32, #tpu.memory_space<vmem>>, %arg24: memref<1x16x1xf32, #tpu.memory_space<vmem>>, %arg25: memref<1x16x1xf32, #tpu.memory_space<vmem>>, %arg26: memref<1x2x16xf32, #tpu.memory_space<vmem>>, %arg27: memref<1x1x16xf32, #tpu.memory_space<vmem>>, %arg28: memref<1x16x5xf32, #tpu.memory_space<vmem>>, %arg29: memref<1x16x16x5xf32, #tpu.memory_space<vmem>>, %arg30: memref<1x1x5xf32, #tpu.memory_space<vmem>>, %arg31: memref<1x2x5xf32, #tpu.memory_space<vmem>>) attributes {dimension_semantics = [#tpu.dimension_semantics<parallel>], iteration_bounds = array<i64: 2>, scalar_prefetch = 0 : i64, scratch_operands = 0 : i64, tpu.core_type = #tpu.core_type<tc>, window_params = [{pipeline_mode = #tpu.pipeline_mode<synchronous>, transform_indices = @transform_0, window_bounds = array<i64: 2, 4, 64>}, {pipeline_mode = #tpu.pipeline_mode<synchronous>, transform_indices = @transform_1, window_bounds = array<i64: 2, 2>}, {transform_indices = @transform_2, window_bounds = array<i64: 1, 8, 20>}, {transform_indices = @transform_3, window_bounds = array<i64: 1, 8, 1>}, {transform_indices = @transform_4, window_bounds = array<i64: 1, 8, 1>}, {transform_indices = @transform_5, window_bounds = array<i64: 1, 16, 40>}, {transform_indices = @transform_6, window_bounds = array<i64: 1, 16, 1>}, {transform_indices = @transform_7, window_bounds = array<i64: 1, 16, 1>}, {transform_indices = @transform_8, window_bounds = array<i64: 1, 16, 80>}, {transform_indices = @transform_9, window_bounds = array<i64: 1, 16, 1>}, {transform_indices = @transform_10, window_bounds = array<i64: 1, 4, 16>}, {transform_indices = @transform_11, window_bounds = array<i64: 1, 16, 4>}, {transform_indices = @transform_12, window_bounds = array<i64: 1, 16, 8>}, {transform_indices = @transform_13, window_bounds = array<i64: 1, 16, 1>}, {transform_indices = @transform_14, window_bounds = array<i64: 1, 16, 1>}, {transform_indices = @transform_15, window_bounds = array<i64: 1, 16, 1>}, {transform_indices = @transform_16, window_bounds = array<i64: 1, 16, 80>}, {transform_indices = @transform_17, window_bounds = array<i64: 1, 16, 1>}, {transform_indices = @transform_18, window_bounds = array<i64: 1, 16, 1>}, {transform_indices = @transform_19, window_bounds = array<i64: 1, 16, 80>}, {transform_indices = @transform_20, window_bounds = array<i64: 1, 16, 1>}, {transform_indices = @transform_21, window_bounds = array<i64: 1, 4, 16>}, {transform_indices = @transform_22, window_bounds = array<i64: 1, 16, 4>}, {transform_indices = @transform_23, window_bounds = array<i64: 1, 16, 1>}, {transform_indices = @transform_24, window_bounds = array<i64: 1, 16, 1>}, {transform_indices = @transform_25, window_bounds = array<i64: 1, 2, 16>}, {transform_indices = @transform_26, window_bounds = array<i64: 1, 1, 16>}, {transform_indices = @transform_27, window_bounds = array<i64: 1, 16, 5>}, {transform_indices = @transform_28, window_bounds = array<i64: 1, 16, 16, 5>}, {transform_indices = @transform_29, window_bounds = array<i64: 1, 1, 5>}, {transform_indices = @transform_30, window_bounds = array<i64: 1, 2, 5>}]} {
    %c0 = arith.constant 0 : index
    %c0_0 = arith.constant 0 : index
    %0 = vector.load %arg2[%c0, %c0_0] : memref<2x2xf32, #tpu.memory_space<vmem>>, vector<2x2xf32>
    %c0_1 = arith.constant 0 : index
    %c0_2 = arith.constant 0 : index
    %c0_3 = arith.constant 0 : index
    %1 = vector.load %arg26[%c0_1, %c0_2, %c0_3] : memref<1x2x16xf32, #tpu.memory_space<vmem>>, vector<1x2x16xf32>
    %2 = vector.shape_cast %1 : vector<1x2x16xf32> to vector<2x16xf32>
    %cst = arith.constant dense<0.000000e+00> : vector<2x16xf32>
    %3 = tpu.matmul %0, %2, %cst {dimension_numbers = #tpu.dot_dimension_numbers<[1], [0], [0], [1], [0, 0, 1, 1], [], []>} : vector<2x2xf32>, vector<2x16xf32>, vector<2x16xf32> -> vector<2x16xf32>
    %c0_4 = arith.constant 0 : index
    %c0_5 = arith.constant 0 : index
    %c0_6 = arith.constant 0 : index
    %4 = vector.load %arg27[%c0_4, %c0_5, %c0_6] : memref<1x1x16xf32, #tpu.memory_space<vmem>>, vector<1x1x16xf32>
    %5 = vector.shape_cast %4 : vector<1x1x16xf32> to vector<1x16xf32>
    %6 = vector.broadcast %5 : vector<1x16xf32> to vector<2x16xf32>
    %7 = arith.addf %3, %6 : vector<2x16xf32>
    %cst_7 = arith.constant 0.000000e+00 : f32
    %8 = vector.broadcast %cst_7 : f32 to vector<2x16xf32>
    %9 = arith.maximumf %7, %8 : vector<2x16xf32>
    %c0_8 = arith.constant 0 : index
    %c0_9 = arith.constant 0 : index
    %c0_10 = arith.constant 0 : index
    %10 = vector.load %arg1[%c0_8, %c0_9, %c0_10] : memref<2x4x64xf32, #tpu.memory_space<vmem>>, vector<1x4x64xf32>
    %11 = vector.shape_cast %10 : vector<1x4x64xf32> to vector<4x64xf32>
    %c0_11 = arith.constant 0 : index
    %c0_12 = arith.constant 0 : index
    %c0_13 = arith.constant 0 : index
    %12 = vector.load %arg3[%c0_11, %c0_12, %c0_13] : memref<1x8x20xf32, #tpu.memory_space<vmem>>, vector<1x8x20xf32>
    %13 = vector.shape_cast %12 : vector<1x8x20xf32> to vector<8x20xf32>
    %14 = tpu.iota {dimensions = array<i32: 0>} : vector<64x64xi32>
    %15 = tpu.iota {dimensions = array<i32: 1>} : vector<64x64xi32>
    %c1_i32 = arith.constant 1 : i32
    %16 = vector.broadcast %c1_i32 : i32 to vector<64x64xi32>
    %17 = arith.muli %15, %16 : vector<64x64xi32>
    %c-2_i32 = arith.constant -2 : i32
    %18 = vector.broadcast %c-2_i32 : i32 to vector<64x64xi32>
    %19 = arith.addi %17, %18 : vector<64x64xi32>
    %20 = arith.cmpi eq, %14, %19 : vector<64x64xi32>
    %21 = arith.extui %20 : vector<64x64xi1> to vector<64x64xi32>
    %22 = arith.sitofp %21 : vector<64x64xi32> to vector<64x64xf32>
    %cst_14 = arith.constant dense<0.000000e+00> : vector<4x64xf32>
    %23 = tpu.matmul %11, %22, %cst_14 {dimension_numbers = #tpu.dot_dimension_numbers<[1], [0], [0], [1], [0, 0, 1, 1], [], []>} : vector<4x64xf32>, vector<64x64xf32>, vector<4x64xf32> -> vector<4x64xf32>
    %24 = vector.extract_strided_slice %13 {offsets = [0, 0], sizes = [8, 4], strides = [1, 1]} : vector<8x20xf32> to vector<8x4xf32>
    %cst_15 = arith.constant dense<0.000000e+00> : vector<8x64xf32>
    %25 = tpu.matmul %24, %23, %cst_15 {dimension_numbers = #tpu.dot_dimension_numbers<[1], [0], [0], [1], [0, 0, 1, 1], [], []>} : vector<8x4xf32>, vector<4x64xf32>, vector<8x64xf32> -> vector<8x64xf32>
    %c1_i32_16 = arith.constant 1 : i32
    %26 = vector.broadcast %c1_i32_16 : i32 to vector<64x64xi32>
    %27 = arith.muli %15, %26 : vector<64x64xi32>
    %c-1_i32 = arith.constant -1 : i32
    %28 = vector.broadcast %c-1_i32 : i32 to vector<64x64xi32>
    %29 = arith.addi %27, %28 : vector<64x64xi32>
    %30 = arith.cmpi eq, %14, %29 : vector<64x64xi32>
    %31 = arith.extui %30 : vector<64x64xi1> to vector<64x64xi32>
    %32 = arith.sitofp %31 : vector<64x64xi32> to vector<64x64xf32>
    %cst_17 = arith.constant dense<0.000000e+00> : vector<4x64xf32>
    %33 = tpu.matmul %11, %32, %cst_17 {dimension_numbers = #tpu.dot_dimension_numbers<[1], [0], [0], [1], [0, 0, 1, 1], [], []>} : vector<4x64xf32>, vector<64x64xf32>, vector<4x64xf32> -> vector<4x64xf32>
    %34 = vector.extract_strided_slice %13 {offsets = [0, 4], sizes = [8, 4], strides = [1, 1]} : vector<8x20xf32> to vector<8x4xf32>
    %cst_18 = arith.constant dense<0.000000e+00> : vector<8x64xf32>
    %35 = tpu.matmul %34, %33, %cst_18 {dimension_numbers = #tpu.dot_dimension_numbers<[1], [0], [0], [1], [0, 0, 1, 1], [], []>} : vector<8x4xf32>, vector<4x64xf32>, vector<8x64xf32> -> vector<8x64xf32>
    %36 = arith.addf %25, %35 : vector<8x64xf32>
    %c1_i32_19 = arith.constant 1 : i32
    %37 = vector.broadcast %c1_i32_19 : i32 to vector<64x64xi32>
    %38 = arith.muli %15, %37 : vector<64x64xi32>
    %c0_i32 = arith.constant 0 : i32
    %39 = vector.broadcast %c0_i32 : i32 to vector<64x64xi32>
    %40 = arith.addi %38, %39 : vector<64x64xi32>
    %41 = arith.cmpi eq, %14, %40 : vector<64x64xi32>
    %42 = arith.extui %41 : vector<64x64xi1> to vector<64x64xi32>
    %43 = arith.sitofp %42 : vector<64x64xi32> to vector<64x64xf32>
    %cst_20 = arith.constant dense<0.000000e+00> : vector<4x64xf32>
    %44 = tpu.matmul %11, %43, %cst_20 {dimension_numbers = #tpu.dot_dimension_numbers<[1], [0], [0], [1], [0, 0, 1, 1], [], []>} : vector<4x64xf32>, vector<64x64xf32>, vector<4x64xf32> -> vector<4x64xf32>
    %45 = vector.extract_strided_slice %13 {offsets = [0, 8], sizes = [8, 4], strides = [1, 1]} : vector<8x20xf32> to vector<8x4xf32>
    %cst_21 = arith.constant dense<0.000000e+00> : vector<8x64xf32>
    %46 = tpu.matmul %45, %44, %cst_21 {dimension_numbers = #tpu.dot_dimension_numbers<[1], [0], [0], [1], [0, 0, 1, 1], [], []>} : vector<8x4xf32>, vector<4x64xf32>, vector<8x64xf32> -> vector<8x64xf32>
    %47 = arith.addf %36, %46 : vector<8x64xf32>
    %c1_i32_22 = arith.constant 1 : i32
    %48 = vector.broadcast %c1_i32_22 : i32 to vector<64x64xi32>
    %49 = arith.muli %15, %48 : vector<64x64xi32>
    %c1_i32_23 = arith.constant 1 : i32
    %50 = vector.broadcast %c1_i32_23 : i32 to vector<64x64xi32>
    %51 = arith.addi %49, %50 : vector<64x64xi32>
    %52 = arith.cmpi eq, %14, %51 : vector<64x64xi32>
    %53 = arith.extui %52 : vector<64x64xi1> to vector<64x64xi32>
    %54 = arith.sitofp %53 : vector<64x64xi32> to vector<64x64xf32>
    %cst_24 = arith.constant dense<0.000000e+00> : vector<4x64xf32>
    %55 = tpu.matmul %11, %54, %cst_24 {dimension_numbers = #tpu.dot_dimension_numbers<[1], [0], [0], [1], [0, 0, 1, 1], [], []>} : vector<4x64xf32>, vector<64x64xf32>, vector<4x64xf32> -> vector<4x64xf32>
    %56 = vector.extract_strided_slice %13 {offsets = [0, 12], sizes = [8, 4], strides = [1, 1]} : vector<8x20xf32> to vector<8x4xf32>
    %cst_25 = arith.constant dense<0.000000e+00> : vector<8x64xf32>
    %57 = tpu.matmul %56, %55, %cst_25 {dimension_numbers = #tpu.dot_dimension_numbers<[1], [0], [0], [1], [0, 0, 1, 1], [], []>} : vector<8x4xf32>, vector<4x64xf32>, vector<8x64xf32> -> vector<8x64xf32>
    %58 = arith.addf %47, %57 : vector<8x64xf32>
    %c1_i32_26 = arith.constant 1 : i32
    %59 = vector.broadcast %c1_i32_26 : i32 to vector<64x64xi32>
    %60 = arith.muli %15, %59 : vector<64x64xi32>
    %c2_i32 = arith.constant 2 : i32
    %61 = vector.broadcast %c2_i32 : i32 to vector<64x64xi32>
    %62 = arith.addi %60, %61 : vector<64x64xi32>
    %63 = arith.cmpi eq, %14, %62 : vector<64x64xi32>
    %64 = arith.extui %63 : vector<64x64xi1> to vector<64x64xi32>
    %65 = arith.sitofp %64 : vector<64x64xi32> to vector<64x64xf32>
    %cst_27 = arith.constant dense<0.000000e+00> : vector<4x64xf32>
    %66 = tpu.matmul %11, %65, %cst_27 {dimension_numbers = #tpu.dot_dimension_numbers<[1], [0], [0], [1], [0, 0, 1, 1], [], []>} : vector<4x64xf32>, vector<64x64xf32>, vector<4x64xf32> -> vector<4x64xf32>
    %67 = vector.extract_strided_slice %13 {offsets = [0, 16], sizes = [8, 4], strides = [1, 1]} : vector<8x20xf32> to vector<8x4xf32>
    %cst_28 = arith.constant dense<0.000000e+00> : vector<8x64xf32>
    %68 = tpu.matmul %67, %66, %cst_28 {dimension_numbers = #tpu.dot_dimension_numbers<[1], [0], [0], [1], [0, 0, 1, 1], [], []>} : vector<8x4xf32>, vector<4x64xf32>, vector<8x64xf32> -> vector<8x64xf32>
    %69 = arith.addf %58, %68 : vector<8x64xf32>
    %c0_29 = arith.constant 0 : index
    %c0_30 = arith.constant 0 : index
    %c0_31 = arith.constant 0 : index
    %70 = vector.load %arg4[%c0_29, %c0_30, %c0_31] : memref<1x8x1xf32, #tpu.memory_space<vmem>>, vector<1x8x1xf32>
    %71 = vector.shape_cast %70 : vector<1x8x1xf32> to vector<8x1xf32>
    %c0_32 = arith.constant 0 : index
    %c0_33 = arith.constant 0 : index
    %c0_34 = arith.constant 0 : index
    %72 = vector.load %arg5[%c0_32, %c0_33, %c0_34] : memref<1x8x1xf32, #tpu.memory_space<vmem>>, vector<1x8x1xf32>
    %73 = vector.shape_cast %72 : vector<1x8x1xf32> to vector<8x1xf32>
    %74 = vector.broadcast %71 : vector<8x1xf32> to vector<8x64xf32>
    %75 = arith.mulf %69, %74 : vector<8x64xf32>
    %76 = vector.broadcast %73 : vector<8x1xf32> to vector<8x64xf32>
    %77 = arith.addf %75, %76 : vector<8x64xf32>
    %cst_35 = arith.constant 0.000000e+00 : f32
    %78 = vector.broadcast %cst_35 : f32 to vector<8x64xf32>
    %79 = arith.maximumf %77, %78 : vector<8x64xf32>
    %80 = tpu.iota {dimensions = array<i32: 0>} : vector<64x32xi32>
    %81 = tpu.iota {dimensions = array<i32: 1>} : vector<64x32xi32>
    %c2_i32_36 = arith.constant 2 : i32
    %82 = vector.broadcast %c2_i32_36 : i32 to vector<64x32xi32>
    %83 = arith.muli %82, %81 : vector<64x32xi32>
    %c0_i32_37 = arith.constant 0 : i32
    %84 = vector.broadcast %c0_i32_37 : i32 to vector<64x32xi32>
    %85 = arith.addi %83, %84 : vector<64x32xi32>
    %86 = arith.cmpi eq, %80, %85 : vector<64x32xi32>
    %87 = arith.extui %86 : vector<64x32xi1> to vector<64x32xi32>
    %88 = arith.sitofp %87 : vector<64x32xi32> to vector<64x32xf32>
    %cst_38 = arith.constant dense<0.000000e+00> : vector<8x32xf32>
    %89 = tpu.matmul %79, %88, %cst_38 {dimension_numbers = #tpu.dot_dimension_numbers<[1], [0], [0], [1], [0, 0, 1, 1], [], []>} : vector<8x64xf32>, vector<64x32xf32>, vector<8x32xf32> -> vector<8x32xf32>
    %c2_i32_39 = arith.constant 2 : i32
    %90 = vector.broadcast %c2_i32_39 : i32 to vector<64x32xi32>
    %91 = arith.muli %90, %81 : vector<64x32xi32>
    %c1_i32_40 = arith.constant 1 : i32
    %92 = vector.broadcast %c1_i32_40 : i32 to vector<64x32xi32>
    %93 = arith.addi %91, %92 : vector<64x32xi32>
    %94 = arith.cmpi eq, %80, %93 : vector<64x32xi32>
    %95 = arith.extui %94 : vector<64x32xi1> to vector<64x32xi32>
    %96 = arith.sitofp %95 : vector<64x32xi32> to vector<64x32xf32>
    %cst_41 = arith.constant dense<0.000000e+00> : vector<8x32xf32>
    %97 = tpu.matmul %79, %96, %cst_41 {dimension_numbers = #tpu.dot_dimension_numbers<[1], [0], [0], [1], [0, 0, 1, 1], [], []>} : vector<8x64xf32>, vector<64x32xf32>, vector<8x32xf32> -> vector<8x32xf32>
    %98 = arith.maximumf %89, %97 : vector<8x32xf32>
    %c0_42 = arith.constant 0 : index
    %c0_43 = arith.constant 0 : index
    %c0_44 = arith.constant 0 : index
    %99 = vector.load %arg13[%c0_42, %c0_43, %c0_44] : memref<1x16x8xf32, #tpu.memory_space<vmem>>, vector<1x16x8xf32>
    %100 = vector.shape_cast %99 : vector<1x16x8xf32> to vector<16x8xf32>
    %cst_45 = arith.constant dense<0.000000e+00> : vector<16x32xf32>
    %101 = tpu.matmul %100, %98, %cst_45 {dimension_numbers = #tpu.dot_dimension_numbers<[1], [0], [0], [1], [0, 0, 1, 1], [], []>} : vector<16x8xf32>, vector<8x32xf32>, vector<16x32xf32> -> vector<16x32xf32>
    %c0_46 = arith.constant 0 : index
    %c0_47 = arith.constant 0 : index
    %c0_48 = arith.constant 0 : index
    %102 = vector.load %arg14[%c0_46, %c0_47, %c0_48] : memref<1x16x1xf32, #tpu.memory_space<vmem>>, vector<1x16x1xf32>
    %103 = vector.shape_cast %102 : vector<1x16x1xf32> to vector<16x1xf32>
    %104 = vector.broadcast %103 : vector<16x1xf32> to vector<16x32xf32>
    %105 = arith.addf %101, %104 : vector<16x32xf32>
    %c0_49 = arith.constant 0 : index
    %c0_50 = arith.constant 0 : index
    %c0_51 = arith.constant 0 : index
    %106 = vector.load %arg6[%c0_49, %c0_50, %c0_51] : memref<1x16x40xf32, #tpu.memory_space<vmem>>, vector<1x16x40xf32>
    %107 = vector.shape_cast %106 : vector<1x16x40xf32> to vector<16x40xf32>
    %108 = tpu.iota {dimensions = array<i32: 0>} : vector<64x64xi32>
    %109 = tpu.iota {dimensions = array<i32: 1>} : vector<64x64xi32>
    %c1_i32_52 = arith.constant 1 : i32
    %110 = vector.broadcast %c1_i32_52 : i32 to vector<64x64xi32>
    %111 = arith.muli %109, %110 : vector<64x64xi32>
    %c-2_i32_53 = arith.constant -2 : i32
    %112 = vector.broadcast %c-2_i32_53 : i32 to vector<64x64xi32>
    %113 = arith.addi %111, %112 : vector<64x64xi32>
    %114 = arith.cmpi eq, %108, %113 : vector<64x64xi32>
    %115 = arith.extui %114 : vector<64x64xi1> to vector<64x64xi32>
    %116 = arith.sitofp %115 : vector<64x64xi32> to vector<64x64xf32>
    %cst_54 = arith.constant dense<0.000000e+00> : vector<8x64xf32>
    %117 = tpu.matmul %79, %116, %cst_54 {dimension_numbers = #tpu.dot_dimension_numbers<[1], [0], [0], [1], [0, 0, 1, 1], [], []>} : vector<8x64xf32>, vector<64x64xf32>, vector<8x64xf32> -> vector<8x64xf32>
    %118 = vector.extract_strided_slice %107 {offsets = [0, 0], sizes = [16, 8], strides = [1, 1]} : vector<16x40xf32> to vector<16x8xf32>
    %cst_55 = arith.constant dense<0.000000e+00> : vector<16x64xf32>
    %119 = tpu.matmul %118, %117, %cst_55 {dimension_numbers = #tpu.dot_dimension_numbers<[1], [0], [0], [1], [0, 0, 1, 1], [], []>} : vector<16x8xf32>, vector<8x64xf32>, vector<16x64xf32> -> vector<16x64xf32>
    %c1_i32_56 = arith.constant 1 : i32
    %120 = vector.broadcast %c1_i32_56 : i32 to vector<64x64xi32>
    %121 = arith.muli %109, %120 : vector<64x64xi32>
    %c-1_i32_57 = arith.constant -1 : i32
    %122 = vector.broadcast %c-1_i32_57 : i32 to vector<64x64xi32>
    %123 = arith.addi %121, %122 : vector<64x64xi32>
    %124 = arith.cmpi eq, %108, %123 : vector<64x64xi32>
    %125 = arith.extui %124 : vector<64x64xi1> to vector<64x64xi32>
    %126 = arith.sitofp %125 : vector<64x64xi32> to vector<64x64xf32>
    %cst_58 = arith.constant dense<0.000000e+00> : vector<8x64xf32>
    %127 = tpu.matmul %79, %126, %cst_58 {dimension_numbers = #tpu.dot_dimension_numbers<[1], [0], [0], [1], [0, 0, 1, 1], [], []>} : vector<8x64xf32>, vector<64x64xf32>, vector<8x64xf32> -> vector<8x64xf32>
    %128 = vector.extract_strided_slice %107 {offsets = [0, 8], sizes = [16, 8], strides = [1, 1]} : vector<16x40xf32> to vector<16x8xf32>
    %cst_59 = arith.constant dense<0.000000e+00> : vector<16x64xf32>
    %129 = tpu.matmul %128, %127, %cst_59 {dimension_numbers = #tpu.dot_dimension_numbers<[1], [0], [0], [1], [0, 0, 1, 1], [], []>} : vector<16x8xf32>, vector<8x64xf32>, vector<16x64xf32> -> vector<16x64xf32>
    %130 = arith.addf %119, %129 : vector<16x64xf32>
    %c1_i32_60 = arith.constant 1 : i32
    %131 = vector.broadcast %c1_i32_60 : i32 to vector<64x64xi32>
    %132 = arith.muli %109, %131 : vector<64x64xi32>
    %c0_i32_61 = arith.constant 0 : i32
    %133 = vector.broadcast %c0_i32_61 : i32 to vector<64x64xi32>
    %134 = arith.addi %132, %133 : vector<64x64xi32>
    %135 = arith.cmpi eq, %108, %134 : vector<64x64xi32>
    %136 = arith.extui %135 : vector<64x64xi1> to vector<64x64xi32>
    %137 = arith.sitofp %136 : vector<64x64xi32> to vector<64x64xf32>
    %cst_62 = arith.constant dense<0.000000e+00> : vector<8x64xf32>
    %138 = tpu.matmul %79, %137, %cst_62 {dimension_numbers = #tpu.dot_dimension_numbers<[1], [0], [0], [1], [0, 0, 1, 1], [], []>} : vector<8x64xf32>, vector<64x64xf32>, vector<8x64xf32> -> vector<8x64xf32>
    %139 = vector.extract_strided_slice %107 {offsets = [0, 16], sizes = [16, 8], strides = [1, 1]} : vector<16x40xf32> to vector<16x8xf32>
    %cst_63 = arith.constant dense<0.000000e+00> : vector<16x64xf32>
    %140 = tpu.matmul %139, %138, %cst_63 {dimension_numbers = #tpu.dot_dimension_numbers<[1], [0], [0], [1], [0, 0, 1, 1], [], []>} : vector<16x8xf32>, vector<8x64xf32>, vector<16x64xf32> -> vector<16x64xf32>
    %141 = arith.addf %130, %140 : vector<16x64xf32>
    %c1_i32_64 = arith.constant 1 : i32
    %142 = vector.broadcast %c1_i32_64 : i32 to vector<64x64xi32>
    %143 = arith.muli %109, %142 : vector<64x64xi32>
    %c1_i32_65 = arith.constant 1 : i32
    %144 = vector.broadcast %c1_i32_65 : i32 to vector<64x64xi32>
    %145 = arith.addi %143, %144 : vector<64x64xi32>
    %146 = arith.cmpi eq, %108, %145 : vector<64x64xi32>
    %147 = arith.extui %146 : vector<64x64xi1> to vector<64x64xi32>
    %148 = arith.sitofp %147 : vector<64x64xi32> to vector<64x64xf32>
    %cst_66 = arith.constant dense<0.000000e+00> : vector<8x64xf32>
    %149 = tpu.matmul %79, %148, %cst_66 {dimension_numbers = #tpu.dot_dimension_numbers<[1], [0], [0], [1], [0, 0, 1, 1], [], []>} : vector<8x64xf32>, vector<64x64xf32>, vector<8x64xf32> -> vector<8x64xf32>
    %150 = vector.extract_strided_slice %107 {offsets = [0, 24], sizes = [16, 8], strides = [1, 1]} : vector<16x40xf32> to vector<16x8xf32>
    %cst_67 = arith.constant dense<0.000000e+00> : vector<16x64xf32>
    %151 = tpu.matmul %150, %149, %cst_67 {dimension_numbers = #tpu.dot_dimension_numbers<[1], [0], [0], [1], [0, 0, 1, 1], [], []>} : vector<16x8xf32>, vector<8x64xf32>, vector<16x64xf32> -> vector<16x64xf32>
    %152 = arith.addf %141, %151 : vector<16x64xf32>
    %c1_i32_68 = arith.constant 1 : i32
    %153 = vector.broadcast %c1_i32_68 : i32 to vector<64x64xi32>
    %154 = arith.muli %109, %153 : vector<64x64xi32>
    %c2_i32_69 = arith.constant 2 : i32
    %155 = vector.broadcast %c2_i32_69 : i32 to vector<64x64xi32>
    %156 = arith.addi %154, %155 : vector<64x64xi32>
    %157 = arith.cmpi eq, %108, %156 : vector<64x64xi32>
    %158 = arith.extui %157 : vector<64x64xi1> to vector<64x64xi32>
    %159 = arith.sitofp %158 : vector<64x64xi32> to vector<64x64xf32>
    %cst_70 = arith.constant dense<0.000000e+00> : vector<8x64xf32>
    %160 = tpu.matmul %79, %159, %cst_70 {dimension_numbers = #tpu.dot_dimension_numbers<[1], [0], [0], [1], [0, 0, 1, 1], [], []>} : vector<8x64xf32>, vector<64x64xf32>, vector<8x64xf32> -> vector<8x64xf32>
    %161 = vector.extract_strided_slice %107 {offsets = [0, 32], sizes = [16, 8], strides = [1, 1]} : vector<16x40xf32> to vector<16x8xf32>
    %cst_71 = arith.constant dense<0.000000e+00> : vector<16x64xf32>
    %162 = tpu.matmul %161, %160, %cst_71 {dimension_numbers = #tpu.dot_dimension_numbers<[1], [0], [0], [1], [0, 0, 1, 1], [], []>} : vector<16x8xf32>, vector<8x64xf32>, vector<16x64xf32> -> vector<16x64xf32>
    %163 = arith.addf %152, %162 : vector<16x64xf32>
    %c0_72 = arith.constant 0 : index
    %c0_73 = arith.constant 0 : index
    %c0_74 = arith.constant 0 : index
    %164 = vector.load %arg7[%c0_72, %c0_73, %c0_74] : memref<1x16x1xf32, #tpu.memory_space<vmem>>, vector<1x16x1xf32>
    %165 = vector.shape_cast %164 : vector<1x16x1xf32> to vector<16x1xf32>
    %c0_75 = arith.constant 0 : index
    %c0_76 = arith.constant 0 : index
    %c0_77 = arith.constant 0 : index
    %166 = vector.load %arg8[%c0_75, %c0_76, %c0_77] : memref<1x16x1xf32, #tpu.memory_space<vmem>>, vector<1x16x1xf32>
    %167 = vector.shape_cast %166 : vector<1x16x1xf32> to vector<16x1xf32>
    %168 = vector.broadcast %165 : vector<16x1xf32> to vector<16x64xf32>
    %169 = arith.mulf %163, %168 : vector<16x64xf32>
    %170 = vector.broadcast %167 : vector<16x1xf32> to vector<16x64xf32>
    %171 = arith.addf %169, %170 : vector<16x64xf32>
    %cst_78 = arith.constant 0.000000e+00 : f32
    %172 = vector.broadcast %cst_78 : f32 to vector<16x64xf32>
    %173 = arith.maximumf %171, %172 : vector<16x64xf32>
    %c0_79 = arith.constant 0 : index
    %c0_80 = arith.constant 0 : index
    %c0_81 = arith.constant 0 : index
    %174 = vector.load %arg9[%c0_79, %c0_80, %c0_81] : memref<1x16x80xf32, #tpu.memory_space<vmem>>, vector<1x16x80xf32>
    %175 = vector.shape_cast %174 : vector<1x16x80xf32> to vector<16x80xf32>
    %176 = tpu.iota {dimensions = array<i32: 0>} : vector<64x32xi32>
    %177 = tpu.iota {dimensions = array<i32: 1>} : vector<64x32xi32>
    %c2_i32_82 = arith.constant 2 : i32
    %178 = vector.broadcast %c2_i32_82 : i32 to vector<64x32xi32>
    %179 = arith.muli %177, %178 : vector<64x32xi32>
    %c-2_i32_83 = arith.constant -2 : i32
    %180 = vector.broadcast %c-2_i32_83 : i32 to vector<64x32xi32>
    %181 = arith.addi %179, %180 : vector<64x32xi32>
    %182 = arith.cmpi eq, %176, %181 : vector<64x32xi32>
    %183 = arith.extui %182 : vector<64x32xi1> to vector<64x32xi32>
    %184 = arith.sitofp %183 : vector<64x32xi32> to vector<64x32xf32>
    %cst_84 = arith.constant dense<0.000000e+00> : vector<16x32xf32>
    %185 = tpu.matmul %173, %184, %cst_84 {dimension_numbers = #tpu.dot_dimension_numbers<[1], [0], [0], [1], [0, 0, 1, 1], [], []>} : vector<16x64xf32>, vector<64x32xf32>, vector<16x32xf32> -> vector<16x32xf32>
    %186 = vector.extract_strided_slice %175 {offsets = [0, 0], sizes = [16, 16], strides = [1, 1]} : vector<16x80xf32> to vector<16x16xf32>
    %cst_85 = arith.constant dense<0.000000e+00> : vector<16x32xf32>
    %187 = tpu.matmul %186, %185, %cst_85 {dimension_numbers = #tpu.dot_dimension_numbers<[1], [0], [0], [1], [0, 0, 1, 1], [], []>} : vector<16x16xf32>, vector<16x32xf32>, vector<16x32xf32> -> vector<16x32xf32>
    %c2_i32_86 = arith.constant 2 : i32
    %188 = vector.broadcast %c2_i32_86 : i32 to vector<64x32xi32>
    %189 = arith.muli %177, %188 : vector<64x32xi32>
    %c-1_i32_87 = arith.constant -1 : i32
    %190 = vector.broadcast %c-1_i32_87 : i32 to vector<64x32xi32>
    %191 = arith.addi %189, %190 : vector<64x32xi32>
    %192 = arith.cmpi eq, %176, %191 : vector<64x32xi32>
    %193 = arith.extui %192 : vector<64x32xi1> to vector<64x32xi32>
    %194 = arith.sitofp %193 : vector<64x32xi32> to vector<64x32xf32>
    %cst_88 = arith.constant dense<0.000000e+00> : vector<16x32xf32>
    %195 = tpu.matmul %173, %194, %cst_88 {dimension_numbers = #tpu.dot_dimension_numbers<[1], [0], [0], [1], [0, 0, 1, 1], [], []>} : vector<16x64xf32>, vector<64x32xf32>, vector<16x32xf32> -> vector<16x32xf32>
    %196 = vector.extract_strided_slice %175 {offsets = [0, 16], sizes = [16, 16], strides = [1, 1]} : vector<16x80xf32> to vector<16x16xf32>
    %cst_89 = arith.constant dense<0.000000e+00> : vector<16x32xf32>
    %197 = tpu.matmul %196, %195, %cst_89 {dimension_numbers = #tpu.dot_dimension_numbers<[1], [0], [0], [1], [0, 0, 1, 1], [], []>} : vector<16x16xf32>, vector<16x32xf32>, vector<16x32xf32> -> vector<16x32xf32>
    %198 = arith.addf %187, %197 : vector<16x32xf32>
    %c2_i32_90 = arith.constant 2 : i32
    %199 = vector.broadcast %c2_i32_90 : i32 to vector<64x32xi32>
    %200 = arith.muli %177, %199 : vector<64x32xi32>
    %c0_i32_91 = arith.constant 0 : i32
    %201 = vector.broadcast %c0_i32_91 : i32 to vector<64x32xi32>
    %202 = arith.addi %200, %201 : vector<64x32xi32>
    %203 = arith.cmpi eq, %176, %202 : vector<64x32xi32>
    %204 = arith.extui %203 : vector<64x32xi1> to vector<64x32xi32>
    %205 = arith.sitofp %204 : vector<64x32xi32> to vector<64x32xf32>
    %cst_92 = arith.constant dense<0.000000e+00> : vector<16x32xf32>
    %206 = tpu.matmul %173, %205, %cst_92 {dimension_numbers = #tpu.dot_dimension_numbers<[1], [0], [0], [1], [0, 0, 1, 1], [], []>} : vector<16x64xf32>, vector<64x32xf32>, vector<16x32xf32> -> vector<16x32xf32>
    %207 = vector.extract_strided_slice %175 {offsets = [0, 32], sizes = [16, 16], strides = [1, 1]} : vector<16x80xf32> to vector<16x16xf32>
    %cst_93 = arith.constant dense<0.000000e+00> : vector<16x32xf32>
    %208 = tpu.matmul %207, %206, %cst_93 {dimension_numbers = #tpu.dot_dimension_numbers<[1], [0], [0], [1], [0, 0, 1, 1], [], []>} : vector<16x16xf32>, vector<16x32xf32>, vector<16x32xf32> -> vector<16x32xf32>
    %209 = arith.addf %198, %208 : vector<16x32xf32>
    %c2_i32_94 = arith.constant 2 : i32
    %210 = vector.broadcast %c2_i32_94 : i32 to vector<64x32xi32>
    %211 = arith.muli %177, %210 : vector<64x32xi32>
    %c1_i32_95 = arith.constant 1 : i32
    %212 = vector.broadcast %c1_i32_95 : i32 to vector<64x32xi32>
    %213 = arith.addi %211, %212 : vector<64x32xi32>
    %214 = arith.cmpi eq, %176, %213 : vector<64x32xi32>
    %215 = arith.extui %214 : vector<64x32xi1> to vector<64x32xi32>
    %216 = arith.sitofp %215 : vector<64x32xi32> to vector<64x32xf32>
    %cst_96 = arith.constant dense<0.000000e+00> : vector<16x32xf32>
    %217 = tpu.matmul %173, %216, %cst_96 {dimension_numbers = #tpu.dot_dimension_numbers<[1], [0], [0], [1], [0, 0, 1, 1], [], []>} : vector<16x64xf32>, vector<64x32xf32>, vector<16x32xf32> -> vector<16x32xf32>
    %218 = vector.extract_strided_slice %175 {offsets = [0, 48], sizes = [16, 16], strides = [1, 1]} : vector<16x80xf32> to vector<16x16xf32>
    %cst_97 = arith.constant dense<0.000000e+00> : vector<16x32xf32>
    %219 = tpu.matmul %218, %217, %cst_97 {dimension_numbers = #tpu.dot_dimension_numbers<[1], [0], [0], [1], [0, 0, 1, 1], [], []>} : vector<16x16xf32>, vector<16x32xf32>, vector<16x32xf32> -> vector<16x32xf32>
    %220 = arith.addf %209, %219 : vector<16x32xf32>
    %c2_i32_98 = arith.constant 2 : i32
    %221 = vector.broadcast %c2_i32_98 : i32 to vector<64x32xi32>
    %222 = arith.muli %177, %221 : vector<64x32xi32>
    %c2_i32_99 = arith.constant 2 : i32
    %223 = vector.broadcast %c2_i32_99 : i32 to vector<64x32xi32>
    %224 = arith.addi %222, %223 : vector<64x32xi32>
    %225 = arith.cmpi eq, %176, %224 : vector<64x32xi32>
    %226 = arith.extui %225 : vector<64x32xi1> to vector<64x32xi32>
    %227 = arith.sitofp %226 : vector<64x32xi32> to vector<64x32xf32>
    %cst_100 = arith.constant dense<0.000000e+00> : vector<16x32xf32>
    %228 = tpu.matmul %173, %227, %cst_100 {dimension_numbers = #tpu.dot_dimension_numbers<[1], [0], [0], [1], [0, 0, 1, 1], [], []>} : vector<16x64xf32>, vector<64x32xf32>, vector<16x32xf32> -> vector<16x32xf32>
    %229 = vector.extract_strided_slice %175 {offsets = [0, 64], sizes = [16, 16], strides = [1, 1]} : vector<16x80xf32> to vector<16x16xf32>
    %cst_101 = arith.constant dense<0.000000e+00> : vector<16x32xf32>
    %230 = tpu.matmul %229, %228, %cst_101 {dimension_numbers = #tpu.dot_dimension_numbers<[1], [0], [0], [1], [0, 0, 1, 1], [], []>} : vector<16x16xf32>, vector<16x32xf32>, vector<16x32xf32> -> vector<16x32xf32>
    %231 = arith.addf %220, %230 : vector<16x32xf32>
    %c0_102 = arith.constant 0 : index
    %c0_103 = arith.constant 0 : index
    %c0_104 = arith.constant 0 : index
    %232 = vector.load %arg10[%c0_102, %c0_103, %c0_104] : memref<1x16x1xf32, #tpu.memory_space<vmem>>, vector<1x16x1xf32>
    %233 = vector.shape_cast %232 : vector<1x16x1xf32> to vector<16x1xf32>
    %234 = vector.broadcast %233 : vector<16x1xf32> to vector<16x32xf32>
    %235 = arith.addf %231, %234 : vector<16x32xf32>
    %c0_105 = arith.constant 0 : index
    %c0_106 = arith.constant 0 : index
    %c0_107 = arith.constant 0 : index
    %236 = vector.load %arg11[%c0_105, %c0_106, %c0_107] : memref<1x4x16xf32, #tpu.memory_space<vmem>>, vector<1x4x16xf32>
    %237 = vector.shape_cast %236 : vector<1x4x16xf32> to vector<4x16xf32>
    %c0_108 = arith.constant 0 : index
    %c0_109 = arith.constant 0 : index
    %c0_110 = arith.constant 0 : index
    %238 = vector.load %arg12[%c0_108, %c0_109, %c0_110] : memref<1x16x4xf32, #tpu.memory_space<vmem>>, vector<1x16x4xf32>
    %239 = vector.shape_cast %238 : vector<1x16x4xf32> to vector<16x4xf32>
    %cst_111 = arith.constant dense<0.000000e+00> : vector<16xf32>
    %240 = vector.multi_reduction <add>, %235, %cst_111 [1] : vector<16x32xf32> to vector<16xf32>
    %241 = vector.shape_cast %240 : vector<16xf32> to vector<16x1xf32>
    %cst_112 = arith.constant 3.200000e+01 : f32
    %242 = vector.broadcast %cst_112 : f32 to vector<16x1xf32>
    %243 = arith.divf %241, %242 : vector<16x1xf32>
    %cst_113 = arith.constant dense<0.000000e+00> : vector<4x1xf32>
    %244 = tpu.matmul %237, %243, %cst_113 {dimension_numbers = #tpu.dot_dimension_numbers<[1], [0], [0], [1], [0, 0, 1, 1], [], []>} : vector<4x16xf32>, vector<16x1xf32>, vector<4x1xf32> -> vector<4x1xf32>
    %cst_114 = arith.constant 0.000000e+00 : f32
    %245 = vector.broadcast %cst_114 : f32 to vector<4x1xf32>
    %246 = arith.maximumf %244, %245 : vector<4x1xf32>
    %cst_115 = arith.constant dense<0.000000e+00> : vector<16x1xf32>
    %247 = tpu.matmul %239, %246, %cst_115 {dimension_numbers = #tpu.dot_dimension_numbers<[1], [0], [0], [1], [0, 0, 1, 1], [], []>} : vector<16x4xf32>, vector<4x1xf32>, vector<16x1xf32> -> vector<16x1xf32>
    %cst_116 = arith.constant 0.000000e+00 : f32
    %248 = vector.broadcast %cst_116 : f32 to vector<16x1xf32>
    %249 = arith.subf %248, %247 : vector<16x1xf32>
    %250 = math.exp %249 : vector<16x1xf32>
    %cst_117 = arith.constant 1.000000e+00 : f32
    %251 = vector.broadcast %cst_117 : f32 to vector<16x1xf32>
    %252 = arith.addf %251, %250 : vector<16x1xf32>
    %cst_118 = arith.constant 1.000000e+00 : f32
    %253 = vector.broadcast %cst_118 : f32 to vector<16x1xf32>
    %254 = arith.divf %253, %252 : vector<16x1xf32>
    %255 = vector.broadcast %254 : vector<16x1xf32> to vector<16x32xf32>
    %256 = arith.mulf %235, %255 : vector<16x32xf32>
    %257 = arith.addf %256, %105 : vector<16x32xf32>
    %258 = tpu.iota {dimensions = array<i32: 0>} : vector<32x16xi32>
    %259 = tpu.iota {dimensions = array<i32: 1>} : vector<32x16xi32>
    %c2_i32_119 = arith.constant 2 : i32
    %260 = vector.broadcast %c2_i32_119 : i32 to vector<32x16xi32>
    %261 = arith.muli %260, %259 : vector<32x16xi32>
    %c0_i32_120 = arith.constant 0 : i32
    %262 = vector.broadcast %c0_i32_120 : i32 to vector<32x16xi32>
    %263 = arith.addi %261, %262 : vector<32x16xi32>
    %264 = arith.cmpi eq, %258, %263 : vector<32x16xi32>
    %265 = arith.extui %264 : vector<32x16xi1> to vector<32x16xi32>
    %266 = arith.sitofp %265 : vector<32x16xi32> to vector<32x16xf32>
    %cst_121 = arith.constant dense<0.000000e+00> : vector<16x16xf32>
    %267 = tpu.matmul %257, %266, %cst_121 {dimension_numbers = #tpu.dot_dimension_numbers<[1], [0], [0], [1], [0, 0, 1, 1], [], []>} : vector<16x32xf32>, vector<32x16xf32>, vector<16x16xf32> -> vector<16x16xf32>
    %c2_i32_122 = arith.constant 2 : i32
    %268 = vector.broadcast %c2_i32_122 : i32 to vector<32x16xi32>
    %269 = arith.muli %268, %259 : vector<32x16xi32>
    %c1_i32_123 = arith.constant 1 : i32
    %270 = vector.broadcast %c1_i32_123 : i32 to vector<32x16xi32>
    %271 = arith.addi %269, %270 : vector<32x16xi32>
    %272 = arith.cmpi eq, %258, %271 : vector<32x16xi32>
    %273 = arith.extui %272 : vector<32x16xi1> to vector<32x16xi32>
    %274 = arith.sitofp %273 : vector<32x16xi32> to vector<32x16xf32>
    %cst_124 = arith.constant dense<0.000000e+00> : vector<16x16xf32>
    %275 = tpu.matmul %257, %274, %cst_124 {dimension_numbers = #tpu.dot_dimension_numbers<[1], [0], [0], [1], [0, 0, 1, 1], [], []>} : vector<16x32xf32>, vector<32x16xf32>, vector<16x16xf32> -> vector<16x16xf32>
    %276 = arith.maximumf %267, %275 : vector<16x16xf32>
    %c0_125 = arith.constant 0 : index
    %c0_126 = arith.constant 0 : index
    %c0_127 = arith.constant 0 : index
    %277 = vector.load %arg15[%c0_125, %c0_126, %c0_127] : memref<1x16x1xf32, #tpu.memory_space<vmem>>, vector<1x16x1xf32>
    %278 = vector.shape_cast %277 : vector<1x16x1xf32> to vector<16x1xf32>
    %c0_128 = arith.constant 0 : index
    %c0_129 = arith.constant 0 : index
    %c0_130 = arith.constant 0 : index
    %279 = vector.load %arg16[%c0_128, %c0_129, %c0_130] : memref<1x16x1xf32, #tpu.memory_space<vmem>>, vector<1x16x1xf32>
    %280 = vector.shape_cast %279 : vector<1x16x1xf32> to vector<16x1xf32>
    %281 = vector.broadcast %278 : vector<16x1xf32> to vector<16x32xf32>
    %282 = arith.mulf %257, %281 : vector<16x32xf32>
    %283 = vector.broadcast %280 : vector<16x1xf32> to vector<16x32xf32>
    %284 = arith.addf %282, %283 : vector<16x32xf32>
    %cst_131 = arith.constant 0.000000e+00 : f32
    %285 = vector.broadcast %cst_131 : f32 to vector<16x32xf32>
    %286 = arith.maximumf %284, %285 : vector<16x32xf32>
    %c0_132 = arith.constant 0 : index
    %c0_133 = arith.constant 0 : index
    %c0_134 = arith.constant 0 : index
    %287 = vector.load %arg17[%c0_132, %c0_133, %c0_134] : memref<1x16x80xf32, #tpu.memory_space<vmem>>, vector<1x16x80xf32>
    %288 = vector.shape_cast %287 : vector<1x16x80xf32> to vector<16x80xf32>
    %289 = tpu.iota {dimensions = array<i32: 0>} : vector<32x32xi32>
    %290 = tpu.iota {dimensions = array<i32: 1>} : vector<32x32xi32>
    %c1_i32_135 = arith.constant 1 : i32
    %291 = vector.broadcast %c1_i32_135 : i32 to vector<32x32xi32>
    %292 = arith.muli %290, %291 : vector<32x32xi32>
    %c-2_i32_136 = arith.constant -2 : i32
    %293 = vector.broadcast %c-2_i32_136 : i32 to vector<32x32xi32>
    %294 = arith.addi %292, %293 : vector<32x32xi32>
    %295 = arith.cmpi eq, %289, %294 : vector<32x32xi32>
    %296 = arith.extui %295 : vector<32x32xi1> to vector<32x32xi32>
    %297 = arith.sitofp %296 : vector<32x32xi32> to vector<32x32xf32>
    %cst_137 = arith.constant dense<0.000000e+00> : vector<16x32xf32>
    %298 = tpu.matmul %286, %297, %cst_137 {dimension_numbers = #tpu.dot_dimension_numbers<[1], [0], [0], [1], [0, 0, 1, 1], [], []>} : vector<16x32xf32>, vector<32x32xf32>, vector<16x32xf32> -> vector<16x32xf32>
    %299 = vector.extract_strided_slice %288 {offsets = [0, 0], sizes = [16, 16], strides = [1, 1]} : vector<16x80xf32> to vector<16x16xf32>
    %cst_138 = arith.constant dense<0.000000e+00> : vector<16x32xf32>
    %300 = tpu.matmul %299, %298, %cst_138 {dimension_numbers = #tpu.dot_dimension_numbers<[1], [0], [0], [1], [0, 0, 1, 1], [], []>} : vector<16x16xf32>, vector<16x32xf32>, vector<16x32xf32> -> vector<16x32xf32>
    %c1_i32_139 = arith.constant 1 : i32
    %301 = vector.broadcast %c1_i32_139 : i32 to vector<32x32xi32>
    %302 = arith.muli %290, %301 : vector<32x32xi32>
    %c-1_i32_140 = arith.constant -1 : i32
    %303 = vector.broadcast %c-1_i32_140 : i32 to vector<32x32xi32>
    %304 = arith.addi %302, %303 : vector<32x32xi32>
    %305 = arith.cmpi eq, %289, %304 : vector<32x32xi32>
    %306 = arith.extui %305 : vector<32x32xi1> to vector<32x32xi32>
    %307 = arith.sitofp %306 : vector<32x32xi32> to vector<32x32xf32>
    %cst_141 = arith.constant dense<0.000000e+00> : vector<16x32xf32>
    %308 = tpu.matmul %286, %307, %cst_141 {dimension_numbers = #tpu.dot_dimension_numbers<[1], [0], [0], [1], [0, 0, 1, 1], [], []>} : vector<16x32xf32>, vector<32x32xf32>, vector<16x32xf32> -> vector<16x32xf32>
    %309 = vector.extract_strided_slice %288 {offsets = [0, 16], sizes = [16, 16], strides = [1, 1]} : vector<16x80xf32> to vector<16x16xf32>
    %cst_142 = arith.constant dense<0.000000e+00> : vector<16x32xf32>
    %310 = tpu.matmul %309, %308, %cst_142 {dimension_numbers = #tpu.dot_dimension_numbers<[1], [0], [0], [1], [0, 0, 1, 1], [], []>} : vector<16x16xf32>, vector<16x32xf32>, vector<16x32xf32> -> vector<16x32xf32>
    %311 = arith.addf %300, %310 : vector<16x32xf32>
    %c1_i32_143 = arith.constant 1 : i32
    %312 = vector.broadcast %c1_i32_143 : i32 to vector<32x32xi32>
    %313 = arith.muli %290, %312 : vector<32x32xi32>
    %c0_i32_144 = arith.constant 0 : i32
    %314 = vector.broadcast %c0_i32_144 : i32 to vector<32x32xi32>
    %315 = arith.addi %313, %314 : vector<32x32xi32>
    %316 = arith.cmpi eq, %289, %315 : vector<32x32xi32>
    %317 = arith.extui %316 : vector<32x32xi1> to vector<32x32xi32>
    %318 = arith.sitofp %317 : vector<32x32xi32> to vector<32x32xf32>
    %cst_145 = arith.constant dense<0.000000e+00> : vector<16x32xf32>
    %319 = tpu.matmul %286, %318, %cst_145 {dimension_numbers = #tpu.dot_dimension_numbers<[1], [0], [0], [1], [0, 0, 1, 1], [], []>} : vector<16x32xf32>, vector<32x32xf32>, vector<16x32xf32> -> vector<16x32xf32>
    %320 = vector.extract_strided_slice %288 {offsets = [0, 32], sizes = [16, 16], strides = [1, 1]} : vector<16x80xf32> to vector<16x16xf32>
    %cst_146 = arith.constant dense<0.000000e+00> : vector<16x32xf32>
    %321 = tpu.matmul %320, %319, %cst_146 {dimension_numbers = #tpu.dot_dimension_numbers<[1], [0], [0], [1], [0, 0, 1, 1], [], []>} : vector<16x16xf32>, vector<16x32xf32>, vector<16x32xf32> -> vector<16x32xf32>
    %322 = arith.addf %311, %321 : vector<16x32xf32>
    %c1_i32_147 = arith.constant 1 : i32
    %323 = vector.broadcast %c1_i32_147 : i32 to vector<32x32xi32>
    %324 = arith.muli %290, %323 : vector<32x32xi32>
    %c1_i32_148 = arith.constant 1 : i32
    %325 = vector.broadcast %c1_i32_148 : i32 to vector<32x32xi32>
    %326 = arith.addi %324, %325 : vector<32x32xi32>
    %327 = arith.cmpi eq, %289, %326 : vector<32x32xi32>
    %328 = arith.extui %327 : vector<32x32xi1> to vector<32x32xi32>
    %329 = arith.sitofp %328 : vector<32x32xi32> to vector<32x32xf32>
    %cst_149 = arith.constant dense<0.000000e+00> : vector<16x32xf32>
    %330 = tpu.matmul %286, %329, %cst_149 {dimension_numbers = #tpu.dot_dimension_numbers<[1], [0], [0], [1], [0, 0, 1, 1], [], []>} : vector<16x32xf32>, vector<32x32xf32>, vector<16x32xf32> -> vector<16x32xf32>
    %331 = vector.extract_strided_slice %288 {offsets = [0, 48], sizes = [16, 16], strides = [1, 1]} : vector<16x80xf32> to vector<16x16xf32>
    %cst_150 = arith.constant dense<0.000000e+00> : vector<16x32xf32>
    %332 = tpu.matmul %331, %330, %cst_150 {dimension_numbers = #tpu.dot_dimension_numbers<[1], [0], [0], [1], [0, 0, 1, 1], [], []>} : vector<16x16xf32>, vector<16x32xf32>, vector<16x32xf32> -> vector<16x32xf32>
    %333 = arith.addf %322, %332 : vector<16x32xf32>
    %c1_i32_151 = arith.constant 1 : i32
    %334 = vector.broadcast %c1_i32_151 : i32 to vector<32x32xi32>
    %335 = arith.muli %290, %334 : vector<32x32xi32>
    %c2_i32_152 = arith.constant 2 : i32
    %336 = vector.broadcast %c2_i32_152 : i32 to vector<32x32xi32>
    %337 = arith.addi %335, %336 : vector<32x32xi32>
    %338 = arith.cmpi eq, %289, %337 : vector<32x32xi32>
    %339 = arith.extui %338 : vector<32x32xi1> to vector<32x32xi32>
    %340 = arith.sitofp %339 : vector<32x32xi32> to vector<32x32xf32>
    %cst_153 = arith.constant dense<0.000000e+00> : vector<16x32xf32>
    %341 = tpu.matmul %286, %340, %cst_153 {dimension_numbers = #tpu.dot_dimension_numbers<[1], [0], [0], [1], [0, 0, 1, 1], [], []>} : vector<16x32xf32>, vector<32x32xf32>, vector<16x32xf32> -> vector<16x32xf32>
    %342 = vector.extract_strided_slice %288 {offsets = [0, 64], sizes = [16, 16], strides = [1, 1]} : vector<16x80xf32> to vector<16x16xf32>
    %cst_154 = arith.constant dense<0.000000e+00> : vector<16x32xf32>
    %343 = tpu.matmul %342, %341, %cst_154 {dimension_numbers = #tpu.dot_dimension_numbers<[1], [0], [0], [1], [0, 0, 1, 1], [], []>} : vector<16x16xf32>, vector<16x32xf32>, vector<16x32xf32> -> vector<16x32xf32>
    %344 = arith.addf %333, %343 : vector<16x32xf32>
    %c0_155 = arith.constant 0 : index
    %c0_156 = arith.constant 0 : index
    %c0_157 = arith.constant 0 : index
    %345 = vector.load %arg18[%c0_155, %c0_156, %c0_157] : memref<1x16x1xf32, #tpu.memory_space<vmem>>, vector<1x16x1xf32>
    %346 = vector.shape_cast %345 : vector<1x16x1xf32> to vector<16x1xf32>
    %c0_158 = arith.constant 0 : index
    %c0_159 = arith.constant 0 : index
    %c0_160 = arith.constant 0 : index
    %347 = vector.load %arg19[%c0_158, %c0_159, %c0_160] : memref<1x16x1xf32, #tpu.memory_space<vmem>>, vector<1x16x1xf32>
    %348 = vector.shape_cast %347 : vector<1x16x1xf32> to vector<16x1xf32>
    %349 = vector.broadcast %346 : vector<16x1xf32> to vector<16x32xf32>
    %350 = arith.mulf %344, %349 : vector<16x32xf32>
    %351 = vector.broadcast %348 : vector<16x1xf32> to vector<16x32xf32>
    %352 = arith.addf %350, %351 : vector<16x32xf32>
    %cst_161 = arith.constant 0.000000e+00 : f32
    %353 = vector.broadcast %cst_161 : f32 to vector<16x32xf32>
    %354 = arith.maximumf %352, %353 : vector<16x32xf32>
    %c0_162 = arith.constant 0 : index
    %c0_163 = arith.constant 0 : index
    %c0_164 = arith.constant 0 : index
    %355 = vector.load %arg20[%c0_162, %c0_163, %c0_164] : memref<1x16x80xf32, #tpu.memory_space<vmem>>, vector<1x16x80xf32>
    %356 = vector.shape_cast %355 : vector<1x16x80xf32> to vector<16x80xf32>
    %357 = tpu.iota {dimensions = array<i32: 0>} : vector<32x16xi32>
    %358 = tpu.iota {dimensions = array<i32: 1>} : vector<32x16xi32>
    %c2_i32_165 = arith.constant 2 : i32
    %359 = vector.broadcast %c2_i32_165 : i32 to vector<32x16xi32>
    %360 = arith.muli %358, %359 : vector<32x16xi32>
    %c-2_i32_166 = arith.constant -2 : i32
    %361 = vector.broadcast %c-2_i32_166 : i32 to vector<32x16xi32>
    %362 = arith.addi %360, %361 : vector<32x16xi32>
    %363 = arith.cmpi eq, %357, %362 : vector<32x16xi32>
    %364 = arith.extui %363 : vector<32x16xi1> to vector<32x16xi32>
    %365 = arith.sitofp %364 : vector<32x16xi32> to vector<32x16xf32>
    %cst_167 = arith.constant dense<0.000000e+00> : vector<16x16xf32>
    %366 = tpu.matmul %354, %365, %cst_167 {dimension_numbers = #tpu.dot_dimension_numbers<[1], [0], [0], [1], [0, 0, 1, 1], [], []>} : vector<16x32xf32>, vector<32x16xf32>, vector<16x16xf32> -> vector<16x16xf32>
    %367 = vector.extract_strided_slice %356 {offsets = [0, 0], sizes = [16, 16], strides = [1, 1]} : vector<16x80xf32> to vector<16x16xf32>
    %cst_168 = arith.constant dense<0.000000e+00> : vector<16x16xf32>
    %368 = tpu.matmul %367, %366, %cst_168 {dimension_numbers = #tpu.dot_dimension_numbers<[1], [0], [0], [1], [0, 0, 1, 1], [], []>} : vector<16x16xf32>, vector<16x16xf32>, vector<16x16xf32> -> vector<16x16xf32>
    %c2_i32_169 = arith.constant 2 : i32
    %369 = vector.broadcast %c2_i32_169 : i32 to vector<32x16xi32>
    %370 = arith.muli %358, %369 : vector<32x16xi32>
    %c-1_i32_170 = arith.constant -1 : i32
    %371 = vector.broadcast %c-1_i32_170 : i32 to vector<32x16xi32>
    %372 = arith.addi %370, %371 : vector<32x16xi32>
    %373 = arith.cmpi eq, %357, %372 : vector<32x16xi32>
    %374 = arith.extui %373 : vector<32x16xi1> to vector<32x16xi32>
    %375 = arith.sitofp %374 : vector<32x16xi32> to vector<32x16xf32>
    %cst_171 = arith.constant dense<0.000000e+00> : vector<16x16xf32>
    %376 = tpu.matmul %354, %375, %cst_171 {dimension_numbers = #tpu.dot_dimension_numbers<[1], [0], [0], [1], [0, 0, 1, 1], [], []>} : vector<16x32xf32>, vector<32x16xf32>, vector<16x16xf32> -> vector<16x16xf32>
    %377 = vector.extract_strided_slice %356 {offsets = [0, 16], sizes = [16, 16], strides = [1, 1]} : vector<16x80xf32> to vector<16x16xf32>
    %cst_172 = arith.constant dense<0.000000e+00> : vector<16x16xf32>
    %378 = tpu.matmul %377, %376, %cst_172 {dimension_numbers = #tpu.dot_dimension_numbers<[1], [0], [0], [1], [0, 0, 1, 1], [], []>} : vector<16x16xf32>, vector<16x16xf32>, vector<16x16xf32> -> vector<16x16xf32>
    %379 = arith.addf %368, %378 : vector<16x16xf32>
    %c2_i32_173 = arith.constant 2 : i32
    %380 = vector.broadcast %c2_i32_173 : i32 to vector<32x16xi32>
    %381 = arith.muli %358, %380 : vector<32x16xi32>
    %c0_i32_174 = arith.constant 0 : i32
    %382 = vector.broadcast %c0_i32_174 : i32 to vector<32x16xi32>
    %383 = arith.addi %381, %382 : vector<32x16xi32>
    %384 = arith.cmpi eq, %357, %383 : vector<32x16xi32>
    %385 = arith.extui %384 : vector<32x16xi1> to vector<32x16xi32>
    %386 = arith.sitofp %385 : vector<32x16xi32> to vector<32x16xf32>
    %cst_175 = arith.constant dense<0.000000e+00> : vector<16x16xf32>
    %387 = tpu.matmul %354, %386, %cst_175 {dimension_numbers = #tpu.dot_dimension_numbers<[1], [0], [0], [1], [0, 0, 1, 1], [], []>} : vector<16x32xf32>, vector<32x16xf32>, vector<16x16xf32> -> vector<16x16xf32>
    %388 = vector.extract_strided_slice %356 {offsets = [0, 32], sizes = [16, 16], strides = [1, 1]} : vector<16x80xf32> to vector<16x16xf32>
    %cst_176 = arith.constant dense<0.000000e+00> : vector<16x16xf32>
    %389 = tpu.matmul %388, %387, %cst_176 {dimension_numbers = #tpu.dot_dimension_numbers<[1], [0], [0], [1], [0, 0, 1, 1], [], []>} : vector<16x16xf32>, vector<16x16xf32>, vector<16x16xf32> -> vector<16x16xf32>
    %390 = arith.addf %379, %389 : vector<16x16xf32>
    %c2_i32_177 = arith.constant 2 : i32
    %391 = vector.broadcast %c2_i32_177 : i32 to vector<32x16xi32>
    %392 = arith.muli %358, %391 : vector<32x16xi32>
    %c1_i32_178 = arith.constant 1 : i32
    %393 = vector.broadcast %c1_i32_178 : i32 to vector<32x16xi32>
    %394 = arith.addi %392, %393 : vector<32x16xi32>
    %395 = arith.cmpi eq, %357, %394 : vector<32x16xi32>
    %396 = arith.extui %395 : vector<32x16xi1> to vector<32x16xi32>
    %397 = arith.sitofp %396 : vector<32x16xi32> to vector<32x16xf32>
    %cst_179 = arith.constant dense<0.000000e+00> : vector<16x16xf32>
    %398 = tpu.matmul %354, %397, %cst_179 {dimension_numbers = #tpu.dot_dimension_numbers<[1], [0], [0], [1], [0, 0, 1, 1], [], []>} : vector<16x32xf32>, vector<32x16xf32>, vector<16x16xf32> -> vector<16x16xf32>
    %399 = vector.extract_strided_slice %356 {offsets = [0, 48], sizes = [16, 16], strides = [1, 1]} : vector<16x80xf32> to vector<16x16xf32>
    %cst_180 = arith.constant dense<0.000000e+00> : vector<16x16xf32>
    %400 = tpu.matmul %399, %398, %cst_180 {dimension_numbers = #tpu.dot_dimension_numbers<[1], [0], [0], [1], [0, 0, 1, 1], [], []>} : vector<16x16xf32>, vector<16x16xf32>, vector<16x16xf32> -> vector<16x16xf32>
    %401 = arith.addf %390, %400 : vector<16x16xf32>
    %c2_i32_181 = arith.constant 2 : i32
    %402 = vector.broadcast %c2_i32_181 : i32 to vector<32x16xi32>
    %403 = arith.muli %358, %402 : vector<32x16xi32>
    %c2_i32_182 = arith.constant 2 : i32
    %404 = vector.broadcast %c2_i32_182 : i32 to vector<32x16xi32>
    %405 = arith.addi %403, %404 : vector<32x16xi32>
    %406 = arith.cmpi eq, %357, %405 : vector<32x16xi32>
    %407 = arith.extui %406 : vector<32x16xi1> to vector<32x16xi32>
    %408 = arith.sitofp %407 : vector<32x16xi32> to vector<32x16xf32>
    %cst_183 = arith.constant dense<0.000000e+00> : vector<16x16xf32>
    %409 = tpu.matmul %354, %408, %cst_183 {dimension_numbers = #tpu.dot_dimension_numbers<[1], [0], [0], [1], [0, 0, 1, 1], [], []>} : vector<16x32xf32>, vector<32x16xf32>, vector<16x16xf32> -> vector<16x16xf32>
    %410 = vector.extract_strided_slice %356 {offsets = [0, 64], sizes = [16, 16], strides = [1, 1]} : vector<16x80xf32> to vector<16x16xf32>
    %cst_184 = arith.constant dense<0.000000e+00> : vector<16x16xf32>
    %411 = tpu.matmul %410, %409, %cst_184 {dimension_numbers = #tpu.dot_dimension_numbers<[1], [0], [0], [1], [0, 0, 1, 1], [], []>} : vector<16x16xf32>, vector<16x16xf32>, vector<16x16xf32> -> vector<16x16xf32>
    %412 = arith.addf %401, %411 : vector<16x16xf32>
    %c0_185 = arith.constant 0 : index
    %c0_186 = arith.constant 0 : index
    %c0_187 = arith.constant 0 : index
    %413 = vector.load %arg21[%c0_185, %c0_186, %c0_187] : memref<1x16x1xf32, #tpu.memory_space<vmem>>, vector<1x16x1xf32>
    %414 = vector.shape_cast %413 : vector<1x16x1xf32> to vector<16x1xf32>
    %415 = vector.broadcast %414 : vector<16x1xf32> to vector<16x16xf32>
    %416 = arith.addf %412, %415 : vector<16x16xf32>
    %c0_188 = arith.constant 0 : index
    %c0_189 = arith.constant 0 : index
    %c0_190 = arith.constant 0 : index
    %417 = vector.load %arg22[%c0_188, %c0_189, %c0_190] : memref<1x4x16xf32, #tpu.memory_space<vmem>>, vector<1x4x16xf32>
    %418 = vector.shape_cast %417 : vector<1x4x16xf32> to vector<4x16xf32>
    %c0_191 = arith.constant 0 : index
    %c0_192 = arith.constant 0 : index
    %c0_193 = arith.constant 0 : index
    %419 = vector.load %arg23[%c0_191, %c0_192, %c0_193] : memref<1x16x4xf32, #tpu.memory_space<vmem>>, vector<1x16x4xf32>
    %420 = vector.shape_cast %419 : vector<1x16x4xf32> to vector<16x4xf32>
    %cst_194 = arith.constant dense<0.000000e+00> : vector<16xf32>
    %421 = vector.multi_reduction <add>, %416, %cst_194 [1] : vector<16x16xf32> to vector<16xf32>
    %422 = vector.shape_cast %421 : vector<16xf32> to vector<16x1xf32>
    %cst_195 = arith.constant 1.600000e+01 : f32
    %423 = vector.broadcast %cst_195 : f32 to vector<16x1xf32>
    %424 = arith.divf %422, %423 : vector<16x1xf32>
    %cst_196 = arith.constant dense<0.000000e+00> : vector<4x1xf32>
    %425 = tpu.matmul %418, %424, %cst_196 {dimension_numbers = #tpu.dot_dimension_numbers<[1], [0], [0], [1], [0, 0, 1, 1], [], []>} : vector<4x16xf32>, vector<16x1xf32>, vector<4x1xf32> -> vector<4x1xf32>
    %cst_197 = arith.constant 0.000000e+00 : f32
    %426 = vector.broadcast %cst_197 : f32 to vector<4x1xf32>
    %427 = arith.maximumf %425, %426 : vector<4x1xf32>
    %cst_198 = arith.constant dense<0.000000e+00> : vector<16x1xf32>
    %428 = tpu.matmul %420, %427, %cst_198 {dimension_numbers = #tpu.dot_dimension_numbers<[1], [0], [0], [1], [0, 0, 1, 1], [], []>} : vector<16x4xf32>, vector<4x1xf32>, vector<16x1xf32> -> vector<16x1xf32>
    %cst_199 = arith.constant 0.000000e+00 : f32
    %429 = vector.broadcast %cst_199 : f32 to vector<16x1xf32>
    %430 = arith.subf %429, %428 : vector<16x1xf32>
    %431 = math.exp %430 : vector<16x1xf32>
    %cst_200 = arith.constant 1.000000e+00 : f32
    %432 = vector.broadcast %cst_200 : f32 to vector<16x1xf32>
    %433 = arith.addf %432, %431 : vector<16x1xf32>
    %cst_201 = arith.constant 1.000000e+00 : f32
    %434 = vector.broadcast %cst_201 : f32 to vector<16x1xf32>
    %435 = arith.divf %434, %433 : vector<16x1xf32>
    %436 = vector.broadcast %435 : vector<16x1xf32> to vector<16x16xf32>
    %437 = arith.mulf %416, %436 : vector<16x16xf32>
    %438 = arith.addf %437, %276 : vector<16x16xf32>
    %c0_202 = arith.constant 0 : index
    %c0_203 = arith.constant 0 : index
    %c0_204 = arith.constant 0 : index
    %439 = vector.load %arg24[%c0_202, %c0_203, %c0_204] : memref<1x16x1xf32, #tpu.memory_space<vmem>>, vector<1x16x1xf32>
    %440 = vector.shape_cast %439 : vector<1x16x1xf32> to vector<16x1xf32>
    %c0_205 = arith.constant 0 : index
    %c0_206 = arith.constant 0 : index
    %c0_207 = arith.constant 0 : index
    %441 = vector.load %arg25[%c0_205, %c0_206, %c0_207] : memref<1x16x1xf32, #tpu.memory_space<vmem>>, vector<1x16x1xf32>
    %442 = vector.shape_cast %441 : vector<1x16x1xf32> to vector<16x1xf32>
    %443 = vector.broadcast %440 : vector<16x1xf32> to vector<16x16xf32>
    %444 = arith.mulf %438, %443 : vector<16x16xf32>
    %445 = vector.broadcast %442 : vector<16x1xf32> to vector<16x16xf32>
    %446 = arith.addf %444, %445 : vector<16x16xf32>
    %cst_208 = arith.constant 0.000000e+00 : f32
    %447 = vector.broadcast %cst_208 : f32 to vector<16x16xf32>
    %448 = arith.maximumf %446, %447 : vector<16x16xf32>
    %449 = vector.extract_strided_slice %9 {offsets = [0, 0], sizes = [1, 16], strides = [1, 1]} : vector<2x16xf32> to vector<1x16xf32>
    %c0_209 = arith.constant 0 : index
    %c0_210 = arith.constant 0 : index
    %c0_211 = arith.constant 0 : index
    %450 = vector.load %arg28[%c0_209, %c0_210, %c0_211] : memref<1x16x5xf32, #tpu.memory_space<vmem>>, vector<1x16x5xf32>
    %451 = vector.shape_cast %450 : vector<1x16x5xf32> to vector<16x5xf32>
    %cst_212 = arith.constant dense<0.000000e+00> : vector<1x5xf32>
    %452 = tpu.matmul %449, %451, %cst_212 {dimension_numbers = #tpu.dot_dimension_numbers<[1], [0], [0], [1], [0, 0, 1, 1], [], []>} : vector<1x16xf32>, vector<16x5xf32>, vector<1x5xf32> -> vector<1x5xf32>
    %453 = vector.extract_strided_slice %448 {offsets = [0, 0], sizes = [1, 16], strides = [1, 1]} : vector<16x16xf32> to vector<1x16xf32>
    %c0_213 = arith.constant 0 : index
    %c0_214 = arith.constant 0 : index
    %c0_215 = arith.constant 0 : index
    %c0_216 = arith.constant 0 : index
    %454 = vector.load %arg29[%c0_213, %c0_214, %c0_215, %c0_216] : memref<1x16x16x5xf32, #tpu.memory_space<vmem>>, vector<1x1x16x5xf32>
    %455 = vector.shape_cast %454 : vector<1x1x16x5xf32> to vector<16x5xf32>
    %cst_217 = arith.constant dense<0.000000e+00> : vector<1x5xf32>
    %456 = tpu.matmul %453, %455, %cst_217 {dimension_numbers = #tpu.dot_dimension_numbers<[1], [0], [0], [1], [0, 0, 1, 1], [], []>} : vector<1x16xf32>, vector<16x5xf32>, vector<1x5xf32> -> vector<1x5xf32>
    %457 = arith.addf %452, %456 : vector<1x5xf32>
    %458 = vector.extract_strided_slice %448 {offsets = [1, 0], sizes = [1, 16], strides = [1, 1]} : vector<16x16xf32> to vector<1x16xf32>
    %c0_218 = arith.constant 0 : index
    %c1 = arith.constant 1 : index
    %c0_219 = arith.constant 0 : index
    %c0_220 = arith.constant 0 : index
    %459 = vector.load %arg29[%c0_218, %c1, %c0_219, %c0_220] : memref<1x16x16x5xf32, #tpu.memory_space<vmem>>, vector<1x1x16x5xf32>
    %460 = vector.shape_cast %459 : vector<1x1x16x5xf32> to vector<16x5xf32>
    %cst_221 = arith.constant dense<0.000000e+00> : vector<1x5xf32>
    %461 = tpu.matmul %458, %460, %cst_221 {dimension_numbers = #tpu.dot_dimension_numbers<[1], [0], [0], [1], [0, 0, 1, 1], [], []>} : vector<1x16xf32>, vector<16x5xf32>, vector<1x5xf32> -> vector<1x5xf32>
    %462 = arith.addf %457, %461 : vector<1x5xf32>
    %463 = vector.extract_strided_slice %448 {offsets = [2, 0], sizes = [1, 16], strides = [1, 1]} : vector<16x16xf32> to vector<1x16xf32>
    %c0_222 = arith.constant 0 : index
    %c2 = arith.constant 2 : index
    %c0_223 = arith.constant 0 : index
    %c0_224 = arith.constant 0 : index
    %464 = vector.load %arg29[%c0_222, %c2, %c0_223, %c0_224] : memref<1x16x16x5xf32, #tpu.memory_space<vmem>>, vector<1x1x16x5xf32>
    %465 = vector.shape_cast %464 : vector<1x1x16x5xf32> to vector<16x5xf32>
    %cst_225 = arith.constant dense<0.000000e+00> : vector<1x5xf32>
    %466 = tpu.matmul %463, %465, %cst_225 {dimension_numbers = #tpu.dot_dimension_numbers<[1], [0], [0], [1], [0, 0, 1, 1], [], []>} : vector<1x16xf32>, vector<16x5xf32>, vector<1x5xf32> -> vector<1x5xf32>
    %467 = arith.addf %462, %466 : vector<1x5xf32>
    %468 = vector.extract_strided_slice %448 {offsets = [3, 0], sizes = [1, 16], strides = [1, 1]} : vector<16x16xf32> to vector<1x16xf32>
    %c0_226 = arith.constant 0 : index
    %c3 = arith.constant 3 : index
    %c0_227 = arith.constant 0 : index
    %c0_228 = arith.constant 0 : index
    %469 = vector.load %arg29[%c0_226, %c3, %c0_227, %c0_228] : memref<1x16x16x5xf32, #tpu.memory_space<vmem>>, vector<1x1x16x5xf32>
    %470 = vector.shape_cast %469 : vector<1x1x16x5xf32> to vector<16x5xf32>
    %cst_229 = arith.constant dense<0.000000e+00> : vector<1x5xf32>
    %471 = tpu.matmul %468, %470, %cst_229 {dimension_numbers = #tpu.dot_dimension_numbers<[1], [0], [0], [1], [0, 0, 1, 1], [], []>} : vector<1x16xf32>, vector<16x5xf32>, vector<1x5xf32> -> vector<1x5xf32>
    %472 = arith.addf %467, %471 : vector<1x5xf32>
    %473 = vector.extract_strided_slice %448 {offsets = [4, 0], sizes = [1, 16], strides = [1, 1]} : vector<16x16xf32> to vector<1x16xf32>
    %c0_230 = arith.constant 0 : index
    %c4 = arith.constant 4 : index
    %c0_231 = arith.constant 0 : index
    %c0_232 = arith.constant 0 : index
    %474 = vector.load %arg29[%c0_230, %c4, %c0_231, %c0_232] : memref<1x16x16x5xf32, #tpu.memory_space<vmem>>, vector<1x1x16x5xf32>
    %475 = vector.shape_cast %474 : vector<1x1x16x5xf32> to vector<16x5xf32>
    %cst_233 = arith.constant dense<0.000000e+00> : vector<1x5xf32>
    %476 = tpu.matmul %473, %475, %cst_233 {dimension_numbers = #tpu.dot_dimension_numbers<[1], [0], [0], [1], [0, 0, 1, 1], [], []>} : vector<1x16xf32>, vector<16x5xf32>, vector<1x5xf32> -> vector<1x5xf32>
    %477 = arith.addf %472, %476 : vector<1x5xf32>
    %478 = vector.extract_strided_slice %448 {offsets = [5, 0], sizes = [1, 16], strides = [1, 1]} : vector<16x16xf32> to vector<1x16xf32>
    %c0_234 = arith.constant 0 : index
    %c5 = arith.constant 5 : index
    %c0_235 = arith.constant 0 : index
    %c0_236 = arith.constant 0 : index
    %479 = vector.load %arg29[%c0_234, %c5, %c0_235, %c0_236] : memref<1x16x16x5xf32, #tpu.memory_space<vmem>>, vector<1x1x16x5xf32>
    %480 = vector.shape_cast %479 : vector<1x1x16x5xf32> to vector<16x5xf32>
    %cst_237 = arith.constant dense<0.000000e+00> : vector<1x5xf32>
    %481 = tpu.matmul %478, %480, %cst_237 {dimension_numbers = #tpu.dot_dimension_numbers<[1], [0], [0], [1], [0, 0, 1, 1], [], []>} : vector<1x16xf32>, vector<16x5xf32>, vector<1x5xf32> -> vector<1x5xf32>
    %482 = arith.addf %477, %481 : vector<1x5xf32>
    %483 = vector.extract_strided_slice %448 {offsets = [6, 0], sizes = [1, 16], strides = [1, 1]} : vector<16x16xf32> to vector<1x16xf32>
    %c0_238 = arith.constant 0 : index
    %c6 = arith.constant 6 : index
    %c0_239 = arith.constant 0 : index
    %c0_240 = arith.constant 0 : index
    %484 = vector.load %arg29[%c0_238, %c6, %c0_239, %c0_240] : memref<1x16x16x5xf32, #tpu.memory_space<vmem>>, vector<1x1x16x5xf32>
    %485 = vector.shape_cast %484 : vector<1x1x16x5xf32> to vector<16x5xf32>
    %cst_241 = arith.constant dense<0.000000e+00> : vector<1x5xf32>
    %486 = tpu.matmul %483, %485, %cst_241 {dimension_numbers = #tpu.dot_dimension_numbers<[1], [0], [0], [1], [0, 0, 1, 1], [], []>} : vector<1x16xf32>, vector<16x5xf32>, vector<1x5xf32> -> vector<1x5xf32>
    %487 = arith.addf %482, %486 : vector<1x5xf32>
    %488 = vector.extract_strided_slice %448 {offsets = [7, 0], sizes = [1, 16], strides = [1, 1]} : vector<16x16xf32> to vector<1x16xf32>
    %c0_242 = arith.constant 0 : index
    %c7 = arith.constant 7 : index
    %c0_243 = arith.constant 0 : index
    %c0_244 = arith.constant 0 : index
    %489 = vector.load %arg29[%c0_242, %c7, %c0_243, %c0_244] : memref<1x16x16x5xf32, #tpu.memory_space<vmem>>, vector<1x1x16x5xf32>
    %490 = vector.shape_cast %489 : vector<1x1x16x5xf32> to vector<16x5xf32>
    %cst_245 = arith.constant dense<0.000000e+00> : vector<1x5xf32>
    %491 = tpu.matmul %488, %490, %cst_245 {dimension_numbers = #tpu.dot_dimension_numbers<[1], [0], [0], [1], [0, 0, 1, 1], [], []>} : vector<1x16xf32>, vector<16x5xf32>, vector<1x5xf32> -> vector<1x5xf32>
    %492 = arith.addf %487, %491 : vector<1x5xf32>
    %493 = vector.extract_strided_slice %448 {offsets = [8, 0], sizes = [1, 16], strides = [1, 1]} : vector<16x16xf32> to vector<1x16xf32>
    %c0_246 = arith.constant 0 : index
    %c8 = arith.constant 8 : index
    %c0_247 = arith.constant 0 : index
    %c0_248 = arith.constant 0 : index
    %494 = vector.load %arg29[%c0_246, %c8, %c0_247, %c0_248] : memref<1x16x16x5xf32, #tpu.memory_space<vmem>>, vector<1x1x16x5xf32>
    %495 = vector.shape_cast %494 : vector<1x1x16x5xf32> to vector<16x5xf32>
    %cst_249 = arith.constant dense<0.000000e+00> : vector<1x5xf32>
    %496 = tpu.matmul %493, %495, %cst_249 {dimension_numbers = #tpu.dot_dimension_numbers<[1], [0], [0], [1], [0, 0, 1, 1], [], []>} : vector<1x16xf32>, vector<16x5xf32>, vector<1x5xf32> -> vector<1x5xf32>
    %497 = arith.addf %492, %496 : vector<1x5xf32>
    %498 = vector.extract_strided_slice %448 {offsets = [9, 0], sizes = [1, 16], strides = [1, 1]} : vector<16x16xf32> to vector<1x16xf32>
    %c0_250 = arith.constant 0 : index
    %c9 = arith.constant 9 : index
    %c0_251 = arith.constant 0 : index
    %c0_252 = arith.constant 0 : index
    %499 = vector.load %arg29[%c0_250, %c9, %c0_251, %c0_252] : memref<1x16x16x5xf32, #tpu.memory_space<vmem>>, vector<1x1x16x5xf32>
    %500 = vector.shape_cast %499 : vector<1x1x16x5xf32> to vector<16x5xf32>
    %cst_253 = arith.constant dense<0.000000e+00> : vector<1x5xf32>
    %501 = tpu.matmul %498, %500, %cst_253 {dimension_numbers = #tpu.dot_dimension_numbers<[1], [0], [0], [1], [0, 0, 1, 1], [], []>} : vector<1x16xf32>, vector<16x5xf32>, vector<1x5xf32> -> vector<1x5xf32>
    %502 = arith.addf %497, %501 : vector<1x5xf32>
    %503 = vector.extract_strided_slice %448 {offsets = [10, 0], sizes = [1, 16], strides = [1, 1]} : vector<16x16xf32> to vector<1x16xf32>
    %c0_254 = arith.constant 0 : index
    %c10 = arith.constant 10 : index
    %c0_255 = arith.constant 0 : index
    %c0_256 = arith.constant 0 : index
    %504 = vector.load %arg29[%c0_254, %c10, %c0_255, %c0_256] : memref<1x16x16x5xf32, #tpu.memory_space<vmem>>, vector<1x1x16x5xf32>
    %505 = vector.shape_cast %504 : vector<1x1x16x5xf32> to vector<16x5xf32>
    %cst_257 = arith.constant dense<0.000000e+00> : vector<1x5xf32>
    %506 = tpu.matmul %503, %505, %cst_257 {dimension_numbers = #tpu.dot_dimension_numbers<[1], [0], [0], [1], [0, 0, 1, 1], [], []>} : vector<1x16xf32>, vector<16x5xf32>, vector<1x5xf32> -> vector<1x5xf32>
    %507 = arith.addf %502, %506 : vector<1x5xf32>
    %508 = vector.extract_strided_slice %448 {offsets = [11, 0], sizes = [1, 16], strides = [1, 1]} : vector<16x16xf32> to vector<1x16xf32>
    %c0_258 = arith.constant 0 : index
    %c11 = arith.constant 11 : index
    %c0_259 = arith.constant 0 : index
    %c0_260 = arith.constant 0 : index
    %509 = vector.load %arg29[%c0_258, %c11, %c0_259, %c0_260] : memref<1x16x16x5xf32, #tpu.memory_space<vmem>>, vector<1x1x16x5xf32>
    %510 = vector.shape_cast %509 : vector<1x1x16x5xf32> to vector<16x5xf32>
    %cst_261 = arith.constant dense<0.000000e+00> : vector<1x5xf32>
    %511 = tpu.matmul %508, %510, %cst_261 {dimension_numbers = #tpu.dot_dimension_numbers<[1], [0], [0], [1], [0, 0, 1, 1], [], []>} : vector<1x16xf32>, vector<16x5xf32>, vector<1x5xf32> -> vector<1x5xf32>
    %512 = arith.addf %507, %511 : vector<1x5xf32>
    %513 = vector.extract_strided_slice %448 {offsets = [12, 0], sizes = [1, 16], strides = [1, 1]} : vector<16x16xf32> to vector<1x16xf32>
    %c0_262 = arith.constant 0 : index
    %c12 = arith.constant 12 : index
    %c0_263 = arith.constant 0 : index
    %c0_264 = arith.constant 0 : index
    %514 = vector.load %arg29[%c0_262, %c12, %c0_263, %c0_264] : memref<1x16x16x5xf32, #tpu.memory_space<vmem>>, vector<1x1x16x5xf32>
    %515 = vector.shape_cast %514 : vector<1x1x16x5xf32> to vector<16x5xf32>
    %cst_265 = arith.constant dense<0.000000e+00> : vector<1x5xf32>
    %516 = tpu.matmul %513, %515, %cst_265 {dimension_numbers = #tpu.dot_dimension_numbers<[1], [0], [0], [1], [0, 0, 1, 1], [], []>} : vector<1x16xf32>, vector<16x5xf32>, vector<1x5xf32> -> vector<1x5xf32>
    %517 = arith.addf %512, %516 : vector<1x5xf32>
    %518 = vector.extract_strided_slice %448 {offsets = [13, 0], sizes = [1, 16], strides = [1, 1]} : vector<16x16xf32> to vector<1x16xf32>
    %c0_266 = arith.constant 0 : index
    %c13 = arith.constant 13 : index
    %c0_267 = arith.constant 0 : index
    %c0_268 = arith.constant 0 : index
    %519 = vector.load %arg29[%c0_266, %c13, %c0_267, %c0_268] : memref<1x16x16x5xf32, #tpu.memory_space<vmem>>, vector<1x1x16x5xf32>
    %520 = vector.shape_cast %519 : vector<1x1x16x5xf32> to vector<16x5xf32>
    %cst_269 = arith.constant dense<0.000000e+00> : vector<1x5xf32>
    %521 = tpu.matmul %518, %520, %cst_269 {dimension_numbers = #tpu.dot_dimension_numbers<[1], [0], [0], [1], [0, 0, 1, 1], [], []>} : vector<1x16xf32>, vector<16x5xf32>, vector<1x5xf32> -> vector<1x5xf32>
    %522 = arith.addf %517, %521 : vector<1x5xf32>
    %523 = vector.extract_strided_slice %448 {offsets = [14, 0], sizes = [1, 16], strides = [1, 1]} : vector<16x16xf32> to vector<1x16xf32>
    %c0_270 = arith.constant 0 : index
    %c14 = arith.constant 14 : index
    %c0_271 = arith.constant 0 : index
    %c0_272 = arith.constant 0 : index
    %524 = vector.load %arg29[%c0_270, %c14, %c0_271, %c0_272] : memref<1x16x16x5xf32, #tpu.memory_space<vmem>>, vector<1x1x16x5xf32>
    %525 = vector.shape_cast %524 : vector<1x1x16x5xf32> to vector<16x5xf32>
    %cst_273 = arith.constant dense<0.000000e+00> : vector<1x5xf32>
    %526 = tpu.matmul %523, %525, %cst_273 {dimension_numbers = #tpu.dot_dimension_numbers<[1], [0], [0], [1], [0, 0, 1, 1], [], []>} : vector<1x16xf32>, vector<16x5xf32>, vector<1x5xf32> -> vector<1x5xf32>
    %527 = arith.addf %522, %526 : vector<1x5xf32>
    %528 = vector.extract_strided_slice %448 {offsets = [15, 0], sizes = [1, 16], strides = [1, 1]} : vector<16x16xf32> to vector<1x16xf32>
    %c0_274 = arith.constant 0 : index
    %c15 = arith.constant 15 : index
    %c0_275 = arith.constant 0 : index
    %c0_276 = arith.constant 0 : index
    %529 = vector.load %arg29[%c0_274, %c15, %c0_275, %c0_276] : memref<1x16x16x5xf32, #tpu.memory_space<vmem>>, vector<1x1x16x5xf32>
    %530 = vector.shape_cast %529 : vector<1x1x16x5xf32> to vector<16x5xf32>
    %cst_277 = arith.constant dense<0.000000e+00> : vector<1x5xf32>
    %531 = tpu.matmul %528, %530, %cst_277 {dimension_numbers = #tpu.dot_dimension_numbers<[1], [0], [0], [1], [0, 0, 1, 1], [], []>} : vector<1x16xf32>, vector<16x5xf32>, vector<1x5xf32> -> vector<1x5xf32>
    %532 = arith.addf %527, %531 : vector<1x5xf32>
    %c0_278 = arith.constant 0 : index
    %c0_279 = arith.constant 0 : index
    %c0_280 = arith.constant 0 : index
    %533 = vector.load %arg30[%c0_278, %c0_279, %c0_280] : memref<1x1x5xf32, #tpu.memory_space<vmem>>, vector<1x1x5xf32>
    %534 = vector.shape_cast %533 : vector<1x1x5xf32> to vector<1x5xf32>
    %535 = arith.addf %532, %534 : vector<1x5xf32>
    %c0_281 = arith.constant 0 : index
    %c0_282 = arith.constant 0 : index
    %c0_283 = arith.constant 0 : index
    %536 = vector.load %arg31[%c0_281, %c0_282, %c0_283] : memref<1x2x5xf32, #tpu.memory_space<vmem>>, vector<1x1x5xf32>
    %537 = vector.shape_cast %536 : vector<1x1x5xf32> to vector<1x5xf32>
    %538 = vector.shape_cast %535 : vector<1x5xf32> to vector<1x1x5xf32>
    tpu.vector_store %arg31[%c0_281, %c0_282, %c0_283], %538 {strides = array<i32>} : memref<1x2x5xf32, #tpu.memory_space<vmem>>, vector<1x1x5xf32>,
    %c1_284 = arith.constant 1 : index
    %c0_285 = arith.constant 0 : index
    %c0_286 = arith.constant 0 : index
    %539 = vector.load %arg1[%c1_284, %c0_285, %c0_286] : memref<2x4x64xf32, #tpu.memory_space<vmem>>, vector<1x4x64xf32>
    %540 = vector.shape_cast %539 : vector<1x4x64xf32> to vector<4x64xf32>
    %c0_287 = arith.constant 0 : index
    %c0_288 = arith.constant 0 : index
    %c0_289 = arith.constant 0 : index
    %541 = vector.load %arg3[%c0_287, %c0_288, %c0_289] : memref<1x8x20xf32, #tpu.memory_space<vmem>>, vector<1x8x20xf32>
    %542 = vector.shape_cast %541 : vector<1x8x20xf32> to vector<8x20xf32>
    %543 = tpu.iota {dimensions = array<i32: 0>} : vector<64x64xi32>
    %544 = tpu.iota {dimensions = array<i32: 1>} : vector<64x64xi32>
    %c1_i32_290 = arith.constant 1 : i32
    %545 = vector.broadcast %c1_i32_290 : i32 to vector<64x64xi32>
    %546 = arith.muli %544, %545 : vector<64x64xi32>
    %c-2_i32_291 = arith.constant -2 : i32
    %547 = vector.broadcast %c-2_i32_291 : i32 to vector<64x64xi32>
    %548 = arith.addi %546, %547 : vector<64x64xi32>
    %549 = arith.cmpi eq, %543, %548 : vector<64x64xi32>
    %550 = arith.extui %549 : vector<64x64xi1> to vector<64x64xi32>
    %551 = arith.sitofp %550 : vector<64x64xi32> to vector<64x64xf32>
    %cst_292 = arith.constant dense<0.000000e+00> : vector<4x64xf32>
    %552 = tpu.matmul %540, %551, %cst_292 {dimension_numbers = #tpu.dot_dimension_numbers<[1], [0], [0], [1], [0, 0, 1, 1], [], []>} : vector<4x64xf32>, vector<64x64xf32>, vector<4x64xf32> -> vector<4x64xf32>
    %553 = vector.extract_strided_slice %542 {offsets = [0, 0], sizes = [8, 4], strides = [1, 1]} : vector<8x20xf32> to vector<8x4xf32>
    %cst_293 = arith.constant dense<0.000000e+00> : vector<8x64xf32>
    %554 = tpu.matmul %553, %552, %cst_293 {dimension_numbers = #tpu.dot_dimension_numbers<[1], [0], [0], [1], [0, 0, 1, 1], [], []>} : vector<8x4xf32>, vector<4x64xf32>, vector<8x64xf32> -> vector<8x64xf32>
    %c1_i32_294 = arith.constant 1 : i32
    %555 = vector.broadcast %c1_i32_294 : i32 to vector<64x64xi32>
    %556 = arith.muli %544, %555 : vector<64x64xi32>
    %c-1_i32_295 = arith.constant -1 : i32
    %557 = vector.broadcast %c-1_i32_295 : i32 to vector<64x64xi32>
    %558 = arith.addi %556, %557 : vector<64x64xi32>
    %559 = arith.cmpi eq, %543, %558 : vector<64x64xi32>
    %560 = arith.extui %559 : vector<64x64xi1> to vector<64x64xi32>
    %561 = arith.sitofp %560 : vector<64x64xi32> to vector<64x64xf32>
    %cst_296 = arith.constant dense<0.000000e+00> : vector<4x64xf32>
    %562 = tpu.matmul %540, %561, %cst_296 {dimension_numbers = #tpu.dot_dimension_numbers<[1], [0], [0], [1], [0, 0, 1, 1], [], []>} : vector<4x64xf32>, vector<64x64xf32>, vector<4x64xf32> -> vector<4x64xf32>
    %563 = vector.extract_strided_slice %542 {offsets = [0, 4], sizes = [8, 4], strides = [1, 1]} : vector<8x20xf32> to vector<8x4xf32>
    %cst_297 = arith.constant dense<0.000000e+00> : vector<8x64xf32>
    %564 = tpu.matmul %563, %562, %cst_297 {dimension_numbers = #tpu.dot_dimension_numbers<[1], [0], [0], [1], [0, 0, 1, 1], [], []>} : vector<8x4xf32>, vector<4x64xf32>, vector<8x64xf32> -> vector<8x64xf32>
    %565 = arith.addf %554, %564 : vector<8x64xf32>
    %c1_i32_298 = arith.constant 1 : i32
    %566 = vector.broadcast %c1_i32_298 : i32 to vector<64x64xi32>
    %567 = arith.muli %544, %566 : vector<64x64xi32>
    %c0_i32_299 = arith.constant 0 : i32
    %568 = vector.broadcast %c0_i32_299 : i32 to vector<64x64xi32>
    %569 = arith.addi %567, %568 : vector<64x64xi32>
    %570 = arith.cmpi eq, %543, %569 : vector<64x64xi32>
    %571 = arith.extui %570 : vector<64x64xi1> to vector<64x64xi32>
    %572 = arith.sitofp %571 : vector<64x64xi32> to vector<64x64xf32>
    %cst_300 = arith.constant dense<0.000000e+00> : vector<4x64xf32>
    %573 = tpu.matmul %540, %572, %cst_300 {dimension_numbers = #tpu.dot_dimension_numbers<[1], [0], [0], [1], [0, 0, 1, 1], [], []>} : vector<4x64xf32>, vector<64x64xf32>, vector<4x64xf32> -> vector<4x64xf32>
    %574 = vector.extract_strided_slice %542 {offsets = [0, 8], sizes = [8, 4], strides = [1, 1]} : vector<8x20xf32> to vector<8x4xf32>
    %cst_301 = arith.constant dense<0.000000e+00> : vector<8x64xf32>
    %575 = tpu.matmul %574, %573, %cst_301 {dimension_numbers = #tpu.dot_dimension_numbers<[1], [0], [0], [1], [0, 0, 1, 1], [], []>} : vector<8x4xf32>, vector<4x64xf32>, vector<8x64xf32> -> vector<8x64xf32>
    %576 = arith.addf %565, %575 : vector<8x64xf32>
    %c1_i32_302 = arith.constant 1 : i32
    %577 = vector.broadcast %c1_i32_302 : i32 to vector<64x64xi32>
    %578 = arith.muli %544, %577 : vector<64x64xi32>
    %c1_i32_303 = arith.constant 1 : i32
    %579 = vector.broadcast %c1_i32_303 : i32 to vector<64x64xi32>
    %580 = arith.addi %578, %579 : vector<64x64xi32>
    %581 = arith.cmpi eq, %543, %580 : vector<64x64xi32>
    %582 = arith.extui %581 : vector<64x64xi1> to vector<64x64xi32>
    %583 = arith.sitofp %582 : vector<64x64xi32> to vector<64x64xf32>
    %cst_304 = arith.constant dense<0.000000e+00> : vector<4x64xf32>
    %584 = tpu.matmul %540, %583, %cst_304 {dimension_numbers = #tpu.dot_dimension_numbers<[1], [0], [0], [1], [0, 0, 1, 1], [], []>} : vector<4x64xf32>, vector<64x64xf32>, vector<4x64xf32> -> vector<4x64xf32>
    %585 = vector.extract_strided_slice %542 {offsets = [0, 12], sizes = [8, 4], strides = [1, 1]} : vector<8x20xf32> to vector<8x4xf32>
    %cst_305 = arith.constant dense<0.000000e+00> : vector<8x64xf32>
    %586 = tpu.matmul %585, %584, %cst_305 {dimension_numbers = #tpu.dot_dimension_numbers<[1], [0], [0], [1], [0, 0, 1, 1], [], []>} : vector<8x4xf32>, vector<4x64xf32>, vector<8x64xf32> -> vector<8x64xf32>
    %587 = arith.addf %576, %586 : vector<8x64xf32>
    %c1_i32_306 = arith.constant 1 : i32
    %588 = vector.broadcast %c1_i32_306 : i32 to vector<64x64xi32>
    %589 = arith.muli %544, %588 : vector<64x64xi32>
    %c2_i32_307 = arith.constant 2 : i32
    %590 = vector.broadcast %c2_i32_307 : i32 to vector<64x64xi32>
    %591 = arith.addi %589, %590 : vector<64x64xi32>
    %592 = arith.cmpi eq, %543, %591 : vector<64x64xi32>
    %593 = arith.extui %592 : vector<64x64xi1> to vector<64x64xi32>
    %594 = arith.sitofp %593 : vector<64x64xi32> to vector<64x64xf32>
    %cst_308 = arith.constant dense<0.000000e+00> : vector<4x64xf32>
    %595 = tpu.matmul %540, %594, %cst_308 {dimension_numbers = #tpu.dot_dimension_numbers<[1], [0], [0], [1], [0, 0, 1, 1], [], []>} : vector<4x64xf32>, vector<64x64xf32>, vector<4x64xf32> -> vector<4x64xf32>
    %596 = vector.extract_strided_slice %542 {offsets = [0, 16], sizes = [8, 4], strides = [1, 1]} : vector<8x20xf32> to vector<8x4xf32>
    %cst_309 = arith.constant dense<0.000000e+00> : vector<8x64xf32>
    %597 = tpu.matmul %596, %595, %cst_309 {dimension_numbers = #tpu.dot_dimension_numbers<[1], [0], [0], [1], [0, 0, 1, 1], [], []>} : vector<8x4xf32>, vector<4x64xf32>, vector<8x64xf32> -> vector<8x64xf32>
    %598 = arith.addf %587, %597 : vector<8x64xf32>
    %c0_310 = arith.constant 0 : index
    %c0_311 = arith.constant 0 : index
    %c0_312 = arith.constant 0 : index
    %599 = vector.load %arg4[%c0_310, %c0_311, %c0_312] : memref<1x8x1xf32, #tpu.memory_space<vmem>>, vector<1x8x1xf32>
    %600 = vector.shape_cast %599 : vector<1x8x1xf32> to vector<8x1xf32>
    %c0_313 = arith.constant 0 : index
    %c0_314 = arith.constant 0 : index
    %c0_315 = arith.constant 0 : index
    %601 = vector.load %arg5[%c0_313, %c0_314, %c0_315] : memref<1x8x1xf32, #tpu.memory_space<vmem>>, vector<1x8x1xf32>
    %602 = vector.shape_cast %601 : vector<1x8x1xf32> to vector<8x1xf32>
    %603 = vector.broadcast %600 : vector<8x1xf32> to vector<8x64xf32>
    %604 = arith.mulf %598, %603 : vector<8x64xf32>
    %605 = vector.broadcast %602 : vector<8x1xf32> to vector<8x64xf32>
    %606 = arith.addf %604, %605 : vector<8x64xf32>
    %cst_316 = arith.constant 0.000000e+00 : f32
    %607 = vector.broadcast %cst_316 : f32 to vector<8x64xf32>
    %608 = arith.maximumf %606, %607 : vector<8x64xf32>
    %609 = tpu.iota {dimensions = array<i32: 0>} : vector<64x32xi32>
    %610 = tpu.iota {dimensions = array<i32: 1>} : vector<64x32xi32>
    %c2_i32_317 = arith.constant 2 : i32
    %611 = vector.broadcast %c2_i32_317 : i32 to vector<64x32xi32>
    %612 = arith.muli %611, %610 : vector<64x32xi32>
    %c0_i32_318 = arith.constant 0 : i32
    %613 = vector.broadcast %c0_i32_318 : i32 to vector<64x32xi32>
    %614 = arith.addi %612, %613 : vector<64x32xi32>
    %615 = arith.cmpi eq, %609, %614 : vector<64x32xi32>
    %616 = arith.extui %615 : vector<64x32xi1> to vector<64x32xi32>
    %617 = arith.sitofp %616 : vector<64x32xi32> to vector<64x32xf32>
    %cst_319 = arith.constant dense<0.000000e+00> : vector<8x32xf32>
    %618 = tpu.matmul %608, %617, %cst_319 {dimension_numbers = #tpu.dot_dimension_numbers<[1], [0], [0], [1], [0, 0, 1, 1], [], []>} : vector<8x64xf32>, vector<64x32xf32>, vector<8x32xf32> -> vector<8x32xf32>
    %c2_i32_320 = arith.constant 2 : i32
    %619 = vector.broadcast %c2_i32_320 : i32 to vector<64x32xi32>
    %620 = arith.muli %619, %610 : vector<64x32xi32>
    %c1_i32_321 = arith.constant 1 : i32
    %621 = vector.broadcast %c1_i32_321 : i32 to vector<64x32xi32>
    %622 = arith.addi %620, %621 : vector<64x32xi32>
    %623 = arith.cmpi eq, %609, %622 : vector<64x32xi32>
    %624 = arith.extui %623 : vector<64x32xi1> to vector<64x32xi32>
    %625 = arith.sitofp %624 : vector<64x32xi32> to vector<64x32xf32>
    %cst_322 = arith.constant dense<0.000000e+00> : vector<8x32xf32>
    %626 = tpu.matmul %608, %625, %cst_322 {dimension_numbers = #tpu.dot_dimension_numbers<[1], [0], [0], [1], [0, 0, 1, 1], [], []>} : vector<8x64xf32>, vector<64x32xf32>, vector<8x32xf32> -> vector<8x32xf32>
    %627 = arith.maximumf %618, %626 : vector<8x32xf32>
    %c0_323 = arith.constant 0 : index
    %c0_324 = arith.constant 0 : index
    %c0_325 = arith.constant 0 : index
    %628 = vector.load %arg13[%c0_323, %c0_324, %c0_325] : memref<1x16x8xf32, #tpu.memory_space<vmem>>, vector<1x16x8xf32>
    %629 = vector.shape_cast %628 : vector<1x16x8xf32> to vector<16x8xf32>
    %cst_326 = arith.constant dense<0.000000e+00> : vector<16x32xf32>
    %630 = tpu.matmul %629, %627, %cst_326 {dimension_numbers = #tpu.dot_dimension_numbers<[1], [0], [0], [1], [0, 0, 1, 1], [], []>} : vector<16x8xf32>, vector<8x32xf32>, vector<16x32xf32> -> vector<16x32xf32>
    %c0_327 = arith.constant 0 : index
    %c0_328 = arith.constant 0 : index
    %c0_329 = arith.constant 0 : index
    %631 = vector.load %arg14[%c0_327, %c0_328, %c0_329] : memref<1x16x1xf32, #tpu.memory_space<vmem>>, vector<1x16x1xf32>
    %632 = vector.shape_cast %631 : vector<1x16x1xf32> to vector<16x1xf32>
    %633 = vector.broadcast %632 : vector<16x1xf32> to vector<16x32xf32>
    %634 = arith.addf %630, %633 : vector<16x32xf32>
    %c0_330 = arith.constant 0 : index
    %c0_331 = arith.constant 0 : index
    %c0_332 = arith.constant 0 : index
    %635 = vector.load %arg6[%c0_330, %c0_331, %c0_332] : memref<1x16x40xf32, #tpu.memory_space<vmem>>, vector<1x16x40xf32>
    %636 = vector.shape_cast %635 : vector<1x16x40xf32> to vector<16x40xf32>
    %637 = tpu.iota {dimensions = array<i32: 0>} : vector<64x64xi32>
    %638 = tpu.iota {dimensions = array<i32: 1>} : vector<64x64xi32>
    %c1_i32_333 = arith.constant 1 : i32
    %639 = vector.broadcast %c1_i32_333 : i32 to vector<64x64xi32>
    %640 = arith.muli %638, %639 : vector<64x64xi32>
    %c-2_i32_334 = arith.constant -2 : i32
    %641 = vector.broadcast %c-2_i32_334 : i32 to vector<64x64xi32>
    %642 = arith.addi %640, %641 : vector<64x64xi32>
    %643 = arith.cmpi eq, %637, %642 : vector<64x64xi32>
    %644 = arith.extui %643 : vector<64x64xi1> to vector<64x64xi32>
    %645 = arith.sitofp %644 : vector<64x64xi32> to vector<64x64xf32>
    %cst_335 = arith.constant dense<0.000000e+00> : vector<8x64xf32>
    %646 = tpu.matmul %608, %645, %cst_335 {dimension_numbers = #tpu.dot_dimension_numbers<[1], [0], [0], [1], [0, 0, 1, 1], [], []>} : vector<8x64xf32>, vector<64x64xf32>, vector<8x64xf32> -> vector<8x64xf32>
    %647 = vector.extract_strided_slice %636 {offsets = [0, 0], sizes = [16, 8], strides = [1, 1]} : vector<16x40xf32> to vector<16x8xf32>
    %cst_336 = arith.constant dense<0.000000e+00> : vector<16x64xf32>
    %648 = tpu.matmul %647, %646, %cst_336 {dimension_numbers = #tpu.dot_dimension_numbers<[1], [0], [0], [1], [0, 0, 1, 1], [], []>} : vector<16x8xf32>, vector<8x64xf32>, vector<16x64xf32> -> vector<16x64xf32>
    %c1_i32_337 = arith.constant 1 : i32
    %649 = vector.broadcast %c1_i32_337 : i32 to vector<64x64xi32>
    %650 = arith.muli %638, %649 : vector<64x64xi32>
    %c-1_i32_338 = arith.constant -1 : i32
    %651 = vector.broadcast %c-1_i32_338 : i32 to vector<64x64xi32>
    %652 = arith.addi %650, %651 : vector<64x64xi32>
    %653 = arith.cmpi eq, %637, %652 : vector<64x64xi32>
    %654 = arith.extui %653 : vector<64x64xi1> to vector<64x64xi32>
    %655 = arith.sitofp %654 : vector<64x64xi32> to vector<64x64xf32>
    %cst_339 = arith.constant dense<0.000000e+00> : vector<8x64xf32>
    %656 = tpu.matmul %608, %655, %cst_339 {dimension_numbers = #tpu.dot_dimension_numbers<[1], [0], [0], [1], [0, 0, 1, 1], [], []>} : vector<8x64xf32>, vector<64x64xf32>, vector<8x64xf32> -> vector<8x64xf32>
    %657 = vector.extract_strided_slice %636 {offsets = [0, 8], sizes = [16, 8], strides = [1, 1]} : vector<16x40xf32> to vector<16x8xf32>
    %cst_340 = arith.constant dense<0.000000e+00> : vector<16x64xf32>
    %658 = tpu.matmul %657, %656, %cst_340 {dimension_numbers = #tpu.dot_dimension_numbers<[1], [0], [0], [1], [0, 0, 1, 1], [], []>} : vector<16x8xf32>, vector<8x64xf32>, vector<16x64xf32> -> vector<16x64xf32>
    %659 = arith.addf %648, %658 : vector<16x64xf32>
    %c1_i32_341 = arith.constant 1 : i32
    %660 = vector.broadcast %c1_i32_341 : i32 to vector<64x64xi32>
    %661 = arith.muli %638, %660 : vector<64x64xi32>
    %c0_i32_342 = arith.constant 0 : i32
    %662 = vector.broadcast %c0_i32_342 : i32 to vector<64x64xi32>
    %663 = arith.addi %661, %662 : vector<64x64xi32>
    %664 = arith.cmpi eq, %637, %663 : vector<64x64xi32>
    %665 = arith.extui %664 : vector<64x64xi1> to vector<64x64xi32>
    %666 = arith.sitofp %665 : vector<64x64xi32> to vector<64x64xf32>
    %cst_343 = arith.constant dense<0.000000e+00> : vector<8x64xf32>
    %667 = tpu.matmul %608, %666, %cst_343 {dimension_numbers = #tpu.dot_dimension_numbers<[1], [0], [0], [1], [0, 0, 1, 1], [], []>} : vector<8x64xf32>, vector<64x64xf32>, vector<8x64xf32> -> vector<8x64xf32>
    %668 = vector.extract_strided_slice %636 {offsets = [0, 16], sizes = [16, 8], strides = [1, 1]} : vector<16x40xf32> to vector<16x8xf32>
    %cst_344 = arith.constant dense<0.000000e+00> : vector<16x64xf32>
    %669 = tpu.matmul %668, %667, %cst_344 {dimension_numbers = #tpu.dot_dimension_numbers<[1], [0], [0], [1], [0, 0, 1, 1], [], []>} : vector<16x8xf32>, vector<8x64xf32>, vector<16x64xf32> -> vector<16x64xf32>
    %670 = arith.addf %659, %669 : vector<16x64xf32>
    %c1_i32_345 = arith.constant 1 : i32
    %671 = vector.broadcast %c1_i32_345 : i32 to vector<64x64xi32>
    %672 = arith.muli %638, %671 : vector<64x64xi32>
    %c1_i32_346 = arith.constant 1 : i32
    %673 = vector.broadcast %c1_i32_346 : i32 to vector<64x64xi32>
    %674 = arith.addi %672, %673 : vector<64x64xi32>
    %675 = arith.cmpi eq, %637, %674 : vector<64x64xi32>
    %676 = arith.extui %675 : vector<64x64xi1> to vector<64x64xi32>
    %677 = arith.sitofp %676 : vector<64x64xi32> to vector<64x64xf32>
    %cst_347 = arith.constant dense<0.000000e+00> : vector<8x64xf32>
    %678 = tpu.matmul %608, %677, %cst_347 {dimension_numbers = #tpu.dot_dimension_numbers<[1], [0], [0], [1], [0, 0, 1, 1], [], []>} : vector<8x64xf32>, vector<64x64xf32>, vector<8x64xf32> -> vector<8x64xf32>
    %679 = vector.extract_strided_slice %636 {offsets = [0, 24], sizes = [16, 8], strides = [1, 1]} : vector<16x40xf32> to vector<16x8xf32>
    %cst_348 = arith.constant dense<0.000000e+00> : vector<16x64xf32>
    %680 = tpu.matmul %679, %678, %cst_348 {dimension_numbers = #tpu.dot_dimension_numbers<[1], [0], [0], [1], [0, 0, 1, 1], [], []>} : vector<16x8xf32>, vector<8x64xf32>, vector<16x64xf32> -> vector<16x64xf32>
    %681 = arith.addf %670, %680 : vector<16x64xf32>
    %c1_i32_349 = arith.constant 1 : i32
    %682 = vector.broadcast %c1_i32_349 : i32 to vector<64x64xi32>
    %683 = arith.muli %638, %682 : vector<64x64xi32>
    %c2_i32_350 = arith.constant 2 : i32
    %684 = vector.broadcast %c2_i32_350 : i32 to vector<64x64xi32>
    %685 = arith.addi %683, %684 : vector<64x64xi32>
    %686 = arith.cmpi eq, %637, %685 : vector<64x64xi32>
    %687 = arith.extui %686 : vector<64x64xi1> to vector<64x64xi32>
    %688 = arith.sitofp %687 : vector<64x64xi32> to vector<64x64xf32>
    %cst_351 = arith.constant dense<0.000000e+00> : vector<8x64xf32>
    %689 = tpu.matmul %608, %688, %cst_351 {dimension_numbers = #tpu.dot_dimension_numbers<[1], [0], [0], [1], [0, 0, 1, 1], [], []>} : vector<8x64xf32>, vector<64x64xf32>, vector<8x64xf32> -> vector<8x64xf32>
    %690 = vector.extract_strided_slice %636 {offsets = [0, 32], sizes = [16, 8], strides = [1, 1]} : vector<16x40xf32> to vector<16x8xf32>
    %cst_352 = arith.constant dense<0.000000e+00> : vector<16x64xf32>
    %691 = tpu.matmul %690, %689, %cst_352 {dimension_numbers = #tpu.dot_dimension_numbers<[1], [0], [0], [1], [0, 0, 1, 1], [], []>} : vector<16x8xf32>, vector<8x64xf32>, vector<16x64xf32> -> vector<16x64xf32>
    %692 = arith.addf %681, %691 : vector<16x64xf32>
    %c0_353 = arith.constant 0 : index
    %c0_354 = arith.constant 0 : index
    %c0_355 = arith.constant 0 : index
    %693 = vector.load %arg7[%c0_353, %c0_354, %c0_355] : memref<1x16x1xf32, #tpu.memory_space<vmem>>, vector<1x16x1xf32>
    %694 = vector.shape_cast %693 : vector<1x16x1xf32> to vector<16x1xf32>
    %c0_356 = arith.constant 0 : index
    %c0_357 = arith.constant 0 : index
    %c0_358 = arith.constant 0 : index
    %695 = vector.load %arg8[%c0_356, %c0_357, %c0_358] : memref<1x16x1xf32, #tpu.memory_space<vmem>>, vector<1x16x1xf32>
    %696 = vector.shape_cast %695 : vector<1x16x1xf32> to vector<16x1xf32>
    %697 = vector.broadcast %694 : vector<16x1xf32> to vector<16x64xf32>
    %698 = arith.mulf %692, %697 : vector<16x64xf32>
    %699 = vector.broadcast %696 : vector<16x1xf32> to vector<16x64xf32>
    %700 = arith.addf %698, %699 : vector<16x64xf32>
    %cst_359 = arith.constant 0.000000e+00 : f32
    %701 = vector.broadcast %cst_359 : f32 to vector<16x64xf32>
    %702 = arith.maximumf %700, %701 : vector<16x64xf32>
    %c0_360 = arith.constant 0 : index
    %c0_361 = arith.constant 0 : index
    %c0_362 = arith.constant 0 : index
    %703 = vector.load %arg9[%c0_360, %c0_361, %c0_362] : memref<1x16x80xf32, #tpu.memory_space<vmem>>, vector<1x16x80xf32>
    %704 = vector.shape_cast %703 : vector<1x16x80xf32> to vector<16x80xf32>
    %705 = tpu.iota {dimensions = array<i32: 0>} : vector<64x32xi32>
    %706 = tpu.iota {dimensions = array<i32: 1>} : vector<64x32xi32>
    %c2_i32_363 = arith.constant 2 : i32
    %707 = vector.broadcast %c2_i32_363 : i32 to vector<64x32xi32>
    %708 = arith.muli %706, %707 : vector<64x32xi32>
    %c-2_i32_364 = arith.constant -2 : i32
    %709 = vector.broadcast %c-2_i32_364 : i32 to vector<64x32xi32>
    %710 = arith.addi %708, %709 : vector<64x32xi32>
    %711 = arith.cmpi eq, %705, %710 : vector<64x32xi32>
    %712 = arith.extui %711 : vector<64x32xi1> to vector<64x32xi32>
    %713 = arith.sitofp %712 : vector<64x32xi32> to vector<64x32xf32>
    %cst_365 = arith.constant dense<0.000000e+00> : vector<16x32xf32>
    %714 = tpu.matmul %702, %713, %cst_365 {dimension_numbers = #tpu.dot_dimension_numbers<[1], [0], [0], [1], [0, 0, 1, 1], [], []>} : vector<16x64xf32>, vector<64x32xf32>, vector<16x32xf32> -> vector<16x32xf32>
    %715 = vector.extract_strided_slice %704 {offsets = [0, 0], sizes = [16, 16], strides = [1, 1]} : vector<16x80xf32> to vector<16x16xf32>
    %cst_366 = arith.constant dense<0.000000e+00> : vector<16x32xf32>
    %716 = tpu.matmul %715, %714, %cst_366 {dimension_numbers = #tpu.dot_dimension_numbers<[1], [0], [0], [1], [0, 0, 1, 1], [], []>} : vector<16x16xf32>, vector<16x32xf32>, vector<16x32xf32> -> vector<16x32xf32>
    %c2_i32_367 = arith.constant 2 : i32
    %717 = vector.broadcast %c2_i32_367 : i32 to vector<64x32xi32>
    %718 = arith.muli %706, %717 : vector<64x32xi32>
    %c-1_i32_368 = arith.constant -1 : i32
    %719 = vector.broadcast %c-1_i32_368 : i32 to vector<64x32xi32>
    %720 = arith.addi %718, %719 : vector<64x32xi32>
    %721 = arith.cmpi eq, %705, %720 : vector<64x32xi32>
    %722 = arith.extui %721 : vector<64x32xi1> to vector<64x32xi32>
    %723 = arith.sitofp %722 : vector<64x32xi32> to vector<64x32xf32>
    %cst_369 = arith.constant dense<0.000000e+00> : vector<16x32xf32>
    %724 = tpu.matmul %702, %723, %cst_369 {dimension_numbers = #tpu.dot_dimension_numbers<[1], [0], [0], [1], [0, 0, 1, 1], [], []>} : vector<16x64xf32>, vector<64x32xf32>, vector<16x32xf32> -> vector<16x32xf32>
    %725 = vector.extract_strided_slice %704 {offsets = [0, 16], sizes = [16, 16], strides = [1, 1]} : vector<16x80xf32> to vector<16x16xf32>
    %cst_370 = arith.constant dense<0.000000e+00> : vector<16x32xf32>
    %726 = tpu.matmul %725, %724, %cst_370 {dimension_numbers = #tpu.dot_dimension_numbers<[1], [0], [0], [1], [0, 0, 1, 1], [], []>} : vector<16x16xf32>, vector<16x32xf32>, vector<16x32xf32> -> vector<16x32xf32>
    %727 = arith.addf %716, %726 : vector<16x32xf32>
    %c2_i32_371 = arith.constant 2 : i32
    %728 = vector.broadcast %c2_i32_371 : i32 to vector<64x32xi32>
    %729 = arith.muli %706, %728 : vector<64x32xi32>
    %c0_i32_372 = arith.constant 0 : i32
    %730 = vector.broadcast %c0_i32_372 : i32 to vector<64x32xi32>
    %731 = arith.addi %729, %730 : vector<64x32xi32>
    %732 = arith.cmpi eq, %705, %731 : vector<64x32xi32>
    %733 = arith.extui %732 : vector<64x32xi1> to vector<64x32xi32>
    %734 = arith.sitofp %733 : vector<64x32xi32> to vector<64x32xf32>
    %cst_373 = arith.constant dense<0.000000e+00> : vector<16x32xf32>
    %735 = tpu.matmul %702, %734, %cst_373 {dimension_numbers = #tpu.dot_dimension_numbers<[1], [0], [0], [1], [0, 0, 1, 1], [], []>} : vector<16x64xf32>, vector<64x32xf32>, vector<16x32xf32> -> vector<16x32xf32>
    %736 = vector.extract_strided_slice %704 {offsets = [0, 32], sizes = [16, 16], strides = [1, 1]} : vector<16x80xf32> to vector<16x16xf32>
    %cst_374 = arith.constant dense<0.000000e+00> : vector<16x32xf32>
    %737 = tpu.matmul %736, %735, %cst_374 {dimension_numbers = #tpu.dot_dimension_numbers<[1], [0], [0], [1], [0, 0, 1, 1], [], []>} : vector<16x16xf32>, vector<16x32xf32>, vector<16x32xf32> -> vector<16x32xf32>
    %738 = arith.addf %727, %737 : vector<16x32xf32>
    %c2_i32_375 = arith.constant 2 : i32
    %739 = vector.broadcast %c2_i32_375 : i32 to vector<64x32xi32>
    %740 = arith.muli %706, %739 : vector<64x32xi32>
    %c1_i32_376 = arith.constant 1 : i32
    %741 = vector.broadcast %c1_i32_376 : i32 to vector<64x32xi32>
    %742 = arith.addi %740, %741 : vector<64x32xi32>
    %743 = arith.cmpi eq, %705, %742 : vector<64x32xi32>
    %744 = arith.extui %743 : vector<64x32xi1> to vector<64x32xi32>
    %745 = arith.sitofp %744 : vector<64x32xi32> to vector<64x32xf32>
    %cst_377 = arith.constant dense<0.000000e+00> : vector<16x32xf32>
    %746 = tpu.matmul %702, %745, %cst_377 {dimension_numbers = #tpu.dot_dimension_numbers<[1], [0], [0], [1], [0, 0, 1, 1], [], []>} : vector<16x64xf32>, vector<64x32xf32>, vector<16x32xf32> -> vector<16x32xf32>
    %747 = vector.extract_strided_slice %704 {offsets = [0, 48], sizes = [16, 16], strides = [1, 1]} : vector<16x80xf32> to vector<16x16xf32>
    %cst_378 = arith.constant dense<0.000000e+00> : vector<16x32xf32>
    %748 = tpu.matmul %747, %746, %cst_378 {dimension_numbers = #tpu.dot_dimension_numbers<[1], [0], [0], [1], [0, 0, 1, 1], [], []>} : vector<16x16xf32>, vector<16x32xf32>, vector<16x32xf32> -> vector<16x32xf32>
    %749 = arith.addf %738, %748 : vector<16x32xf32>
    %c2_i32_379 = arith.constant 2 : i32
    %750 = vector.broadcast %c2_i32_379 : i32 to vector<64x32xi32>
    %751 = arith.muli %706, %750 : vector<64x32xi32>
    %c2_i32_380 = arith.constant 2 : i32
    %752 = vector.broadcast %c2_i32_380 : i32 to vector<64x32xi32>
    %753 = arith.addi %751, %752 : vector<64x32xi32>
    %754 = arith.cmpi eq, %705, %753 : vector<64x32xi32>
    %755 = arith.extui %754 : vector<64x32xi1> to vector<64x32xi32>
    %756 = arith.sitofp %755 : vector<64x32xi32> to vector<64x32xf32>
    %cst_381 = arith.constant dense<0.000000e+00> : vector<16x32xf32>
    %757 = tpu.matmul %702, %756, %cst_381 {dimension_numbers = #tpu.dot_dimension_numbers<[1], [0], [0], [1], [0, 0, 1, 1], [], []>} : vector<16x64xf32>, vector<64x32xf32>, vector<16x32xf32> -> vector<16x32xf32>
    %758 = vector.extract_strided_slice %704 {offsets = [0, 64], sizes = [16, 16], strides = [1, 1]} : vector<16x80xf32> to vector<16x16xf32>
    %cst_382 = arith.constant dense<0.000000e+00> : vector<16x32xf32>
    %759 = tpu.matmul %758, %757, %cst_382 {dimension_numbers = #tpu.dot_dimension_numbers<[1], [0], [0], [1], [0, 0, 1, 1], [], []>} : vector<16x16xf32>, vector<16x32xf32>, vector<16x32xf32> -> vector<16x32xf32>
    %760 = arith.addf %749, %759 : vector<16x32xf32>
    %c0_383 = arith.constant 0 : index
    %c0_384 = arith.constant 0 : index
    %c0_385 = arith.constant 0 : index
    %761 = vector.load %arg10[%c0_383, %c0_384, %c0_385] : memref<1x16x1xf32, #tpu.memory_space<vmem>>, vector<1x16x1xf32>
    %762 = vector.shape_cast %761 : vector<1x16x1xf32> to vector<16x1xf32>
    %763 = vector.broadcast %762 : vector<16x1xf32> to vector<16x32xf32>
    %764 = arith.addf %760, %763 : vector<16x32xf32>
    %c0_386 = arith.constant 0 : index
    %c0_387 = arith.constant 0 : index
    %c0_388 = arith.constant 0 : index
    %765 = vector.load %arg11[%c0_386, %c0_387, %c0_388] : memref<1x4x16xf32, #tpu.memory_space<vmem>>, vector<1x4x16xf32>
    %766 = vector.shape_cast %765 : vector<1x4x16xf32> to vector<4x16xf32>
    %c0_389 = arith.constant 0 : index
    %c0_390 = arith.constant 0 : index
    %c0_391 = arith.constant 0 : index
    %767 = vector.load %arg12[%c0_389, %c0_390, %c0_391] : memref<1x16x4xf32, #tpu.memory_space<vmem>>, vector<1x16x4xf32>
    %768 = vector.shape_cast %767 : vector<1x16x4xf32> to vector<16x4xf32>
    %cst_392 = arith.constant dense<0.000000e+00> : vector<16xf32>
    %769 = vector.multi_reduction <add>, %764, %cst_392 [1] : vector<16x32xf32> to vector<16xf32>
    %770 = vector.shape_cast %769 : vector<16xf32> to vector<16x1xf32>
    %cst_393 = arith.constant 3.200000e+01 : f32
    %771 = vector.broadcast %cst_393 : f32 to vector<16x1xf32>
    %772 = arith.divf %770, %771 : vector<16x1xf32>
    %cst_394 = arith.constant dense<0.000000e+00> : vector<4x1xf32>
    %773 = tpu.matmul %766, %772, %cst_394 {dimension_numbers = #tpu.dot_dimension_numbers<[1], [0], [0], [1], [0, 0, 1, 1], [], []>} : vector<4x16xf32>, vector<16x1xf32>, vector<4x1xf32> -> vector<4x1xf32>
    %cst_395 = arith.constant 0.000000e+00 : f32
    %774 = vector.broadcast %cst_395 : f32 to vector<4x1xf32>
    %775 = arith.maximumf %773, %774 : vector<4x1xf32>
    %cst_396 = arith.constant dense<0.000000e+00> : vector<16x1xf32>
    %776 = tpu.matmul %768, %775, %cst_396 {dimension_numbers = #tpu.dot_dimension_numbers<[1], [0], [0], [1], [0, 0, 1, 1], [], []>} : vector<16x4xf32>, vector<4x1xf32>, vector<16x1xf32> -> vector<16x1xf32>
    %cst_397 = arith.constant 0.000000e+00 : f32
    %777 = vector.broadcast %cst_397 : f32 to vector<16x1xf32>
    %778 = arith.subf %777, %776 : vector<16x1xf32>
    %779 = math.exp %778 : vector<16x1xf32>
    %cst_398 = arith.constant 1.000000e+00 : f32
    %780 = vector.broadcast %cst_398 : f32 to vector<16x1xf32>
    %781 = arith.addf %780, %779 : vector<16x1xf32>
    %cst_399 = arith.constant 1.000000e+00 : f32
    %782 = vector.broadcast %cst_399 : f32 to vector<16x1xf32>
    %783 = arith.divf %782, %781 : vector<16x1xf32>
    %784 = vector.broadcast %783 : vector<16x1xf32> to vector<16x32xf32>
    %785 = arith.mulf %764, %784 : vector<16x32xf32>
    %786 = arith.addf %785, %634 : vector<16x32xf32>
    %787 = tpu.iota {dimensions = array<i32: 0>} : vector<32x16xi32>
    %788 = tpu.iota {dimensions = array<i32: 1>} : vector<32x16xi32>
    %c2_i32_400 = arith.constant 2 : i32
    %789 = vector.broadcast %c2_i32_400 : i32 to vector<32x16xi32>
    %790 = arith.muli %789, %788 : vector<32x16xi32>
    %c0_i32_401 = arith.constant 0 : i32
    %791 = vector.broadcast %c0_i32_401 : i32 to vector<32x16xi32>
    %792 = arith.addi %790, %791 : vector<32x16xi32>
    %793 = arith.cmpi eq, %787, %792 : vector<32x16xi32>
    %794 = arith.extui %793 : vector<32x16xi1> to vector<32x16xi32>
    %795 = arith.sitofp %794 : vector<32x16xi32> to vector<32x16xf32>
    %cst_402 = arith.constant dense<0.000000e+00> : vector<16x16xf32>
    %796 = tpu.matmul %786, %795, %cst_402 {dimension_numbers = #tpu.dot_dimension_numbers<[1], [0], [0], [1], [0, 0, 1, 1], [], []>} : vector<16x32xf32>, vector<32x16xf32>, vector<16x16xf32> -> vector<16x16xf32>
    %c2_i32_403 = arith.constant 2 : i32
    %797 = vector.broadcast %c2_i32_403 : i32 to vector<32x16xi32>
    %798 = arith.muli %797, %788 : vector<32x16xi32>
    %c1_i32_404 = arith.constant 1 : i32
    %799 = vector.broadcast %c1_i32_404 : i32 to vector<32x16xi32>
    %800 = arith.addi %798, %799 : vector<32x16xi32>
    %801 = arith.cmpi eq, %787, %800 : vector<32x16xi32>
    %802 = arith.extui %801 : vector<32x16xi1> to vector<32x16xi32>
    %803 = arith.sitofp %802 : vector<32x16xi32> to vector<32x16xf32>
    %cst_405 = arith.constant dense<0.000000e+00> : vector<16x16xf32>
    %804 = tpu.matmul %786, %803, %cst_405 {dimension_numbers = #tpu.dot_dimension_numbers<[1], [0], [0], [1], [0, 0, 1, 1], [], []>} : vector<16x32xf32>, vector<32x16xf32>, vector<16x16xf32> -> vector<16x16xf32>
    %805 = arith.maximumf %796, %804 : vector<16x16xf32>
    %c0_406 = arith.constant 0 : index
    %c0_407 = arith.constant 0 : index
    %c0_408 = arith.constant 0 : index
    %806 = vector.load %arg15[%c0_406, %c0_407, %c0_408] : memref<1x16x1xf32, #tpu.memory_space<vmem>>, vector<1x16x1xf32>
    %807 = vector.shape_cast %806 : vector<1x16x1xf32> to vector<16x1xf32>
    %c0_409 = arith.constant 0 : index
    %c0_410 = arith.constant 0 : index
    %c0_411 = arith.constant 0 : index
    %808 = vector.load %arg16[%c0_409, %c0_410, %c0_411] : memref<1x16x1xf32, #tpu.memory_space<vmem>>, vector<1x16x1xf32>
    %809 = vector.shape_cast %808 : vector<1x16x1xf32> to vector<16x1xf32>
    %810 = vector.broadcast %807 : vector<16x1xf32> to vector<16x32xf32>
    %811 = arith.mulf %786, %810 : vector<16x32xf32>
    %812 = vector.broadcast %809 : vector<16x1xf32> to vector<16x32xf32>
    %813 = arith.addf %811, %812 : vector<16x32xf32>
    %cst_412 = arith.constant 0.000000e+00 : f32
    %814 = vector.broadcast %cst_412 : f32 to vector<16x32xf32>
    %815 = arith.maximumf %813, %814 : vector<16x32xf32>
    %c0_413 = arith.constant 0 : index
    %c0_414 = arith.constant 0 : index
    %c0_415 = arith.constant 0 : index
    %816 = vector.load %arg17[%c0_413, %c0_414, %c0_415] : memref<1x16x80xf32, #tpu.memory_space<vmem>>, vector<1x16x80xf32>
    %817 = vector.shape_cast %816 : vector<1x16x80xf32> to vector<16x80xf32>
    %818 = tpu.iota {dimensions = array<i32: 0>} : vector<32x32xi32>
    %819 = tpu.iota {dimensions = array<i32: 1>} : vector<32x32xi32>
    %c1_i32_416 = arith.constant 1 : i32
    %820 = vector.broadcast %c1_i32_416 : i32 to vector<32x32xi32>
    %821 = arith.muli %819, %820 : vector<32x32xi32>
    %c-2_i32_417 = arith.constant -2 : i32
    %822 = vector.broadcast %c-2_i32_417 : i32 to vector<32x32xi32>
    %823 = arith.addi %821, %822 : vector<32x32xi32>
    %824 = arith.cmpi eq, %818, %823 : vector<32x32xi32>
    %825 = arith.extui %824 : vector<32x32xi1> to vector<32x32xi32>
    %826 = arith.sitofp %825 : vector<32x32xi32> to vector<32x32xf32>
    %cst_418 = arith.constant dense<0.000000e+00> : vector<16x32xf32>
    %827 = tpu.matmul %815, %826, %cst_418 {dimension_numbers = #tpu.dot_dimension_numbers<[1], [0], [0], [1], [0, 0, 1, 1], [], []>} : vector<16x32xf32>, vector<32x32xf32>, vector<16x32xf32> -> vector<16x32xf32>
    %828 = vector.extract_strided_slice %817 {offsets = [0, 0], sizes = [16, 16], strides = [1, 1]} : vector<16x80xf32> to vector<16x16xf32>
    %cst_419 = arith.constant dense<0.000000e+00> : vector<16x32xf32>
    %829 = tpu.matmul %828, %827, %cst_419 {dimension_numbers = #tpu.dot_dimension_numbers<[1], [0], [0], [1], [0, 0, 1, 1], [], []>} : vector<16x16xf32>, vector<16x32xf32>, vector<16x32xf32> -> vector<16x32xf32>
    %c1_i32_420 = arith.constant 1 : i32
    %830 = vector.broadcast %c1_i32_420 : i32 to vector<32x32xi32>
    %831 = arith.muli %819, %830 : vector<32x32xi32>
    %c-1_i32_421 = arith.constant -1 : i32
    %832 = vector.broadcast %c-1_i32_421 : i32 to vector<32x32xi32>
    %833 = arith.addi %831, %832 : vector<32x32xi32>
    %834 = arith.cmpi eq, %818, %833 : vector<32x32xi32>
    %835 = arith.extui %834 : vector<32x32xi1> to vector<32x32xi32>
    %836 = arith.sitofp %835 : vector<32x32xi32> to vector<32x32xf32>
    %cst_422 = arith.constant dense<0.000000e+00> : vector<16x32xf32>
    %837 = tpu.matmul %815, %836, %cst_422 {dimension_numbers = #tpu.dot_dimension_numbers<[1], [0], [0], [1], [0, 0, 1, 1], [], []>} : vector<16x32xf32>, vector<32x32xf32>, vector<16x32xf32> -> vector<16x32xf32>
    %838 = vector.extract_strided_slice %817 {offsets = [0, 16], sizes = [16, 16], strides = [1, 1]} : vector<16x80xf32> to vector<16x16xf32>
    %cst_423 = arith.constant dense<0.000000e+00> : vector<16x32xf32>
    %839 = tpu.matmul %838, %837, %cst_423 {dimension_numbers = #tpu.dot_dimension_numbers<[1], [0], [0], [1], [0, 0, 1, 1], [], []>} : vector<16x16xf32>, vector<16x32xf32>, vector<16x32xf32> -> vector<16x32xf32>
    %840 = arith.addf %829, %839 : vector<16x32xf32>
    %c1_i32_424 = arith.constant 1 : i32
    %841 = vector.broadcast %c1_i32_424 : i32 to vector<32x32xi32>
    %842 = arith.muli %819, %841 : vector<32x32xi32>
    %c0_i32_425 = arith.constant 0 : i32
    %843 = vector.broadcast %c0_i32_425 : i32 to vector<32x32xi32>
    %844 = arith.addi %842, %843 : vector<32x32xi32>
    %845 = arith.cmpi eq, %818, %844 : vector<32x32xi32>
    %846 = arith.extui %845 : vector<32x32xi1> to vector<32x32xi32>
    %847 = arith.sitofp %846 : vector<32x32xi32> to vector<32x32xf32>
    %cst_426 = arith.constant dense<0.000000e+00> : vector<16x32xf32>
    %848 = tpu.matmul %815, %847, %cst_426 {dimension_numbers = #tpu.dot_dimension_numbers<[1], [0], [0], [1], [0, 0, 1, 1], [], []>} : vector<16x32xf32>, vector<32x32xf32>, vector<16x32xf32> -> vector<16x32xf32>
    %849 = vector.extract_strided_slice %817 {offsets = [0, 32], sizes = [16, 16], strides = [1, 1]} : vector<16x80xf32> to vector<16x16xf32>
    %cst_427 = arith.constant dense<0.000000e+00> : vector<16x32xf32>
    %850 = tpu.matmul %849, %848, %cst_427 {dimension_numbers = #tpu.dot_dimension_numbers<[1], [0], [0], [1], [0, 0, 1, 1], [], []>} : vector<16x16xf32>, vector<16x32xf32>, vector<16x32xf32> -> vector<16x32xf32>
    %851 = arith.addf %840, %850 : vector<16x32xf32>
    %c1_i32_428 = arith.constant 1 : i32
    %852 = vector.broadcast %c1_i32_428 : i32 to vector<32x32xi32>
    %853 = arith.muli %819, %852 : vector<32x32xi32>
    %c1_i32_429 = arith.constant 1 : i32
    %854 = vector.broadcast %c1_i32_429 : i32 to vector<32x32xi32>
    %855 = arith.addi %853, %854 : vector<32x32xi32>
    %856 = arith.cmpi eq, %818, %855 : vector<32x32xi32>
    %857 = arith.extui %856 : vector<32x32xi1> to vector<32x32xi32>
    %858 = arith.sitofp %857 : vector<32x32xi32> to vector<32x32xf32>
    %cst_430 = arith.constant dense<0.000000e+00> : vector<16x32xf32>
    %859 = tpu.matmul %815, %858, %cst_430 {dimension_numbers = #tpu.dot_dimension_numbers<[1], [0], [0], [1], [0, 0, 1, 1], [], []>} : vector<16x32xf32>, vector<32x32xf32>, vector<16x32xf32> -> vector<16x32xf32>
    %860 = vector.extract_strided_slice %817 {offsets = [0, 48], sizes = [16, 16], strides = [1, 1]} : vector<16x80xf32> to vector<16x16xf32>
    %cst_431 = arith.constant dense<0.000000e+00> : vector<16x32xf32>
    %861 = tpu.matmul %860, %859, %cst_431 {dimension_numbers = #tpu.dot_dimension_numbers<[1], [0], [0], [1], [0, 0, 1, 1], [], []>} : vector<16x16xf32>, vector<16x32xf32>, vector<16x32xf32> -> vector<16x32xf32>
    %862 = arith.addf %851, %861 : vector<16x32xf32>
    %c1_i32_432 = arith.constant 1 : i32
    %863 = vector.broadcast %c1_i32_432 : i32 to vector<32x32xi32>
    %864 = arith.muli %819, %863 : vector<32x32xi32>
    %c2_i32_433 = arith.constant 2 : i32
    %865 = vector.broadcast %c2_i32_433 : i32 to vector<32x32xi32>
    %866 = arith.addi %864, %865 : vector<32x32xi32>
    %867 = arith.cmpi eq, %818, %866 : vector<32x32xi32>
    %868 = arith.extui %867 : vector<32x32xi1> to vector<32x32xi32>
    %869 = arith.sitofp %868 : vector<32x32xi32> to vector<32x32xf32>
    %cst_434 = arith.constant dense<0.000000e+00> : vector<16x32xf32>
    %870 = tpu.matmul %815, %869, %cst_434 {dimension_numbers = #tpu.dot_dimension_numbers<[1], [0], [0], [1], [0, 0, 1, 1], [], []>} : vector<16x32xf32>, vector<32x32xf32>, vector<16x32xf32> -> vector<16x32xf32>
    %871 = vector.extract_strided_slice %817 {offsets = [0, 64], sizes = [16, 16], strides = [1, 1]} : vector<16x80xf32> to vector<16x16xf32>
    %cst_435 = arith.constant dense<0.000000e+00> : vector<16x32xf32>
    %872 = tpu.matmul %871, %870, %cst_435 {dimension_numbers = #tpu.dot_dimension_numbers<[1], [0], [0], [1], [0, 0, 1, 1], [], []>} : vector<16x16xf32>, vector<16x32xf32>, vector<16x32xf32> -> vector<16x32xf32>
    %873 = arith.addf %862, %872 : vector<16x32xf32>
    %c0_436 = arith.constant 0 : index
    %c0_437 = arith.constant 0 : index
    %c0_438 = arith.constant 0 : index
    %874 = vector.load %arg18[%c0_436, %c0_437, %c0_438] : memref<1x16x1xf32, #tpu.memory_space<vmem>>, vector<1x16x1xf32>
    %875 = vector.shape_cast %874 : vector<1x16x1xf32> to vector<16x1xf32>
    %c0_439 = arith.constant 0 : index
    %c0_440 = arith.constant 0 : index
    %c0_441 = arith.constant 0 : index
    %876 = vector.load %arg19[%c0_439, %c0_440, %c0_441] : memref<1x16x1xf32, #tpu.memory_space<vmem>>, vector<1x16x1xf32>
    %877 = vector.shape_cast %876 : vector<1x16x1xf32> to vector<16x1xf32>
    %878 = vector.broadcast %875 : vector<16x1xf32> to vector<16x32xf32>
    %879 = arith.mulf %873, %878 : vector<16x32xf32>
    %880 = vector.broadcast %877 : vector<16x1xf32> to vector<16x32xf32>
    %881 = arith.addf %879, %880 : vector<16x32xf32>
    %cst_442 = arith.constant 0.000000e+00 : f32
    %882 = vector.broadcast %cst_442 : f32 to vector<16x32xf32>
    %883 = arith.maximumf %881, %882 : vector<16x32xf32>
    %c0_443 = arith.constant 0 : index
    %c0_444 = arith.constant 0 : index
    %c0_445 = arith.constant 0 : index
    %884 = vector.load %arg20[%c0_443, %c0_444, %c0_445] : memref<1x16x80xf32, #tpu.memory_space<vmem>>, vector<1x16x80xf32>
    %885 = vector.shape_cast %884 : vector<1x16x80xf32> to vector<16x80xf32>
    %886 = tpu.iota {dimensions = array<i32: 0>} : vector<32x16xi32>
    %887 = tpu.iota {dimensions = array<i32: 1>} : vector<32x16xi32>
    %c2_i32_446 = arith.constant 2 : i32
    %888 = vector.broadcast %c2_i32_446 : i32 to vector<32x16xi32>
    %889 = arith.muli %887, %888 : vector<32x16xi32>
    %c-2_i32_447 = arith.constant -2 : i32
    %890 = vector.broadcast %c-2_i32_447 : i32 to vector<32x16xi32>
    %891 = arith.addi %889, %890 : vector<32x16xi32>
    %892 = arith.cmpi eq, %886, %891 : vector<32x16xi32>
    %893 = arith.extui %892 : vector<32x16xi1> to vector<32x16xi32>
    %894 = arith.sitofp %893 : vector<32x16xi32> to vector<32x16xf32>
    %cst_448 = arith.constant dense<0.000000e+00> : vector<16x16xf32>
    %895 = tpu.matmul %883, %894, %cst_448 {dimension_numbers = #tpu.dot_dimension_numbers<[1], [0], [0], [1], [0, 0, 1, 1], [], []>} : vector<16x32xf32>, vector<32x16xf32>, vector<16x16xf32> -> vector<16x16xf32>
    %896 = vector.extract_strided_slice %885 {offsets = [0, 0], sizes = [16, 16], strides = [1, 1]} : vector<16x80xf32> to vector<16x16xf32>
    %cst_449 = arith.constant dense<0.000000e+00> : vector<16x16xf32>
    %897 = tpu.matmul %896, %895, %cst_449 {dimension_numbers = #tpu.dot_dimension_numbers<[1], [0], [0], [1], [0, 0, 1, 1], [], []>} : vector<16x16xf32>, vector<16x16xf32>, vector<16x16xf32> -> vector<16x16xf32>
    %c2_i32_450 = arith.constant 2 : i32
    %898 = vector.broadcast %c2_i32_450 : i32 to vector<32x16xi32>
    %899 = arith.muli %887, %898 : vector<32x16xi32>
    %c-1_i32_451 = arith.constant -1 : i32
    %900 = vector.broadcast %c-1_i32_451 : i32 to vector<32x16xi32>
    %901 = arith.addi %899, %900 : vector<32x16xi32>
    %902 = arith.cmpi eq, %886, %901 : vector<32x16xi32>
    %903 = arith.extui %902 : vector<32x16xi1> to vector<32x16xi32>
    %904 = arith.sitofp %903 : vector<32x16xi32> to vector<32x16xf32>
    %cst_452 = arith.constant dense<0.000000e+00> : vector<16x16xf32>
    %905 = tpu.matmul %883, %904, %cst_452 {dimension_numbers = #tpu.dot_dimension_numbers<[1], [0], [0], [1], [0, 0, 1, 1], [], []>} : vector<16x32xf32>, vector<32x16xf32>, vector<16x16xf32> -> vector<16x16xf32>
    %906 = vector.extract_strided_slice %885 {offsets = [0, 16], sizes = [16, 16], strides = [1, 1]} : vector<16x80xf32> to vector<16x16xf32>
    %cst_453 = arith.constant dense<0.000000e+00> : vector<16x16xf32>
    %907 = tpu.matmul %906, %905, %cst_453 {dimension_numbers = #tpu.dot_dimension_numbers<[1], [0], [0], [1], [0, 0, 1, 1], [], []>} : vector<16x16xf32>, vector<16x16xf32>, vector<16x16xf32> -> vector<16x16xf32>
    %908 = arith.addf %897, %907 : vector<16x16xf32>
    %c2_i32_454 = arith.constant 2 : i32
    %909 = vector.broadcast %c2_i32_454 : i32 to vector<32x16xi32>
    %910 = arith.muli %887, %909 : vector<32x16xi32>
    %c0_i32_455 = arith.constant 0 : i32
    %911 = vector.broadcast %c0_i32_455 : i32 to vector<32x16xi32>
    %912 = arith.addi %910, %911 : vector<32x16xi32>
    %913 = arith.cmpi eq, %886, %912 : vector<32x16xi32>
    %914 = arith.extui %913 : vector<32x16xi1> to vector<32x16xi32>
    %915 = arith.sitofp %914 : vector<32x16xi32> to vector<32x16xf32>
    %cst_456 = arith.constant dense<0.000000e+00> : vector<16x16xf32>
    %916 = tpu.matmul %883, %915, %cst_456 {dimension_numbers = #tpu.dot_dimension_numbers<[1], [0], [0], [1], [0, 0, 1, 1], [], []>} : vector<16x32xf32>, vector<32x16xf32>, vector<16x16xf32> -> vector<16x16xf32>
    %917 = vector.extract_strided_slice %885 {offsets = [0, 32], sizes = [16, 16], strides = [1, 1]} : vector<16x80xf32> to vector<16x16xf32>
    %cst_457 = arith.constant dense<0.000000e+00> : vector<16x16xf32>
    %918 = tpu.matmul %917, %916, %cst_457 {dimension_numbers = #tpu.dot_dimension_numbers<[1], [0], [0], [1], [0, 0, 1, 1], [], []>} : vector<16x16xf32>, vector<16x16xf32>, vector<16x16xf32> -> vector<16x16xf32>
    %919 = arith.addf %908, %918 : vector<16x16xf32>
    %c2_i32_458 = arith.constant 2 : i32
    %920 = vector.broadcast %c2_i32_458 : i32 to vector<32x16xi32>
    %921 = arith.muli %887, %920 : vector<32x16xi32>
    %c1_i32_459 = arith.constant 1 : i32
    %922 = vector.broadcast %c1_i32_459 : i32 to vector<32x16xi32>
    %923 = arith.addi %921, %922 : vector<32x16xi32>
    %924 = arith.cmpi eq, %886, %923 : vector<32x16xi32>
    %925 = arith.extui %924 : vector<32x16xi1> to vector<32x16xi32>
    %926 = arith.sitofp %925 : vector<32x16xi32> to vector<32x16xf32>
    %cst_460 = arith.constant dense<0.000000e+00> : vector<16x16xf32>
    %927 = tpu.matmul %883, %926, %cst_460 {dimension_numbers = #tpu.dot_dimension_numbers<[1], [0], [0], [1], [0, 0, 1, 1], [], []>} : vector<16x32xf32>, vector<32x16xf32>, vector<16x16xf32> -> vector<16x16xf32>
    %928 = vector.extract_strided_slice %885 {offsets = [0, 48], sizes = [16, 16], strides = [1, 1]} : vector<16x80xf32> to vector<16x16xf32>
    %cst_461 = arith.constant dense<0.000000e+00> : vector<16x16xf32>
    %929 = tpu.matmul %928, %927, %cst_461 {dimension_numbers = #tpu.dot_dimension_numbers<[1], [0], [0], [1], [0, 0, 1, 1], [], []>} : vector<16x16xf32>, vector<16x16xf32>, vector<16x16xf32> -> vector<16x16xf32>
    %930 = arith.addf %919, %929 : vector<16x16xf32>
    %c2_i32_462 = arith.constant 2 : i32
    %931 = vector.broadcast %c2_i32_462 : i32 to vector<32x16xi32>
    %932 = arith.muli %887, %931 : vector<32x16xi32>
    %c2_i32_463 = arith.constant 2 : i32
    %933 = vector.broadcast %c2_i32_463 : i32 to vector<32x16xi32>
    %934 = arith.addi %932, %933 : vector<32x16xi32>
    %935 = arith.cmpi eq, %886, %934 : vector<32x16xi32>
    %936 = arith.extui %935 : vector<32x16xi1> to vector<32x16xi32>
    %937 = arith.sitofp %936 : vector<32x16xi32> to vector<32x16xf32>
    %cst_464 = arith.constant dense<0.000000e+00> : vector<16x16xf32>
    %938 = tpu.matmul %883, %937, %cst_464 {dimension_numbers = #tpu.dot_dimension_numbers<[1], [0], [0], [1], [0, 0, 1, 1], [], []>} : vector<16x32xf32>, vector<32x16xf32>, vector<16x16xf32> -> vector<16x16xf32>
    %939 = vector.extract_strided_slice %885 {offsets = [0, 64], sizes = [16, 16], strides = [1, 1]} : vector<16x80xf32> to vector<16x16xf32>
    %cst_465 = arith.constant dense<0.000000e+00> : vector<16x16xf32>
    %940 = tpu.matmul %939, %938, %cst_465 {dimension_numbers = #tpu.dot_dimension_numbers<[1], [0], [0], [1], [0, 0, 1, 1], [], []>} : vector<16x16xf32>, vector<16x16xf32>, vector<16x16xf32> -> vector<16x16xf32>
    %941 = arith.addf %930, %940 : vector<16x16xf32>
    %c0_466 = arith.constant 0 : index
    %c0_467 = arith.constant 0 : index
    %c0_468 = arith.constant 0 : index
    %942 = vector.load %arg21[%c0_466, %c0_467, %c0_468] : memref<1x16x1xf32, #tpu.memory_space<vmem>>, vector<1x16x1xf32>
    %943 = vector.shape_cast %942 : vector<1x16x1xf32> to vector<16x1xf32>
    %944 = vector.broadcast %943 : vector<16x1xf32> to vector<16x16xf32>
    %945 = arith.addf %941, %944 : vector<16x16xf32>
    %c0_469 = arith.constant 0 : index
    %c0_470 = arith.constant 0 : index
    %c0_471 = arith.constant 0 : index
    %946 = vector.load %arg22[%c0_469, %c0_470, %c0_471] : memref<1x4x16xf32, #tpu.memory_space<vmem>>, vector<1x4x16xf32>
    %947 = vector.shape_cast %946 : vector<1x4x16xf32> to vector<4x16xf32>
    %c0_472 = arith.constant 0 : index
    %c0_473 = arith.constant 0 : index
    %c0_474 = arith.constant 0 : index
    %948 = vector.load %arg23[%c0_472, %c0_473, %c0_474] : memref<1x16x4xf32, #tpu.memory_space<vmem>>, vector<1x16x4xf32>
    %949 = vector.shape_cast %948 : vector<1x16x4xf32> to vector<16x4xf32>
    %cst_475 = arith.constant dense<0.000000e+00> : vector<16xf32>
    %950 = vector.multi_reduction <add>, %945, %cst_475 [1] : vector<16x16xf32> to vector<16xf32>
    %951 = vector.shape_cast %950 : vector<16xf32> to vector<16x1xf32>
    %cst_476 = arith.constant 1.600000e+01 : f32
    %952 = vector.broadcast %cst_476 : f32 to vector<16x1xf32>
    %953 = arith.divf %951, %952 : vector<16x1xf32>
    %cst_477 = arith.constant dense<0.000000e+00> : vector<4x1xf32>
    %954 = tpu.matmul %947, %953, %cst_477 {dimension_numbers = #tpu.dot_dimension_numbers<[1], [0], [0], [1], [0, 0, 1, 1], [], []>} : vector<4x16xf32>, vector<16x1xf32>, vector<4x1xf32> -> vector<4x1xf32>
    %cst_478 = arith.constant 0.000000e+00 : f32
    %955 = vector.broadcast %cst_478 : f32 to vector<4x1xf32>
    %956 = arith.maximumf %954, %955 : vector<4x1xf32>
    %cst_479 = arith.constant dense<0.000000e+00> : vector<16x1xf32>
    %957 = tpu.matmul %949, %956, %cst_479 {dimension_numbers = #tpu.dot_dimension_numbers<[1], [0], [0], [1], [0, 0, 1, 1], [], []>} : vector<16x4xf32>, vector<4x1xf32>, vector<16x1xf32> -> vector<16x1xf32>
    %cst_480 = arith.constant 0.000000e+00 : f32
    %958 = vector.broadcast %cst_480 : f32 to vector<16x1xf32>
    %959 = arith.subf %958, %957 : vector<16x1xf32>
    %960 = math.exp %959 : vector<16x1xf32>
    %cst_481 = arith.constant 1.000000e+00 : f32
    %961 = vector.broadcast %cst_481 : f32 to vector<16x1xf32>
    %962 = arith.addf %961, %960 : vector<16x1xf32>
    %cst_482 = arith.constant 1.000000e+00 : f32
    %963 = vector.broadcast %cst_482 : f32 to vector<16x1xf32>
    %964 = arith.divf %963, %962 : vector<16x1xf32>
    %965 = vector.broadcast %964 : vector<16x1xf32> to vector<16x16xf32>
    %966 = arith.mulf %945, %965 : vector<16x16xf32>
    %967 = arith.addf %966, %805 : vector<16x16xf32>
    %c0_483 = arith.constant 0 : index
    %c0_484 = arith.constant 0 : index
    %c0_485 = arith.constant 0 : index
    %968 = vector.load %arg24[%c0_483, %c0_484, %c0_485] : memref<1x16x1xf32, #tpu.memory_space<vmem>>, vector<1x16x1xf32>
    %969 = vector.shape_cast %968 : vector<1x16x1xf32> to vector<16x1xf32>
    %c0_486 = arith.constant 0 : index
    %c0_487 = arith.constant 0 : index
    %c0_488 = arith.constant 0 : index
    %970 = vector.load %arg25[%c0_486, %c0_487, %c0_488] : memref<1x16x1xf32, #tpu.memory_space<vmem>>, vector<1x16x1xf32>
    %971 = vector.shape_cast %970 : vector<1x16x1xf32> to vector<16x1xf32>
    %972 = vector.broadcast %969 : vector<16x1xf32> to vector<16x16xf32>
    %973 = arith.mulf %967, %972 : vector<16x16xf32>
    %974 = vector.broadcast %971 : vector<16x1xf32> to vector<16x16xf32>
    %975 = arith.addf %973, %974 : vector<16x16xf32>
    %cst_489 = arith.constant 0.000000e+00 : f32
    %976 = vector.broadcast %cst_489 : f32 to vector<16x16xf32>
    %977 = arith.maximumf %975, %976 : vector<16x16xf32>
    %978 = vector.extract_strided_slice %9 {offsets = [1, 0], sizes = [1, 16], strides = [1, 1]} : vector<2x16xf32> to vector<1x16xf32>
    %c0_490 = arith.constant 0 : index
    %c0_491 = arith.constant 0 : index
    %c0_492 = arith.constant 0 : index
    %979 = vector.load %arg28[%c0_490, %c0_491, %c0_492] : memref<1x16x5xf32, #tpu.memory_space<vmem>>, vector<1x16x5xf32>
    %980 = vector.shape_cast %979 : vector<1x16x5xf32> to vector<16x5xf32>
    %cst_493 = arith.constant dense<0.000000e+00> : vector<1x5xf32>
    %981 = tpu.matmul %978, %980, %cst_493 {dimension_numbers = #tpu.dot_dimension_numbers<[1], [0], [0], [1], [0, 0, 1, 1], [], []>} : vector<1x16xf32>, vector<16x5xf32>, vector<1x5xf32> -> vector<1x5xf32>
    %982 = vector.extract_strided_slice %977 {offsets = [0, 0], sizes = [1, 16], strides = [1, 1]} : vector<16x16xf32> to vector<1x16xf32>
    %c0_494 = arith.constant 0 : index
    %c0_495 = arith.constant 0 : index
    %c0_496 = arith.constant 0 : index
    %c0_497 = arith.constant 0 : index
    %983 = vector.load %arg29[%c0_494, %c0_495, %c0_496, %c0_497] : memref<1x16x16x5xf32, #tpu.memory_space<vmem>>, vector<1x1x16x5xf32>
    %984 = vector.shape_cast %983 : vector<1x1x16x5xf32> to vector<16x5xf32>
    %cst_498 = arith.constant dense<0.000000e+00> : vector<1x5xf32>
    %985 = tpu.matmul %982, %984, %cst_498 {dimension_numbers = #tpu.dot_dimension_numbers<[1], [0], [0], [1], [0, 0, 1, 1], [], []>} : vector<1x16xf32>, vector<16x5xf32>, vector<1x5xf32> -> vector<1x5xf32>
    %986 = arith.addf %981, %985 : vector<1x5xf32>
    %987 = vector.extract_strided_slice %977 {offsets = [1, 0], sizes = [1, 16], strides = [1, 1]} : vector<16x16xf32> to vector<1x16xf32>
    %c0_499 = arith.constant 0 : index
    %c1_500 = arith.constant 1 : index
    %c0_501 = arith.constant 0 : index
    %c0_502 = arith.constant 0 : index
    %988 = vector.load %arg29[%c0_499, %c1_500, %c0_501, %c0_502] : memref<1x16x16x5xf32, #tpu.memory_space<vmem>>, vector<1x1x16x5xf32>
    %989 = vector.shape_cast %988 : vector<1x1x16x5xf32> to vector<16x5xf32>
    %cst_503 = arith.constant dense<0.000000e+00> : vector<1x5xf32>
    %990 = tpu.matmul %987, %989, %cst_503 {dimension_numbers = #tpu.dot_dimension_numbers<[1], [0], [0], [1], [0, 0, 1, 1], [], []>} : vector<1x16xf32>, vector<16x5xf32>, vector<1x5xf32> -> vector<1x5xf32>
    %991 = arith.addf %986, %990 : vector<1x5xf32>
    %992 = vector.extract_strided_slice %977 {offsets = [2, 0], sizes = [1, 16], strides = [1, 1]} : vector<16x16xf32> to vector<1x16xf32>
    %c0_504 = arith.constant 0 : index
    %c2_505 = arith.constant 2 : index
    %c0_506 = arith.constant 0 : index
    %c0_507 = arith.constant 0 : index
    %993 = vector.load %arg29[%c0_504, %c2_505, %c0_506, %c0_507] : memref<1x16x16x5xf32, #tpu.memory_space<vmem>>, vector<1x1x16x5xf32>
    %994 = vector.shape_cast %993 : vector<1x1x16x5xf32> to vector<16x5xf32>
    %cst_508 = arith.constant dense<0.000000e+00> : vector<1x5xf32>
    %995 = tpu.matmul %992, %994, %cst_508 {dimension_numbers = #tpu.dot_dimension_numbers<[1], [0], [0], [1], [0, 0, 1, 1], [], []>} : vector<1x16xf32>, vector<16x5xf32>, vector<1x5xf32> -> vector<1x5xf32>
    %996 = arith.addf %991, %995 : vector<1x5xf32>
    %997 = vector.extract_strided_slice %977 {offsets = [3, 0], sizes = [1, 16], strides = [1, 1]} : vector<16x16xf32> to vector<1x16xf32>
    %c0_509 = arith.constant 0 : index
    %c3_510 = arith.constant 3 : index
    %c0_511 = arith.constant 0 : index
    %c0_512 = arith.constant 0 : index
    %998 = vector.load %arg29[%c0_509, %c3_510, %c0_511, %c0_512] : memref<1x16x16x5xf32, #tpu.memory_space<vmem>>, vector<1x1x16x5xf32>
    %999 = vector.shape_cast %998 : vector<1x1x16x5xf32> to vector<16x5xf32>
    %cst_513 = arith.constant dense<0.000000e+00> : vector<1x5xf32>
    %1000 = tpu.matmul %997, %999, %cst_513 {dimension_numbers = #tpu.dot_dimension_numbers<[1], [0], [0], [1], [0, 0, 1, 1], [], []>} : vector<1x16xf32>, vector<16x5xf32>, vector<1x5xf32> -> vector<1x5xf32>
    %1001 = arith.addf %996, %1000 : vector<1x5xf32>
    %1002 = vector.extract_strided_slice %977 {offsets = [4, 0], sizes = [1, 16], strides = [1, 1]} : vector<16x16xf32> to vector<1x16xf32>
    %c0_514 = arith.constant 0 : index
    %c4_515 = arith.constant 4 : index
    %c0_516 = arith.constant 0 : index
    %c0_517 = arith.constant 0 : index
    %1003 = vector.load %arg29[%c0_514, %c4_515, %c0_516, %c0_517] : memref<1x16x16x5xf32, #tpu.memory_space<vmem>>, vector<1x1x16x5xf32>
    %1004 = vector.shape_cast %1003 : vector<1x1x16x5xf32> to vector<16x5xf32>
    %cst_518 = arith.constant dense<0.000000e+00> : vector<1x5xf32>
    %1005 = tpu.matmul %1002, %1004, %cst_518 {dimension_numbers = #tpu.dot_dimension_numbers<[1], [0], [0], [1], [0, 0, 1, 1], [], []>} : vector<1x16xf32>, vector<16x5xf32>, vector<1x5xf32> -> vector<1x5xf32>
    %1006 = arith.addf %1001, %1005 : vector<1x5xf32>
    %1007 = vector.extract_strided_slice %977 {offsets = [5, 0], sizes = [1, 16], strides = [1, 1]} : vector<16x16xf32> to vector<1x16xf32>
    %c0_519 = arith.constant 0 : index
    %c5_520 = arith.constant 5 : index
    %c0_521 = arith.constant 0 : index
    %c0_522 = arith.constant 0 : index
    %1008 = vector.load %arg29[%c0_519, %c5_520, %c0_521, %c0_522] : memref<1x16x16x5xf32, #tpu.memory_space<vmem>>, vector<1x1x16x5xf32>
    %1009 = vector.shape_cast %1008 : vector<1x1x16x5xf32> to vector<16x5xf32>
    %cst_523 = arith.constant dense<0.000000e+00> : vector<1x5xf32>
    %1010 = tpu.matmul %1007, %1009, %cst_523 {dimension_numbers = #tpu.dot_dimension_numbers<[1], [0], [0], [1], [0, 0, 1, 1], [], []>} : vector<1x16xf32>, vector<16x5xf32>, vector<1x5xf32> -> vector<1x5xf32>
    %1011 = arith.addf %1006, %1010 : vector<1x5xf32>
    %1012 = vector.extract_strided_slice %977 {offsets = [6, 0], sizes = [1, 16], strides = [1, 1]} : vector<16x16xf32> to vector<1x16xf32>
    %c0_524 = arith.constant 0 : index
    %c6_525 = arith.constant 6 : index
    %c0_526 = arith.constant 0 : index
    %c0_527 = arith.constant 0 : index
    %1013 = vector.load %arg29[%c0_524, %c6_525, %c0_526, %c0_527] : memref<1x16x16x5xf32, #tpu.memory_space<vmem>>, vector<1x1x16x5xf32>
    %1014 = vector.shape_cast %1013 : vector<1x1x16x5xf32> to vector<16x5xf32>
    %cst_528 = arith.constant dense<0.000000e+00> : vector<1x5xf32>
    %1015 = tpu.matmul %1012, %1014, %cst_528 {dimension_numbers = #tpu.dot_dimension_numbers<[1], [0], [0], [1], [0, 0, 1, 1], [], []>} : vector<1x16xf32>, vector<16x5xf32>, vector<1x5xf32> -> vector<1x5xf32>
    %1016 = arith.addf %1011, %1015 : vector<1x5xf32>
    %1017 = vector.extract_strided_slice %977 {offsets = [7, 0], sizes = [1, 16], strides = [1, 1]} : vector<16x16xf32> to vector<1x16xf32>
    %c0_529 = arith.constant 0 : index
    %c7_530 = arith.constant 7 : index
    %c0_531 = arith.constant 0 : index
    %c0_532 = arith.constant 0 : index
    %1018 = vector.load %arg29[%c0_529, %c7_530, %c0_531, %c0_532] : memref<1x16x16x5xf32, #tpu.memory_space<vmem>>, vector<1x1x16x5xf32>
    %1019 = vector.shape_cast %1018 : vector<1x1x16x5xf32> to vector<16x5xf32>
    %cst_533 = arith.constant dense<0.000000e+00> : vector<1x5xf32>
    %1020 = tpu.matmul %1017, %1019, %cst_533 {dimension_numbers = #tpu.dot_dimension_numbers<[1], [0], [0], [1], [0, 0, 1, 1], [], []>} : vector<1x16xf32>, vector<16x5xf32>, vector<1x5xf32> -> vector<1x5xf32>
    %1021 = arith.addf %1016, %1020 : vector<1x5xf32>
    %1022 = vector.extract_strided_slice %977 {offsets = [8, 0], sizes = [1, 16], strides = [1, 1]} : vector<16x16xf32> to vector<1x16xf32>
    %c0_534 = arith.constant 0 : index
    %c8_535 = arith.constant 8 : index
    %c0_536 = arith.constant 0 : index
    %c0_537 = arith.constant 0 : index
    %1023 = vector.load %arg29[%c0_534, %c8_535, %c0_536, %c0_537] : memref<1x16x16x5xf32, #tpu.memory_space<vmem>>, vector<1x1x16x5xf32>
    %1024 = vector.shape_cast %1023 : vector<1x1x16x5xf32> to vector<16x5xf32>
    %cst_538 = arith.constant dense<0.000000e+00> : vector<1x5xf32>
    %1025 = tpu.matmul %1022, %1024, %cst_538 {dimension_numbers = #tpu.dot_dimension_numbers<[1], [0], [0], [1], [0, 0, 1, 1], [], []>} : vector<1x16xf32>, vector<16x5xf32>, vector<1x5xf32> -> vector<1x5xf32>
    %1026 = arith.addf %1021, %1025 : vector<1x5xf32>
    %1027 = vector.extract_strided_slice %977 {offsets = [9, 0], sizes = [1, 16], strides = [1, 1]} : vector<16x16xf32> to vector<1x16xf32>
    %c0_539 = arith.constant 0 : index
    %c9_540 = arith.constant 9 : index
    %c0_541 = arith.constant 0 : index
    %c0_542 = arith.constant 0 : index
    %1028 = vector.load %arg29[%c0_539, %c9_540, %c0_541, %c0_542] : memref<1x16x16x5xf32, #tpu.memory_space<vmem>>, vector<1x1x16x5xf32>
    %1029 = vector.shape_cast %1028 : vector<1x1x16x5xf32> to vector<16x5xf32>
    %cst_543 = arith.constant dense<0.000000e+00> : vector<1x5xf32>
    %1030 = tpu.matmul %1027, %1029, %cst_543 {dimension_numbers = #tpu.dot_dimension_numbers<[1], [0], [0], [1], [0, 0, 1, 1], [], []>} : vector<1x16xf32>, vector<16x5xf32>, vector<1x5xf32> -> vector<1x5xf32>
    %1031 = arith.addf %1026, %1030 : vector<1x5xf32>
    %1032 = vector.extract_strided_slice %977 {offsets = [10, 0], sizes = [1, 16], strides = [1, 1]} : vector<16x16xf32> to vector<1x16xf32>
    %c0_544 = arith.constant 0 : index
    %c10_545 = arith.constant 10 : index
    %c0_546 = arith.constant 0 : index
    %c0_547 = arith.constant 0 : index
    %1033 = vector.load %arg29[%c0_544, %c10_545, %c0_546, %c0_547] : memref<1x16x16x5xf32, #tpu.memory_space<vmem>>, vector<1x1x16x5xf32>
    %1034 = vector.shape_cast %1033 : vector<1x1x16x5xf32> to vector<16x5xf32>
    %cst_548 = arith.constant dense<0.000000e+00> : vector<1x5xf32>
    %1035 = tpu.matmul %1032, %1034, %cst_548 {dimension_numbers = #tpu.dot_dimension_numbers<[1], [0], [0], [1], [0, 0, 1, 1], [], []>} : vector<1x16xf32>, vector<16x5xf32>, vector<1x5xf32> -> vector<1x5xf32>
    %1036 = arith.addf %1031, %1035 : vector<1x5xf32>
    %1037 = vector.extract_strided_slice %977 {offsets = [11, 0], sizes = [1, 16], strides = [1, 1]} : vector<16x16xf32> to vector<1x16xf32>
    %c0_549 = arith.constant 0 : index
    %c11_550 = arith.constant 11 : index
    %c0_551 = arith.constant 0 : index
    %c0_552 = arith.constant 0 : index
    %1038 = vector.load %arg29[%c0_549, %c11_550, %c0_551, %c0_552] : memref<1x16x16x5xf32, #tpu.memory_space<vmem>>, vector<1x1x16x5xf32>
    %1039 = vector.shape_cast %1038 : vector<1x1x16x5xf32> to vector<16x5xf32>
    %cst_553 = arith.constant dense<0.000000e+00> : vector<1x5xf32>
    %1040 = tpu.matmul %1037, %1039, %cst_553 {dimension_numbers = #tpu.dot_dimension_numbers<[1], [0], [0], [1], [0, 0, 1, 1], [], []>} : vector<1x16xf32>, vector<16x5xf32>, vector<1x5xf32> -> vector<1x5xf32>
    %1041 = arith.addf %1036, %1040 : vector<1x5xf32>
    %1042 = vector.extract_strided_slice %977 {offsets = [12, 0], sizes = [1, 16], strides = [1, 1]} : vector<16x16xf32> to vector<1x16xf32>
    %c0_554 = arith.constant 0 : index
    %c12_555 = arith.constant 12 : index
    %c0_556 = arith.constant 0 : index
    %c0_557 = arith.constant 0 : index
    %1043 = vector.load %arg29[%c0_554, %c12_555, %c0_556, %c0_557] : memref<1x16x16x5xf32, #tpu.memory_space<vmem>>, vector<1x1x16x5xf32>
    %1044 = vector.shape_cast %1043 : vector<1x1x16x5xf32> to vector<16x5xf32>
    %cst_558 = arith.constant dense<0.000000e+00> : vector<1x5xf32>
    %1045 = tpu.matmul %1042, %1044, %cst_558 {dimension_numbers = #tpu.dot_dimension_numbers<[1], [0], [0], [1], [0, 0, 1, 1], [], []>} : vector<1x16xf32>, vector<16x5xf32>, vector<1x5xf32> -> vector<1x5xf32>
    %1046 = arith.addf %1041, %1045 : vector<1x5xf32>
    %1047 = vector.extract_strided_slice %977 {offsets = [13, 0], sizes = [1, 16], strides = [1, 1]} : vector<16x16xf32> to vector<1x16xf32>
    %c0_559 = arith.constant 0 : index
    %c13_560 = arith.constant 13 : index
    %c0_561 = arith.constant 0 : index
    %c0_562 = arith.constant 0 : index
    %1048 = vector.load %arg29[%c0_559, %c13_560, %c0_561, %c0_562] : memref<1x16x16x5xf32, #tpu.memory_space<vmem>>, vector<1x1x16x5xf32>
    %1049 = vector.shape_cast %1048 : vector<1x1x16x5xf32> to vector<16x5xf32>
    %cst_563 = arith.constant dense<0.000000e+00> : vector<1x5xf32>
    %1050 = tpu.matmul %1047, %1049, %cst_563 {dimension_numbers = #tpu.dot_dimension_numbers<[1], [0], [0], [1], [0, 0, 1, 1], [], []>} : vector<1x16xf32>, vector<16x5xf32>, vector<1x5xf32> -> vector<1x5xf32>
    %1051 = arith.addf %1046, %1050 : vector<1x5xf32>
    %1052 = vector.extract_strided_slice %977 {offsets = [14, 0], sizes = [1, 16], strides = [1, 1]} : vector<16x16xf32> to vector<1x16xf32>
    %c0_564 = arith.constant 0 : index
    %c14_565 = arith.constant 14 : index
    %c0_566 = arith.constant 0 : index
    %c0_567 = arith.constant 0 : index
    %1053 = vector.load %arg29[%c0_564, %c14_565, %c0_566, %c0_567] : memref<1x16x16x5xf32, #tpu.memory_space<vmem>>, vector<1x1x16x5xf32>
    %1054 = vector.shape_cast %1053 : vector<1x1x16x5xf32> to vector<16x5xf32>
    %cst_568 = arith.constant dense<0.000000e+00> : vector<1x5xf32>
    %1055 = tpu.matmul %1052, %1054, %cst_568 {dimension_numbers = #tpu.dot_dimension_numbers<[1], [0], [0], [1], [0, 0, 1, 1], [], []>} : vector<1x16xf32>, vector<16x5xf32>, vector<1x5xf32> -> vector<1x5xf32>
    %1056 = arith.addf %1051, %1055 : vector<1x5xf32>
    %1057 = vector.extract_strided_slice %977 {offsets = [15, 0], sizes = [1, 16], strides = [1, 1]} : vector<16x16xf32> to vector<1x16xf32>
    %c0_569 = arith.constant 0 : index
    %c15_570 = arith.constant 15 : index
    %c0_571 = arith.constant 0 : index
    %c0_572 = arith.constant 0 : index
    %1058 = vector.load %arg29[%c0_569, %c15_570, %c0_571, %c0_572] : memref<1x16x16x5xf32, #tpu.memory_space<vmem>>, vector<1x1x16x5xf32>
    %1059 = vector.shape_cast %1058 : vector<1x1x16x5xf32> to vector<16x5xf32>
    %cst_573 = arith.constant dense<0.000000e+00> : vector<1x5xf32>
    %1060 = tpu.matmul %1057, %1059, %cst_573 {dimension_numbers = #tpu.dot_dimension_numbers<[1], [0], [0], [1], [0, 0, 1, 1], [], []>} : vector<1x16xf32>, vector<16x5xf32>, vector<1x5xf32> -> vector<1x5xf32>
    %1061 = arith.addf %1056, %1060 : vector<1x5xf32>
    %c0_574 = arith.constant 0 : index
    %c0_575 = arith.constant 0 : index
    %c0_576 = arith.constant 0 : index
    %1062 = vector.load %arg30[%c0_574, %c0_575, %c0_576] : memref<1x1x5xf32, #tpu.memory_space<vmem>>, vector<1x1x5xf32>
    %1063 = vector.shape_cast %1062 : vector<1x1x5xf32> to vector<1x5xf32>
    %1064 = arith.addf %1061, %1063 : vector<1x5xf32>
    %c0_577 = arith.constant 0 : index
    %c1_578 = arith.constant 1 : index
    %c0_579 = arith.constant 0 : index
    %1065 = vector.load %arg31[%c0_577, %c1_578, %c0_579] : memref<1x2x5xf32, #tpu.memory_space<vmem>>, vector<1x1x5xf32>
    %1066 = vector.shape_cast %1065 : vector<1x1x5xf32> to vector<1x5xf32>
    %1067 = vector.shape_cast %1064 : vector<1x5xf32> to vector<1x1x5xf32>
    tpu.vector_store %arg31[%c0_577, %c1_578, %c0_579], %1067 {strides = array<i32>} : memref<1x2x5xf32, #tpu.memory_space<vmem>>, vector<1x1x5xf32>,
    return
  }
  func.func @transform_0(%arg0: i32) -> (i32, i32, i32) {
    %c0_i32 = arith.constant 0 : i32
    %c0_i32_0 = arith.constant 0 : i32
    %c0_i32_1 = arith.constant 0 : i32
    %c0_i32_2 = arith.constant 0 : i32
    return %c0_i32, %c0_i32_0, %c0_i32_1 : i32, i32, i32
  }
  func.func @transform_1(%arg0: i32) -> (i32, i32) {
    %c0_i32 = arith.constant 0 : i32
    %c0_i32_0 = arith.constant 0 : i32
    %c0_i32_1 = arith.constant 0 : i32
    return %c0_i32, %c0_i32_0 : i32, i32
  }
  func.func @transform_2(%arg0: i32) -> (i32, i32, i32) {
    %c0_i32 = arith.constant 0 : i32
    %c0_i32_0 = arith.constant 0 : i32
    %c0_i32_1 = arith.constant 0 : i32
    return %arg0, %c0_i32, %c0_i32_0 : i32, i32, i32
  }
  func.func @transform_3(%arg0: i32) -> (i32, i32, i32) {
    %c0_i32 = arith.constant 0 : i32
    %c0_i32_0 = arith.constant 0 : i32
    %c0_i32_1 = arith.constant 0 : i32
    return %arg0, %c0_i32, %c0_i32_0 : i32, i32, i32
  }
  func.func @transform_4(%arg0: i32) -> (i32, i32, i32) {
    %c0_i32 = arith.constant 0 : i32
    %c0_i32_0 = arith.constant 0 : i32
    %c0_i32_1 = arith.constant 0 : i32
    return %arg0, %c0_i32, %c0_i32_0 : i32, i32, i32
  }
  func.func @transform_5(%arg0: i32) -> (i32, i32, i32) {
    %c0_i32 = arith.constant 0 : i32
    %c0_i32_0 = arith.constant 0 : i32
    %c0_i32_1 = arith.constant 0 : i32
    return %arg0, %c0_i32, %c0_i32_0 : i32, i32, i32
  }
  func.func @transform_6(%arg0: i32) -> (i32, i32, i32) {
    %c0_i32 = arith.constant 0 : i32
    %c0_i32_0 = arith.constant 0 : i32
    %c0_i32_1 = arith.constant 0 : i32
    return %arg0, %c0_i32, %c0_i32_0 : i32, i32, i32
  }
  func.func @transform_7(%arg0: i32) -> (i32, i32, i32) {
    %c0_i32 = arith.constant 0 : i32
    %c0_i32_0 = arith.constant 0 : i32
    %c0_i32_1 = arith.constant 0 : i32
    return %arg0, %c0_i32, %c0_i32_0 : i32, i32, i32
  }
  func.func @transform_8(%arg0: i32) -> (i32, i32, i32) {
    %c0_i32 = arith.constant 0 : i32
    %c0_i32_0 = arith.constant 0 : i32
    %c0_i32_1 = arith.constant 0 : i32
    return %arg0, %c0_i32, %c0_i32_0 : i32, i32, i32
  }
  func.func @transform_9(%arg0: i32) -> (i32, i32, i32) {
    %c0_i32 = arith.constant 0 : i32
    %c0_i32_0 = arith.constant 0 : i32
    %c0_i32_1 = arith.constant 0 : i32
    return %arg0, %c0_i32, %c0_i32_0 : i32, i32, i32
  }
  func.func @transform_10(%arg0: i32) -> (i32, i32, i32) {
    %c0_i32 = arith.constant 0 : i32
    %c0_i32_0 = arith.constant 0 : i32
    %c0_i32_1 = arith.constant 0 : i32
    return %arg0, %c0_i32, %c0_i32_0 : i32, i32, i32
  }
  func.func @transform_11(%arg0: i32) -> (i32, i32, i32) {
    %c0_i32 = arith.constant 0 : i32
    %c0_i32_0 = arith.constant 0 : i32
    %c0_i32_1 = arith.constant 0 : i32
    return %arg0, %c0_i32, %c0_i32_0 : i32, i32, i32
  }
  func.func @transform_12(%arg0: i32) -> (i32, i32, i32) {
    %c0_i32 = arith.constant 0 : i32
    %c0_i32_0 = arith.constant 0 : i32
    %c0_i32_1 = arith.constant 0 : i32
    return %arg0, %c0_i32, %c0_i32_0 : i32, i32, i32
  }
  func.func @transform_13(%arg0: i32) -> (i32, i32, i32) {
    %c0_i32 = arith.constant 0 : i32
    %c0_i32_0 = arith.constant 0 : i32
    %c0_i32_1 = arith.constant 0 : i32
    return %arg0, %c0_i32, %c0_i32_0 : i32, i32, i32
  }
  func.func @transform_14(%arg0: i32) -> (i32, i32, i32) {
    %c0_i32 = arith.constant 0 : i32
    %c0_i32_0 = arith.constant 0 : i32
    %c0_i32_1 = arith.constant 0 : i32
    return %arg0, %c0_i32, %c0_i32_0 : i32, i32, i32
  }
  func.func @transform_15(%arg0: i32) -> (i32, i32, i32) {
    %c0_i32 = arith.constant 0 : i32
    %c0_i32_0 = arith.constant 0 : i32
    %c0_i32_1 = arith.constant 0 : i32
    return %arg0, %c0_i32, %c0_i32_0 : i32, i32, i32
  }
  func.func @transform_16(%arg0: i32) -> (i32, i32, i32) {
    %c0_i32 = arith.constant 0 : i32
    %c0_i32_0 = arith.constant 0 : i32
    %c0_i32_1 = arith.constant 0 : i32
    return %arg0, %c0_i32, %c0_i32_0 : i32, i32, i32
  }
  func.func @transform_17(%arg0: i32) -> (i32, i32, i32) {
    %c0_i32 = arith.constant 0 : i32
    %c0_i32_0 = arith.constant 0 : i32
    %c0_i32_1 = arith.constant 0 : i32
    return %arg0, %c0_i32, %c0_i32_0 : i32, i32, i32
  }
  func.func @transform_18(%arg0: i32) -> (i32, i32, i32) {
    %c0_i32 = arith.constant 0 : i32
    %c0_i32_0 = arith.constant 0 : i32
    %c0_i32_1 = arith.constant 0 : i32
    return %arg0, %c0_i32, %c0_i32_0 : i32, i32, i32
  }
  func.func @transform_19(%arg0: i32) -> (i32, i32, i32) {
    %c0_i32 = arith.constant 0 : i32
    %c0_i32_0 = arith.constant 0 : i32
    %c0_i32_1 = arith.constant 0 : i32
    return %arg0, %c0_i32, %c0_i32_0 : i32, i32, i32
  }
  func.func @transform_20(%arg0: i32) -> (i32, i32, i32) {
    %c0_i32 = arith.constant 0 : i32
    %c0_i32_0 = arith.constant 0 : i32
    %c0_i32_1 = arith.constant 0 : i32
    return %arg0, %c0_i32, %c0_i32_0 : i32, i32, i32
  }
  func.func @transform_21(%arg0: i32) -> (i32, i32, i32) {
    %c0_i32 = arith.constant 0 : i32
    %c0_i32_0 = arith.constant 0 : i32
    %c0_i32_1 = arith.constant 0 : i32
    return %arg0, %c0_i32, %c0_i32_0 : i32, i32, i32
  }
  func.func @transform_22(%arg0: i32) -> (i32, i32, i32) {
    %c0_i32 = arith.constant 0 : i32
    %c0_i32_0 = arith.constant 0 : i32
    %c0_i32_1 = arith.constant 0 : i32
    return %arg0, %c0_i32, %c0_i32_0 : i32, i32, i32
  }
  func.func @transform_23(%arg0: i32) -> (i32, i32, i32) {
    %c0_i32 = arith.constant 0 : i32
    %c0_i32_0 = arith.constant 0 : i32
    %c0_i32_1 = arith.constant 0 : i32
    return %arg0, %c0_i32, %c0_i32_0 : i32, i32, i32
  }
  func.func @transform_24(%arg0: i32) -> (i32, i32, i32) {
    %c0_i32 = arith.constant 0 : i32
    %c0_i32_0 = arith.constant 0 : i32
    %c0_i32_1 = arith.constant 0 : i32
    return %arg0, %c0_i32, %c0_i32_0 : i32, i32, i32
  }
  func.func @transform_25(%arg0: i32) -> (i32, i32, i32) {
    %c0_i32 = arith.constant 0 : i32
    %c0_i32_0 = arith.constant 0 : i32
    %c0_i32_1 = arith.constant 0 : i32
    return %arg0, %c0_i32, %c0_i32_0 : i32, i32, i32
  }
  func.func @transform_26(%arg0: i32) -> (i32, i32, i32) {
    %c0_i32 = arith.constant 0 : i32
    %c0_i32_0 = arith.constant 0 : i32
    %c0_i32_1 = arith.constant 0 : i32
    return %arg0, %c0_i32, %c0_i32_0 : i32, i32, i32
  }
  func.func @transform_27(%arg0: i32) -> (i32, i32, i32) {
    %c0_i32 = arith.constant 0 : i32
    %c0_i32_0 = arith.constant 0 : i32
    %c0_i32_1 = arith.constant 0 : i32
    return %arg0, %c0_i32, %c0_i32_0 : i32, i32, i32
  }
  func.func @transform_28(%arg0: i32) -> (i32, i32, i32, i32) {
    %c0_i32 = arith.constant 0 : i32
    %c0_i32_0 = arith.constant 0 : i32
    %c0_i32_1 = arith.constant 0 : i32
    %c0_i32_2 = arith.constant 0 : i32
    return %arg0, %c0_i32, %c0_i32_0, %c0_i32_1 : i32, i32, i32, i32
  }
  func.func @transform_29(%arg0: i32) -> (i32, i32, i32) {
    %c0_i32 = arith.constant 0 : i32
    %c0_i32_0 = arith.constant 0 : i32
    %c0_i32_1 = arith.constant 0 : i32
    return %arg0, %c0_i32, %c0_i32_0 : i32, i32, i32
  }
  func.func @transform_30(%arg0: i32) -> (i32, i32, i32) {
    %c0_i32 = arith.constant 0 : i32
    %c0_i32_0 = arith.constant 0 : i32
    %c0_i32_1 = arith.constant 0 : i32
    return %arg0, %c0_i32, %c0_i32_0 : i32, i32, i32
  }
}

</mosaic_0001>

<bundles_post_ra>
// kernel: ensemble_forward.1
= control target key start
LH: loop header
LB: loop body
LE: loop exit
PB: predicated region body
PF: predicated region fallthrough
CT: control target
= control target key end

     0   :  { %s17749_s6 = smov 1   ;;  %s17750_s10 = smov 2   ;;  %s21541_s0 = inlined_call_operand.smem [shape: u32[31], index: -1, kind: input, shape index: {}] }
   0x1   :  { %s17799_s5 = sld [smem:[%s21541_s0]]   ;;  %s17751_s14 = smov 3  }
   0x2   :  { %s17804_s9 = sld [smem:[%s21541_s0 + %s17749_s6]]   ;;  %s17752_s18 = smov 4  }
   0x3   :  { %s17809_s13 = sld [smem:[%s21541_s0 + %s17750_s10]]   ;;  %s17753_s22 = smov 5  }
   0x4   :  { %s17814_s17 = sld [smem:[%s21541_s0 + %s17751_s14]]   ;;  %s17754_s26 = smov 6  }
   0x5   :  { %s17819_s21 = sld [smem:[%s21541_s0 + %s17752_s18]]   ;;  %s17755_s30 = smov 7  }
   0x6   :  { %s17824_s25 = sld [smem:[%s21541_s0 + %s17753_s22]]   ;;  %s17756_s4 = smov 8  }
   0x7   :  { %s17829_s29 = sld [smem:[%s21541_s0 + %s17754_s26]]   ;;  %s17757_s10 = smov 9  }
   0x8   :  { %21856 = sst [smem:[#allocation2_spill]] %s17804_s9  ;;  %s17758_s15 = smov 10  }
   0x9   :  { %21857 = sst [smem:[#allocation3_spill]] %s17809_s13  ;;  %s17759_s20 = smov 11  }
   0xa   :  { %21858 = sst [smem:[#allocation4_spill]] %s17814_s17  ;;  %s17760_s26 = smov 12  }
   0xb   :  { %21859 = sst [smem:[#allocation5_spill]] %s17819_s21  ;;  %s17761_s1 = smov 13  }
   0xc   :  { %21860 = sst [smem:[#allocation6_spill]] %s17824_s25  ;;  %s17762_s7 = smov 14  }
   0xd   :  { %21861 = sst [smem:[#allocation7_spill]] %s17829_s29  ;;  %s17764_s22 = smov 16  }
   0xe   :  { %s17834_s3 = sld [smem:[%s21541_s0 + %s17755_s30]]   ;;  %s17765_s28 = smov 17  }
   0xf   :  { %s17839_s8 = sld [smem:[%s21541_s0 + %s17756_s4]]  }
  0x10   :  { %s17844_s14 = sld [smem:[%s21541_s0 + %s17757_s10]]  }
  0x11   :  { %s17849_s19 = sld [smem:[%s21541_s0 + %s17758_s15]]   ;;  %s17763_s15 = smov 15  }
  0x12   :  { %s17854_s24 = sld [smem:[%s21541_s0 + %s17759_s20]]  }
  0x13   :  { %s17859_s30 = sld [smem:[%s21541_s0 + %s17760_s26]]  }
  0x14   :  { %21862 = sst [smem:[#allocation8_spill]] %s17834_s3 }
  0x15   :  { %21863 = sst [smem:[#allocation9_spill]] %s17839_s8 }
  0x16   :  { %21864 = sst [smem:[#allocation10_spill]] %s17844_s14 }
  0x17   :  { %21865 = sst [smem:[#allocation11_spill]] %s17849_s19 }
  0x18   :  { %21866 = sst [smem:[#allocation12_spill]] %s17854_s24 }
  0x19   :  { %21867 = sst [smem:[#allocation13_spill]] %s17859_s30 }
  0x1a   :  { %s17864_s6 = sld [smem:[%s21541_s0 + %s17761_s1]]  }
  0x1b   :  { %s17869_s12 = sld [smem:[%s21541_s0 + %s17762_s7]]   ;;  %s17766_s7 = smov 18  }
  0x1c   :  { %s17874_s20 = sld [smem:[%s21541_s0 + %s17763_s15]]   ;;  %s17767_s15 = smov 19  }
  0x1d   :  { %s17879_s27 = sld [smem:[%s21541_s0 + %s17764_s22]]   ;;  %s17768_s22 = smov 20  }
  0x1e   :  { %s17884_s4 = sld [smem:[%s21541_s0 + %s17765_s28]]   ;;  %s17769_s28 = smov 21  }
  0x20   :  { %21868 = sst [smem:[#allocation14_spill]] %s17864_s6 }
  0x21   :  { %21869 = sst [smem:[#allocation15_spill]] %s17869_s12 }
  0x22   :  { %21870 = sst [smem:[#allocation16_spill]] %s17874_s20 }
  0x23   :  { %21871 = sst [smem:[#allocation17_spill]] %s17879_s27 }
  0x24   :  { %21872 = sst [smem:[#allocation18_spill]] %s17884_s4 }
  0x25   :  { %s17889_s12 = sld [smem:[%s21541_s0 + %s17766_s7]]   ;;  %s17770_s7 = smov 22  }
  0x26   :  { %s17894_s20 = sld [smem:[%s21541_s0 + %s17767_s15]]   ;;  %s17771_s15 = smov 23  }
  0x27   :  { %s17899_s27 = sld [smem:[%s21541_s0 + %s17768_s22]]   ;;  %s17772_s22 = smov 24  }
  0x28   :  { %s17904_s4 = sld [smem:[%s21541_s0 + %s17769_s28]]   ;;  %s17773_s28 = smov 25  }
  0x2b   :  { %21873 = sst [smem:[#allocation19_spill]] %s17889_s12 }
  0x2c   :  { %21874 = sst [smem:[#allocation20_spill]] %s17894_s20 }
  0x2d   :  { %21875 = sst [smem:[#allocation21_spill]] %s17899_s27 }
  0x2e   :  { %21876 = sst [smem:[#allocation22_spill]] %s17904_s4 }
  0x2f   :  { %s17909_s12 = sld [smem:[%s21541_s0 + %s17770_s7]]   ;;  %s17774_s7 = smov 26  }
  0x30   :  { %s17914_s20 = sld [smem:[%s21541_s0 + %s17771_s15]]   ;;  %s17775_s15 = smov 27  }
  0x31   :  { %s17919_s27 = sld [smem:[%s21541_s0 + %s17772_s22]]   ;;  %s17776_s22 = smov 28  }
  0x32   :  { %s17924_s4 = sld [smem:[%s21541_s0 + %s17773_s28]]   ;;  %s17777_s28 = smov 29  }
  0x33   :  { %s17944_s24 = sld [smem:[%s21541_s0 + %s17777_s28]]  }
  0x35   :  { %21877 = sst [smem:[#allocation23_spill]] %s17909_s12 }
  0x36   :  { %21878 = sst [smem:[#allocation24_spill]] %s17914_s20 }
  0x37   :  { %21879 = sst [smem:[#allocation25_spill]] %s17919_s27 }
  0x38   :  { %21880 = sst [smem:[#allocation26_spill]] %s17924_s4 }
  0x39   :  { %s17929_s12 = sld [smem:[%s21541_s0 + %s17774_s7]]   ;;  %s17778_s7 = smov 30  }
  0x3a   :  { %s17934_s20 = sld [smem:[%s21541_s0 + %s17775_s15]]   ;;  %s17951_s15 = smov 0  }
  0x3b   :  { %s17939_s27 = sld [smem:[%s21541_s0 + %s17776_s22]]  }
  0x3f   :  { %21881 = sst [smem:[#allocation27_spill]] %s17929_s12 }
  0x40   :  { %s17949_s12 = sld [smem:[%s21541_s0 + %s17778_s7]]  }
  0x41 LB: > { %21882 = sst [smem:[#allocation28_spill]] %s17747_s15  ;;  %s14537_s16 = sadd.s32 4294967295, %s17747_s15   ;;  %s17747_s15 = sphi %s17951_s15, %s71_s15  }
  0x42   : > { %p14541_p0 = scmp.ge.s32.totalorder %s17747_s15, 1  ;;  %p1103_p1 = scmp.lt.s32.totalorder %s17747_s15, 3 }
  0x44   : > { %p1104_p2 = pnand %p14541_p0, %p1103_p1 }
  0x46   : > { %1107 = sbr.rel (%p1104_p2) target bundleno = 13480 (0x34a8), region = 140 }
  0x4b   : > { %p1305_p3 = scmp.lt.s32.totalorder %s14537_s16, 1  ;;  %v1529_v0 = vlaneseq  ;;  %s21883_s4 = sld [smem:[#allocation26_spill]]  ;;  %v21634_v1 = vmov 0.0   ;;  %vm21555_vm0 = vmmov 0   ;;  %vm1452_vm1 = vcmask 1041408  }
  0x4c   : > { %s21884_s9 = sld [smem:[#allocation2_spill]]  ;;  %16133 = vmatprep.subr.mxu0 %v21634_v1  ;;  %16135 = vmatprep.mubr.msk.f32.mxu0 %vm21555_vm0, %v21634_v1  ;;  %vm1448_vm2 = vcmask 15360   ;;  %v21632_v11 = vmov 1.0   ;;  %v21888_v15 = vmov 0  ;;  %v21890_v17 = vmov 0  ;;  %s21589_s26 = smov 124  }
  0x4d   : > { %s22569_s16 = smov (!%p1305_p3, %s14537_s16), 1  ;;  %16138 = vmatprep.subr.mxu1 %v21634_v1  ;;  %v17965_v2 = vshrl.u32 %v1529_v0, 7  ;;  %v17967_v3 = vand.u32 127, %v1529_v0  ;;  %16154 = vmatprep.mubr.msk.f32.mxu1 %vm21555_vm0, %v21634_v1  ;;  %s21892_s13 = sld [smem:[#allocation3_spill]]  ;;  %v21893_v18 = vmov 0  ;;  %v21895_v19 = vmov 0 }
  0x4e   : > { %s21579_s0 = sshll.u32 %s22569_s16, 1  ;;  %s18088_s22 = sshll.u32 %s22569_s16, 3  ;;  %v21897_v20 = vmov 0  ;;  %v21899_v21 = vmov 0  ;;  %v21901_v22 = vmov 0  ;;  %v21903_v23 = vmov 0 }
  0x4f   : > { %21885 = vst [vmem:[#allocation29_spill] sm:$0xff] %v17967_v3  ;;  %v17973_v4 = vadd.s32 56, %v17965_v2  ;;  %v17976_v5 = vadd.s32 4294967295, %v17967_v3  ;;  %v17979_v6 = vadd.s32 4294967294, %v17967_v3  ;;  %v17982_v7 = vadd.s32 48, %v17965_v2  ;;  %s21580_s28 = smov 120  }
  0x50   : > { %v17989_v9 = vadd.s32 40, %v17965_v2  ;;  %v18002_v12 = vadd.s32 32, %v17965_v2  ;;  %v18015_v13 = vadd.s32 24, %v17965_v2  ;;  %v18032_v14 = vadd.s32 16, %v17965_v2  ;;  %v18139_v24 = vld [vmem:[%s17799_s5] sm:$0xf] }
  0x51   : > { %21886 = vst [vmem:[#allocation30_spill] sm:$0xff] %v17976_v5  ;;  %21887 = vst [vmem:[#allocation31_spill] sm:$0xff] %v17979_v6  ;;  %s1418_s18 = scalar_lea.vmem %s21883_s4, %s21579_s0  ;;  %vm21551_vm3 = vcmp.eq.s32.totalorder %v17973_v4, %v17976_v5  ;;  %vm21545_vm4 = vcmp.eq.s32.totalorder %v17973_v4, %v17979_v6  ;;  %vm21544_vm5 = vcmp.eq.s32.totalorder %v17982_v7, %v17979_v6  ;;  %v18053_v16 = vadd.s32 8, %v17965_v2  ;;  %s21582_s1 = smov 116  }
  0x52   : > { %v1439_v8 = vld [vmem:[%s21884_s9] sm:$0x3]  ;;  %16139 = vmatpush3.msk.msra.mxu1 %vm21545_vm4, %v21632_v11  ;;  %vm21548_vm6 = vcmp.eq.s32.totalorder %v17982_v7, %v17976_v5  ;;  %vm21543_vm7 = vcmp.eq.s32.totalorder %v17989_v9, %v17979_v6  ;;  %vm21547_vm8 = vcmp.eq.s32.totalorder %v17989_v9, %v17976_v5  ;;  %vm21542_vm9 = vcmp.eq.s32.totalorder %v18002_v12, %v17979_v6  ;;  %s21594_s2 = smov 112   ;;  %s21935_s17 = sld [smem:[#allocation4_spill]] }
  0x53   : > { %v1440_v10 = vld [vmem:[%s1418_s18] sm:$0x3]  ;;  %16140 = vmatprep.subr.mxu1 %v21634_v1  ;;  %vm21546_vm10 = vcmp.eq.s32.totalorder %v18002_v12, %v17976_v5  ;;  %vm18048_vm11 = vcmp.eq.s32.totalorder %v18015_v13, %v17979_v6  ;;  %vm18062_vm12 = vcmp.eq.s32.totalorder %v18015_v13, %v17976_v5  ;;  %vm18073_vm13 = vcmp.eq.s32.totalorder %v18032_v14, %v17979_v6  ;;  %s18116_s23 = scalar_lea.vmem %s21892_s13, %s18088_s22  ;;  %s21936_s21 = sld [smem:[#allocation5_spill]] }
  0x54   : > { %16134 = vmatpush3.msk.msra.mxu0 %vm1452_vm1, %v1440_v10  ;;  %16141 = vmatpush3.msk.msra.mxu1 %vm21544_vm5, %v21632_v11  ;;  %v21889_v15 = vsel %vm18048_vm11, 4294967295, %v21888_v15  ;;  %v21891_v17 = vsel %vm18062_vm12, 4294967295, %v21890_v17  ;;  %v21894_v18 = vsel %vm18073_vm13, 4294967295, %v21893_v18  ;;  %vm18083_vm14 = vcmp.eq.s32.totalorder %v18032_v14, %v17976_v5  ;;  %v18145_v25 = vld [vmem:[%s18116_s23] sm:$0xff]  ;;  %s21943_s25 = sld [smem:[#allocation6_spill]]  ;;  %s18419_s7 = sshll.u32 %s22569_s16, 4 }
  0x55   : > { %16136 = vmatmul.mubr.msk.f32.vlgmr.msra.gmra.mxu0 %vm1448_vm2, %v1439_v8  ;;  %16157 = vmatprep.subr.mxu0 %v21634_v1  ;;  %v21896_v19 = vsel %vm18083_vm14, 4294967295, %v21895_v19  ;;  %vm18096_vm15 = vcmp.eq.s32.totalorder %v18053_v16, %v17979_v6  ;;  %vm18106_vm1 = vcmp.eq.s32.totalorder %v18053_v16, %v17976_v5  ;;  %vm18124_vm2 = vcmp.eq.s32.totalorder %v17965_v2, %v17976_v5  ;;  %s21948_s29 = sld [smem:[#allocation7_spill]]  ;;  %s21748_s4 = sshll.u32 %s22569_s16, 2 }
  0x56   : > { %16158 = vmatpush3.msk.msra.mxu0 %vm21551_vm3, %v21632_v11  ;;  %16142 = vmatprep.subr.mxu1 %v21634_v1  ;;  %v21898_v20 = vsel %vm18096_vm15, 4294967295, %v21897_v20  ;;  %v21900_v21 = vsel %vm18106_vm1, 4294967295, %v21899_v21  ;;  %v21902_v22 = vsel %vm18124_vm2, 4294967295, %v21901_v22  ;;  %vm21559_vm5 = vcmask 1043456   ;;  %s21949_s3 = sld [smem:[#allocation8_spill]] }
  0x57   : > { %16159 = vmatprep.subr.mxu0 %v21634_v1  ;;  %16143 = vmatpush3.msk.msra.mxu1 %vm21543_vm7, %v21632_v11  ;;  %vm21554_vm7 = vcmask 523264   ;;  %vm21560_vm4 = vcmask 31744   ;;  %v21906_v33 = vmov 0  ;;  %vm18216_vm3 = vcmp.eq.s32.totalorder %v18032_v14, %v17967_v3  ;;  %s21950_s8 = sld [smem:[#allocation9_spill]] }
  0x58   : > { %16160 = vmatpush3.msk.msra.mxu0 %vm21548_vm6, %v21632_v11  ;;  %16144 = vmatprep.subr.mxu1 %v21634_v1  ;;  %vm21552_vm6 = vcmp.eq.s32.totalorder %v17989_v9, %v17967_v3  ;;  %v21908_v34 = vmov 0  ;;  %v21910_v35 = vmov 0  ;;  %v21912_v36 = vmov 0  ;;  %s18423_s10 = scalar_lea.vmem %s21935_s17, %s18088_s22  ;;  %s21951_s14 = sld [smem:[#allocation10_spill]] }
  0x59   : > { %16161 = vmatprep.subr.mxu0 %v21634_v1  ;;  %16145 = vmatpush3.msk.msra.mxu1 %vm21542_vm9, %v21632_v11  ;;  %vm18130_vm9 = vcmp.eq.s32.totalorder %v17965_v2, %v17979_v6  ;;  %v21909_v34 = vsel %vm18216_vm3, 4294967295, %v21908_v34  ;;  %v18255_v42 = vadd.s32 1, %v17967_v3  ;;  %v21916_v46 = vmov 0  ;;  %s18427_s11 = scalar_lea.vmem %s21936_s21, %s18088_s22  ;;  %v2407_v62 = vld [vmem:[%s18423_s10] sm:$0xff]  ;;  %s21583_s22 = smov 104  }
  0x5a   : > { %16162 = vmatpush3.msk.msra.mxu0 %vm21547_vm8, %v21632_v11  ;;  %16146 = vmatprep.subr.mxu1 %v21634_v1  ;;  %v21904_v23 = vsel %vm18130_vm9, 4294967295, %v21903_v23  ;;  %vm21550_vm8 = vcmp.eq.s32.totalorder %v17982_v7, %v17967_v3  ;;  %v21919_v47 = vmov 0  ;;  %v21922_v48 = vmov 0  ;;  %v2408_v63 = vld [vmem:[%s18427_s11] sm:$0xff]  ;;  %s18433_s18 = scalar_lea.vmem %s21943_s25, %s18419_s7  ;;  %s22001_s30 = sld [smem:[#allocation13_spill]] }
  0x5b   : > { %16163 = vmatprep.subr.mxu0 %v21634_v1  ;;  %16147 = vmatpush3.msk.msra.mxu1 %vm18048_vm11, %v21632_v11  ;;  %21914 = vst [vmem:[#allocation33_spill] sm:$0xff] %v18255_v42  ;;  %v21925_v49 = vmov 0  ;;  %v18339_v53 = vadd.s32 2, %v17967_v3  ;;  %v21932_v57 = vmov 0  ;;  %v21937_v58 = vmov 0  ;;  %v18436_v0 = vld [vmem:[%s18433_s18 + $0x8] sm:$0xff]  ;;  %s18455_s0 = scalar_lea.vmem %s21948_s29, %s18419_s7 }
  0x5c   : > { %16164 = vmatpush3.msk.msra.mxu0 %vm21546_vm10, %v21632_v11  ;;  %16148 = vmatprep.subr.mxu1 %v21634_v1  ;;  %vm21549_vm10 = vcmp.eq.s32.totalorder %v17973_v4, %v17967_v3  ;;  %v21940_v59 = vmov 0  ;;  %v21944_v60 = vmov 0  ;;  %v17786_v61 = vmov 0   ;;  %v18439_v8 = vld [vmem:[%s18433_s18] sm:$0xff]  ;;  %v3484_v10 = vld [vmem:[%s18455_s0 + $0x8] sm:$0xff]  ;;  %s22104_s6 = sld [smem:[#allocation14_spill]] }
  0x5d   : > { %16165 = vmatprep.subr.mxu0 %v21634_v1  ;;  %16149 = vmatpush3.msk.msra.mxu1 %vm18073_vm13, %v21632_v11  ;;  %21929 = vst [vmem:[#allocation38_spill] sm:$0xff] %v18339_v53  ;;  %s22105_s19 = sld [smem:[#allocation11_spill]]  ;;  %s22120_s25 = smov 80  }
  0x5e   : > { %16166 = vmatpush3.msk.msra.mxu0 %vm18062_vm12, %v21632_v11  ;;  %16150 = vmatprep.subr.mxu1 %v21634_v1  ;;  %s22113_s9 = sld [smem:[#allocation17_spill]] }
  0x5f   : > { %16167 = vmatprep.subr.mxu0 %v21634_v1  ;;  %16151 = vmatpush3.msk.msra.mxu1 %vm18096_vm15, %v21632_v11  ;;  %s22114_s17 = sld [smem:[#allocation18_spill]] }
  0x60   : > { %16168 = vmatpush3.msk.msra.mxu0 %vm18083_vm14, %v21632_v11  ;;  %16152 = vmatprep.subr.mxu1 %v21634_v1  ;;  %s22118_s21 = sld [smem:[#allocation20_spill]] }
  0x61   : > { %16169 = vmatprep.subr.mxu0 %v21634_v1  ;;  %16173 = vmatprep.mubr.msk.f32.mxu0 %vm21555_vm0, %v21634_v1 }
  0x62   : > { %16170 = vmatpush3.msk.msra.mxu0 %vm18106_vm1, %v21632_v11  ;;  %16153 = vmatpush3.msk.msra.mxu1 %vm18130_vm9, %v21632_v11  ;;  %vm21915_vm9 = vmmov 0  }
  0x63   : > { %16171 = vmatprep.subr.mxu0 %v21634_v1  ;;  %16155 = vmatmul.mubr.msk.f32.vlgmr.msra.gmra.mxu1 %vm21554_vm7, %v18139_v24 }
  0x64   : > { %16172 = vmatpush3.msk.msra.mxu0 %vm18124_vm2, %v21632_v11  ;;  %1735 = vrot.lane.b32.xlu0 %v18145_v25, %s21589_s26  ;;  %s21740_s26 = smov 80  }
  0x65   : > { %16174 = vmatmul.mubr.msk.f32.vlgmr.msra.gmra.mxu0 %vm21554_vm7, %v18139_v24  ;;  %16176 = vmatprep.subr.mxu1 %v21634_v1  ;;  %s19447_s29 = scalar_lea.vmem %s22114_s17, %s18419_s7 }
  0x66   : > { %16178 = vmatprep.mubr.msk.f32.mxu1 %vm21555_vm0, %v21634_v1  ;;  %16181 = vmatprep.subr.mxu0 %v21634_v1  ;;  %22121 = sst [smem:[#allocation64_spill]] %s19447_s29  ;;  %s19462_s17 = scalar_lea.vmem %s22118_s21, %s18419_s7 }
  0x67   : > { %16183 = vmatprep.mubr.msk.f32.mxu0 %vm21555_vm0, %v21634_v1  ;;  %2156 = vrot.lane.b32.xlu1 %v18145_v25, %s21582_s1  ;;  %s18465_s1 = scalar_lea.vmem %s21949_s3, %s18419_s7  ;;  %s22106_s3 = sld [smem:[#allocation12_spill]] }
  0x68   : > { %1983 = vrot.lane.b32.xlu0 %v18145_v25, %s21580_s28  ;;  %17705 = vset.pattern.permute.xlu1 %v17786_v61  ;;  %22125 = sst [smem:[#allocation66_spill]] %s19462_s17 }
  0x69   : > { %17704 = vset.pattern.permute.xlu0 %v17786_v61  ;;  %v21972_v61 = vmov 0 }
  0x6b   : > { %2329 = vrot.lane.b32.xlu1 %v18145_v25, %s21594_s2 }
  0x6c   : > { %2411 = vperm.xlu0 %17704, %v2407_v62   ;;  %v21975_v62 = vmov 0 }
  0x6f   : > { %2417 = vperm.xlu1 %17705, %v2408_v63   ;;  %v21977_v63 = vmov 0 }
  0x70   : > { %2858 = vrot.lane.b32.xlu0 %v18436_v0, %s21580_s28 }
  0x73   : > { %2856 = vrot.lane.b32.xlu1 %v18439_v8, %s21580_s28  ;;  %s21590_s28 = smov 96  }
  0x74   : > { %3090 = vrot.lane.b32.xlu0 %v18436_v0, %s21594_s2 }
  0x77   : > { %3088 = vrot.lane.b32.xlu1 %v18439_v8, %s21594_s2 }
  0x78   : > { %3245 = vrot.lane.b32.xlu0 %v18436_v0, %s21583_s22 }
  0x7b   : > { %3243 = vrot.lane.b32.xlu1 %v18439_v8, %s21583_s22  ;;  %s18471_s22 = scalar_lea.vmem %s21950_s8, %s18419_s7  ;;  %s19369_s8 = scalar_lea.vmem %s22105_s19, %s21748_s4 }
  0x7c   : > { %3400 = vrot.lane.b32.xlu0 %v18436_v0, %s21590_s28  ;;  %s22112_s4 = sld [smem:[#allocation16_spill]]  ;;  %s19424_s19 = scalar_lea.vmem %s22113_s9, %s18419_s7 }
  0x7d   : > { %22115 = sst [smem:[#allocation63_spill]] %s19424_s19  ;;  %s22119_s9 = smov 96  }
  0x7f   : > { %3398 = vrot.lane.b32.xlu1 %v18439_v8, %s21590_s28 }
  0x80   : > { %3494 = vperm.xlu0 %17704, %v3484_v10   ;;  %v21979_v10 = vmov 0 }
  0xd6   : > { %v1736_v28 = vpop.permute.xlu0 %1735 }
  0xd9   : > { %v2157_v54 = vpop.permute.xlu1 %2156 }
  0xda   : > { %v1984_v43 = vpop.permute.xlu0 %1983 }
 0x115   : > { %v18167_v26 = vpop.f32.mrf.mxu0 }
 0x116   : > { %21905 = vst [vmem:[#allocation32_spill] sm:$0xff] %v18167_v26 }
 0x117   : > { %v16137_v27 = vpop.f32.mrf.mxu0 }
 0x118   : > { %v3485_v27 = vld [vmem:[%s18465_s1] sm:$0xff] }
 0x123   : > { %v1635_v30 = vpop.f32.mrf.mxu1 }
 0x124   : > { %16182 = vmatpush3.msk.msra.mxu0 %vm21559_vm5, %v1635_v30  ;;  %v18480_v30 = vmul.u32 2, %v17967_v3 }
 0x125   : > { %v1730_v29 = vpop.f32.mrf.mxu0  ;;  %v16156_v32 = vpop.f32.mrf.mxu1  ;;  %16184 = vmatmul.mubr.msk.f32.vlgmr.msra.gmra.mxu0 %vm21560_vm4, %v18145_v25  ;;  %16205 = vmatprep.subr.mxu0 %v21634_v1  ;;  %v3486_v25 = vld [vmem:[%s18465_s1 + $0x8] sm:$0xff] }
 0x126   : > { %16177 = vmatpush3.msk.msra.mxu1 %vm21559_vm5, %v1730_v29  ;;  %16207 = vmatprep.mubr.msk.f32.mxu0 %vm21555_vm0, %v21634_v1  ;;  %v18477_v29 = vld [vmem:[%s18471_s22] sm:$0xff]  ;;  %v21952_v32 = vmov 0 }
 0x127   : > { %v16175_v31 = vpop.f32.mrf.mxu0  ;;  %16179 = vmatmul.mubr.msk.f32.vlgmr.msra.gmra.mxu1 %vm21560_vm4, %v1736_v28  ;;  %16186 = vmatprep.subr.mxu1 %v21634_v1  ;;  %v18474_v28 = vld [vmem:[%s18471_s22 + $0x8] sm:$0xff] }
 0x128   : > { %16187 = vmatpush3.msk.msra.mxu1 %vm21549_vm10, %v21632_v11  ;;  %16202 = vmatprep.mubr.msk.f32.mxu1 %vm21555_vm0, %v21634_v1  ;;  %vm21553_vm10 = vcmp.eq.s32.totalorder %v18002_v12, %v17967_v3  ;;  %v18487_v31 = vadd.s32 1, %v18480_v30 }
 0x129   : > { %16188 = vmatprep.subr.mxu1 %v21634_v1  ;;  %3506 = vperm.xlu0 %17704, %v3486_v25   ;;  %v21983_v25 = vmov 0 }
 0x12a   : > { %16189 = vmatpush3.msk.msra.mxu1 %vm21550_vm8, %v21632_v11  ;;  %vm18205_vm8 = vcmp.eq.s32.totalorder %v18015_v13, %v17967_v3 }
 0x12b   : > { %16190 = vmatprep.subr.mxu1 %v21634_v1  ;;  %v21907_v33 = vsel %vm18205_vm8, 4294967295, %v21906_v33 }
 0x12c   : > { %16191 = vmatpush3.msk.msra.mxu1 %vm21552_vm6, %v21632_v11  ;;  %vm18226_vm6 = vcmp.eq.s32.totalorder %v18053_v16, %v17967_v3 }
 0x12d   : > { %16192 = vmatprep.subr.mxu1 %v21634_v1  ;;  %v21911_v35 = vsel %vm18226_vm6, 4294967295, %v21910_v35  ;;  %3725 = vrot.lane.b32.xlu0 %v18474_v28, %s21594_s2 }
 0x12e   : > { %16193 = vmatpush3.msk.msra.mxu1 %vm21553_vm10, %v21632_v11  ;;  %vm18236_vm10 = vcmp.eq.s32.totalorder %v17965_v2, %v17967_v3 }
 0x12f   : > { %16194 = vmatprep.subr.mxu1 %v21634_v1  ;;  %v21913_v36 = vsel %vm18236_vm10, 4294967295, %v21912_v36 }
 0x130   : > { %16195 = vmatpush3.msk.msra.mxu1 %vm18205_vm8, %v21632_v11 }
 0x131   : > { %16196 = vmatprep.subr.mxu1 %v21634_v1  ;;  %3963 = vrot.lane.b32.xlu0 %v18474_v28, %s21590_s28 }
 0x132   : > { %16197 = vmatpush3.msk.msra.mxu1 %vm18216_vm3, %v21632_v11 }
 0x133   : > { %16198 = vmatprep.subr.mxu1 %v21634_v1 }
 0x134   : > { %16199 = vmatpush3.msk.msra.mxu1 %vm18226_vm6, %v21632_v11 }
 0x135   : > { %16200 = vmatprep.subr.mxu1 %v21634_v1  ;;  %4123 = vrot.lane.b32.xlu0 %v18474_v28, %s21740_s26 }
 0x136   : > { %16201 = vmatpush3.msk.msra.mxu1 %vm18236_vm10, %v21632_v11 }
 0x137   : > { %16203 = vmatmul.mubr.msk.f32.vlgmr.msra.gmra.mxu1 %vm21554_vm7, %v18139_v24  ;;  %16229 = vmatprep.subr.mxu1 %v21634_v1  ;;  %vm21561_vm7 = vcmp.eq.s32.totalorder %v17973_v4, %v18255_v42 }
 0x138   : > { %16231 = vmatprep.mubr.msk.f32.mxu1 %vm21555_vm0, %v21634_v1  ;;  %vm21562_vm0 = vcmp.eq.s32.totalorder %v17982_v7, %v18255_v42 }
 0x1e5   : > { %v1885_v38 = vpop.f32.mrf.mxu0 }
 0x1e7   : > { %v1810_v37 = vpop.f32.mrf.mxu1  ;;  %v16185_v41 = vpop.f32.mrf.mxu0 }
 0x1e8   : > { %v1886_v39 = vadd.f32 %v1885_v38, %v1810_v37  ;;  %v21954_v37 = vmov 0  ;;  %v21956_v38 = vmov 0 }
 0x1e9   : > { %v16180_v40 = vpop.f32.mrf.mxu1 }
 0x1f7   : > { %v1979_v44 = vpop.f32.mrf.mxu1 }
 0x1f8   : > { %16206 = vmatpush3.msk.msra.mxu0 %vm21559_vm5, %v1979_v44  ;;  %vm21563_vm5 = vcmp.eq.s32.totalorder %v17989_v9, %v18255_v42 }
 0x1f9   : > { %v16204_v45 = vpop.f32.mrf.mxu1  ;;  %16208 = vmatmul.mubr.msk.f32.vlgmr.msra.gmra.mxu0 %vm21560_vm4, %v1984_v43  ;;  %16210 = vmatprep.subr.mxu0 %v21634_v1  ;;  %vm21564_vm4 = vcmp.eq.s32.totalorder %v18002_v12, %v18255_v42 }
 0x1fa   : > { %16211 = vmatpush3.msk.msra.mxu0 %vm21561_vm7, %v21632_v11  ;;  %16226 = vmatprep.mubr.msk.f32.mxu0 %vm21915_vm9, %v21634_v1  ;;  %vm18287_vm7 = vcmp.eq.s32.totalorder %v18015_v13, %v18255_v42 }
 0x1fb   : > { %16212 = vmatprep.subr.mxu0 %v21634_v1  ;;  %v21917_v46 = vsel %vm18287_vm7, 4294967295, %v21916_v46 }
 0x1fc   : > { %16213 = vmatpush3.msk.msra.mxu0 %vm21562_vm0, %v21632_v11  ;;  %21918 = vst [vmem:[#allocation34_spill] sm:$0xff] %v21917_v46  ;;  %vm18298_vm0 = vcmp.eq.s32.totalorder %v18032_v14, %v18255_v42 }
 0x1fd   : > { %16214 = vmatprep.subr.mxu0 %v21634_v1  ;;  %v21920_v47 = vsel %vm18298_vm0, 4294967295, %v21919_v47 }
 0x1fe   : > { %16215 = vmatpush3.msk.msra.mxu0 %vm21563_vm5, %v21632_v11  ;;  %21921 = vst [vmem:[#allocation35_spill] sm:$0xff] %v21920_v47  ;;  %vm18308_vm5 = vcmp.eq.s32.totalorder %v18053_v16, %v18255_v42 }
 0x1ff   : > { %16216 = vmatprep.subr.mxu0 %v21634_v1  ;;  %v21923_v48 = vsel %vm18308_vm5, 4294967295, %v21922_v48 }
 0x200   : > { %16217 = vmatpush3.msk.msra.mxu0 %vm21564_vm4, %v21632_v11  ;;  %21924 = vst [vmem:[#allocation36_spill] sm:$0xff] %v21923_v48  ;;  %vm18318_vm4 = vcmp.eq.s32.totalorder %v17965_v2, %v18255_v42 }
 0x201   : > { %16218 = vmatprep.subr.mxu0 %v21634_v1  ;;  %v21926_v49 = vsel %vm18318_vm4, 4294967295, %v21925_v49 }
 0x202   : > { %16219 = vmatpush3.msk.msra.mxu0 %vm18287_vm7, %v21632_v11  ;;  %21927 = vst [vmem:[#allocation37_spill] sm:$0xff] %v21926_v49  ;;  %vm21576_vm7 = vcmp.eq.s32.totalorder %v17982_v7, %v18339_v53 }
 0x203   : > { %16220 = vmatprep.subr.mxu0 %v21634_v1 }
 0x204   : > { %16221 = vmatpush3.msk.msra.mxu0 %vm18298_vm0, %v21632_v11  ;;  %vm21928_vm0 = vcmask 523264  }
 0x205   : > { %16222 = vmatprep.subr.mxu0 %v21634_v1 }
 0x206   : > { %16223 = vmatpush3.msk.msra.mxu0 %vm18308_vm5, %v21632_v11  ;;  %vm21931_vm5 = vcmask 31744  }
 0x207   : > { %16224 = vmatprep.subr.mxu0 %v21634_v1 }
 0x208   : > { %16225 = vmatpush3.msk.msra.mxu0 %vm18318_vm4, %v21632_v11  ;;  %vm21930_vm4 = vcmask 1043456  }
 0x209   : > { %16227 = vmatmul.mubr.msk.f32.vlgmr.msra.gmra.mxu0 %vm21928_vm0, %v18139_v24  ;;  %16253 = vmatprep.subr.mxu0 %v21634_v1  ;;  %vm21573_vm0 = vcmp.eq.s32.totalorder %v17973_v4, %v18339_v53 }
 0x20a   : > { %16255 = vmatprep.mubr.msk.f32.mxu0 %vm21915_vm9, %v21634_v1 }
 0x2b9   : > { %v2056_v50 = vpop.f32.mrf.mxu0 }
 0x2ba   : > { %v18336_v51 = vadd.f32 %v2056_v50, %v1886_v39  ;;  %v21958_v39 = vmov 0  ;;  %v2330_v50 = vpop.permute.xlu1 %2329 }
 0x2bb   : > { %v16209_v52 = vpop.f32.mrf.mxu0 }
 0x2c9   : > { %v2152_v55 = vpop.f32.mrf.mxu0 }
 0x2ca   : > { %16230 = vmatpush3.msk.msra.mxu1 %vm21930_vm4, %v2152_v55  ;;  %vm21574_vm4 = vcmp.eq.s32.totalorder %v17989_v9, %v18339_v53 }
 0x2cb   : > { %v16228_v56 = vpop.f32.mrf.mxu0  ;;  %16232 = vmatmul.mubr.msk.f32.vlgmr.msra.gmra.mxu1 %vm21931_vm5, %v2157_v54  ;;  %16234 = vmatprep.subr.mxu1 %v21634_v1  ;;  %vm21575_vm5 = vcmp.eq.s32.totalorder %v18002_v12, %v18339_v53  ;;  %v21961_v54 = vmov 0 }
 0x2cc   : > { %16235 = vmatpush3.msk.msra.mxu1 %vm21573_vm0, %v21632_v11  ;;  %16250 = vmatprep.mubr.msk.f32.mxu1 %vm21915_vm9, %v21634_v1  ;;  %vm18371_vm0 = vcmp.eq.s32.totalorder %v18015_v13, %v18339_v53  ;;  %v21969_v56 = vmov 0 }
 0x2cd   : > { %16236 = vmatprep.subr.mxu1 %v21634_v1  ;;  %v21933_v57 = vsel %vm18371_vm0, 4294967295, %v21932_v57 }
 0x2ce   : > { %16237 = vmatpush3.msk.msra.mxu1 %vm21576_vm7, %v21632_v11  ;;  %21934 = vst [vmem:[#allocation39_spill] sm:$0xff] %v21933_v57  ;;  %vm18402_vm7 = vcmp.eq.s32.totalorder %v17965_v2, %v18339_v53 }
 0x2cf   : > { %16238 = vmatprep.subr.mxu1 %v21634_v1  ;;  %v21945_v60 = vsel %vm18402_vm7, 4294967295, %v21944_v60 }
 0x2d0   : > { %16239 = vmatpush3.msk.msra.mxu1 %vm21574_vm4, %v21632_v11  ;;  %vm18382_vm4 = vcmp.eq.s32.totalorder %v18032_v14, %v18339_v53  ;;  %21946 = vst [vmem:[#allocation42_spill] sm:$0xff] %v21945_v60 }
 0x2d1   : > { %16240 = vmatprep.subr.mxu1 %v21634_v1  ;;  %v21938_v58 = vsel %vm18382_vm4, 4294967295, %v21937_v58 }
 0x2d2   : > { %16241 = vmatpush3.msk.msra.mxu1 %vm21575_vm5, %v21632_v11  ;;  %21939 = vst [vmem:[#allocation40_spill] sm:$0xff] %v21938_v58  ;;  %vm18392_vm5 = vcmp.eq.s32.totalorder %v18053_v16, %v18339_v53 }
 0x2d3   : > { %16242 = vmatprep.subr.mxu1 %v21634_v1  ;;  %v21941_v59 = vsel %vm18392_vm5, 4294967295, %v21940_v59 }
 0x2d4   : > { %16243 = vmatpush3.msk.msra.mxu1 %vm18371_vm0, %v21632_v11  ;;  %21942 = vst [vmem:[#allocation41_spill] sm:$0xff] %v21941_v59  ;;  %vm18559_vm0 = vcmp.eq.s32.totalorder %v17982_v7, %v18480_v30 }
 0x2d5   : > { %16244 = vmatprep.subr.mxu1 %v21634_v1 }
 0x2d6   : > { %16245 = vmatpush3.msk.msra.mxu1 %vm18382_vm4, %v21632_v11  ;;  %vm21947_vm4 = vcmask 523264  }
 0x2d7   : > { %16246 = vmatprep.subr.mxu1 %v21634_v1 }
 0x2d8   : > { %16247 = vmatpush3.msk.msra.mxu1 %vm18392_vm5, %v21632_v11  ;;  %vm18514_vm5 = vcmp.eq.s32.totalorder %v17989_v9, %v18487_v31 }
 0x2d9   : > { %16248 = vmatprep.subr.mxu1 %v21634_v1  ;;  %v21957_v38 = vsel %vm18514_vm5, 4294967295, %v21956_v38 }
 0x2da   : > { %16249 = vmatpush3.msk.msra.mxu1 %vm18402_vm7, %v21632_v11  ;;  %vm18501_vm7 = vcmp.eq.s32.totalorder %v17982_v7, %v18487_v31 }
 0x2db   : > { %16251 = vmatmul.mubr.msk.f32.vlgmr.msra.gmra.mxu1 %vm21947_vm4, %v18139_v24  ;;  %16277 = vmatprep.subr.mxu1 %v21634_v1  ;;  %v3483_v24 = vld [vmem:[%s18455_s0] sm:$0xff]  ;;  %vm18491_vm4 = vcmp.eq.s32.totalorder %v17973_v4, %v18487_v31  ;;  %v21955_v37 = vsel %vm18501_vm7, 4294967295, %v21954_v37 }
 0x2dc   : > { %16293 = vmatprep.mubr.msk.f32.mxu1 %vm21915_vm9, %v21634_v1  ;;  %3489 = vperm.xlu1 %17705, %v3483_v24   ;;  %v21953_v32 = vsel %vm18491_vm4, 4294967295, %v21952_v32  ;;  %v21981_v24 = vmov 0 }
 0x2dd   : > { %16278 = vmatpush3.msk.msra.mxu1 %vm18491_vm4, %v21632_v11  ;;  %vm21964_vm4 = vcmask 1043456  }
 0x2de   : > { %16279 = vmatprep.subr.mxu1 %v21634_v1 }
 0x2df   : > { %16280 = vmatpush3.msk.msra.mxu1 %vm18501_vm7, %v21632_v11  ;;  %vm18532_vm7 = vcmp.eq.s32.totalorder %v18002_v12, %v18487_v31 }
 0x2e0   : > { %3501 = vperm.xlu1 %17705, %v3485_v27   ;;  %16281 = vmatprep.subr.mxu1 %v21634_v1  ;;  %v21959_v39 = vsel %vm18532_vm7, 4294967295, %v21958_v39  ;;  %v21985_v27 = vmov 0 }
 0x2e1   : > { %16282 = vmatpush3.msk.msra.mxu1 %vm18514_vm5, %v21632_v11  ;;  %21960 = vst [vmem:[#allocation43_spill] sm:$0xff] %v21959_v39  ;;  %vm18550_vm5 = vcmp.eq.s32.totalorder %v17973_v4, %v18480_v30 }
 0x2e2   : > { %16283 = vmatprep.subr.mxu1 %v21634_v1  ;;  %v21962_v54 = vsel %vm18550_vm5, 4294967295, %v21961_v54 }
 0x2e3   : > { %16284 = vmatpush3.msk.msra.mxu1 %vm18532_vm7, %v21632_v11  ;;  %21963 = vst [vmem:[#allocation44_spill] sm:$0xff] %v21962_v54  ;;  %vm21965_vm7 = vcmask 31744  }
 0x2e4   : > { %3723 = vrot.lane.b32.xlu1 %v18477_v29, %s21594_s2  ;;  %s21630_s2 = smov 64   ;;  %16285 = vmatprep.subr.mxu1 %v21634_v1 }
 0x2e5   : > { %4308 = vrot.lane.b32.xlu0 %v18474_v28, %s21630_s2 }
 0x2e8   : > { %3961 = vrot.lane.b32.xlu1 %v18477_v29, %s21590_s28  ;;  %s18525_s28 = scalar_lea.vmem %s21951_s14, %s18419_s7  ;;  %s19418_s14 = scalar_lea.vmem %s22112_s4, %s18419_s7 }
 0x2e9   : > { %v4391_v40 = vld [vmem:[%s18525_s28] sm:$0xff]  ;;  %v4392_v41 = vld [vmem:[%s18525_s28 + $0x8] sm:$0xff]  ;;  %s22117_s4 = smov 112  }
 0x2ea   : > { %4395 = vperm.xlu0 %17704, %v4391_v40   ;;  %v21987_v40 = vmov 0 }
 0x2ec   : > { %4121 = vrot.lane.b32.xlu1 %v18477_v29, %s21740_s26  ;;  %s19361_s26 = scalar_lea.vmem %s22104_s6, %s18419_s7  ;;  %s19376_s6 = scalar_lea.vmem %s22106_s3, %s18419_s7 }
 0x2ed   : > { %s22111_s3 = sld [smem:[#allocation15_spill]] }
 0x2f0   : > { %4306 = vrot.lane.b32.xlu1 %v18477_v29, %s21630_s2  ;;  %s18759_s2 = scalar_lea.vmem %s22001_s30, %s18419_s7  ;;  %s22122_s30 = smov 64  }
 0x2f3   : > { %s19413_s13 = scalar_lea.vmem %s22111_s3, %s18419_s7  ;;  %s22116_s3 = sld [smem:[#allocation19_spill]] }
 0x2f4   : > { %4400 = vperm.xlu1 %17705, %v4392_v41   ;;  %v21990_v41 = vmov 0 }
 0x2f9   : > { %s19456_s15 = scalar_lea.vmem %s22116_s3, %s18419_s7  ;;  %s22209_s3 = sld [smem:[#allocation25_spill]] }
 0x2fa   : > { %22123 = sst [smem:[#allocation65_spill]] %s19456_s15 }
 0x38b   : > { %v2229_v43 = vpop.f32.mrf.mxu1 }
 0x38c   : > { %v2233_v44 = vadd.f32 %v2229_v43, %v18336_v51  ;;  %v21966_v51 = vmov 0 }
 0x38d   : > { %v16233_v45 = vpop.f32.mrf.mxu1  ;;  %v21967_v51 = vsel %vm18559_vm0, 4294967295, %v21966_v51 }
 0x38e   : > { %21968 = vst [vmem:[#allocation45_spill] sm:$0xff] %v21967_v51  ;;  %v2412_v45 = vpop.permute.xlu0 %2411 }
 0x39b   : > { %v2325_v52 = vpop.f32.mrf.mxu1 }
 0x39c   : > { %16254 = vmatpush3.msk.msra.mxu0 %vm21964_vm4, %v2325_v52  ;;  %vm18585_vm4 = vcmp.eq.s32.totalorder %v18002_v12, %v18480_v30 }
 0x39d   : > { %v16252_v55 = vpop.f32.mrf.mxu1  ;;  %16256 = vmatmul.mubr.msk.f32.vlgmr.msra.gmra.mxu0 %vm21965_vm7, %v2330_v50  ;;  %16258 = vmatprep.subr.mxu0 %v21634_v1  ;;  %vm18571_vm7 = vcmp.eq.s32.totalorder %v17989_v9, %v18480_v30  ;;  %v21973_v61 = vsel %vm18585_vm4, 4294967295, %v21972_v61 }
 0x39e   : > { %16259 = vmatpush3.msk.msra.mxu0 %vm18550_vm5, %v21632_v11  ;;  %16274 = vmatprep.mubr.msk.f32.mxu0 %vm21915_vm9, %v21634_v1  ;;  %v21970_v56 = vsel %vm18571_vm7, 4294967295, %v21969_v56  ;;  %21974 = vst [vmem:[#allocation47_spill] sm:$0xff] %v21973_v61  ;;  %v2418_v55 = vpop.permute.xlu1 %2417  ;;  %vm21995_vm5 = vcmp.eq.s32.totalorder %v17982_v7, %v17976_v5 }
 0x39f   : > { %16260 = vmatprep.subr.mxu0 %v21634_v1  ;;  %21971 = vst [vmem:[#allocation46_spill] sm:$0xff] %v21970_v56 }
 0x3a0   : > { %16261 = vmatpush3.msk.msra.mxu0 %vm18559_vm0, %v21632_v11  ;;  %vm18594_vm0 = vcmp.eq.s32.totalorder %v18015_v13, %v18487_v31 }
 0x3a1   : > { %16262 = vmatprep.subr.mxu0 %v21634_v1  ;;  %v21976_v62 = vsel %vm18594_vm0, 4294967295, %v21975_v62  ;;  %16286 = vmatpush3.msk.msra.mxu1 %vm18594_vm0, %v21632_v11  ;;  %vm18624_vm0 = vcmp.eq.s32.totalorder %v18032_v14, %v18480_v30 }
 0x3a2   : > { %16263 = vmatpush3.msk.msra.mxu0 %vm18571_vm7, %v21632_v11  ;;  %vm18604_vm7 = vcmp.eq.s32.totalorder %v18015_v13, %v18480_v30  ;;  %16287 = vmatprep.subr.mxu1 %v21634_v1  ;;  %v21982_v24 = vsel %vm18624_vm0, 4294967295, %v21981_v24 }
 0x3a3   : > { %16264 = vmatprep.subr.mxu0 %v21634_v1  ;;  %v21978_v63 = vsel %vm18604_vm7, 4294967295, %v21977_v63 }
 0x3a4   : > { %16265 = vmatpush3.msk.msra.mxu0 %vm18585_vm4, %v21632_v11  ;;  %vm18614_vm4 = vcmp.eq.s32.totalorder %v18032_v14, %v18487_v31 }
 0x3a5   : > { %16266 = vmatprep.subr.mxu0 %v21634_v1  ;;  %v21980_v10 = vsel %vm18614_vm4, 4294967295, %v21979_v10  ;;  %16288 = vmatpush3.msk.msra.mxu1 %vm18614_vm4, %v21632_v11  ;;  %vm18644_vm4 = vcmp.eq.s32.totalorder %v18053_v16, %v18480_v30 }
 0x3a6   : > { %16267 = vmatpush3.msk.msra.mxu0 %vm18604_vm7, %v21632_v11  ;;  %16289 = vmatprep.subr.mxu1 %v21634_v1  ;;  %vm18634_vm7 = vcmp.eq.s32.totalorder %v18053_v16, %v18487_v31  ;;  %v21986_v27 = vsel %vm18644_vm4, 4294967295, %v21985_v27 }
 0x3a7   : > { %16268 = vmatprep.subr.mxu0 %v21634_v1  ;;  %v21984_v25 = vsel %vm18634_vm7, 4294967295, %v21983_v25  ;;  %16290 = vmatpush3.msk.msra.mxu1 %vm18634_vm7, %v21632_v11  ;;  %vm18664_vm7 = vcmp.eq.s32.totalorder %v17965_v2, %v18480_v30 }
 0x3a8   : > { %16269 = vmatpush3.msk.msra.mxu0 %vm18624_vm0, %v21632_v11  ;;  %16291 = vmatprep.subr.mxu1 %v21634_v1  ;;  %vm18654_vm0 = vcmp.eq.s32.totalorder %v17965_v2, %v18487_v31  ;;  %v21991_v41 = vsel %vm18664_vm7, 4294967295, %v21990_v41 }
 0x3a9   : > { %16270 = vmatprep.subr.mxu0 %v21634_v1  ;;  %v21988_v40 = vsel %vm18654_vm0, 4294967295, %v21987_v40  ;;  %16292 = vmatpush3.msk.msra.mxu1 %vm18654_vm0, %v21632_v11  ;;  %vm21992_vm0 = vcmask 523264  }
 0x3aa   : > { %16271 = vmatpush3.msk.msra.mxu0 %vm18644_vm4, %v21632_v11  ;;  %21989 = vst [vmem:[#allocation48_spill] sm:$0xff] %v21988_v40  ;;  %16320 = vmatprep.subr.mxu1 %v21634_v1  ;;  %vm21993_vm4 = vmmov %vm21992_vm0 }
 0x3ab   : > { %16272 = vmatprep.subr.mxu0 %v21634_v1 }
 0x3ac   : > { %16273 = vmatpush3.msk.msra.mxu0 %vm18664_vm7, %v21632_v11  ;;  %vm21994_vm7 = vcmp.eq.s32.totalorder %v17973_v4, %v17976_v5 }
 0x45d   : > { %v2402_v31 = vpop.f32.mrf.mxu0 }
 0x45e   : > { %v2406_v43 = vadd.f32 %v2402_v31, %v2233_v44 }
 0x45f   : > { %v16257_v50 = vpop.f32.mrf.mxu0 }
 0x460   : > { %v2414_v52 = vmul.f32 %v2412_v45, %v2406_v43  ;;  %v2616_v43 = vld [vmem:[%s18759_s2] sm:$0xff] }
 0x462   : > { %v2420_v26 = vadd.f32 %v2418_v55, %v2414_v52 }
 0x464   : > { %v18672_v40 = vmax.f32 %v2420_v26, 0.0  ;;  %v2857_v26 = vpop.permute.xlu1 %2856 }
 0x466   : > { %16275 = vmatmul.mubr.msk.f32.vlgmr.msra.gmra.mxu0 %vm21992_vm0, %v18672_v40  ;;  %16294 = vmatmul.mubr.msk.f32.vlgmr.msra.gmra.mxu1 %vm21993_vm4, %v18672_v40  ;;  %vm21996_vm0 = vcmp.eq.s32.totalorder %v17989_v9, %v17976_v5 }
 0x467   : > { %16321 = vmatpush3.msk.msra.mxu1 %vm21994_vm7, %v21632_v11  ;;  %16336 = vmatprep.mubr.msk.f32.mxu1 %vm21915_vm9, %v21634_v1  ;;  %vm21997_vm7 = vcmp.eq.s32.totalorder %v18002_v12, %v17976_v5  ;;  %v22006_v5 = vmov 1.0  }
 0x468   : > { %16322 = vmatprep.subr.mxu1 %v21634_v1  ;;  %v3089_v44 = vpop.permute.xlu1 %3088 }
 0x469   : > { %16323 = vmatpush3.msk.msra.mxu1 %vm21995_vm5, %v21632_v11  ;;  %vm21998_vm5 = vmmov %vm21993_vm4  ;;  %vm21999_vm4 = vcmp.eq.s32.totalorder %v17973_v4, %v17967_v3 }
 0x46a   : > { %16324 = vmatprep.subr.mxu1 %v21634_v1 }
 0x46b   : > { %16325 = vmatpush3.msk.msra.mxu1 %vm21996_vm0, %v21632_v11  ;;  %vm22000_vm0 = vcmp.eq.s32.totalorder %v17982_v7, %v17967_v3 }
 0x46c   : > { %16326 = vmatprep.subr.mxu1 %v21634_v1  ;;  %v3244_v31 = vpop.permute.xlu1 %3243 }
 0x46d   : > { %16327 = vmatpush3.msk.msra.mxu1 %vm21997_vm7, %v21632_v11  ;;  %vm22002_vm7 = vcmp.eq.s32.totalorder %v17989_v9, %v17967_v3 }
 0x46e   : > { %16328 = vmatprep.subr.mxu1 %v21634_v1 }
 0x46f   : > { %16329 = vmatpush3.msk.msra.mxu1 %vm18062_vm12, %v21632_v11 }
 0x470   : > { %16330 = vmatprep.subr.mxu1 %v21634_v1 }
 0x471   : > { %16331 = vmatpush3.msk.msra.mxu1 %vm18083_vm14, %v21632_v11  ;;  %vm22089_vm14 = vcmask 523264  }
 0x472   : > { %16332 = vmatprep.subr.mxu1 %v21634_v1 }
 0x473   : > { %16333 = vmatpush3.msk.msra.mxu1 %vm18106_vm1, %v21632_v11  ;;  %vm22087_vm1 = vcmask 130048  }
 0x474   : > { %16334 = vmatprep.subr.mxu1 %v21634_v1 }
 0x475   : > { %16335 = vmatpush3.msk.msra.mxu1 %vm18124_vm2, %v21632_v11  ;;  %vm22078_vm2 = vnez %v21955_v37 }
 0x476   : > { %16337 = vmatmul.mubr.msk.f32.vlgmr.msra.gmra.mxu1 %vm21998_vm5, %v18672_v40  ;;  %16349 = vmatprep.subr.mxu1 %v21634_v1  ;;  %vm22003_vm5 = vcmp.eq.s32.totalorder %v18002_v12, %v17967_v3  ;;  %v22005_v3 = vmov 0.0  }
 0x477   : > { %16350 = vmatpush3.msk.msra.mxu1 %vm21999_vm4, %v21632_v11  ;;  %16365 = vmatprep.mubr.msk.f32.mxu1 %vm21915_vm9, %v21634_v1  ;;  %vm22004_vm4 = vcmask 523264  }
 0x478   : > { %16351 = vmatprep.subr.mxu1 %v21634_v1 }
 0x479   : > { %16352 = vmatpush3.msk.msra.mxu1 %vm22000_vm0, %v21632_v11  ;;  %vm21640_vm0 = vcmask 64512  }
 0x47a   : > { %16353 = vmatprep.subr.mxu1 %v21634_v1  ;;  %16298 = vmatprep.mubr.msk.f32.mxu0 %vm21640_vm0, %v2616_v43 }
 0x47b   : > { %16354 = vmatpush3.msk.msra.mxu1 %vm22002_vm7, %v21632_v11  ;;  %vm22007_vm7 = vcmp.eq.s32.totalorder %v17973_v4, %v17979_v6 }
 0x47c   : > { %16355 = vmatprep.subr.mxu1 %v21634_v1 }
 0x47d   : > { %16356 = vmatpush3.msk.msra.mxu1 %vm22003_vm5, %v21632_v11  ;;  %vm22008_vm5 = vcmp.eq.s32.totalorder %v17982_v7, %v17979_v6 }
 0x47e   : > { %16357 = vmatprep.subr.mxu1 %v21634_v1 }
 0x47f   : > { %16358 = vmatpush3.msk.msra.mxu1 %vm18205_vm8, %v21632_v11 }
 0x480   : > { %16359 = vmatprep.subr.mxu1 %v21634_v1 }
 0x481   : > { %16360 = vmatpush3.msk.msra.mxu1 %vm18216_vm3, %v21632_v11  ;;  %vm22074_vm3 = vcmask 130048  }
 0x482   : > { %16361 = vmatprep.subr.mxu1 %v21634_v1  ;;  %vm22075_vm8 = vmmov %vm22074_vm3 }
 0x483   : > { %16362 = vmatpush3.msk.msra.mxu1 %vm18226_vm6, %v21632_v11  ;;  %vm22022_vm6 = vcmask 64512  }
 0x484   : > { %16363 = vmatprep.subr.mxu1 %v21634_v1  ;;  %v2617_v1 = vld [vmem:[%s18759_s2 + $0x8] sm:$0xff] }
 0x485   : > { %16364 = vmatpush3.msk.msra.mxu1 %vm18236_vm10, %v21632_v11  ;;  %vm22017_vm10 = vnez %v21917_v46 }
 0x486   : > { %16366 = vmatmul.mubr.msk.f32.vlgmr.msra.gmra.mxu1 %vm22004_vm4, %v18672_v40  ;;  %vm22009_vm4 = vcmp.eq.s32.totalorder %v17989_v9, %v17979_v6 }
 0x487   : > { %16394 = vmatprep.mubr.msk.f32.mxu1 %vm21640_vm0, %v3244_v31  ;;  %v2859_v31 = vpop.permute.xlu0 %2858 }
 0x526   : > { %v2516_v45 = vpop.f32.mrf.mxu0  ;;  %v2611_v50 = vpop.f32.mrf.mxu1 }
 0x527   : > { %v2615_v52 = vmax.f32 %v2516_v45, %v2611_v50 }
 0x528   : > { %v16276_v55 = vpop.f32.mrf.mxu0  ;;  %v16295_v11 = vpop.f32.mrf.mxu1 }
 0x529   : > { %16296 = vmatprep.subr.mxu0 %v2615_v52 }
 0x52a   : > { %16297 = vmatpush3.msra.mxu0 %v2615_v52 }
 0x52b   : > { %16299 = vmatmul.mubr.msk.f32.vlgmr.msra.gmra.mxu0 %vm21640_vm0, %v2617_v1  ;;  %16301 = vmatprep.subr.mxu0 %v22005_v3 }
 0x52c   : > { %16302 = vmatpush3.msk.msra.mxu0 %vm22007_vm7, %v22006_v5  ;;  %16317 = vmatprep.mubr.msk.f32.mxu0 %vm21915_vm9, %v22005_v3  ;;  %vm22010_vm7 = vcmp.eq.s32.totalorder %v18002_v12, %v17979_v6 }
 0x52d   : > { %16303 = vmatprep.subr.mxu0 %v22005_v3 }
 0x52e   : > { %16304 = vmatpush3.msk.msra.mxu0 %vm22008_vm5, %v22006_v5  ;;  %vm22011_vm5 = vnez %v21904_v23 }
 0x52f   : > { %16305 = vmatprep.subr.mxu0 %v22005_v3 }
 0x530   : > { %16306 = vmatpush3.msk.msra.mxu0 %vm22009_vm4, %v22006_v5  ;;  %vm22012_vm4 = vcmask 523264  }
 0x531   : > { %16307 = vmatprep.subr.mxu0 %v22005_v3 }
 0x532   : > { %16308 = vmatpush3.msk.msra.mxu0 %vm22010_vm7, %v22006_v5  ;;  %vm22013_vm7 = vcmp.eq.s32.totalorder %v17973_v4, %v18255_v42 }
 0x533   : > { %16309 = vmatprep.subr.mxu0 %v22005_v3 }
 0x534   : > { %16310 = vmatpush3.msk.msra.mxu0 %vm18048_vm11, %v22006_v5 }
 0x535   : > { %16311 = vmatprep.subr.mxu0 %v22005_v3 }
 0x536   : > { %v2850_v1 = vpop.f32.mrf.mxu1  ;;  %16312 = vmatpush3.msk.msra.mxu0 %vm18073_vm13, %v22006_v5 }
 0x537   : > { %16313 = vmatprep.subr.mxu0 %v22005_v3 }
 0x538   : > { %v16338_v11 = vpop.f32.mrf.mxu1  ;;  %16314 = vmatpush3.msk.msra.mxu0 %vm18096_vm15, %v22006_v5 }
 0x539   : > { %16315 = vmatprep.subr.mxu0 %v22005_v3 }
 0x53a   : > { %16316 = vmatpush3.msk.msra.mxu0 %vm22011_vm5, %v22006_v5  ;;  %vm22086_vm5 = vcmask 523264  }
 0x53b   : > { %16318 = vmatmul.mubr.msk.f32.vlgmr.msra.gmra.mxu0 %vm22012_vm4, %v18672_v40  ;;  %16339 = vmatprep.subr.mxu0 %v2850_v1  ;;  %vm22014_vm4 = vcmp.eq.s32.totalorder %v17982_v7, %v18255_v42 }
 0x53c   : > { %16340 = vmatpush3.msra.mxu0 %v2850_v1  ;;  %16341 = vmatprep.mubr.msk.f32.mxu0 %vm21640_vm0, %v2857_v26 }
 0x53f   : > { %16342 = vmatmul.mubr.msk.f32.vlgmr.msra.gmra.mxu0 %vm21640_vm0, %v2859_v31 }
 0x540   : > { %16346 = vmatprep.mubr.msk.f32.mxu0 %vm21640_vm0, %v18439_v8  ;;  %v3091_v8 = vpop.permute.xlu0 %3090 }
 0x546   : > { %v3084_v43 = vpop.f32.mrf.mxu1 }
 0x548   : > { %v16367_v45 = vpop.f32.mrf.mxu1 }
 0x5eb   : > { %v18810_v50 = vpop.f32.mrf.mxu0 }
 0x5ed   : > { %v18812_v52 = vpop.f32.mrf.mxu0 }
 0x5fb   : > { %v2780_v55 = vpop.f32.mrf.mxu0 }
 0x5fc   : > { %16344 = vmatprep.subr.mxu0 %v2780_v55 }
 0x5fd   : > { %v16319_v11 = vpop.f32.mrf.mxu0  ;;  %16345 = vmatpush3.msra.mxu0 %v2780_v55 }
 0x5fe   : > { %16347 = vmatmul.mubr.msk.f32.vlgmr.msra.gmra.mxu0 %vm21640_vm0, %v18436_v0  ;;  %16368 = vmatprep.subr.mxu0 %v3084_v43  ;;  %v3399_v0 = vpop.permute.xlu1 %3398 }
 0x5ff   : > { %16369 = vmatpush3.msra.mxu0 %v3084_v43  ;;  %16370 = vmatprep.mubr.msk.f32.mxu0 %vm21640_vm0, %v3089_v44  ;;  %v16343_v26 = vpop.f32.mrf.mxu0 }
 0x600   : > { %16373 = vmatprep.subr.mxu0 %v22005_v3 }
 0x601   : > { %v18859_v44 = vpop.f32.mrf.mxu0 }
 0x602   : > { %16371 = vmatmul.mubr.msk.f32.vlgmr.msra.gmra.mxu0 %vm21640_vm0, %v3091_v8  ;;  %vm22015_vm0 = vcmp.eq.s32.totalorder %v17989_v9, %v18255_v42 }
 0x603   : > { %16374 = vmatpush3.msk.msra.mxu0 %vm22013_vm7, %v22006_v5  ;;  %16389 = vmatprep.mubr.msk.f32.mxu0 %vm21915_vm9, %v22005_v3  ;;  %vm22016_vm7 = vcmp.eq.s32.totalorder %v18002_v12, %v18255_v42  ;;  %v3246_v42 = vpop.permute.xlu0 %3245 }
 0x604   : > { %16375 = vmatprep.subr.mxu0 %v22005_v3 }
 0x605   : > { %16376 = vmatpush3.msk.msra.mxu0 %vm22014_vm4, %v22006_v5  ;;  %vm22018_vm4 = vnez %v21920_v47 }
 0x606   : > { %16377 = vmatprep.subr.mxu0 %v22005_v3 }
 0x607   : > { %16378 = vmatpush3.msk.msra.mxu0 %vm22015_vm0, %v22006_v5  ;;  %vm22019_vm0 = vnez %v21923_v48 }
 0x608   : > { %16379 = vmatprep.subr.mxu0 %v22005_v3 }
 0x609   : > { %16380 = vmatpush3.msk.msra.mxu0 %vm22016_vm7, %v22006_v5  ;;  %vm22020_vm7 = vnez %v21926_v49 }
 0x60a   : > { %16381 = vmatprep.subr.mxu0 %v22005_v3 }
 0x60b   : > { %16382 = vmatpush3.msk.msra.mxu0 %vm22017_vm10, %v22006_v5  ;;  %vm22021_vm10 = vcmask 523264  }
 0x60c   : > { %16383 = vmatprep.subr.mxu0 %v22005_v3 }
 0x60d   : > { %16384 = vmatpush3.msk.msra.mxu0 %vm22018_vm4, %v22006_v5 }
 0x60e   : > { %16385 = vmatprep.subr.mxu0 %v22005_v3 }
 0x60f   : > { %16386 = vmatpush3.msk.msra.mxu0 %vm22019_vm0, %v22006_v5  ;;  %vm22028_vm0 = vnez %v21933_v57 }
 0x610   : > { %16387 = vmatprep.subr.mxu0 %v22005_v3 }
 0x611   : > { %16388 = vmatpush3.msk.msra.mxu0 %vm22020_vm7, %v22006_v5  ;;  %vm22023_vm7 = vmmov %vm22022_vm6 }
 0x612   : > { %16390 = vmatmul.mubr.msk.f32.vlgmr.msra.gmra.mxu0 %vm22021_vm10, %v18672_v40  ;;  %vm22025_vm10 = vcmp.eq.s32.totalorder %v17982_v7, %v18339_v53 }
 0x613   : > { %16418 = vmatprep.mubr.msk.f32.mxu0 %vm22022_vm6, %v3399_v0  ;;  %vm22024_vm6 = vcmp.eq.s32.totalorder %v17973_v4, %v18339_v53  ;;  %v18930_v0 = vadd.s32 4294967294, %v18480_v30 }
 0x615   : > { %22034 = vst [vmem:[#allocation50_spill] sm:$0xff] %v18930_v0 }
 0x6be   : > { %v16348_v1 = vpop.f32.mrf.mxu0 }
 0x6bf   : > { %v3015_v43 = vadd.f32 %v16348_v1, %v16343_v26 }
 0x6c0   : > { %v18861_v31 = vpop.f32.mrf.mxu0 }
 0x6c2   : > { %v16372_v45 = vpop.f32.mrf.mxu0 }
 0x6c3   : > { %v3172_v55 = vadd.f32 %v16372_v45, %v3015_v43  ;;  %v3401_v43 = vpop.permute.xlu0 %3400 }
 0x6c4   : > { %v18863_v11 = vpop.f32.mrf.mxu0 }
 0x6d2   : > { %v3239_v8 = vpop.f32.mrf.mxu0 }
 0x6d3   : > { %16392 = vmatprep.subr.mxu1 %v3239_v8 }
 0x6d4   : > { %v16391_v6 = vpop.f32.mrf.mxu0  ;;  %16393 = vmatpush3.msra.mxu1 %v3239_v8  ;;  %v22039_v8 = vmov 0 }
 0x6d5   : > { %16395 = vmatmul.mubr.msk.f32.vlgmr.msra.gmra.mxu1 %vm22023_vm7, %v3246_v42  ;;  %16397 = vmatprep.subr.mxu1 %v22005_v3  ;;  %vm22026_vm7 = vcmp.eq.s32.totalorder %v17989_v9, %v18339_v53  ;;  %v18907_v6 = vadd.s32 4294967295, %v18480_v30 }
 0x6d6   : > { %16398 = vmatpush3.msk.msra.mxu1 %vm22024_vm6, %v22006_v5  ;;  %16413 = vmatprep.mubr.msk.f32.mxu1 %vm21915_vm9, %v22005_v3  ;;  %vm22027_vm6 = vcmp.eq.s32.totalorder %v18002_v12, %v18339_v53  ;;  %v22054_v53 = vmov 0 }
 0x6d7   : > { %16399 = vmatprep.subr.mxu1 %v22005_v3  ;;  %22033 = vst [vmem:[#allocation49_spill] sm:$0xff] %v18907_v6  ;;  %vm21650_vm4 = vcmp.eq.s32.totalorder %v17982_v7, %v18907_v6 }
 0x6d8   : > { %16400 = vmatpush3.msk.msra.mxu1 %vm22025_vm10, %v22006_v5  ;;  %vm22029_vm10 = vnez %v21938_v58 }
 0x6d9   : > { %16401 = vmatprep.subr.mxu1 %v22005_v3 }
 0x6da   : > { %16402 = vmatpush3.msk.msra.mxu1 %vm22026_vm7, %v22006_v5  ;;  %vm22030_vm7 = vnez %v21941_v59 }
 0x6db   : > { %16403 = vmatprep.subr.mxu1 %v22005_v3 }
 0x6dc   : > { %16404 = vmatpush3.msk.msra.mxu1 %vm22027_vm6, %v22006_v5  ;;  %vm22031_vm6 = vnez %v21945_v60 }
 0x6dd   : > { %16405 = vmatprep.subr.mxu1 %v22005_v3 }
 0x6de   : > { %16406 = vmatpush3.msk.msra.mxu1 %vm22028_vm0, %v22006_v5  ;;  %vm22032_vm0 = vcmask 523264  }
 0x6df   : > { %16407 = vmatprep.subr.mxu1 %v22005_v3 }
 0x6e0   : > { %16408 = vmatpush3.msk.msra.mxu1 %vm22029_vm10, %v22006_v5  ;;  %vm21649_vm10 = vcmp.eq.s32.totalorder %v17973_v4, %v18907_v6 }
 0x6e1   : > { %16409 = vmatprep.subr.mxu1 %v22005_v3 }
 0x6e2   : > { %16410 = vmatpush3.msk.msra.mxu1 %vm22030_vm7, %v22006_v5  ;;  %vm21711_vm7 = vcmask 130048  }
 0x6e3   : > { %16411 = vmatprep.subr.mxu1 %v22005_v3 }
 0x6e4   : > { %16412 = vmatpush3.msk.msra.mxu1 %vm22031_vm6, %v22006_v5  ;;  %vm22035_vm6 = vcmask 64512  }
 0x6e5   : > { %16414 = vmatmul.mubr.msk.f32.vlgmr.msra.gmra.mxu1 %vm22032_vm0, %v18672_v40  ;;  %16440 = vmatprep.subr.msk.mxu1 %vm21649_vm10, %v22006_v5  ;;  %vm21652_vm0 = vcmp.eq.s32.totalorder %v17973_v4, %v18930_v0 }
 0x6e6   : > { %16441 = vmatpush3.msk.msra.mxu1 %vm21649_vm10, %v22006_v5  ;;  %vm21651_vm10 = vcmp.eq.s32.totalorder %v17982_v7, %v18930_v0 }
 0x6e7   : > { %16442 = vmatprep.subr.msk.mxu1 %vm21650_vm4, %v22006_v5 }
 0x6e8   : > { %16443 = vmatpush3.msk.msra.mxu1 %vm21650_vm4, %v22006_v5  ;;  %vm21654_vm4 = vcmp.eq.s32.totalorder %v17989_v9, %v18907_v6 }
 0x6e9   : > { %16444 = vmatprep.subr.msk.mxu1 %vm21654_vm4, %v22006_v5 }
 0x6ea   : > { %16445 = vmatpush3.msk.msra.mxu1 %vm21654_vm4, %v22006_v5  ;;  %vm19001_vm4 = vcmp.eq.s32.totalorder %v18015_v13, %v18907_v6 }
 0x6eb   : > { %v22040_v8 = vsel %vm19001_vm4, 4294967295, %v22039_v8 }
 0x6ec   : > { %22041 = vst [vmem:[#allocation52_spill] sm:$0xff] %v22040_v8 }
 0x795   : > { %v16396_v42 = vpop.f32.mrf.mxu1 }
 0x796   : > { %v3327_v40 = vadd.f32 %v16396_v42, %v3172_v55  ;;  %v22036_v55 = vmov 0  ;;  %v22042_v42 = vmov 0 }
 0x797   : > { %v3317_v26 = vpop.f32.mrf.mxu1 }
 0x7a5   : > { %v3394_v1 = vpop.f32.mrf.mxu1 }
 0x7a6   : > { %16416 = vmatprep.subr.mxu0 %v3394_v1 }
 0x7a7   : > { %v16415_v45 = vpop.f32.mrf.mxu1  ;;  %16417 = vmatpush3.msra.mxu0 %v3394_v1  ;;  %v22045_v1 = vmov 0 }
 0x7a8   : > { %16419 = vmatmul.mubr.msk.f32.vlgmr.msra.gmra.mxu0 %vm22035_vm6, %v3401_v43  ;;  %16421 = vmatprep.subr.msk.mxu0 %vm21652_vm0, %v22006_v5  ;;  %vm21653_vm6 = vcmp.eq.s32.totalorder %v17989_v9, %v18930_v0  ;;  %v22048_v43 = vmov 0  ;;  %v22051_v45 = vmov 0 }
 0x7a9   : > { %16422 = vmatpush3.msk.msra.mxu0 %vm21652_vm0, %v22006_v5  ;;  %vm21656_vm0 = vcmp.eq.s32.totalorder %v18002_v12, %v18907_v6 }
 0x7aa   : > { %16423 = vmatprep.subr.msk.mxu0 %vm21651_vm10, %v22006_v5  ;;  %16446 = vmatprep.subr.msk.mxu1 %vm21656_vm0, %v22006_v5 }
 0x7ab   : > { %16424 = vmatpush3.msk.msra.mxu0 %vm21651_vm10, %v22006_v5  ;;  %vm21655_vm10 = vcmp.eq.s32.totalorder %v18002_v12, %v18930_v0  ;;  %16447 = vmatpush3.msk.msra.mxu1 %vm21656_vm0, %v22006_v5  ;;  %vm19025_vm0 = vcmp.eq.s32.totalorder %v18032_v14, %v18907_v6 }
 0x7ac   : > { %16425 = vmatprep.subr.msk.mxu0 %vm21653_vm6, %v22006_v5  ;;  %16448 = vmatprep.subr.msk.mxu1 %vm19001_vm4, %v22006_v5  ;;  %v22046_v1 = vsel %vm19025_vm0, 4294967295, %v22045_v1 }
 0x7ad   : > { %16426 = vmatpush3.msk.msra.mxu0 %vm21653_vm6, %v22006_v5  ;;  %vm18995_vm6 = vcmp.eq.s32.totalorder %v18015_v13, %v18930_v0  ;;  %16449 = vmatpush3.msk.msra.mxu1 %vm19001_vm4, %v22006_v5  ;;  %22047 = vst [vmem:[#allocation54_spill] sm:$0xff] %v22046_v1  ;;  %vm19049_vm4 = vcmp.eq.s32.totalorder %v18053_v16, %v18907_v6 }
 0x7ae   : > { %16427 = vmatprep.subr.msk.mxu0 %vm21655_vm10, %v22006_v5  ;;  %v22037_v55 = vsel %vm18995_vm6, 4294967295, %v22036_v55  ;;  %16450 = vmatprep.subr.msk.mxu1 %vm19025_vm0, %v22006_v5  ;;  %v22052_v45 = vsel %vm19049_vm4, 4294967295, %v22051_v45 }
 0x7af   : > { %16428 = vmatpush3.msk.msra.mxu0 %vm21655_vm10, %v22006_v5  ;;  %22038 = vst [vmem:[#allocation51_spill] sm:$0xff] %v22037_v55  ;;  %vm19019_vm10 = vcmp.eq.s32.totalorder %v18032_v14, %v18930_v0  ;;  %16451 = vmatpush3.msk.msra.mxu1 %vm19025_vm0, %v22006_v5  ;;  %22053 = vst [vmem:[#allocation56_spill] sm:$0xff] %v22052_v45  ;;  %vm19073_vm0 = vcmp.eq.s32.totalorder %v17965_v2, %v18907_v6  ;;  %v3495_v6 = vpop.permute.xlu0 %3494  ;;  %v3490_v55 = vpop.permute.xlu1 %3489 }
 0x7b0   : > { %16429 = vmatprep.subr.msk.mxu0 %vm18995_vm6, %v22006_v5  ;;  %v22043_v42 = vsel %vm19019_vm10, 4294967295, %v22042_v42  ;;  %16452 = vmatprep.subr.msk.mxu1 %vm19049_vm4, %v22006_v5 }
 0x7b1   : > { %16430 = vmatpush3.msk.msra.mxu0 %vm18995_vm6, %v22006_v5  ;;  %22044 = vst [vmem:[#allocation53_spill] sm:$0xff] %v22043_v42  ;;  %vm19043_vm6 = vcmp.eq.s32.totalorder %v18053_v16, %v18930_v0  ;;  %16453 = vmatpush3.msk.msra.mxu1 %vm19049_vm4, %v22006_v5  ;;  %v22057_v42 = vmov 0 }
 0x7b2   : > { %16431 = vmatprep.subr.msk.mxu0 %vm19019_vm10, %v22006_v5  ;;  %v22049_v43 = vsel %vm19043_vm6, 4294967295, %v22048_v43  ;;  %v22058_v42 = vsel %vm19073_vm0, 4294967295, %v22057_v42  ;;  %16454 = vmatprep.subr.msk.mxu1 %vm19073_vm0, %v22006_v5 }
 0x7b3   : > { %16432 = vmatpush3.msk.msra.mxu0 %vm19019_vm10, %v22006_v5  ;;  %22050 = vst [vmem:[#allocation55_spill] sm:$0xff] %v22049_v43  ;;  %vm19067_vm10 = vcmp.eq.s32.totalorder %v17965_v2, %v18930_v0  ;;  %22059 = vst [vmem:[#allocation58_spill] sm:$0xff] %v22058_v42  ;;  %16455 = vmatpush3.msk.msra.mxu1 %vm19073_vm0, %v22006_v5  ;;  %v3010_v0 = vadd.f32 %v18861_v31, %v18859_v44  ;;  %v3507_v57 = vpop.permute.xlu0 %3506  ;;  %v3502_v49 = vpop.permute.xlu1 %3501 }
 0x7b4   : > { %16433 = vmatprep.subr.msk.mxu0 %vm19043_vm6, %v22006_v5  ;;  %v22055_v53 = vsel %vm19067_vm10, 4294967295, %v22054_v53 }
 0x7b5   : > { %16434 = vmatpush3.msk.msra.mxu0 %vm19043_vm6, %v22006_v5  ;;  %22056 = vst [vmem:[#allocation57_spill] sm:$0xff] %v22055_v53  ;;  %v3171_v43 = vadd.f32 %v18863_v11, %v3010_v0 }
 0x7b6   : > { %16435 = vmatprep.subr.msk.mxu0 %vm19067_vm10, %v22006_v5 }
 0x7b7   : > { %16436 = vmatpush3.msk.msra.mxu0 %vm19067_vm10, %v22006_v5  ;;  %v3326_v1 = vadd.f32 %v3317_v26, %v3171_v43  ;;  %vm22060_vm10 = vcmask 523264   ;;  %v22084_v26 = vld [vmem:[#allocation48_spill] sm:$0xff] }
 0x7b8   : > { %vm22061_vm6 = vmmov %vm22060_vm10 }
 0x7b9   : > { %vm22062_vm0 = vmmov %vm22061_vm6 }
 0x7ba   : > { %vm22063_vm4 = vmmov %vm22062_vm0 }
 0x868   : > { %v16420_v45 = vpop.f32.mrf.mxu0 }
 0x869   : > { %v3482_v8 = vadd.f32 %v16420_v45, %v3327_v40  ;;  %v19223_v45 = vadd.s32 2, %v18480_v30  ;;  %v22090_v30 = vmov 0 }
 0x86a   : > { %v3472_v60 = vpop.f32.mrf.mxu0 }
 0x86b   : > { %v3498_v59 = vmul.f32 %v3495_v6, %v3482_v8  ;;  %v3481_v58 = vadd.f32 %v3472_v60, %v3326_v1  ;;  %22088 = vst [vmem:[#allocation48_spill] sm:$0xff] %v19223_v45  ;;  %vm21737_vm15 = vcmp.eq.s32.totalorder %v17973_v4, %v19223_v45  ;;  %vm21735_vm13 = vcmp.eq.s32.totalorder %v17989_v9, %v19223_v45 }
 0x86d   : > { %v3497_v53 = vmul.f32 %v3490_v55, %v3481_v58  ;;  %v3510_v48 = vadd.f32 %v3507_v57, %v3498_v59  ;;  %v3724_v58 = vpop.permute.xlu1 %3723 }
 0x86f   : > { %v3509_v47 = vadd.f32 %v3502_v49, %v3497_v53  ;;  %v19094_v46 = vmax.f32 %v3510_v48, 0.0  ;;  %v3726_v53 = vpop.permute.xlu0 %3725 }
 0x871   : > { %v19092_v42 = vmax.f32 %v3509_v47, 0.0  ;;  %v3962_v60 = vpop.permute.xlu1 %3961 }
 0x873   : > { %16437 = vmatprep.mubr.msk.f32.mxu0 %vm22060_vm10, %v19092_v42  ;;  %16456 = vmatprep.mubr.msk.f32.mxu1 %vm22061_vm6, %v19092_v42  ;;  %vm22065_vm10 = vmmov %vm22062_vm0  ;;  %vm22067_vm6 = vnez %v21970_v56  ;;  %v3964_v0 = vpop.permute.xlu0 %3963 }
 0x874   : > { %16438 = vmatmul.mubr.msk.f32.vlgmr.msra.gmra.mxu0 %vm22062_vm0, %v19094_v46  ;;  %16457 = vmatmul.mubr.msk.f32.vlgmr.msra.gmra.mxu1 %vm22063_vm4, %v19094_v46  ;;  %vm22064_vm4 = vnez %v21962_v54  ;;  %vm22066_vm0 = vnez %v21967_v51  ;;  %v22180_v51 = vld [vmem:[#allocation51_spill] sm:$0xff] }
 0x875   : > { %16463 = vmatprep.mubr.msk.f32.mxu0 %vm21711_vm7, %v3724_v58  ;;  %16496 = vmatprep.mubr.msk.f32.mxu1 %vm21711_vm7, %v3962_v60  ;;  %v4122_v59 = vpop.permute.xlu1 %4121 }
 0x879   : > { %v4307_v55 = vpop.permute.xlu1 %4306 }
 0x934   : > { %v16458_v47 = vpop.f32.mrf.mxu1  ;;  %v16439_v48 = vpop.f32.mrf.mxu0 }
 0x935   : > { %16459 = vmatprep.subr.mxu0 %v16458_v47 }
 0x936   : > { %v3712_v49 = vpop.f32.mrf.mxu1  ;;  %16460 = vmatpush3.msra.mxu0 %v16458_v47  ;;  %v3612_v57 = vpop.f32.mrf.mxu0 }
 0x937   : > { %16461 = vmatprep.subr.mxu0 %v3712_v49  ;;  %v4124_v47 = vpop.permute.xlu0 %4123 }
 0x938   : > { %16462 = vmatpush3.msra.mxu0 %v3712_v49 }
 0x939   : > { %16464 = vmatmul.mubr.msk.f32.vlgmr.msra.gmra.mxu0 %vm21711_vm7, %v3726_v53  ;;  %16466 = vmatprep.subr.mxu0 %v16439_v48 }
 0x93a   : > { %16467 = vmatpush3.msra.mxu0 %v16439_v48  ;;  %16470 = vmatprep.mubr.msk.f32.mxu0 %vm21711_vm7, %v18477_v29 }
 0x93b   : > { %16468 = vmatprep.subr.mxu0 %v3612_v57  ;;  %v4309_v53 = vpop.permute.xlu0 %4308 }
 0x93c   : > { %16469 = vmatpush3.msra.mxu0 %v3612_v57 }
 0x93d   : > { %16471 = vmatmul.mubr.msk.f32.vlgmr.msra.gmra.mxu0 %vm21711_vm7, %v18474_v28  ;;  %16473 = vmatprep.subr.msk.mxu0 %vm22064_vm4, %v22006_v5  ;;  %vm22068_vm7 = vnez %v21973_v61 }
 0x93e   : > { %16474 = vmatpush3.msk.msra.mxu0 %vm22064_vm4, %v22006_v5  ;;  %16489 = vmatprep.mubr.msk.f32.mxu0 %vm22065_vm10, %v19092_v42  ;;  %vm22069_vm10 = vnez %v21978_v63  ;;  %vm22073_vm4 = vcmask 523264  }
 0x93f   : > { %16475 = vmatprep.subr.msk.mxu0 %vm22066_vm0, %v22006_v5 }
 0x940   : > { %16476 = vmatpush3.msk.msra.mxu0 %vm22066_vm0, %v22006_v5  ;;  %vm22070_vm0 = vnez %v21982_v24 }
 0x941   : > { %16477 = vmatprep.subr.msk.mxu0 %vm22067_vm6, %v22006_v5 }
 0x942   : > { %16478 = vmatpush3.msk.msra.mxu0 %vm22067_vm6, %v22006_v5  ;;  %vm22071_vm6 = vnez %v21986_v27 }
 0x943   : > { %16479 = vmatprep.subr.msk.mxu0 %vm22068_vm7, %v22006_v5 }
 0x944   : > { %16480 = vmatpush3.msk.msra.mxu0 %vm22068_vm7, %v22006_v5  ;;  %vm22072_vm7 = vnez %v21991_v41 }
 0x945   : > { %16481 = vmatprep.subr.msk.mxu0 %vm22069_vm10, %v22006_v5 }
 0x946   : > { %16482 = vmatpush3.msk.msra.mxu0 %vm22069_vm10, %v22006_v5 }
 0x947   : > { %16483 = vmatprep.subr.msk.mxu0 %vm22070_vm0, %v22006_v5 }
 0x948   : > { %16484 = vmatpush3.msk.msra.mxu0 %vm22070_vm0, %v22006_v5 }
 0x949   : > { %16485 = vmatprep.subr.msk.mxu0 %vm22071_vm6, %v22006_v5 }
 0x94a   : > { %16486 = vmatpush3.msk.msra.mxu0 %vm22071_vm6, %v22006_v5 }
 0x94b   : > { %16487 = vmatprep.subr.msk.mxu0 %vm22072_vm7, %v22006_v5 }
 0x94c   : > { %16488 = vmatpush3.msk.msra.mxu0 %vm22072_vm7, %v22006_v5 }
 0x94d   : > { %16490 = vmatmul.mubr.msk.f32.vlgmr.msra.gmra.mxu0 %vm22073_vm4, %v19094_v46  ;;  %vm22076_vm4 = vnez %v21953_v32 }
 0x94e   : > { %16522 = vmatprep.mubr.msk.f32.mxu0 %vm22074_vm3, %v4122_v59  ;;  %vm22077_vm3 = vcmask 523264  }
 0x9f9   : > { %v16465_v28 = vpop.f32.mrf.mxu0 }
 0x9fb   : > { %v19164_v29 = vpop.f32.mrf.mxu0 }
 0x9fd   : > { %v16472_v44 = vpop.f32.mrf.mxu0 }
 0x9fe   : > { %v3883_v31 = vadd.f32 %v16472_v44, %v16465_v28 }
 0x9ff   : > { %v19166_v11 = vpop.f32.mrf.mxu0 }
 0xa00   : > { %v3878_v57 = vadd.f32 %v19166_v11, %v19164_v29 }
 0xa0d   : > { %v16491_v6 = vpop.f32.mrf.mxu0 }
 0xa0e   : > { %16492 = vmatprep.subr.mxu1 %v16491_v6 }
 0xa0f   : > { %v3952_v40 = vpop.f32.mrf.mxu0  ;;  %16493 = vmatpush3.msra.mxu1 %v16491_v6  ;;  %v4401_v6 = vpop.permute.xlu1 %4400 }
 0xa10   : > { %16494 = vmatprep.subr.mxu1 %v3952_v40 }
 0xa11   : > { %16495 = vmatpush3.msra.mxu1 %v3952_v40 }
 0xa12   : > { %16497 = vmatmul.mubr.msk.f32.vlgmr.msra.gmra.mxu1 %vm22075_vm8, %v3964_v0  ;;  %16499 = vmatprep.subr.msk.mxu1 %vm22076_vm4, %v22006_v5  ;;  %vm22079_vm8 = vnez %v21957_v38 }
 0xa13   : > { %16500 = vmatpush3.msk.msra.mxu1 %vm22076_vm4, %v22006_v5  ;;  %16515 = vmatprep.mubr.msk.f32.mxu1 %vm22077_vm3, %v19092_v42  ;;  %vm22080_vm4 = vnez %v21959_v39  ;;  %vm22081_vm3 = vnez %v21976_v62 }
 0xa14   : > { %16501 = vmatprep.subr.msk.mxu1 %vm22078_vm2, %v22006_v5 }
 0xa15   : > { %16502 = vmatpush3.msk.msra.mxu1 %vm22078_vm2, %v22006_v5  ;;  %vm22082_vm2 = vnez %v21980_v10 }
 0xa16   : > { %16503 = vmatprep.subr.msk.mxu1 %vm22079_vm8, %v22006_v5 }
 0xa17   : > { %16504 = vmatpush3.msk.msra.mxu1 %vm22079_vm8, %v22006_v5  ;;  %vm22083_vm8 = vnez %v21984_v25 }
 0xa18   : > { %16505 = vmatprep.subr.msk.mxu1 %vm22080_vm4, %v22006_v5 }
 0xa19   : > { %16506 = vmatpush3.msk.msra.mxu1 %vm22080_vm4, %v22006_v5  ;;  %vm22085_vm4 = vnez %v22084_v26 }
 0xa1a   : > { %16507 = vmatprep.subr.msk.mxu1 %vm22081_vm3, %v22006_v5 }
 0xa1b   : > { %16508 = vmatpush3.msk.msra.mxu1 %vm22081_vm3, %v22006_v5 }
 0xa1c   : > { %16509 = vmatprep.subr.msk.mxu1 %vm22082_vm2, %v22006_v5 }
 0xa1d   : > { %16510 = vmatpush3.msk.msra.mxu1 %vm22082_vm2, %v22006_v5 }
 0xa1e   : > { %16511 = vmatprep.subr.msk.mxu1 %vm22083_vm8, %v22006_v5 }
 0xa1f   : > { %16512 = vmatpush3.msk.msra.mxu1 %vm22083_vm8, %v22006_v5 }
 0xa20   : > { %16513 = vmatprep.subr.msk.mxu1 %vm22085_vm4, %v22006_v5 }
 0xa21   : > { %16514 = vmatpush3.msk.msra.mxu1 %vm22085_vm4, %v22006_v5 }
 0xa22   : > { %16516 = vmatmul.mubr.msk.f32.vlgmr.msra.gmra.mxu1 %vm22086_vm5, %v19094_v46  ;;  %vm21734_vm5 = vcmp.eq.s32.totalorder %v17982_v7, %v19223_v45 }
 0xa23   : > { %16548 = vmatprep.mubr.msk.f32.mxu1 %vm22087_vm1, %v4307_v55 }
 0xad2   : > { %v16498_v8 = vpop.f32.mrf.mxu1 }
 0xad3   : > { %v4045_v1 = vadd.f32 %v16498_v8, %v3883_v31  ;;  %v4396_v8 = vpop.permute.xlu0 %4395 }
 0xad4   : > { %v4035_v43 = vpop.f32.mrf.mxu1 }
 0xad5   : > { %v4044_v59 = vadd.f32 %v4035_v43, %v3878_v57  ;;  %v2619_v43 = vld [vmem:[%s19361_s26 + $0x8] sm:$0xff] }
 0xae2   : > { %v16517_v58 = vpop.f32.mrf.mxu1 }
 0xae3   : > { %16518 = vmatprep.subr.mxu0 %v16517_v58 }
 0xae4   : > { %v4112_v60 = vpop.f32.mrf.mxu1  ;;  %16519 = vmatpush3.msra.mxu0 %v16517_v58  ;;  %v2618_v58 = vld [vmem:[%s19361_s26] sm:$0xff] }
 0xae5   : > { %16520 = vmatprep.subr.mxu0 %v4112_v60 }
 0xae6   : > { %16521 = vmatpush3.msra.mxu0 %v4112_v60 }
 0xae7   : > { %16523 = vmatmul.mubr.msk.f32.vlgmr.msra.gmra.mxu0 %vm22087_vm1, %v4124_v47  ;;  %16525 = vmatprep.subr.msk.mxu0 %vm21737_vm15, %v22006_v5  ;;  %vm21736_vm1 = vcmp.eq.s32.totalorder %v18002_v12, %v19223_v45 }
 0xae8   : > { %16526 = vmatpush3.msk.msra.mxu0 %vm21737_vm15, %v22006_v5  ;;  %16541 = vmatprep.mubr.msk.f32.mxu0 %vm22089_vm14, %v19092_v42  ;;  %vm19262_vm14 = vcmp.eq.s32.totalorder %v18015_v13, %v19223_v45  ;;  %v22093_v42 = vmov 0  ;;  %v22096_v13 = vmov 0  ;;  %vm22102_vm15 = vcmask 523264  }
 0xae9   : > { %16527 = vmatprep.subr.msk.mxu0 %vm21734_vm5, %v22006_v5  ;;  %v22091_v30 = vsel %vm19262_vm14, 4294967295, %v22090_v30 }
 0xaea   : > { %16528 = vmatpush3.msk.msra.mxu0 %vm21734_vm5, %v22006_v5  ;;  %22092 = vst [vmem:[#allocation59_spill] sm:$0xff] %v22091_v30  ;;  %vm19276_vm5 = vcmp.eq.s32.totalorder %v18032_v14, %v19223_v45  ;;  %v22099_v14 = vmov 0 }
 0xaeb   : > { %16529 = vmatprep.subr.msk.mxu0 %vm21735_vm13, %v22006_v5  ;;  %v22094_v42 = vsel %vm19276_vm5, 4294967295, %v22093_v42 }
 0xaec   : > { %16530 = vmatpush3.msk.msra.mxu0 %vm21735_vm13, %v22006_v5  ;;  %22095 = vst [vmem:[#allocation60_spill] sm:$0xff] %v22094_v42  ;;  %vm19288_vm13 = vcmp.eq.s32.totalorder %v18053_v16, %v19223_v45 }
 0xaed   : > { %16531 = vmatprep.subr.msk.mxu0 %vm21736_vm1, %v22006_v5  ;;  %v22097_v13 = vsel %vm19288_vm13, 4294967295, %v22096_v13 }
 0xaee   : > { %16532 = vmatpush3.msk.msra.mxu0 %vm21736_vm1, %v22006_v5  ;;  %22098 = vst [vmem:[#allocation61_spill] sm:$0xff] %v22097_v13  ;;  %vm19300_vm1 = vcmp.eq.s32.totalorder %v17965_v2, %v19223_v45 }
 0xaef   : > { %16533 = vmatprep.subr.msk.mxu0 %vm19262_vm14, %v22006_v5  ;;  %v22100_v14 = vsel %vm19300_vm1, 4294967295, %v22099_v14 }
 0xaf0   : > { %16534 = vmatpush3.msk.msra.mxu0 %vm19262_vm14, %v22006_v5  ;;  %22101 = vst [vmem:[#allocation62_spill] sm:$0xff] %v22100_v14 }
 0xaf1   : > { %16535 = vmatprep.subr.msk.mxu0 %vm19276_vm5, %v22006_v5 }
 0xaf2   : > { %16536 = vmatpush3.msk.msra.mxu0 %vm19276_vm5, %v22006_v5 }
 0xaf3   : > { %16537 = vmatprep.subr.msk.mxu0 %vm19288_vm13, %v22006_v5 }
 0xaf4   : > { %16538 = vmatpush3.msk.msra.mxu0 %vm19288_vm13, %v22006_v5 }
 0xaf5   : > { %16539 = vmatprep.subr.msk.mxu0 %vm19300_vm1, %v22006_v5 }
 0xaf6   : > { %16540 = vmatpush3.msk.msra.mxu0 %vm19300_vm1, %v22006_v5  ;;  %vm21742_vm1 = vcmask 261120  }
 0xaf7   : > { %16542 = vmatmul.mubr.msk.f32.vlgmr.msra.gmra.mxu0 %vm22102_vm15, %v19094_v46  ;;  %16574 = vmatprep.subr.msk.mxu0 %vm22081_vm3, %v22006_v5  ;;  %vm22103_vm15 = vcmask 130048  }
 0xaf8   : > { %16575 = vmatpush3.msk.msra.mxu0 %vm22081_vm3, %v22006_v5 }
 0xaf9   : > { %16576 = vmatprep.subr.msk.mxu0 %vm22082_vm2, %v22006_v5 }
 0xafa   : > { %16577 = vmatpush3.msk.msra.mxu0 %vm22082_vm2, %v22006_v5 }
 0xafb   : > { %16578 = vmatprep.subr.msk.mxu0 %vm22083_vm8, %v22006_v5 }
 0xafc   : > { %16579 = vmatpush3.msk.msra.mxu0 %vm22083_vm8, %v22006_v5 }
 0xafd   : > { %16580 = vmatprep.subr.msk.mxu0 %vm22085_vm4, %v22006_v5 }
 0xafe   : > { %16581 = vmatpush3.msk.msra.mxu0 %vm22085_vm4, %v22006_v5 }
 0xaff   : > { %16596 = vmatprep.subr.msk.mxu0 %vm18062_vm12, %v22006_v5 }
 0xba7   : > { %v16524_v2 = vpop.f32.mrf.mxu0 }
 0xba8   : > { %v4205_v16 = vadd.f32 %v16524_v2, %v4045_v1 }
 0xba9   : > { %v4195_v46 = vpop.f32.mrf.mxu0 }
 0xbaa   : > { %v4204_v44 = vadd.f32 %v4195_v46, %v4044_v59  ;;  %v4405_v46 = vld [vmem:[%s19369_s8] sm:$0xf]  ;;  %v4407_v59 = vld [vmem:[%s19376_s6 + $0x8] sm:$0xff] }
 0xbb7   : > { %v16543_v48 = vpop.f32.mrf.mxu0 }
 0xbb8   : > { %16544 = vmatprep.subr.mxu1 %v16543_v48 }
 0xbb9   : > { %v4297_v49 = vpop.f32.mrf.mxu0  ;;  %16545 = vmatpush3.msra.mxu1 %v16543_v48  ;;  %v4406_v48 = vld [vmem:[%s19376_s6] sm:$0xff] }
 0xbba   : > { %16546 = vmatprep.subr.mxu1 %v4297_v49 }
 0xbbb   : > { %16547 = vmatpush3.msra.mxu1 %v4297_v49 }
 0xbbc   : > { %16549 = vmatmul.mubr.msk.f32.vlgmr.msra.gmra.mxu1 %vm22103_vm15, %v4309_v53  ;;  %16551 = vmatprep.subr.mxu1 %v22005_v3 }
 0xbbd   : > { %16555 = vmatprep.mubr.msk.f32.mxu1 %vm21915_vm9, %v22005_v3  ;;  %vm22108_vm9 = vcmask 1043456  }
 0xbbe   : > { %vm22109_vm13 = vmmov %vm22108_vm9 }
 0xc7c   : > { %v16550_v28 = vpop.f32.mrf.mxu1 }
 0xc7d   : > { %v4390_v31 = vadd.f32 %v16550_v28, %v4205_v16 }
 0xc7e   : > { %v4380_v40 = vpop.f32.mrf.mxu1 }
 0xc7f   : > { %v4389_v0 = vadd.f32 %v4380_v40, %v4204_v44  ;;  %v19351_v55 = vadd.f32 %v4401_v6, %v4390_v31 }
 0xc81   : > { %v4412_v1 = vsel %vm21742_vm1, %v19351_v55, 0.0  ;;  %v19355_v29 = vadd.f32 %v4396_v8, %v4389_v0 }
 0xc82   : > { %4413 = vadd.xlane.f32.xlu1 %v4412_v1 }
 0xc83   : > { %v4409_v11 = vsel %vm21742_vm1, %v19355_v29, 0.0  ;;  %vm22107_vm1 = vcmask 31744  }
 0xc84   : > { %4410 = vadd.xlane.f32.xlu0 %v4409_v11  ;;  %vm22110_vm5 = vmmov %vm22107_vm1 }
 0xc93   : > { %2627 = vperm.xlu1 %17705, %v2619_v43  }
 0xc9a   : > { %2622 = vperm.xlu0 %17704, %v2618_v58  }
 0xd0b   : > { %v4414_v60 = vpop.xlane.xlu1 %4413 }
 0xd0c   : > { %v4417_v47 = vmul.f32 0.03125, %v4414_v60 }
 0xd0d   : > { %v4411_v2 = vpop.xlane.xlu0 %4410 }
 0xd0e   : > { %v4416_v16 = vmul.f32 0.03125, %v4411_v2  ;;  %16552 = vmatpush3.msra.mxu1 %v4417_v47  ;;  %v4761_v47 = vld [vmem:[%s19413_s13 + $0x8] sm:$0xff]  ;;  %v4760_v2 = vld [vmem:[%s19413_s13] sm:$0xff] }
 0xd0f   : > { %16553 = vmatprep.subr.mxu1 %v22005_v3 }
 0xd10   : > { %16554 = vmatpush3.msra.mxu1 %v4416_v16  ;;  %v4763_v16 = vld [vmem:[%s19418_s14 + $0x8] sm:$0xff] }
 0xd11   : > { %16556 = vmatmul.mubr.msk.f32.vlgmr.msra.gmra.mxu1 %vm22103_vm15, %v4405_v46  ;;  %v4762_v46 = vld [vmem:[%s19418_s14] sm:$0xff]  ;;  %vm22131_vm15 = vnez %v21894_v18 }
 0xd12   : > { %16560 = vmatprep.mubr.msk.f32.mxu1 %vm22107_vm1, %v4406_v48  ;;  %v19428_v48 = vld [vmem:[%s19424_s19 + $0x8] sm:$0xff] }
 0xdd1   : > { %v4487_v49 = vpop.f32.mrf.mxu1 }
 0xdd2   : > { %v4491_v53 = vmax.f32 %v4487_v49, 0.0  ;;  %v19431_v49 = vld [vmem:[%s19424_s19] sm:$0xff]  ;;  %s22124_s19 = sld [smem:[#allocation21_spill]] }
 0xdd3   : > { %v16557_v57 = vpop.f32.mrf.mxu1 }
 0xdd4   : > { %16558 = vmatprep.subr.msk.mxu1 %vm22108_vm9, %v4491_v53  ;;  %v5592_v57 = vld [vmem:[%s19447_s29] sm:$0xff]  ;;  %vm22127_vm9 = vcmask 261120  }
 0xdd5   : > { %16559 = vmatpush3.msk.msra.mxu1 %vm22109_vm13, %v4491_v53  ;;  %v5593_v53 = vld [vmem:[%s19447_s29 + $0x8] sm:$0xff]  ;;  %vm22128_vm13 = vmmov %vm22127_vm9  ;;  %s22215_s29 = sld [smem:[#allocation22_spill]] }
 0xdd6   : > { %16561 = vmatmul.mubr.msk.f32.vlgmr.msra.gmra.mxu1 %vm22110_vm5, %v4407_v59  ;;  %16563 = vmatprep.subr.msk.mxu1 %vm22069_vm10, %v22006_v5  ;;  %v5595_v59 = vld [vmem:[%s19456_s15 + $0x8] sm:$0xff]  ;;  %vm22129_vm5 = vmmov %vm22127_vm9 }
 0xdd7   : > { %16564 = vmatpush3.msk.msra.mxu1 %vm22069_vm10, %v22006_v5  ;;  %vm22130_vm1 = vmmov %vm22129_vm5 }
 0xdd8   : > { %16565 = vmatprep.subr.msk.mxu1 %vm22070_vm0, %v22006_v5  ;;  %s19485_s21 = scalar_lea.vmem %s22124_s19, %s18419_s7  ;;  %s22207_s19 = sld [smem:[#allocation24_spill]] }
 0xdd9   : > { %16566 = vmatpush3.msk.msra.mxu1 %vm22070_vm0, %v22006_v5  ;;  %22126 = sst [smem:[#allocation67_spill]] %s19485_s21 }
 0xdda   : > { %16567 = vmatprep.subr.msk.mxu1 %vm22071_vm6, %v22006_v5 }
 0xddb   : > { %16568 = vmatpush3.msk.msra.mxu1 %vm22071_vm6, %v22006_v5 }
 0xddc   : > { %16569 = vmatprep.subr.msk.mxu1 %vm22072_vm7, %v22006_v5 }
 0xddd   : > { %16570 = vmatpush3.msk.msra.mxu1 %vm22072_vm7, %v22006_v5 }
 0xdde   : > { %16585 = vmatprep.subr.msk.mxu1 %vm18048_vm11, %v22006_v5 }
 0xe96   : > { %v16562_v28 = vpop.f32.mrf.mxu1 }
 0xe97   : > { %v4577_v44 = vsub.f32 0.0, %v16562_v28  ;;  %v5594_v28 = vld [vmem:[%s19456_s15] sm:$0xff]  ;;  %s22212_s15 = smov 124  }
 0xe98   : > { %v4567_v31 = vpop.f32.mrf.mxu1 }
 0xe99   : > { %v4580_v6 = vmul.f32 1.442695, %v4577_v44  ;;  %v4576_v40 = vsub.f32 0.0, %v4567_v31  ;;  %v19466_v44 = vld [vmem:[%s19462_s17 + $0x8] sm:$0xff]  ;;  %v19469_v31 = vld [vmem:[%s19462_s17] sm:$0xff]  ;;  %s19835_s17 = scalar_lea.vmem %s22209_s3, %s18419_s7  ;;  %s22214_s3 = smov 120  }
 0xe9b   : > { %17706 = vpow2.f32 %v4580_v6  ;;  %v4578_v0 = vmul.f32 1.442695, %v4576_v40  ;;  %v6424_v6 = vld [vmem:[%s19485_s21] sm:$0xff]  ;;  %v6425_v40 = vld [vmem:[%s19485_s21 + $0x8] sm:$0xff]  ;;  %s19830_s21 = scalar_lea.vmem %s22207_s19, %s18419_s7  ;;  %s22213_s19 = smov 116  }
 0xe9c   : > { %22211 = sst [smem:[#allocation68_spill]] %s19830_s21 }
 0xe9d   : > { %17708 = vpow2.f32 %v4578_v0  ;;  %v2623_v0 = vpop.permute.xlu0 %2622 }
 0xea8   : > { %v17707_v8 = vpop.eup %17706 }
 0xea9   : > { %v4583_v1 = vadd.f32 1.0, %v17707_v8  ;;  %v2628_v8 = vpop.permute.xlu1 %2627 }
 0xeaa   : > { %v17709_v11 = vpop.eup %17708 }
 0xeab   : > { %17710 = vrcp.f32 %v4583_v1  ;;  %v4582_v43 = vadd.f32 1.0, %v17709_v11 }
 0xead   : > { %17712 = vrcp.f32 %v4582_v43 }
 0xeb8   : > { %v17711_v58 = vpop.eup %17710 }
 0xeb9   : > { %4595 = vperm.xlu0 %17704, %v17711_v58   ;;  %v2709_v58 = vadd.f32 %v18810_v50, %v2628_v8 }
 0xeba   : > { %v17713_v60 = vpop.eup %17712 }
 0xebb   : > { %4590 = vperm.xlu1 %17705, %v17713_v60   ;;  %v2704_v60 = vadd.f32 %v18812_v52, %v2623_v0 }
 0xebd   : > { %4771 = vperm.xlu0 %17704, %v4761_v47  }
 0xebf   : > { %4766 = vperm.xlu1 %17705, %v4760_v2  }
 0xec1   : > { %4783 = vperm.xlu0 %17704, %v4763_v16  }
 0xec3   : > { %4778 = vperm.xlu1 %17705, %v4762_v46  }
 0xec5   : > { %4952 = vrot.lane.b32.xlu0 %v19428_v48, %s22117_s4 }
 0xec7   : > { %4950 = vrot.lane.b32.xlu1 %v19431_v49, %s22117_s4 }
 0xec9   : > { %5189 = vrot.lane.b32.xlu0 %v19428_v48, %s22119_s9 }
 0xecb   : > { %5187 = vrot.lane.b32.xlu1 %v19431_v49, %s22119_s9 }
 0xecd   : > { %5349 = vrot.lane.b32.xlu0 %v19428_v48, %s22120_s25 }
 0xecf   : > { %5347 = vrot.lane.b32.xlu1 %v19431_v49, %s22120_s25 }
 0xed1   : > { %5509 = vrot.lane.b32.xlu0 %v19428_v48, %s22122_s30 }
 0xed3   : > { %5507 = vrot.lane.b32.xlu1 %v19431_v49, %s22122_s30 }
 0xed5   : > { %5603 = vperm.xlu0 %17704, %v5593_v53  }
 0xed7   : > { %5598 = vperm.xlu1 %17705, %v5592_v57  }
 0xed9   : > { %5615 = vperm.xlu0 %17704, %v5595_v59  }
 0xedb   : > { %5610 = vperm.xlu1 %17705, %v5594_v28  }
 0xedd   : > { %5784 = vrot.lane.b32.xlu0 %v19466_v44, %s22117_s4 }
 0xedf   : > { %5782 = vrot.lane.b32.xlu1 %v19469_v31, %s22117_s4 }
 0xee1   : > { %6021 = vrot.lane.b32.xlu0 %v19466_v44, %s22119_s9 }
 0xee3   : > { %6019 = vrot.lane.b32.xlu1 %v19469_v31, %s22119_s9 }
 0xee5   : > { %6181 = vrot.lane.b32.xlu0 %v19466_v44, %s22120_s25 }
 0xee7   : > { %6179 = vrot.lane.b32.xlu1 %v19469_v31, %s22120_s25 }
 0xee9   : > { %6341 = vrot.lane.b32.xlu0 %v19466_v44, %s22122_s30 }
 0xeeb   : > { %6339 = vrot.lane.b32.xlu1 %v19469_v31, %s22122_s30 }
 0xeed   : > { %6428 = vperm.xlu0 %17704, %v6424_v6  }
 0xeef   : > { %6433 = vperm.xlu1 %17705, %v6425_v40  }
 0xf34   : > { %v4596_v1 = vpop.permute.xlu0 %4595 }
 0xf35   : > { %v4599_v11 = vmul.f32 %v4596_v1, %v19351_v55 }
 0xf36   : > { %v4591_v43 = vpop.permute.xlu1 %4590 }
 0xf37   : > { %v4598_v47 = vmul.f32 %v4591_v43, %v19355_v29  ;;  %v4601_v16 = vadd.f32 %v4599_v11, %v2709_v58 }
 0xf38   : > { %v4772_v2 = vpop.permute.xlu0 %4771 }
 0xf39   : > { %v4600_v46 = vadd.f32 %v4598_v47, %v2704_v60  ;;  %v4775_v57 = vmul.f32 %v4772_v2, %v4601_v16 }
 0xf3a   : > { %v4767_v53 = vpop.permute.xlu1 %4766 }
 0xf3b   : > { %16571 = vmatprep.mubr.msk.f32.mxu1 %vm22127_vm9, %v4600_v46  ;;  %16582 = vmatprep.mubr.msk.f32.mxu0 %vm22128_vm13, %v4600_v46  ;;  %v4774_v59 = vmul.f32 %v4767_v53, %v4600_v46  ;;  %vm22132_vm9 = vnez %v21896_v19  ;;  %vm22133_vm13 = vnez %v21898_v20 }
 0xf3c   : > { %16572 = vmatmul.mubr.msk.f32.vlgmr.msra.gmra.mxu1 %vm22129_vm5, %v4601_v16  ;;  %16583 = vmatmul.mubr.msk.f32.vlgmr.msra.gmra.mxu0 %vm22130_vm1, %v4601_v16  ;;  %v4784_v55 = vpop.permute.xlu0 %4783  ;;  %vm22134_vm5 = vnez %v21900_v21  ;;  %vm22135_vm1 = vnez %v21904_v23 }
 0xf3d   : > { %16586 = vmatpush3.msk.msra.mxu1 %vm18048_vm11, %v22006_v5  ;;  %16597 = vmatpush3.msk.msra.mxu0 %vm18062_vm12, %v22006_v5  ;;  %v4787_v52 = vadd.f32 %v4784_v55, %v4775_v57  ;;  %vm22141_vm11 = vcmask 130048  }
 0xf3e   : > { %v4779_v50 = vpop.permute.xlu1 %4778  ;;  %16587 = vmatprep.subr.msk.mxu1 %vm22131_vm15, %v22006_v5  ;;  %16598 = vmatprep.subr.msk.mxu0 %vm22132_vm9, %v22006_v5 }
 0xf3f   : > { %v4786_v29 = vadd.f32 %v4779_v50, %v4774_v59  ;;  %16588 = vmatpush3.msk.msra.mxu1 %vm22131_vm15, %v22006_v5  ;;  %16599 = vmatpush3.msk.msra.mxu0 %vm22132_vm9, %v22006_v5  ;;  %vm22136_vm9 = vnez %v21902_v22  ;;  %v19539_v6 = vmax.f32 %v4787_v52, 0.0 }
 0xf40   : > { %16589 = vmatprep.subr.msk.mxu1 %vm22133_vm13, %v22006_v5  ;;  %16600 = vmatprep.subr.msk.mxu0 %vm22134_vm5, %v22006_v5 }
 0xf41   : > { %v19525_v28 = vmax.f32 %v4786_v29, 0.0  ;;  %16590 = vmatpush3.msk.msra.mxu1 %vm22133_vm13, %v22006_v5  ;;  %16601 = vmatpush3.msk.msra.mxu0 %vm22134_vm5, %v22006_v5  ;;  %vm22137_vm13 = vcmask 261120   ;;  %v22152_v29 = vld [vmem:[#allocation34_spill] sm:$0xff] }
 0xf42   : > { %16591 = vmatprep.subr.msk.mxu1 %vm22135_vm1, %v22006_v5  ;;  %16602 = vmatprep.subr.msk.mxu0 %vm22136_vm9, %v22006_v5  ;;  %vm22138_vm5 = vmmov %vm22137_vm13  ;;  %v4951_v40 = vpop.permute.xlu1 %4950 }
 0xf43   : > { %16592 = vmatpush3.msk.msra.mxu1 %vm22135_vm1, %v22006_v5  ;;  %16593 = vmatprep.mubr.msk.f32.mxu1 %vm22137_vm13, %v19525_v28  ;;  %vm22139_vm15 = vmmov %vm22138_vm5 }
 0xf44   : > { %16603 = vmatpush3.msk.msra.mxu0 %vm22136_vm9, %v22006_v5  ;;  %16604 = vmatprep.mubr.msk.f32.mxu0 %vm22138_vm5, %v19525_v28  ;;  %vm22140_vm12 = vmmov %vm22138_vm5 }
 0xf45   : > { %16594 = vmatmul.mubr.msk.f32.vlgmr.msra.gmra.mxu1 %vm22139_vm15, %v19539_v6  ;;  %16605 = vmatmul.mubr.msk.f32.vlgmr.msra.gmra.mxu0 %vm22140_vm12, %v19539_v6  ;;  %vm22142_vm1 = vmmov %vm22141_vm11  ;;  %vm22145_vm15 = vnez %v21907_v33 }
 0xf46   : > { %16611 = vmatprep.mubr.msk.f32.mxu1 %vm22141_vm11, %v4951_v40  ;;  %16618 = vmatprep.mubr.msk.f32.mxu0 %vm22142_vm1, %v19431_v49  ;;  %v4953_v49 = vpop.permute.xlu0 %4952  ;;  %vm22143_vm11 = vmmov %vm22142_vm1  ;;  %v5188_v16 = vpop.permute.xlu1 %5187  ;;  %v22154_v40 = vld [vmem:[#allocation35_spill] sm:$0xff] }
 0xf47   : > { %vm22144_vm12 = vmmov %vm22142_vm1 }
 0xf48   : > { %vm22146_vm13 = vmmov %vm22138_vm5 }
 0xf49   : > { %vm22147_vm5 = vmmov %vm22142_vm1  ;;  %vm22148_vm1 = vnez %v21909_v34 }
 0xf4a   : > { %v5190_v52 = vpop.permute.xlu0 %5189 }
 0xffc   : > { %v19558_v0 = vpop.f32.mrf.mxu1  ;;  %v19560_v8 = vpop.f32.mrf.mxu0 }
 0xffe   : > { %v19564_v11 = vpop.f32.mrf.mxu1  ;;  %v19566_v43 = vpop.f32.mrf.mxu0 }
0x1005   : > { %v16595_v58 = vpop.f32.mrf.mxu1  ;;  %v16606_v60 = vpop.f32.mrf.mxu0 }
0x1006   : > { %16607 = vmatprep.subr.mxu1 %v16606_v60  ;;  %16614 = vmatprep.subr.mxu0 %v16595_v58 }
0x1007   : > { %v4864_v47 = vpop.f32.mrf.mxu1  ;;  %v4939_v2 = vpop.f32.mrf.mxu0  ;;  %16608 = vmatpush3.msra.mxu1 %v16606_v60  ;;  %16615 = vmatpush3.msra.mxu0 %v16595_v58  ;;  %v22156_v58 = vld [vmem:[#allocation36_spill] sm:$0xff]  ;;  %v22158_v60 = vld [vmem:[#allocation37_spill] sm:$0xff] }
0x1008   : > { %16609 = vmatprep.subr.mxu1 %v4939_v2  ;;  %16616 = vmatprep.subr.mxu0 %v4864_v47 }
0x1009   : > { %16610 = vmatpush3.msra.mxu1 %v4939_v2  ;;  %16617 = vmatpush3.msra.mxu0 %v4864_v47 }
0x100a   : > { %16612 = vmatmul.mubr.msk.f32.vlgmr.msra.gmra.mxu1 %vm22143_vm11, %v4953_v49  ;;  %16619 = vmatmul.mubr.msk.f32.vlgmr.msra.gmra.mxu0 %vm22144_vm12, %v19428_v48  ;;  %vm22149_vm11 = vnez %v21911_v35  ;;  %vm22150_vm12 = vnez %v21913_v36  ;;  %v5348_v48 = vpop.permute.xlu1 %5347 }
0x100b   : > { %16621 = vmatprep.subr.msk.mxu1 %vm22145_vm15, %v22006_v5  ;;  %16629 = vmatprep.mubr.msk.f32.mxu1 %vm22146_vm13, %v19525_v28 }
0x100c   : > { %16622 = vmatpush3.msk.msra.mxu1 %vm22145_vm15, %v22006_v5  ;;  %16636 = vmatprep.mubr.msk.f32.mxu0 %vm22147_vm5, %v5188_v16 }
0x100d   : > { %16623 = vmatprep.subr.msk.mxu1 %vm22148_vm1, %v22006_v5 }
0x100e   : > { %16624 = vmatpush3.msk.msra.mxu1 %vm22148_vm1, %v22006_v5  ;;  %v5508_v47 = vpop.permute.xlu1 %5507  ;;  %vm22192_vm1 = vcmask 130048  }
0x100f   : > { %16625 = vmatprep.subr.msk.mxu1 %vm22149_vm11, %v22006_v5  ;;  %vm22193_vm15 = vmmov %vm22192_vm1 }
0x1010   : > { %16626 = vmatpush3.msk.msra.mxu1 %vm22149_vm11, %v22006_v5  ;;  %vm22151_vm11 = vmmov %vm22147_vm5 }
0x1011   : > { %16627 = vmatprep.subr.msk.mxu1 %vm22150_vm12, %v22006_v5 }
0x1012   : > { %16628 = vmatpush3.msk.msra.mxu1 %vm22150_vm12, %v22006_v5  ;;  %vm22153_vm12 = vnez %v22152_v29 }
0x1013   : > { %16630 = vmatmul.mubr.msk.f32.vlgmr.msra.gmra.mxu1 %vm22146_vm13, %v19539_v6 }
0x1014   : > { %16654 = vmatprep.mubr.msk.f32.mxu1 %vm22147_vm5, %v5348_v48  ;;  %vm22155_vm5 = vnez %v22154_v40 }
0x10ca   : > { %v16613_v46 = vpop.f32.mrf.mxu1  ;;  %v16620_v53 = vpop.f32.mrf.mxu0 }
0x10cb   : > { %v5109_v55 = vadd.f32 %v16620_v53, %v16613_v46 }
0x10cc   : > { %v5024_v57 = vpop.f32.mrf.mxu1  ;;  %v5103_v2 = vpop.f32.mrf.mxu0 }
0x10d3   : > { %v16631_v59 = vpop.f32.mrf.mxu1 }
0x10d4   : > { %16632 = vmatprep.subr.mxu0 %v16631_v59 }
0x10d5   : > { %v5178_v50 = vpop.f32.mrf.mxu1  ;;  %16633 = vmatpush3.msra.mxu0 %v16631_v59  ;;  %v5350_v59 = vpop.permute.xlu0 %5349 }
0x10d6   : > { %16634 = vmatprep.subr.mxu0 %v5178_v50 }
0x10d7   : > { %16635 = vmatpush3.msra.mxu0 %v5178_v50  ;;  %v22162_v50 = vld [vmem:[#allocation39_spill] sm:$0xff] }
0x10d8   : > { %16637 = vmatmul.mubr.msk.f32.vlgmr.msra.gmra.mxu0 %vm22151_vm11, %v5190_v52  ;;  %16639 = vmatprep.subr.msk.mxu0 %vm22153_vm12, %v22006_v5  ;;  %vm22157_vm11 = vnez %v22156_v58  ;;  %v22167_v52 = vld [vmem:[#allocation41_spill] sm:$0xff] }
0x10d9   : > { %16640 = vmatpush3.msk.msra.mxu0 %vm22153_vm12, %v22006_v5  ;;  %16647 = vmatprep.mubr.msk.f32.mxu0 %vm22146_vm13, %v19525_v28  ;;  %vm22159_vm12 = vnez %v22158_v60 }
0x10da   : > { %16641 = vmatprep.subr.msk.mxu0 %vm22155_vm5, %v22006_v5 }
0x10db   : > { %16642 = vmatpush3.msk.msra.mxu0 %vm22155_vm5, %v22006_v5  ;;  %vm22160_vm5 = vcmask 130048  }
0x10dc   : > { %16643 = vmatprep.subr.msk.mxu0 %vm22157_vm11, %v22006_v5 }
0x10dd   : > { %16644 = vmatpush3.msk.msra.mxu0 %vm22157_vm11, %v22006_v5  ;;  %vm22161_vm11 = vmmov %vm22160_vm5 }
0x10de   : > { %16645 = vmatprep.subr.msk.mxu0 %vm22159_vm12, %v22006_v5 }
0x10df   : > { %16646 = vmatpush3.msk.msra.mxu0 %vm22159_vm12, %v22006_v5  ;;  %vm22163_vm12 = vnez %v22162_v50 }
0x10e0   : > { %16648 = vmatmul.mubr.msk.f32.vlgmr.msra.gmra.mxu0 %vm22146_vm13, %v19539_v6 }
0x10e1   : > { %16672 = vmatprep.mubr.msk.f32.mxu0 %vm22160_vm5, %v5508_v47  ;;  %vm22164_vm5 = vmmov %vm22146_vm13  ;;  %v22169_v47 = vld [vmem:[#allocation42_spill] sm:$0xff] }
0x1198   : > { %v16638_v49 = vpop.f32.mrf.mxu0 }
0x1199   : > { %v5271_v16 = vadd.f32 %v16638_v49, %v5109_v55  ;;  %v22165_v55 = vld [vmem:[#allocation40_spill] sm:$0xff]  ;;  %v22173_v49 = vld [vmem:[#allocation54_spill] sm:$0xff] }
0x119a   : > { %v5261_v48 = vpop.f32.mrf.mxu0  ;;  %vm22166_vm13 = vnez %v22165_v55 }
0x11a0   : > { %v16649_v46 = vpop.f32.mrf.mxu0 }
0x11a1   : > { %16650 = vmatprep.subr.mxu1 %v16649_v46 }
0x11a2   : > { %v5338_v53 = vpop.f32.mrf.mxu0  ;;  %16651 = vmatpush3.msra.mxu1 %v16649_v46  ;;  %v22175_v46 = vld [vmem:[#allocation56_spill] sm:$0xff] }
0x11a3   : > { %16652 = vmatprep.subr.mxu1 %v5338_v53 }
0x11a4   : > { %16653 = vmatpush3.msra.mxu1 %v5338_v53  ;;  %v5104_v53 = vadd.f32 %v5103_v2, %v5024_v57  ;;  %v22182_v57 = vld [vmem:[#allocation53_spill] sm:$0xff]  ;;  %v5599_v2 = vpop.permute.xlu1 %5598 }
0x11a5   : > { %16655 = vmatmul.mubr.msk.f32.vlgmr.msra.gmra.mxu1 %vm22161_vm11, %v5350_v59  ;;  %16657 = vmatprep.subr.msk.mxu1 %vm22163_vm12, %v22006_v5  ;;  %vm22168_vm11 = vnez %v22167_v52 }
0x11a6   : > { %16658 = vmatpush3.msk.msra.mxu1 %vm22163_vm12, %v22006_v5  ;;  %16665 = vmatprep.mubr.msk.f32.mxu1 %vm22164_vm5, %v19525_v28  ;;  %vm22170_vm12 = vnez %v22169_v47  ;;  %v22171_v28 = vld [vmem:[#allocation52_spill] sm:$0xff]  ;;  %v5270_v1 = vadd.f32 %v5261_v48, %v5104_v53 }
0x11a7   : > { %16659 = vmatprep.subr.msk.mxu1 %vm22166_vm13, %v22006_v5 }
0x11a8   : > { %16660 = vmatpush3.msk.msra.mxu1 %vm22166_vm13, %v22006_v5  ;;  %vm22172_vm13 = vnez %v22171_v28 }
0x11a9   : > { %16661 = vmatprep.subr.msk.mxu1 %vm22168_vm11, %v22006_v5 }
0x11aa   : > { %16662 = vmatpush3.msk.msra.mxu1 %vm22168_vm11, %v22006_v5  ;;  %vm22174_vm11 = vnez %v22173_v49 }
0x11ab   : > { %16663 = vmatprep.subr.msk.mxu1 %vm22170_vm12, %v22006_v5 }
0x11ac   : > { %16664 = vmatpush3.msk.msra.mxu1 %vm22170_vm12, %v22006_v5  ;;  %vm22176_vm12 = vnez %v22175_v46  ;;  %v5510_v46 = vpop.permute.xlu0 %5509 }
0x11ad   : > { %16666 = vmatmul.mubr.msk.f32.vlgmr.msra.gmra.mxu1 %vm22164_vm5, %v19539_v6  ;;  %16686 = vmatprep.subr.msk.mxu1 %vm22172_vm13, %v22006_v5  ;;  %v22177_v6 = vld [vmem:[#allocation58_spill] sm:$0xff] }
0x11ae   : > { %16687 = vmatpush3.msk.msra.mxu1 %vm22172_vm13, %v22006_v5  ;;  %vm22178_vm5 = vnez %v22177_v6 }
0x11af   : > { %16688 = vmatprep.subr.msk.mxu1 %vm22174_vm11, %v22006_v5 }
0x11b0   : > { %16689 = vmatpush3.msk.msra.mxu1 %vm22174_vm11, %v22006_v5  ;;  %vm22181_vm11 = vnez %v22180_v51  ;;  %v5611_v51 = vpop.permute.xlu1 %5610 }
0x11b1   : > { %16690 = vmatprep.subr.msk.mxu1 %vm22176_vm12, %v22006_v5 }
0x11b2   : > { %16691 = vmatpush3.msk.msra.mxu1 %vm22176_vm12, %v22006_v5  ;;  %vm22179_vm12 = vcmask 130048  }
0x11b3   : > { %16692 = vmatprep.subr.msk.mxu1 %vm22178_vm5, %v22006_v5 }
0x11b4   : > { %16693 = vmatpush3.msk.msra.mxu1 %vm22178_vm5, %v22006_v5  ;;  %vm22183_vm5 = vnez %v22182_v57 }
0x1265   : > { %v16656_v59 = vpop.f32.mrf.mxu1 }
0x1266   : > { %v5431_v45 = vadd.f32 %v16656_v59, %v5271_v16 }
0x1267   : > { %v5421_v49 = vpop.f32.mrf.mxu1 }
0x1268   : > { %v5430_v28 = vadd.f32 %v5421_v49, %v5270_v1  ;;  %v5604_v1 = vpop.permute.xlu0 %5603 }
0x126c   : > { %v5616_v59 = vpop.permute.xlu0 %5615 }
0x126d   : > { %v16667_v61 = vpop.f32.mrf.mxu1 }
0x126e   : > { %16668 = vmatprep.subr.mxu0 %v16667_v61 }
0x126f   : > { %v5498_v56 = vpop.f32.mrf.mxu1  ;;  %16669 = vmatpush3.msra.mxu0 %v16667_v61  ;;  %v22186_v61 = vld [vmem:[#allocation57_spill] sm:$0xff] }
0x1270   : > { %16670 = vmatprep.subr.mxu0 %v5498_v56 }
0x1271   : > { %16671 = vmatpush3.msra.mxu0 %v5498_v56  ;;  %v22184_v56 = vld [vmem:[#allocation55_spill] sm:$0xff] }
0x1272   : > { %16673 = vmatmul.mubr.msk.f32.vlgmr.msra.gmra.mxu0 %vm22179_vm12, %v5510_v46  ;;  %16675 = vmatprep.subr.msk.mxu0 %vm22181_vm11, %v22006_v5  ;;  %vm22185_vm13 = vnez %v22184_v56  ;;  %vm22187_vm12 = vnez %v22186_v61  ;;  %v5783_v61 = vpop.permute.xlu1 %5782 }
0x1273   : > { %16676 = vmatpush3.msk.msra.mxu0 %vm22181_vm11, %v22006_v5 }
0x1274   : > { %16677 = vmatprep.subr.msk.mxu0 %vm22183_vm5, %v22006_v5 }
0x1275   : > { %16678 = vmatpush3.msk.msra.mxu0 %vm22183_vm5, %v22006_v5 }
0x1276   : > { %16679 = vmatprep.subr.msk.mxu0 %vm22185_vm13, %v22006_v5 }
0x1277   : > { %16680 = vmatpush3.msk.msra.mxu0 %vm22185_vm13, %v22006_v5  ;;  %vm22188_vm13 = vcmask 261120  }
0x1278   : > { %16681 = vmatprep.subr.msk.mxu0 %vm22187_vm12, %v22006_v5 }
0x1279   : > { %16682 = vmatpush3.msk.msra.mxu0 %vm22187_vm12, %v22006_v5  ;;  %vm22189_vm12 = vmmov %vm22188_vm13 }
0x127a   : > { %vm22190_vm5 = vmmov %vm22189_vm12 }
0x127b   : > { %vm22191_vm11 = vmmov %vm22190_vm5 }
0x1332   : > { %v16674_v16 = vpop.f32.mrf.mxu0 }
0x1333   : > { %v5591_v48 = vadd.f32 %v16674_v16, %v5431_v45 }
0x1334   : > { %v5581_v49 = vpop.f32.mrf.mxu0 }
0x1335   : > { %v5607_v46 = vmul.f32 %v5604_v1, %v5591_v48  ;;  %v5590_v53 = vadd.f32 %v5581_v49, %v5430_v28 }
0x1337   : > { %v5606_v57 = vmul.f32 %v5599_v2, %v5590_v53  ;;  %v5619_v56 = vadd.f32 %v5616_v59, %v5607_v46 }
0x1339   : > { %v5618_v6 = vadd.f32 %v5611_v51, %v5606_v57  ;;  %v19711_v39 = vmax.f32 %v5619_v56, 0.0  ;;  %v5785_v57 = vpop.permute.xlu0 %5784  ;;  %v6020_v56 = vpop.permute.xlu1 %6019 }
0x133b   : > { %v19709_v54 = vmax.f32 %v5618_v6, 0.0 }
0x133d   : > { %16683 = vmatprep.mubr.msk.f32.mxu0 %vm22188_vm13, %v19709_v54  ;;  %16694 = vmatprep.mubr.msk.f32.mxu1 %vm22189_vm12, %v19709_v54  ;;  %vm22194_vm13 = vmmov %vm22192_vm1  ;;  %v6022_v49 = vpop.permute.xlu0 %6021 }
0x133e   : > { %16684 = vmatmul.mubr.msk.f32.vlgmr.msra.gmra.mxu0 %vm22190_vm5, %v19711_v39  ;;  %16695 = vmatmul.mubr.msk.f32.vlgmr.msra.gmra.mxu1 %vm22191_vm11, %v19711_v39  ;;  %vm22196_vm11 = vmmov %vm22192_vm1 }
0x133f   : > { %16701 = vmatprep.mubr.msk.f32.mxu0 %vm22192_vm1, %v5783_v61  ;;  %16708 = vmatprep.mubr.msk.f32.mxu1 %vm22193_vm15, %v19469_v31  ;;  %vm22195_vm15 = vmmov %vm22190_vm5 }
0x1340   : > { %vm22197_vm12 = vmmov %vm22192_vm1 }
0x13fe   : > { %v16685_v51 = vpop.f32.mrf.mxu0  ;;  %v16696_v45 = vpop.f32.mrf.mxu1 }
0x13ff   : > { %16697 = vmatprep.subr.mxu0 %v16696_v45  ;;  %16704 = vmatprep.subr.mxu1 %v16685_v51 }
0x1400   : > { %v5696_v28 = vpop.f32.mrf.mxu0  ;;  %v5771_v6 = vpop.f32.mrf.mxu1  ;;  %16698 = vmatpush3.msra.mxu0 %v16696_v45  ;;  %16705 = vmatpush3.msra.mxu1 %v16685_v51 }
0x1401   : > { %16699 = vmatprep.subr.mxu0 %v5771_v6  ;;  %16706 = vmatprep.subr.mxu1 %v5696_v28 }
0x1402   : > { %16700 = vmatpush3.msra.mxu0 %v5771_v6  ;;  %16707 = vmatpush3.msra.mxu1 %v5696_v28 }
0x1403   : > { %16702 = vmatmul.mubr.msk.f32.vlgmr.msra.gmra.mxu0 %vm22194_vm13, %v5785_v57  ;;  %16709 = vmatmul.mubr.msk.f32.vlgmr.msra.gmra.mxu1 %vm22192_vm1, %v19466_v44  ;;  %v6180_v44 = vpop.permute.xlu1 %6179  ;;  %vm22198_vm13 = vmmov %vm22192_vm1 }
0x1404   : > { %16711 = vmatprep.subr.msk.mxu0 %vm22069_vm10, %v22006_v5  ;;  %16719 = vmatprep.mubr.msk.f32.mxu0 %vm22195_vm15, %v19709_v54  ;;  %vm22199_vm1 = vmmov %vm22190_vm5 }
0x1405   : > { %16712 = vmatpush3.msk.msra.mxu0 %vm22069_vm10, %v22006_v5  ;;  %16726 = vmatprep.mubr.msk.f32.mxu1 %vm22196_vm11, %v6020_v56  ;;  %vm22200_vm15 = vmmov %vm22199_vm1 }
0x1406   : > { %16713 = vmatprep.subr.msk.mxu0 %vm22070_vm0, %v22006_v5 }
0x1407   : > { %16714 = vmatpush3.msk.msra.mxu0 %vm22070_vm0, %v22006_v5  ;;  %v6340_v46 = vpop.permute.xlu1 %6339 }
0x1408   : > { %16715 = vmatprep.subr.msk.mxu0 %vm22071_vm6, %v22006_v5 }
0x1409   : > { %16716 = vmatpush3.msk.msra.mxu0 %vm22071_vm6, %v22006_v5 }
0x140a   : > { %16717 = vmatprep.subr.msk.mxu0 %vm22072_vm7, %v22006_v5 }
0x140b   : > { %16718 = vmatpush3.msk.msra.mxu0 %vm22072_vm7, %v22006_v5 }
0x140c   : > { %16720 = vmatmul.mubr.msk.f32.vlgmr.msra.gmra.mxu0 %vm22190_vm5, %v19711_v39  ;;  %vm22201_vm5 = vmmov %vm22196_vm11 }
0x140d   : > { %16744 = vmatprep.mubr.msk.f32.mxu0 %vm22197_vm12, %v6180_v44  ;;  %v6182_v44 = vpop.permute.xlu0 %6181  ;;  %vm22202_vm12 = vmmov %vm22199_vm1 }
0x14c3   : > { %v16703_v31 = vpop.f32.mrf.mxu0  ;;  %v16710_v61 = vpop.f32.mrf.mxu1 }
0x14c4   : > { %v5941_v1 = vadd.f32 %v16710_v61, %v16703_v31 }
0x14c5   : > { %v5856_v2 = vpop.f32.mrf.mxu0  ;;  %v5935_v53 = vpop.f32.mrf.mxu1 }
0x14c6   : > { %v5936_v51 = vadd.f32 %v5935_v53, %v5856_v2 }
0x14cc   : > { %v16721_v16 = vpop.f32.mrf.mxu0 }
0x14cd   : > { %16722 = vmatprep.subr.mxu1 %v16721_v16 }
0x14ce   : > { %v6010_v48 = vpop.f32.mrf.mxu0  ;;  %16723 = vmatpush3.msra.mxu1 %v16721_v16 }
0x14cf   : > { %16724 = vmatprep.subr.mxu1 %v6010_v48 }
0x14d0   : > { %16725 = vmatpush3.msra.mxu1 %v6010_v48  ;;  %v6342_v48 = vpop.permute.xlu0 %6341 }
0x14d1   : > { %16727 = vmatmul.mubr.msk.f32.vlgmr.msra.gmra.mxu1 %vm22198_vm13, %v6022_v49  ;;  %16729 = vmatprep.subr.msk.mxu1 %vm22081_vm3, %v22006_v5  ;;  %vm22203_vm13 = vnez %v22094_v42 }
0x14d2   : > { %16730 = vmatpush3.msk.msra.mxu1 %vm22081_vm3, %v22006_v5  ;;  %16737 = vmatprep.mubr.msk.f32.mxu1 %vm22199_vm1, %v19709_v54  ;;  %vm22204_vm1 = vnez %v22097_v13 }
0x14d3   : > { %16731 = vmatprep.subr.msk.mxu1 %vm22082_vm2, %v22006_v5 }
0x14d4   : > { %16732 = vmatpush3.msk.msra.mxu1 %vm22082_vm2, %v22006_v5 }
0x14d5   : > { %16733 = vmatprep.subr.msk.mxu1 %vm22083_vm8, %v22006_v5 }
0x14d6   : > { %16734 = vmatpush3.msk.msra.mxu1 %vm22083_vm8, %v22006_v5 }
0x14d7   : > { %16735 = vmatprep.subr.msk.mxu1 %vm22085_vm4, %v22006_v5 }
0x14d8   : > { %16736 = vmatpush3.msk.msra.mxu1 %vm22085_vm4, %v22006_v5 }
0x14d9   : > { %16738 = vmatmul.mubr.msk.f32.vlgmr.msra.gmra.mxu1 %vm22200_vm15, %v19711_v39  ;;  %vm22205_vm15 = vnez %v22100_v14 }
0x14da   : > { %16762 = vmatprep.mubr.msk.f32.mxu1 %vm22196_vm11, %v6340_v46  ;;  %vm22206_vm11 = vmmov %vm22202_vm12  ;;  %v6434_v46 = vpop.permute.xlu1 %6433 }
0x1591   : > { %v16728_v59 = vpop.f32.mrf.mxu1 }
0x1592   : > { %v6103_v45 = vadd.f32 %v16728_v59, %v5941_v1 }
0x1593   : > { %v6093_v28 = vpop.f32.mrf.mxu1 }
0x1594   : > { %v6102_v6 = vadd.f32 %v6093_v28, %v5936_v51 }
0x1599   : > { %v16739_v57 = vpop.f32.mrf.mxu1 }
0x159a   : > { %16740 = vmatprep.subr.mxu0 %v16739_v57 }
0x159b   : > { %v6170_v56 = vpop.f32.mrf.mxu1  ;;  %16741 = vmatpush3.msra.mxu0 %v16739_v57 }
0x159c   : > { %16742 = vmatprep.subr.mxu0 %v6170_v56 }
0x159d   : > { %16743 = vmatpush3.msra.mxu0 %v6170_v56  ;;  %v6634_v56 = vld [vmem:[%s19830_s21] sm:$0xff] }
0x159e   : > { %16745 = vmatmul.mubr.msk.f32.vlgmr.msra.gmra.mxu0 %vm22201_vm5, %v6182_v44  ;;  %16747 = vmatprep.subr.msk.mxu0 %vm19262_vm14, %v22006_v5  ;;  %v6636_v44 = vld [vmem:[%s19835_s17] sm:$0xff] }
0x159f   : > { %16748 = vmatpush3.msk.msra.mxu0 %vm19262_vm14, %v22006_v5  ;;  %16755 = vmatprep.mubr.msk.f32.mxu0 %vm22202_vm12, %v19709_v54  ;;  %vm22208_vm12 = vmmov 0   ;;  %vm22258_vm14 = vnez %v21900_v21 }
0x15a0   : > { %16749 = vmatprep.subr.msk.mxu0 %vm22203_vm13, %v22006_v5 }
0x15a1   : > { %16750 = vmatpush3.msk.msra.mxu0 %vm22203_vm13, %v22006_v5  ;;  %vm22257_vm13 = vnez %v21898_v20 }
0x15a2   : > { %16751 = vmatprep.subr.msk.mxu0 %vm22204_vm1, %v22006_v5 }
0x15a3   : > { %16752 = vmatpush3.msk.msra.mxu0 %vm22204_vm1, %v22006_v5 }
0x15a4   : > { %16753 = vmatprep.subr.msk.mxu0 %vm22205_vm15, %v22006_v5 }
0x15a5   : > { %16754 = vmatpush3.msk.msra.mxu0 %vm22205_vm15, %v22006_v5 }
0x15a6   : > { %16756 = vmatmul.mubr.msk.f32.vlgmr.msra.gmra.mxu0 %vm22206_vm11, %v19711_v39  ;;  %vm22210_vm11 = vmmov %vm22201_vm5 }
0x165e   : > { %v16746_v54 = vpop.f32.mrf.mxu0 }
0x165f   : > { %v6263_v31 = vadd.f32 %v16746_v54, %v6103_v45  ;;  %v6429_v45 = vpop.permute.xlu0 %6428  ;;  %v6635_v54 = vld [vmem:[%s19830_s21 + $0x8] sm:$0xff]  ;;  %s22216_s21 = smov 104  }
0x1660   : > { %v6253_v61 = vpop.f32.mrf.mxu0 }
0x1661   : > { %v6262_v1 = vadd.f32 %v6253_v61, %v6102_v6  ;;  %v8716_v61 = vld [vmem:[%s18423_s10] sm:$0xff]  ;;  %s22219_s10 = sshll.u32 %s22569_s16, 2 }
0x1666   : > { %v16757_v2 = vpop.f32.mrf.mxu0 }
0x1667   : > { %16758 = vmatprep.subr.mxu1 %v16757_v2 }
0x1668   : > { %v6330_v16 = vpop.f32.mrf.mxu0  ;;  %16759 = vmatpush3.msra.mxu1 %v16757_v2  ;;  %v9741_v2 = vld [vmem:[%s18455_s0] sm:$0xff] }
0x1669   : > { %16760 = vmatprep.subr.mxu1 %v6330_v16 }
0x166a   : > { %16761 = vmatpush3.msra.mxu1 %v6330_v16  ;;  %v9743_v16 = vld [vmem:[%s18465_s1] sm:$0xff] }
0x166b   : > { %16763 = vmatmul.mubr.msk.f32.vlgmr.msra.gmra.mxu1 %vm22201_vm5, %v6342_v48  ;;  %16765 = vmatprep.subr.mxu1 %v22005_v3  ;;  %v9771_v48 = vld [vmem:[%s18471_s22] sm:$0xff] }
0x166c   : > { %16769 = vmatprep.mubr.msk.f32.mxu1 %vm22208_vm12, %v22005_v3 }
0x172b   : > { %v16764_v39 = vpop.f32.mrf.mxu1 }
0x172c   : > { %v6423_v49 = vadd.f32 %v16764_v39, %v6263_v31  ;;  %v19840_v31 = vld [vmem:[%s18116_s23] sm:$0xff]  ;;  %v10574_v39 = vld [vmem:[%s18525_s28 + $0x8] sm:$0xff]  ;;  %s22218_s23 = sld [smem:[#allocation27_spill]] }
0x172d   : > { %v6413_v53 = vpop.f32.mrf.mxu1 }
0x172e   : > { %v6422_v59 = vadd.f32 %v6413_v53, %v6262_v1  ;;  %v19820_v51 = vadd.f32 %v6434_v46, %v6423_v49  ;;  %v8970_v1 = vld [vmem:[%s18433_s18] sm:$0xff] }
0x1730   : > { %v6444_v28 = vsel %vm22210_vm11, %v19820_v51, 0.0  ;;  %v19824_v6 = vadd.f32 %v6429_v45, %v6422_v59  ;;  %vm22221_vm11 = vmmov %vm22201_vm5 }
0x1731   : > { %6445 = vadd.xlane.f32.xlu1 %v6444_v28 }
0x1732   : > { %v6441_v57 = vsel %vm22201_vm5, %v19824_v6, 0.0  ;;  %vm22222_vm5 = vcmask 31744  }
0x1733   : > { %6442 = vadd.xlane.f32.xlu0 %v6441_v57  ;;  %vm22227_vm1 = vmmov %vm22222_vm5 }
0x1742   : > { %6640 = vperm.xlu1 %17705, %v6634_v56  }
0x1746   : > { %6652 = vperm.xlu1 %17705, %v6636_v44  }
0x174a   : > { %6645 = vperm.xlu1 %17705, %v6635_v54  }
0x174e   : > { %8120 = vrot.lane.b32.xlu1 %v19840_v31, %s22212_s15  ;;  %s22217_s15 = sld [smem:[#allocation23_spill]] }
0x1752   : > { %8490 = vrot.lane.b32.xlu1 %v19840_v31, %s22213_s19  ;;  %s19863_s19 = scalar_lea.vmem %s22215_s29, %s22219_s10  ;;  %s1421_s10 = scalar_lea.vmem %s22218_s23, %s22569_s16 }
0x1753   : > { %22220 = sst [smem:[#allocation69_spill]] %s19863_s19  ;;  %v6438_v45 = vld [vmem:[%s19863_s19] sm:$0xf]  ;;  %s19881_s19 = scalar_lea.vmem %s17934_s20, %s18419_s7 }
0x1754   : > { %s19873_s29 = scalar_lea.vmem %s22217_s15, %s18419_s7  ;;  %v14589_v57 = vld [vmem:[%s1421_s10] ss:$0 sm:$0xff]  ;;  %s15368_s7 = sshll.u32 %s22569_s16, 8 }
0x1755   : > { %v6439_v28 = vld [vmem:[%s19873_s29] sm:$0xff]  ;;  %s19907_s15 = scalar_lea.vmem %s17939_s27, %s15368_s7 }
0x1756   : > { %8720 = vperm.xlu1 %17705, %v8716_v61   ;;  %16774 = vmatprep.mubr.msk.f32.mxu0 %vm22222_vm5, %v6439_v28  ;;  %v6440_v61 = vld [vmem:[%s19873_s29 + $0x8] sm:$0xff]  ;;  %vm22228_vm5 = vcmask 130048  }
0x175a   : > { %9114 = vrot.lane.b32.xlu1 %v8970_v1, %s22214_s3 }
0x175e   : > { %9346 = vrot.lane.b32.xlu1 %v8970_v1, %s22117_s4 }
0x1762   : > { %9501 = vrot.lane.b32.xlu1 %v8970_v1, %s22216_s21 }
0x1766   : > { %9656 = vrot.lane.b32.xlu1 %v8970_v1, %s22119_s9  ;;  %v22223_v1 = vld [vmem:[#allocation32_spill] sm:$0xff] }
0x176a   : > { %9747 = vperm.xlu1 %17705, %v9741_v2   ;;  %v19885_v2 = vadd.f32 %v14589_v57, %v22223_v1 }
0x176c   : > { %22224 = vst [vmem:[#allocation34_spill] sm:$0xff] %v19885_v2 }
0x176e   : > { %9759 = vperm.xlu1 %17705, %v9743_v16   ;;  %v6665_v16 = vld [vmem:[%s19881_s19 + $0x8] sm:$0xff] }
0x1772   : > { %9931 = vrot.lane.b32.xlu1 %v9771_v48, %s22117_s4 }
0x1776   : > { %10168 = vrot.lane.b32.xlu1 %v9771_v48, %s22119_s9 }
0x177a   : > { %10328 = vrot.lane.b32.xlu1 %v9771_v48, %s22120_s25 }
0x177e   : > { %10488 = vrot.lane.b32.xlu1 %v9771_v48, %s22122_s30  ;;  %v6664_v48 = vld [vmem:[%s19881_s19] sm:$0xff] }
0x1782   : > { %10582 = vperm.xlu1 %17705, %v10574_v39   ;;  %v21814_v39 = vmax.f32 %v19885_v2, 0.0 }
0x17ba   : > { %v6446_v49 = vpop.xlane.xlu1 %6445 }
0x17bb   : > { %v6449_v46 = vmul.f32 0.0625, %v6446_v49 }
0x17bc   : > { %v6443_v53 = vpop.xlane.xlu0 %6442 }
0x17bd   : > { %v6448_v59 = vmul.f32 0.0625, %v6443_v53  ;;  %16766 = vmatpush3.msra.mxu1 %v6449_v46 }
0x17be   : > { %16767 = vmatprep.subr.mxu1 %v22005_v3 }
0x17bf   : > { %16768 = vmatpush3.msra.mxu1 %v6448_v59 }
0x17c0   : > { %16770 = vmatmul.mubr.msk.f32.vlgmr.msra.gmra.mxu1 %vm22221_vm11, %v6438_v45  ;;  %16777 = vmatprep.subr.mxu1 %v22005_v3  ;;  %vm22225_vm11 = vcmask 1043456  }
0x17c1   : > { %16781 = vmatprep.mubr.msk.f32.mxu1 %vm22208_vm12, %v22005_v3  ;;  %vm22226_vm15 = vmmov %vm22225_vm11 }
0x1880   : > { %v6519_v56 = vpop.f32.mrf.mxu1 }
0x1881   : > { %v6523_v44 = vmax.f32 %v6519_v56, 0.0 }
0x1882   : > { %v16771_v54 = vpop.f32.mrf.mxu1 }
0x1883   : > { %16772 = vmatprep.subr.msk.mxu0 %vm22225_vm11, %v6523_v44 }
0x1884   : > { %16773 = vmatpush3.msk.msra.mxu0 %vm22226_vm15, %v6523_v44 }
0x1885   : > { %16775 = vmatmul.mubr.msk.f32.vlgmr.msra.gmra.mxu0 %vm22227_vm1, %v6440_v61  ;;  %16784 = vmatprep.subr.mxu0 %v22005_v3  ;;  %vm22230_vm1 = vmmov %vm22228_vm5 }
0x1886   : > { %16785 = vmatpush3.msra.mxu0 %v6665_v16  ;;  %16788 = vmatprep.mubr.msk.f32.mxu0 %vm22208_vm12, %v22005_v3  ;;  %vm22231_vm15 = vmmov %vm22230_vm1 }
0x1887   : > { %16786 = vmatprep.subr.mxu0 %v22005_v3  ;;  %vm22232_vm11 = vmmov %vm22230_vm1 }
0x1888   : > { %16787 = vmatpush3.msra.mxu0 %v6664_v48  ;;  %v6667_v48 = vld [vmem:[%s19907_s15 + $0x8] sm:$0xff] }
0x1889   : > { %16789 = vmatmul.mubr.msk.f32.vlgmr.msra.gmra.mxu0 %vm22228_vm5, %v21814_v39  ;;  %16798 = vmatprep.subr.mxu0 %v22005_v3  ;;  %vm22234_vm5 = vmmov %vm22230_vm1 }
0x188a   : > { %16802 = vmatprep.mubr.msk.f32.mxu0 %vm22208_vm12, %v22005_v3  ;;  %16778 = vmatpush3.msra.mxu1 %v6667_v48 }
0x188b   : > { %16779 = vmatprep.subr.mxu1 %v22005_v3 }
0x1945   : > { %v16776_v49 = vpop.f32.mrf.mxu0 }
0x1946   : > { %v6609_v46 = vsub.f32 0.0, %v16776_v49 }
0x1947   : > { %v6599_v53 = vpop.f32.mrf.mxu0 }
0x1948   : > { %v6612_v59 = vmul.f32 1.442695, %v6609_v46  ;;  %v6608_v45 = vsub.f32 0.0, %v6599_v53  ;;  %v6666_v46 = vld [vmem:[%s19907_s15] sm:$0xff]  ;;  %v14968_v53 = vld [vmem:[%s19907_s15 + $0x28] sm:$0xff] }
0x1949   : > { %v19903_v28 = vpop.f32.mrf.mxu0  ;;  %16780 = vmatpush3.msra.mxu1 %v6666_v46  ;;  %16799 = vmatpush3.msra.mxu0 %v14968_v53 }
0x194a   : > { %v6610_v57 = vmul.f32 1.442695, %v6608_v45  ;;  %17714 = vpow2.f32 %v6612_v59  ;;  %v6637_v59 = vld [vmem:[%s19835_s17 + $0x8] sm:$0xff]  ;;  %16791 = vmatprep.subr.mxu1 %v22005_v3  ;;  %16800 = vmatprep.subr.mxu0 %v22005_v3  ;;  %v14967_v45 = vld [vmem:[%s19907_s15 + $0x20] sm:$0xff] }
0x194b   : > { %v16790_v56 = vpop.f32.mrf.mxu0  ;;  %16801 = vmatpush3.msra.mxu0 %v14967_v45 }
0x194c   : > { %17716 = vpow2.f32 %v6610_v57  ;;  %16812 = vmatprep.subr.mxu0 %v22005_v3  ;;  %v8717_v57 = vld [vmem:[%s18427_s11] sm:$0xff]  ;;  %v19924_v56 = vld [vmem:[%s18433_s18 + $0x8] sm:$0xff] }
0x194d   : > { %22229 = vst [vmem:[#allocation35_spill] sm:$0xff] %v19924_v56 }
0x1957   : > { %v17715_v44 = vpop.eup %17714 }
0x1958   : > { %v6615_v1 = vadd.f32 1.0, %v17715_v44  ;;  %v9742_v44 = vld [vmem:[%s18455_s0 + $0x8] sm:$0xff]  ;;  %s20159_s0 = scalar_lea.vmem %s17944_s24, %s22569_s16 }
0x1959   : > { %v17717_v54 = vpop.eup %17716 }
0x195a   : > { %v6614_v61 = vadd.f32 1.0, %v17717_v54  ;;  %v9744_v54 = vld [vmem:[%s18465_s1 + $0x8] sm:$0xff] }
0x195c   : > { %17718 = vrcp.f32 %v6614_v61  ;;  %v9772_v61 = vld [vmem:[%s18471_s22 + $0x8] sm:$0xff] }
0x195d   : > { %17720 = vrcp.f32 %v6615_v1  ;;  %v10573_v1 = vld [vmem:[%s18525_s28] sm:$0xff]  ;;  %s22262_s28 = sshll.u32 %s22569_s16, 1  ;;  %s22460_s16 = sld [smem:[#allocation65_spill]] }
0x195e   : > { %s20165_s1 = scalar_lea.vmem %s17949_s12, %s22262_s28 }
0x1969   : > { %v17719_v16 = vpop.eup %17718 }
0x196a   : > { %6622 = vperm.xlu0 %17704, %v17719_v16   ;;  %v17721_v49 = vpop.eup %17720  ;;  %v6641_v16 = vpop.permute.xlu1 %6640 }
0x196e   : > { %6627 = vperm.xlu0 %17704, %v17721_v49   ;;  %v4758_v49 = vmax.f32 %v19564_v11, %v19566_v43  ;;  %v6653_v45 = vpop.permute.xlu1 %6652  ;;  %v14974_v11 = vld [vmem:[%s19907_s15 + $0x48] sm:$0xff] }
0x1972   : > { %6657 = vperm.xlu0 %17704, %v6637_v59  }
0x1976   : > { %8342 = vrot.lane.b32.xlu0 %v19840_v31, %s22214_s3 }
0x197a   : > { %8638 = vrot.lane.b32.xlu0 %v19840_v31, %s22117_s4 }
0x197e   : > { %8726 = vperm.xlu0 %17704, %v8717_v57  }
0x1982   : > { %9116 = vrot.lane.b32.xlu0 %v19924_v56, %s22214_s3 }
0x1986   : > { %9348 = vrot.lane.b32.xlu0 %v19924_v56, %s22117_s4 }
0x198a   : > { %9503 = vrot.lane.b32.xlu0 %v19924_v56, %s22216_s21 }
0x198e   : > { %9658 = vrot.lane.b32.xlu0 %v19924_v56, %s22119_s9 }
0x1992   : > { %9752 = vperm.xlu0 %17704, %v9742_v44  }
0x1996   : > { %9764 = vperm.xlu0 %17704, %v9744_v54   ;;  %v14965_v54 = vld [vmem:[%s19907_s15 + $0x18] sm:$0xff] }
0x199a   : > { %9933 = vrot.lane.b32.xlu0 %v9772_v61, %s22117_s4 }
0x199e   : > { %10170 = vrot.lane.b32.xlu0 %v9772_v61, %s22119_s9 }
0x19a2   : > { %10330 = vrot.lane.b32.xlu0 %v9772_v61, %s22120_s25 }
0x19a6   : > { %10490 = vrot.lane.b32.xlu0 %v9772_v61, %s22122_s30 }
0x19aa   : > { %10577 = vperm.xlu0 %17704, %v10573_v1   ;;  %v14964_v1 = vld [vmem:[%s19907_s15 + $0x10] sm:$0xff] }
0x19e5   : > { %v6623_v48 = vpop.permute.xlu0 %6622 }
0x19e6   : > { %v6630_v46 = vmul.f32 %v6623_v48, %v19824_v6  ;;  %v14973_v48 = vld [vmem:[%s19907_s15 + $0x40] sm:$0xff] }
0x19e8   : > { %v6632_v53 = vadd.f32 %v6630_v46, %v4758_v49  ;;  %v14970_v49 = vld [vmem:[%s19907_s15 + $0x30] sm:$0xff] }
0x19e9   : > { %v6628_v61 = vpop.permute.xlu0 %6627 }
0x19ea   : > { %v6648_v59 = vmul.f32 %v6641_v16, %v6632_v53  ;;  %v6631_v43 = vmul.f32 %v6628_v61, %v19820_v51  ;;  %v14971_v16 = vld [vmem:[%s19907_s15 + $0x38] sm:$0xff]  ;;  %v22233_v51 = vmax.f32 %v19558_v0, %v19560_v8  ;;  %v14980_v53 = vld [vmem:[%s19907_s15 + $0x68] sm:$0xff]  ;;  %v6646_v0 = vpop.permute.xlu1 %6645  ;;  %v14979_v8 = vld [vmem:[%s19907_s15 + $0x60] sm:$0xff] }
0x19ec   : > { %v6660_v57 = vadd.f32 %v6653_v45, %v6648_v59  ;;  %v14977_v45 = vld [vmem:[%s19907_s15 + $0x58] sm:$0xff] }
0x19ee   : > { %v19945_v44 = vmax.f32 %v6660_v57, 0.0 }
0x19f0   : > { %16782 = vmatmul.mubr.msk.f32.vlgmr.msra.gmra.mxu1 %vm22230_vm1, %v19945_v44  ;;  %v6894_v39 = vrot.slane %v19945_v44, 2  ;;  %v6817_v6 = vrot.slane %v19945_v44, 1  ;;  %v7048_v46 = vrot.slane %v19945_v44, 4  ;;  %v6971_v59 = vrot.slane %v19945_v44, 3 }
0x19f1   : > { %16792 = vmatpush3.msra.mxu1 %v14965_v54  ;;  %16795 = vmatprep.mubr.msk.f32.mxu1 %vm22208_vm12, %v22005_v3  ;;  %v14976_v54 = vld [vmem:[%s19907_s15 + $0x50] sm:$0xff]  ;;  %v7202_v61 = vrot.slane %v19945_v44, 6 }
0x19f2   : > { %16793 = vmatprep.subr.mxu1 %v22005_v3  ;;  %16803 = vmatmul.mubr.msk.f32.vlgmr.msra.gmra.mxu0 %vm22231_vm15, %v6894_v39  ;;  %v6633_v39 = vadd.f32 %v6631_v43, %v22233_v51  ;;  %vm22235_vm15 = vmmov %vm22230_vm1 }
0x19f3   : > { %16794 = vmatpush3.msra.mxu1 %v14964_v1  ;;  %16813 = vmatpush3.msra.mxu0 %v14974_v11  ;;  %v6658_v1 = vpop.permute.xlu0 %6657  ;;  %v14986_v11 = vld [vmem:[%s19907_s15 + $0x88] sm:$0xff] }
0x19f4   : > { %16805 = vmatprep.subr.mxu1 %v22005_v3  ;;  %16796 = vmatmul.mubr.msk.f32.vlgmr.msra.gmra.mxu1 %vm22232_vm11, %v6817_v6  ;;  %v6649_v57 = vmul.f32 %v6646_v0, %v6633_v39  ;;  %v7125_v6 = vrot.slane %v19945_v44, 5  ;;  %vm22236_vm11 = vmmov %vm22230_vm1  ;;  %v14992_v39 = vld [vmem:[%s19907_s15 + $0xa8] sm:$0xff] }
0x19f5   : > { %16806 = vmatpush3.msra.mxu1 %v14971_v16  ;;  %16814 = vmatprep.subr.mxu0 %v22005_v3  ;;  %v14983_v16 = vld [vmem:[%s19907_s15 + $0x78] sm:$0xff]  ;;  %v14998_v0 = vld [vmem:[%s19907_s15 + $0xc8] sm:$0xff] }
0x19f6   : > { %16807 = vmatprep.subr.mxu1 %v22005_v3  ;;  %16815 = vmatpush3.msra.mxu0 %v14973_v48  ;;  %v6661_v43 = vadd.f32 %v6658_v1, %v6649_v57  ;;  %v14985_v48 = vld [vmem:[%s19907_s15 + $0x80] sm:$0xff]  ;;  %v14995_v57 = vld [vmem:[%s19907_s15 + $0xb8] sm:$0xff] }
0x19f7   : > { %16816 = vmatprep.mubr.msk.f32.mxu0 %vm22208_vm12, %v22005_v3  ;;  %16808 = vmatpush3.msra.mxu1 %v14970_v49  ;;  %v14982_v49 = vld [vmem:[%s19907_s15 + $0x70] sm:$0xff] }
0x19f8   : > { %16817 = vmatmul.mubr.msk.f32.vlgmr.msra.gmra.mxu0 %vm22234_vm5, %v7048_v46  ;;  %16826 = vmatprep.subr.mxu0 %v22005_v3  ;;  %v20000_v51 = vmax.f32 %v6661_v43, 0.0  ;;  %vm22237_vm5 = vmmov %vm22230_vm1  ;;  %v7279_v46 = vrot.slane %v19945_v44, 7 }
0x19f9   : > { %16809 = vmatprep.mubr.msk.f32.mxu1 %vm22208_vm12, %v22005_v3  ;;  %16819 = vmatprep.subr.mxu1 %v22005_v3 }
0x19fa   : > { %16827 = vmatpush3.msra.mxu0 %v14980_v53  ;;  %16810 = vmatmul.mubr.msk.f32.vlgmr.msra.gmra.mxu1 %vm22230_vm1, %v6971_v59  ;;  %v14989_v53 = vld [vmem:[%s19907_s15 + $0x98] sm:$0xff]  ;;  %v14991_v59 = vld [vmem:[%s19907_s15 + $0xa0] sm:$0xff]  ;;  %v7510_v44 = vrot.slane %v20000_v51, 2  ;;  %v7664_v1 = vrot.slane %v20000_v51, 4  ;;  %v7587_v43 = vrot.slane %v20000_v51, 3 }
0x19fb   : > { %16820 = vmatpush3.msra.mxu1 %v14977_v45  ;;  %16828 = vmatprep.subr.mxu0 %v22005_v3  ;;  %v14988_v45 = vld [vmem:[%s19907_s15 + $0x90] sm:$0xff] }
0x19fc   : > { %16821 = vmatprep.subr.mxu1 %v22005_v3  ;;  %16829 = vmatpush3.msra.mxu0 %v14979_v8  ;;  %v7433_v8 = vrot.slane %v20000_v51, 1 }
0x19fd   : > { %16830 = vmatprep.mubr.msk.f32.mxu0 %vm22208_vm12, %v22005_v3  ;;  %16822 = vmatpush3.msra.mxu1 %v14976_v54  ;;  %v14997_v54 = vld [vmem:[%s19907_s15 + $0xc0] sm:$0xff] }
0x19fe   : > { %16831 = vmatmul.mubr.msk.f32.vlgmr.msra.gmra.mxu0 %vm22235_vm15, %v7202_v61  ;;  %16840 = vmatprep.subr.mxu0 %v22005_v3  ;;  %vm22238_vm15 = vmmov %vm22230_vm1  ;;  %v14994_v61 = vld [vmem:[%s19907_s15 + $0xb0] sm:$0xff] }
0x19ff   : > { %16823 = vmatprep.mubr.msk.f32.mxu1 %vm22208_vm12, %v22005_v3  ;;  %16833 = vmatprep.subr.mxu1 %v22005_v3 }
0x1a00   : > { %16841 = vmatpush3.msra.mxu0 %v14986_v11  ;;  %16824 = vmatmul.mubr.msk.f32.vlgmr.msra.gmra.mxu1 %vm22236_vm11, %v7125_v6  ;;  %vm22239_vm11 = vmmov %vm22230_vm1  ;;  %v15004_v11 = vld [vmem:[%s19907_s15 + $0xe8] sm:$0xff]  ;;  %v15001_v6 = vld [vmem:[%s19907_s15 + $0xd8] sm:$0xff] }
0x1a01   : > { %16834 = vmatpush3.msra.mxu1 %v14983_v16  ;;  %16842 = vmatprep.subr.mxu0 %v22005_v3  ;;  %v15003_v16 = vld [vmem:[%s19907_s15 + $0xe0] sm:$0xff] }
0x1a02   : > { %16835 = vmatprep.subr.mxu1 %v22005_v3  ;;  %16843 = vmatpush3.msra.mxu0 %v14985_v48  ;;  %v15000_v48 = vld [vmem:[%s19907_s15 + $0xd0] sm:$0xff] }
0x1a03   : > { %16844 = vmatprep.mubr.msk.f32.mxu0 %vm22208_vm12, %v22005_v3  ;;  %16836 = vmatpush3.msra.mxu1 %v14982_v49  ;;  %v7818_v49 = vrot.slane %v20000_v51, 6 }
0x1a04   : > { %16845 = vmatmul.mubr.msk.f32.vlgmr.msra.gmra.mxu0 %vm22237_vm5, %v20000_v51  ;;  %16854 = vmatprep.subr.mxu0 %v22005_v3  ;;  %vm22240_vm5 = vmmov %vm22230_vm1 }
0x1a05   : > { %16837 = vmatprep.mubr.msk.f32.mxu1 %vm22208_vm12, %v22005_v3  ;;  %16847 = vmatprep.subr.mxu1 %v22005_v3 }
0x1a06   : > { %16855 = vmatpush3.msra.mxu0 %v14992_v39  ;;  %16838 = vmatmul.mubr.msk.f32.vlgmr.msra.gmra.mxu1 %vm22230_vm1, %v7279_v46  ;;  %v7741_v39 = vrot.slane %v20000_v51, 5  ;;  %v15007_v46 = vld [vmem:[%s19907_s15 + $0xf8] sm:$0xff] }
0x1a07   : > { %16848 = vmatpush3.msra.mxu1 %v14989_v53  ;;  %16856 = vmatprep.subr.mxu0 %v22005_v3  ;;  %v15006_v53 = vld [vmem:[%s19907_s15 + $0xf0] sm:$0xff] }
0x1a08   : > { %16849 = vmatprep.subr.mxu1 %v22005_v3  ;;  %16857 = vmatpush3.msra.mxu0 %v14991_v59  ;;  %v7895_v59 = vrot.slane %v20000_v51, 7  ;;  %v20133_v51 = vld [vmem:[%s17799_s5 + $0x4] sm:$0xf] }
0x1a09   : > { %16858 = vmatprep.mubr.msk.f32.mxu0 %vm22208_vm12, %v22005_v3  ;;  %16850 = vmatpush3.msra.mxu1 %v14988_v45  ;;  %v22243_v45 = vld [vmem:[#allocation31_spill] sm:$0xff] }
0x1a0a   : > { %16859 = vmatmul.mubr.msk.f32.vlgmr.msra.gmra.mxu0 %vm22238_vm15, %v7510_v44  ;;  %16868 = vmatprep.subr.mxu0 %v22005_v3  ;;  %vm22241_vm15 = vmmov %vm22230_vm1  ;;  %v22245_v44 = vld [vmem:[#allocation30_spill] sm:$0xff] }
0x1a0b   : > { %16851 = vmatprep.mubr.msk.f32.mxu1 %vm22208_vm12, %v22005_v3  ;;  %16861 = vmatprep.subr.mxu1 %v22005_v3 }
0x1a0c   : > { %16869 = vmatpush3.msra.mxu0 %v14998_v0  ;;  %16852 = vmatmul.mubr.msk.f32.vlgmr.msra.gmra.mxu1 %vm22239_vm11, %v7433_v8  ;;  %vm22242_vm11 = vmmov %vm22230_vm1 }
0x1a0d   : > { %16862 = vmatpush3.msra.mxu1 %v14995_v57  ;;  %16870 = vmatprep.subr.mxu0 %v22005_v3 }
0x1a0e   : > { %16863 = vmatprep.subr.mxu1 %v22005_v3  ;;  %16871 = vmatpush3.msra.mxu0 %v14997_v54 }
0x1a0f   : > { %16872 = vmatprep.mubr.msk.f32.mxu0 %vm22208_vm12, %v22005_v3  ;;  %16864 = vmatpush3.msra.mxu1 %v14994_v61 }
0x1a10   : > { %16873 = vmatmul.mubr.msk.f32.vlgmr.msra.gmra.mxu0 %vm22240_vm5, %v7664_v1  ;;  %16882 = vmatprep.subr.mxu0 %v22005_v3  ;;  %vm22244_vm5 = vcmp.eq.s32.totalorder %v17973_v4, %v22243_v45 }
0x1a11   : > { %16865 = vmatprep.mubr.msk.f32.mxu1 %vm22208_vm12, %v22005_v3  ;;  %16875 = vmatprep.subr.mxu1 %v22005_v3 }
0x1a12   : > { %16883 = vmatpush3.msra.mxu0 %v15004_v11  ;;  %16866 = vmatmul.mubr.msk.f32.vlgmr.msra.gmra.mxu1 %vm22230_vm1, %v7587_v43 }
0x1a13   : > { %16876 = vmatpush3.msra.mxu1 %v15001_v6  ;;  %16884 = vmatprep.subr.mxu0 %v22005_v3 }
0x1a14   : > { %16877 = vmatprep.subr.mxu1 %v22005_v3  ;;  %16885 = vmatpush3.msra.mxu0 %v15003_v16 }
0x1a15   : > { %16886 = vmatprep.mubr.msk.f32.mxu0 %vm22208_vm12, %v22005_v3  ;;  %16878 = vmatpush3.msra.mxu1 %v15000_v48 }
0x1a16   : > { %16887 = vmatmul.mubr.msk.f32.vlgmr.msra.gmra.mxu0 %vm22241_vm15, %v7818_v49  ;;  %16879 = vmatprep.mubr.msk.f32.mxu1 %vm22208_vm12, %v22005_v3  ;;  %vm22246_vm15 = vcmp.eq.s32.totalorder %v17973_v4, %v22245_v44 }
0x1a17   : > { %16889 = vmatprep.subr.mxu1 %v22005_v3  ;;  %16880 = vmatmul.mubr.msk.f32.vlgmr.msra.gmra.mxu1 %vm22242_vm11, %v7741_v39  ;;  %vm22247_vm11 = vcmp.eq.s32.totalorder %v17982_v7, %v22243_v45 }
0x1a18   : > { %16890 = vmatpush3.msra.mxu1 %v15007_v46  ;;  %16893 = vmatprep.mubr.msk.f32.mxu1 %vm22208_vm12, %v22005_v3 }
0x1a19   : > { %16891 = vmatprep.subr.mxu1 %v22005_v3  ;;  %16896 = vmatprep.subr.mxu0 %v22005_v3 }
0x1a1a   : > { %16892 = vmatpush3.msra.mxu1 %v15006_v53  ;;  %16897 = vmatpush3.msk.msra.mxu0 %vm22244_vm5, %v22006_v5  ;;  %vm22248_vm5 = vcmp.eq.s32.totalorder %v17982_v7, %v22245_v44 }
0x1a1b   : > { %16915 = vmatprep.subr.mxu1 %v22005_v3  ;;  %16894 = vmatmul.mubr.msk.f32.vlgmr.msra.gmra.mxu1 %vm22230_vm1, %v7895_v59  ;;  %vm22249_vm1 = vcmp.eq.s32.totalorder %v17989_v9, %v22243_v45 }
0x1a1c   : > { %16916 = vmatpush3.msk.msra.mxu1 %vm22246_vm15, %v22006_v5  ;;  %16898 = vmatprep.subr.mxu0 %v22005_v3  ;;  %vm22250_vm15 = vcmp.eq.s32.totalorder %v17989_v9, %v22245_v44 }
0x1a1d   : > { %16917 = vmatprep.subr.mxu1 %v22005_v3  ;;  %16899 = vmatpush3.msk.msra.mxu0 %vm22247_vm11, %v22006_v5  ;;  %vm22251_vm11 = vcmp.eq.s32.totalorder %v18002_v12, %v22243_v45 }
0x1a1e   : > { %16918 = vmatpush3.msk.msra.mxu1 %vm22248_vm5, %v22006_v5  ;;  %16900 = vmatprep.subr.mxu0 %v22005_v3  ;;  %vm22252_vm5 = vcmp.eq.s32.totalorder %v18002_v12, %v22245_v44 }
0x1a1f   : > { %16919 = vmatprep.subr.mxu1 %v22005_v3  ;;  %16901 = vmatpush3.msk.msra.mxu0 %vm22249_vm1, %v22006_v5  ;;  %vm22253_vm1 = vnez %v21889_v15 }
0x1a20   : > { %16920 = vmatpush3.msk.msra.mxu1 %vm22250_vm15, %v22006_v5  ;;  %16902 = vmatprep.subr.mxu0 %v22005_v3  ;;  %vm22254_vm15 = vnez %v21891_v17 }
0x1a21   : > { %16921 = vmatprep.subr.mxu1 %v22005_v3  ;;  %16903 = vmatpush3.msk.msra.mxu0 %vm22251_vm11, %v22006_v5  ;;  %vm22255_vm11 = vnez %v21894_v18 }
0x1a22   : > { %16922 = vmatpush3.msk.msra.mxu1 %vm22252_vm5, %v22006_v5  ;;  %16904 = vmatprep.subr.mxu0 %v22005_v3  ;;  %vm22256_vm5 = vnez %v21896_v19 }
0x1a23   : > { %16923 = vmatprep.subr.mxu1 %v22005_v3  ;;  %16905 = vmatpush3.msk.msra.mxu0 %vm22253_vm1, %v22006_v5 }
0x1a24   : > { %16924 = vmatpush3.msk.msra.mxu1 %vm22254_vm15, %v22006_v5  ;;  %16906 = vmatprep.subr.mxu0 %v22005_v3 }
0x1a25   : > { %16925 = vmatprep.subr.mxu1 %v22005_v3  ;;  %16907 = vmatpush3.msk.msra.mxu0 %vm22255_vm11, %v22006_v5  ;;  %vm22260_vm11 = vcmask 523264  }
0x1a26   : > { %16926 = vmatpush3.msk.msra.mxu1 %vm22256_vm5, %v22006_v5  ;;  %16908 = vmatprep.subr.mxu0 %v22005_v3  ;;  %vm22261_vm1 = vmmov %vm22260_vm11 }
0x1a27   : > { %16927 = vmatprep.subr.mxu1 %v22005_v3  ;;  %16909 = vmatpush3.msk.msra.mxu0 %vm22257_vm13, %v22006_v5  ;;  %vm22259_vm13 = vnez %v21904_v23 }
0x1a28   : > { %16928 = vmatpush3.msk.msra.mxu1 %vm22258_vm14, %v22006_v5  ;;  %16910 = vmatprep.subr.mxu0 %v22005_v3 }
0x1a29   : > { %16929 = vmatprep.subr.mxu1 %v22005_v3  ;;  %16931 = vmatprep.mubr.msk.f32.mxu1 %vm22208_vm12, %v22005_v3 }
0x1a2a   : > { %16930 = vmatpush3.msk.msra.mxu1 %vm22136_vm9, %v22006_v5  ;;  %16911 = vmatpush3.msk.msra.mxu0 %vm22259_vm13, %v22006_v5  ;;  %vm22264_vm13 = vcmask 31744  }
0x1a2b   : > { %16912 = vmatprep.mubr.msk.f32.mxu0 %vm22208_vm12, %v22005_v3  ;;  %16932 = vmatmul.mubr.msk.f32.vlgmr.msra.gmra.mxu1 %vm22260_vm11, %v20133_v51  ;;  %vm22263_vm11 = vcmask 1043456   ;;  %vm22266_vm14 = vmmov %vm22264_vm13 }
0x1a2c   : > { %16913 = vmatmul.mubr.msk.f32.vlgmr.msra.gmra.mxu0 %vm22261_vm1, %v20133_v51  ;;  %16934 = vmatprep.subr.mxu0 %v22005_v3  ;;  %vm21829_vm1 = vcmask 32768   ;;  %vm22265_vm9 = vmmov %vm22263_vm11 }
0x1a2d   : > { %16936 = vmatprep.mubr.msk.f32.mxu0 %vm22208_vm12, %v22005_v3  ;;  %16939 = vmatprep.subr.mxu1 %v22005_v3 }
0x1a2e   : > { %16941 = vmatprep.mubr.msk.f32.mxu1 %vm22208_vm12, %v22005_v3 }
0x1ab0   : > { %v6737_v0 = vpop.f32.mrf.mxu1 }
0x1ab1   : > { %v6811_v54 = vadd.f32 %v19903_v28, %v6737_v0 }
0x1ab2   : > { %v16783_v8 = vpop.f32.mrf.mxu1  ;;  %v6963_v57 = vpop.f32.mrf.mxu0 }
0x1ab4   : > { %v6886_v61 = vpop.f32.mrf.mxu1  ;;  %v16804_v1 = vpop.f32.mrf.mxu0 }
0x1ab5   : > { %v6890_v11 = vadd.f32 %v6886_v61, %v6811_v54 }
0x1ab6   : > { %v16797_v43 = vpop.f32.mrf.mxu1 }
0x1ab7   : > { %v6967_v6 = vadd.f32 %v6963_v57, %v6890_v11 }
0x1ab8   : > { %v7117_v16 = vpop.f32.mrf.mxu0 }
0x1aba   : > { %v7040_v48 = vpop.f32.mrf.mxu1  ;;  %v16818_v49 = vpop.f32.mrf.mxu0 }
0x1abb   : > { %v7044_v39 = vadd.f32 %v7040_v48, %v6967_v6 }
0x1abc   : > { %v16811_v46 = vpop.f32.mrf.mxu1 }
0x1abd   : > { %v7121_v53 = vadd.f32 %v7117_v16, %v7044_v39 }
0x1abe   : > { %v7271_v59 = vpop.f32.mrf.mxu0 }
0x1ac0   : > { %v7194_v2 = vpop.f32.mrf.mxu1  ;;  %v16832_v14 = vpop.f32.mrf.mxu0 }
0x1ac1   : > { %v7198_v13 = vadd.f32 %v7194_v2, %v7121_v53 }
0x1ac2   : > { %v16825_v42 = vpop.f32.mrf.mxu1 }
0x1ac3   : > { %v7275_v8 = vadd.f32 %v7271_v59, %v7198_v13 }
0x1ac4   : > { %v7425_v30 = vpop.f32.mrf.mxu0 }
0x1ac6   : > { %v7348_v56 = vpop.f32.mrf.mxu1  ;;  %v16846_v28 = vpop.f32.mrf.mxu0 }
0x1ac7   : > { %v7352_v0 = vadd.f32 %v7348_v56, %v7275_v8  ;;  %v7969_v28 = vld [vmem:[%s20159_s0] sm:$0x1] }
0x1ac8   : > { %v16839_v1 = vpop.f32.mrf.mxu1 }
0x1ac9   : > { %v7429_v54 = vadd.f32 %v7425_v30, %v7352_v0 }
0x1aca   : > { %v7579_v61 = vpop.f32.mrf.mxu0 }
0x1acc   : > { %v7502_v57 = vpop.f32.mrf.mxu1  ;;  %v16860_v11 = vpop.f32.mrf.mxu0 }
0x1acd   : > { %v7506_v43 = vadd.f32 %v7502_v57, %v7429_v54  ;;  %v8121_v57 = vpop.permute.xlu1 %8120 }
0x1ace   : > { %v16853_v6 = vpop.f32.mrf.mxu1 }
0x1acf   : > { %v7583_v16 = vadd.f32 %v7579_v61, %v7506_v43 }
0x1ad0   : > { %v7733_v48 = vpop.f32.mrf.mxu0 }
0x1ad2   : > { %v7656_v14 = vpop.f32.mrf.mxu1  ;;  %v16874_v42 = vpop.f32.mrf.mxu0 }
0x1ad3   : > { %v7660_v13 = vadd.f32 %v7656_v14, %v7583_v16  ;;  %v22267_v16 = vld [vmem:[#allocation29_spill] sm:$0xff] }
0x1ad4   : > { %v16867_v2 = vpop.f32.mrf.mxu1 }
0x1ad5   : > { %v7737_v49 = vadd.f32 %v7733_v48, %v7660_v13 }
0x1ad6   : > { %v7887_v39 = vpop.f32.mrf.mxu0 }
0x1ad7   : > { %v7810_v56 = vpop.f32.mrf.mxu1 }
0x1ad8   : > { %v7814_v46 = vadd.f32 %v7810_v56, %v7737_v49  ;;  %v16888_v30 = vpop.f32.mrf.mxu0  ;;  %v8343_v49 = vpop.permute.xlu0 %8342  ;;  %v22279_v56 = vld [vmem:[#allocation33_spill] sm:$0xff] }
0x1ad9   : > { %v16881_v53 = vpop.f32.mrf.mxu1 }
0x1ada   : > { %v7891_v59 = vadd.f32 %v7887_v39, %v7814_v46 }
0x1adb   : > { %v7964_v8 = vpop.f32.mrf.mxu1 }
0x1adc   : > { %v7968_v0 = vadd.f32 %v7964_v8, %v7891_v59  ;;  %v8491_v8 = vpop.permute.xlu1 %8490 }
0x1add   : > { %v16895_v1 = vpop.f32.mrf.mxu1 }
0x1ade   : > { %v7970_v54 = vadd.f32 %v7969_v28, %v7968_v0  ;;  %v22291_v0 = vld [vmem:[#allocation38_spill] sm:$0xff] }
0x1ae0   : > { %7972 = vst.msk [vmem:[%s20165_s1] sm:$0x1] %vm21829_vm1, %v7970_v54  ;;  %vm22268_vm1 = vcmp.eq.s32.totalorder %v17973_v4, %v22267_v16 }
0x1aeb   : > { %v8115_v61 = vpop.f32.mrf.mxu1 }
0x1aec   : > { %v8045_v11 = vpop.f32.mrf.mxu0  ;;  %16935 = vmatpush3.msk.msra.mxu0 %vm22263_vm11, %v8115_v61  ;;  %vm22273_vm11 = vnez %v21909_v34 }
0x1aed   : > { %v16933_v43 = vpop.f32.mrf.mxu1  ;;  %16937 = vmatmul.mubr.msk.f32.vlgmr.msra.gmra.mxu0 %vm22264_vm13, %v8121_v57  ;;  %16940 = vmatpush3.msk.msra.mxu1 %vm22265_vm9, %v8045_v11  ;;  %vm22269_vm9 = vcmp.eq.s32.totalorder %v17982_v7, %v22267_v16  ;;  %vm22271_vm13 = vcmp.eq.s32.totalorder %v18002_v12, %v22267_v16  ;;  %v8639_v11 = vpop.permute.xlu0 %8638 }
0x1aee   : > { %16944 = vmatprep.subr.mxu0 %v22005_v3  ;;  %16942 = vmatmul.mubr.msk.f32.vlgmr.msra.gmra.mxu1 %vm22266_vm14, %v19840_v31  ;;  %v16914_v6 = vpop.f32.mrf.mxu0  ;;  %vm22270_vm14 = vcmp.eq.s32.totalorder %v17989_v9, %v22267_v16 }
0x1aef   : > { %16945 = vmatpush3.msk.msra.mxu0 %vm22268_vm1, %v22006_v5  ;;  %16960 = vmatprep.mubr.msk.f32.mxu0 %vm22208_vm12, %v22005_v3  ;;  %vm22272_vm1 = vnez %v21907_v33  ;;  %v22308_v6 = vld [vmem:[#allocation44_spill] sm:$0xff] }
0x1af0   : > { %16946 = vmatprep.subr.mxu0 %v22005_v3  ;;  %16963 = vmatprep.subr.mxu1 %v22005_v3 }
0x1af1   : > { %16947 = vmatpush3.msk.msra.mxu0 %vm22269_vm9, %v22006_v5  ;;  %16965 = vmatprep.mubr.msk.f32.mxu1 %vm22208_vm12, %v22005_v3  ;;  %vm22274_vm9 = vnez %v21911_v35 }
0x1af2   : > { %16948 = vmatprep.subr.mxu0 %v22005_v3 }
0x1af3   : > { %16949 = vmatpush3.msk.msra.mxu0 %vm22270_vm14, %v22006_v5  ;;  %vm22275_vm14 = vnez %v21913_v36 }
0x1af4   : > { %16950 = vmatprep.subr.mxu0 %v22005_v3 }
0x1af5   : > { %16951 = vmatpush3.msk.msra.mxu0 %vm22271_vm13, %v22006_v5  ;;  %vm22276_vm13 = vcmask 523264  }
0x1af6   : > { %16952 = vmatprep.subr.mxu0 %v22005_v3 }
0x1af7   : > { %16953 = vmatpush3.msk.msra.mxu0 %vm22272_vm1, %v22006_v5 }
0x1af8   : > { %16954 = vmatprep.subr.mxu0 %v22005_v3 }
0x1af9   : > { %16955 = vmatpush3.msk.msra.mxu0 %vm22273_vm11, %v22006_v5  ;;  %vm22278_vm11 = vcmask 31744  }
0x1afa   : > { %16956 = vmatprep.subr.mxu0 %v22005_v3 }
0x1afb   : > { %16957 = vmatpush3.msk.msra.mxu0 %vm22274_vm9, %v22006_v5  ;;  %vm22277_vm9 = vcmask 1043456  }
0x1afc   : > { %16958 = vmatprep.subr.mxu0 %v22005_v3 }
0x1afd   : > { %16959 = vmatpush3.msk.msra.mxu0 %vm22275_vm14, %v22006_v5  ;;  %vm22281_vm14 = vcmp.eq.s32.totalorder %v17982_v7, %v22279_v56 }
0x1afe   : > { %16961 = vmatmul.mubr.msk.f32.vlgmr.msra.gmra.mxu0 %vm22276_vm13, %v20133_v51  ;;  %16987 = vmatprep.subr.mxu0 %v22005_v3  ;;  %vm22280_vm13 = vcmp.eq.s32.totalorder %v17973_v4, %v22279_v56 }
0x1aff   : > { %16989 = vmatprep.mubr.msk.f32.mxu0 %vm22208_vm12, %v22005_v3 }
0x1bad   : > { %v8193_v31 = vpop.f32.mrf.mxu0 }
0x1bae   : > { %v8268_v48 = vpop.f32.mrf.mxu1 }
0x1baf   : > { %v8269_v14 = vadd.f32 %v8268_v48, %v8193_v31  ;;  %v16938_v42 = vpop.f32.mrf.mxu0  ;;  %v22310_v31 = vld [vmem:[#allocation45_spill] sm:$0xff]  ;;  %v22312_v48 = vld [vmem:[#allocation46_spill] sm:$0xff] }
0x1bb0   : > { %v16943_v13 = vpop.f32.mrf.mxu1 }
0x1bbe   : > { %v8338_v2 = vpop.f32.mrf.mxu0 }
0x1bbf   : > { %16964 = vmatpush3.msk.msra.mxu1 %vm22277_vm9, %v8338_v2  ;;  %vm22283_vm9 = vcmp.eq.s32.totalorder %v18002_v12, %v22279_v56  ;;  %v8721_v2 = vpop.permute.xlu1 %8720 }
0x1bc0   : > { %v16962_v39 = vpop.f32.mrf.mxu0  ;;  %16966 = vmatmul.mubr.msk.f32.vlgmr.msra.gmra.mxu1 %vm22278_vm11, %v8343_v49  ;;  %16968 = vmatprep.subr.mxu1 %v22005_v3  ;;  %vm22282_vm11 = vcmp.eq.s32.totalorder %v17989_v9, %v22279_v56 }
0x1bc1   : > { %16969 = vmatpush3.msk.msra.mxu1 %vm22280_vm13, %v22006_v5  ;;  %16984 = vmatprep.mubr.msk.f32.mxu1 %vm22208_vm12, %v22005_v3  ;;  %vm22284_vm13 = vnez %v22152_v29 }
0x1bc2   : > { %16970 = vmatprep.subr.mxu1 %v22005_v3 }
0x1bc3   : > { %16971 = vmatpush3.msk.msra.mxu1 %vm22281_vm14, %v22006_v5  ;;  %vm22285_vm14 = vnez %v22154_v40 }
0x1bc4   : > { %16972 = vmatprep.subr.mxu1 %v22005_v3 }
0x1bc5   : > { %16973 = vmatpush3.msk.msra.mxu1 %vm22282_vm11, %v22006_v5  ;;  %vm22286_vm11 = vnez %v22156_v58 }
0x1bc6   : > { %16974 = vmatprep.subr.mxu1 %v22005_v3 }
0x1bc7   : > { %16975 = vmatpush3.msk.msra.mxu1 %vm22283_vm9, %v22006_v5  ;;  %vm22287_vm9 = vnez %v22158_v60 }
0x1bc8   : > { %16976 = vmatprep.subr.mxu1 %v22005_v3 }
0x1bc9   : > { %16977 = vmatpush3.msk.msra.mxu1 %vm22284_vm13, %v22006_v5  ;;  %vm22288_vm13 = vcmask 523264  }
0x1bca   : > { %16978 = vmatprep.subr.mxu1 %v22005_v3 }
0x1bcb   : > { %16979 = vmatpush3.msk.msra.mxu1 %vm22285_vm14, %v22006_v5  ;;  %vm22290_vm14 = vcmask 31744  }
0x1bcc   : > { %16980 = vmatprep.subr.mxu1 %v22005_v3 }
0x1bcd   : > { %16981 = vmatpush3.msk.msra.mxu1 %vm22286_vm11, %v22006_v5  ;;  %vm22289_vm11 = vcmask 1043456  }
0x1bce   : > { %16982 = vmatprep.subr.mxu1 %v22005_v3 }
0x1bcf   : > { %16983 = vmatpush3.msk.msra.mxu1 %vm22287_vm9, %v22006_v5  ;;  %vm22293_vm9 = vcmp.eq.s32.totalorder %v17982_v7, %v22291_v0 }
0x1bd0   : > { %16985 = vmatmul.mubr.msk.f32.vlgmr.msra.gmra.mxu1 %vm22288_vm13, %v20133_v51  ;;  %17011 = vmatprep.subr.mxu1 %v22005_v3  ;;  %vm22292_vm13 = vcmp.eq.s32.totalorder %v17973_v4, %v22291_v0 }
0x1bd1   : > { %17013 = vmatprep.mubr.msk.f32.mxu1 %vm22208_vm12, %v22005_v3 }
0x1c80   : > { %v8415_v46 = vpop.f32.mrf.mxu1 }
0x1c81   : > { %v8419_v30 = vadd.f32 %v8415_v46, %v8269_v14  ;;  %v22314_v14 = vld [vmem:[#allocation47_spill] sm:$0xff]  ;;  %v8727_v46 = vpop.permute.xlu0 %8726 }
0x1c82   : > { %v16967_v53 = vpop.f32.mrf.mxu1 }
0x1c90   : > { %v8486_v59 = vpop.f32.mrf.mxu1 }
0x1c91   : > { %16988 = vmatpush3.msk.msra.mxu0 %vm22289_vm11, %v8486_v59  ;;  %vm22295_vm11 = vcmp.eq.s32.totalorder %v18002_v12, %v22291_v0 }
0x1c92   : > { %v16986_v28 = vpop.f32.mrf.mxu1  ;;  %16990 = vmatmul.mubr.msk.f32.vlgmr.msra.gmra.mxu0 %vm22290_vm14, %v8491_v8  ;;  %16992 = vmatprep.subr.mxu0 %v22005_v3  ;;  %vm22294_vm14 = vcmp.eq.s32.totalorder %v17989_v9, %v22291_v0  ;;  %v8875_v8 = vld [vmem:[%s18759_s2] sm:$0xff] }
0x1c93   : > { %16993 = vmatpush3.msk.msra.mxu0 %vm22292_vm13, %v22006_v5  ;;  %17008 = vmatprep.mubr.msk.f32.mxu0 %vm22208_vm12, %v22005_v3  ;;  %vm22296_vm13 = vnez %v22162_v50 }
0x1c94   : > { %16994 = vmatprep.subr.mxu0 %v22005_v3 }
0x1c95   : > { %16995 = vmatpush3.msk.msra.mxu0 %vm22293_vm9, %v22006_v5  ;;  %vm22297_vm9 = vnez %v22165_v55 }
0x1c96   : > { %16996 = vmatprep.subr.mxu0 %v22005_v3 }
0x1c97   : > { %16997 = vmatpush3.msk.msra.mxu0 %vm22294_vm14, %v22006_v5  ;;  %vm22298_vm14 = vnez %v22167_v52 }
0x1c98   : > { %16998 = vmatprep.subr.mxu0 %v22005_v3 }
0x1c99   : > { %16999 = vmatpush3.msk.msra.mxu0 %vm22295_vm11, %v22006_v5  ;;  %vm22299_vm11 = vnez %v22169_v47 }
0x1c9a   : > { %17000 = vmatprep.subr.mxu0 %v22005_v3 }
0x1c9b   : > { %17001 = vmatpush3.msk.msra.mxu0 %vm22296_vm13, %v22006_v5  ;;  %vm22300_vm13 = vcmask 523264  }
0x1c9c   : > { %17002 = vmatprep.subr.mxu0 %v22005_v3 }
0x1c9d   : > { %17003 = vmatpush3.msk.msra.mxu0 %vm22297_vm9, %v22006_v5  ;;  %vm22301_vm9 = vnez %v21953_v32 }
0x1c9e   : > { %17004 = vmatprep.subr.mxu0 %v22005_v3 }
0x1c9f   : > { %17005 = vmatpush3.msk.msra.mxu0 %vm22298_vm14, %v22006_v5  ;;  %vm22302_vm14 = vnez %v21955_v37 }
0x1ca0   : > { %17006 = vmatprep.subr.mxu0 %v22005_v3 }
0x1ca1   : > { %17007 = vmatpush3.msk.msra.mxu0 %vm22299_vm11, %v22006_v5 }
0x1ca2   : > { %17009 = vmatmul.mubr.msk.f32.vlgmr.msra.gmra.mxu0 %vm22300_vm13, %v20133_v51  ;;  %17035 = vmatprep.subr.mxu0 %v22005_v3  ;;  %vm22303_vm13 = vnez %v21957_v38  ;;  %v22304_v51 = vld [vmem:[#allocation43_spill] sm:$0xff] }
0x1ca3   : > { %17036 = vmatpush3.msk.msra.mxu0 %vm22301_vm9, %v22006_v5  ;;  %17051 = vmatprep.mubr.msk.f32.mxu0 %vm22208_vm12, %v22005_v3  ;;  %vm22305_vm9 = vnez %v22304_v51 }
0x1ca4   : > { %17037 = vmatprep.subr.mxu0 %v22005_v3 }
0x1ca5   : > { %17038 = vmatpush3.msk.msra.mxu0 %vm22302_vm14, %v22006_v5  ;;  %vm22318_vm14 = vcmp.eq.s32.totalorder %v17973_v4, %v22245_v44 }
0x1ca6   : > { %17039 = vmatprep.subr.mxu0 %v22005_v3 }
0x1ca7   : > { %17040 = vmatpush3.msk.msra.mxu0 %vm22303_vm13, %v22006_v5 }
0x1ca8   : > { %17041 = vmatprep.subr.mxu0 %v22005_v3 }
0x1ca9   : > { %17042 = vmatpush3.msk.msra.mxu0 %vm22305_vm9, %v22006_v5  ;;  %vm22316_vm9 = vcmask 523264  }
0x1caa   : > { %17043 = vmatprep.subr.mxu0 %v22005_v3  ;;  %vm22317_vm13 = vmmov %vm22316_vm9 }
0x1cab   : > { %17044 = vmatpush3.msk.msra.mxu0 %vm22081_vm3, %v22006_v5  ;;  %vm22307_vm3 = vcmask 31744  }
0x1cac   : > { %17045 = vmatprep.subr.mxu0 %v22005_v3 }
0x1cad   : > { %17046 = vmatpush3.msk.msra.mxu0 %vm22082_vm2, %v22006_v5  ;;  %vm22306_vm2 = vcmask 1043456  }
0x1cae   : > { %17047 = vmatprep.subr.mxu0 %v22005_v3 }
0x1caf   : > { %17048 = vmatpush3.msk.msra.mxu0 %vm22083_vm8, %v22006_v5  ;;  %vm22309_vm8 = vnez %v22308_v6 }
0x1cb0   : > { %17049 = vmatprep.subr.mxu0 %v22005_v3 }
0x1cb1   : > { %17050 = vmatpush3.msk.msra.mxu0 %vm22085_vm4, %v22006_v5  ;;  %vm22311_vm4 = vnez %v22310_v31 }
0x1cb2   : > { %17078 = vmatprep.subr.mxu0 %v22005_v3 }
0x1d52   : > { %v8563_v1 = vpop.f32.mrf.mxu0 }
0x1d53   : > { %v8567_v54 = vadd.f32 %v8563_v1, %v8419_v30 }
0x1d54   : > { %v16991_v61 = vpop.f32.mrf.mxu0 }
0x1d62   : > { %v8634_v57 = vpop.f32.mrf.mxu0 }
0x1d63   : > { %17012 = vmatpush3.msk.msra.mxu1 %vm22306_vm2, %v8634_v57  ;;  %vm22313_vm2 = vnez %v22312_v48 }
0x1d64   : > { %v17010_v43 = vpop.f32.mrf.mxu0  ;;  %17014 = vmatmul.mubr.msk.f32.vlgmr.msra.gmra.mxu1 %vm22307_vm3, %v8639_v11  ;;  %17016 = vmatprep.subr.mxu1 %v22005_v3  ;;  %vm22315_vm3 = vnez %v22314_v14  ;;  %v8876_v11 = vld [vmem:[%s18759_s2 + $0x8] sm:$0xff] }
0x1d65   : > { %17017 = vmatpush3.msk.msra.mxu1 %vm22309_vm8, %v22006_v5  ;;  %17032 = vmatprep.mubr.msk.f32.mxu1 %vm22208_vm12, %v22005_v3 }
0x1d66   : > { %17018 = vmatprep.subr.mxu1 %v22005_v3 }
0x1d67   : > { %17019 = vmatpush3.msk.msra.mxu1 %vm22311_vm4, %v22006_v5 }
0x1d68   : > { %17020 = vmatprep.subr.mxu1 %v22005_v3 }
0x1d69   : > { %17021 = vmatpush3.msk.msra.mxu1 %vm22313_vm2, %v22006_v5 }
0x1d6a   : > { %17022 = vmatprep.subr.mxu1 %v22005_v3 }
0x1d6b   : > { %17023 = vmatpush3.msk.msra.mxu1 %vm22315_vm3, %v22006_v5 }
0x1d6c   : > { %17024 = vmatprep.subr.mxu1 %v22005_v3 }
0x1d6d   : > { %17025 = vmatpush3.msk.msra.mxu1 %vm22069_vm10, %v22006_v5 }
0x1d6e   : > { %17026 = vmatprep.subr.mxu1 %v22005_v3 }
0x1d6f   : > { %17027 = vmatpush3.msk.msra.mxu1 %vm22070_vm0, %v22006_v5 }
0x1d70   : > { %17028 = vmatprep.subr.mxu1 %v22005_v3 }
0x1d71   : > { %17029 = vmatpush3.msk.msra.mxu1 %vm22071_vm6, %v22006_v5 }
0x1d72   : > { %17030 = vmatprep.subr.mxu1 %v22005_v3 }
0x1d73   : > { %17031 = vmatpush3.msk.msra.mxu1 %vm22072_vm7, %v22006_v5  ;;  %vm22319_vm7 = vcmp.eq.s32.totalorder %v17982_v7, %v22245_v44 }
0x1e24   : > { %v8711_v42 = vpop.f32.mrf.mxu1 }
0x1e25   : > { %v8715_v13 = vadd.f32 %v8711_v42, %v8567_v54 }
0x1e26   : > { %v17015_v49 = vpop.f32.mrf.mxu1 }
0x1e27   : > { %v8723_v39 = vmul.f32 %v8721_v2, %v8715_v13  ;;  %v17738_v13 = vld [vmem:[%s18433_s18] sm:$0xff] }
0x1e29   : > { %v8729_v30 = vadd.f32 %v8727_v46, %v8723_v39 }
0x1e2b   : > { %v20378_v53 = vmax.f32 %v8729_v30, 0.0 }
0x1e2d   : > { %17033 = vmatmul.mubr.msk.f32.vlgmr.msra.gmra.mxu1 %vm22316_vm9, %v20378_v53  ;;  %17052 = vmatmul.mubr.msk.f32.vlgmr.msra.gmra.mxu0 %vm22317_vm13, %v20378_v53  ;;  %vm22320_vm9 = vcmp.eq.s32.totalorder %v17989_v9, %v22245_v44  ;;  %vm22323_vm13 = vnez %v21902_v22 }
0x1e2e   : > { %17079 = vmatpush3.msk.msra.mxu0 %vm22318_vm14, %v22006_v5  ;;  %17094 = vmatprep.mubr.msk.f32.mxu0 %vm22208_vm12, %v22005_v3  ;;  %vm22321_vm14 = vcmp.eq.s32.totalorder %v18002_v12, %v22245_v44  ;;  %v9115_v44 = vpop.permute.xlu1 %9114 }
0x1e2f   : > { %17080 = vmatprep.subr.mxu0 %v22005_v3 }
0x1e30   : > { %17081 = vmatpush3.msk.msra.mxu0 %vm22319_vm7, %v22006_v5  ;;  %vm22322_vm7 = vnez %v21900_v21 }
0x1e31   : > { %17082 = vmatprep.subr.mxu0 %v22005_v3 }
0x1e32   : > { %17083 = vmatpush3.msk.msra.mxu0 %vm22320_vm9, %v22006_v5  ;;  %vm22324_vm9 = vcmask 523264   ;;  %v9347_v59 = vpop.permute.xlu1 %9346 }
0x1e33   : > { %17084 = vmatprep.subr.mxu0 %v22005_v3 }
0x1e34   : > { %17085 = vmatpush3.msk.msra.mxu0 %vm22321_vm14, %v22006_v5  ;;  %vm22325_vm14 = vcmp.eq.s32.totalorder %v17973_v4, %v22267_v16 }
0x1e35   : > { %17086 = vmatprep.subr.mxu0 %v22005_v3 }
0x1e36   : > { %17087 = vmatpush3.msk.msra.mxu0 %vm22254_vm15, %v22006_v5 }
0x1e37   : > { %17088 = vmatprep.subr.mxu0 %v22005_v3 }
0x1e38   : > { %17089 = vmatpush3.msk.msra.mxu0 %vm22256_vm5, %v22006_v5  ;;  %vm22345_vm5 = vcmask 64512  }
0x1e39   : > { %17090 = vmatprep.subr.mxu0 %v22005_v3 }
0x1e3a   : > { %17091 = vmatpush3.msk.msra.mxu0 %vm22322_vm7, %v22006_v5  ;;  %vm22326_vm7 = vcmp.eq.s32.totalorder %v17982_v7, %v22267_v16 }
0x1e3b   : > { %17092 = vmatprep.subr.mxu0 %v22005_v3 }
0x1e3c   : > { %17093 = vmatpush3.msk.msra.mxu0 %vm22323_vm13, %v22006_v5  ;;  %vm22333_vm13 = vcmask 64512  }
0x1e3d   : > { %17095 = vmatmul.mubr.msk.f32.vlgmr.msra.gmra.mxu0 %vm22324_vm9, %v20378_v53  ;;  %17107 = vmatprep.subr.mxu0 %v22005_v3  ;;  %vm22327_vm9 = vcmp.eq.s32.totalorder %v17989_v9, %v22267_v16 }
0x1e3e   : > { %17108 = vmatpush3.msk.msra.mxu0 %vm22325_vm14, %v22006_v5  ;;  %17123 = vmatprep.mubr.msk.f32.mxu0 %vm22208_vm12, %v22005_v3  ;;  %vm22328_vm14 = vcmp.eq.s32.totalorder %v18002_v12, %v22267_v16  ;;  %v9502_v16 = vpop.permute.xlu1 %9501 }
0x1e3f   : > { %17109 = vmatprep.subr.mxu0 %v22005_v3 }
0x1e40   : > { %17110 = vmatpush3.msk.msra.mxu0 %vm22326_vm7, %v22006_v5  ;;  %vm22329_vm7 = vnez %v21909_v34 }
0x1e41   : > { %17111 = vmatprep.subr.mxu0 %v22005_v3 }
0x1e42   : > { %17112 = vmatpush3.msk.msra.mxu0 %vm22327_vm9, %v22006_v5  ;;  %vm22330_vm9 = vnez %v21911_v35 }
0x1e43   : > { %17113 = vmatprep.subr.mxu0 %v22005_v3 }
0x1e44   : > { %17114 = vmatpush3.msk.msra.mxu0 %vm22328_vm14, %v22006_v5  ;;  %vm22331_vm14 = vnez %v21913_v36 }
0x1e45   : > { %17115 = vmatprep.subr.mxu0 %v22005_v3 }
0x1e46   : > { %17116 = vmatpush3.msk.msra.mxu0 %vm22272_vm1, %v22006_v5  ;;  %vm22332_vm1 = vcmask 523264  }
0x1e47   : > { %17117 = vmatprep.subr.mxu0 %v22005_v3 }
0x1e48   : > { %17118 = vmatpush3.msk.msra.mxu0 %vm22329_vm7, %v22006_v5  ;;  %vm22334_vm7 = vmmov %vm22333_vm13 }
0x1e49   : > { %17119 = vmatprep.subr.mxu0 %v22005_v3  ;;  %17056 = vmatprep.mubr.msk.f32.mxu1 %vm22334_vm7, %v8875_v8  ;;  %v22348_v8 = vld [vmem:[#allocation35_spill] sm:$0xff] }
0x1e4a   : > { %17120 = vmatpush3.msk.msra.mxu0 %vm22330_vm9, %v22006_v5  ;;  %vm22335_vm9 = vmmov %vm22334_vm7  ;;  %vm22338_vm7 = vcmp.eq.s32.totalorder %v17989_v9, %v22243_v45 }
0x1e4b   : > { %17121 = vmatprep.subr.mxu0 %v22005_v3 }
0x1e4c   : > { %17122 = vmatpush3.msk.msra.mxu0 %vm22331_vm14, %v22006_v5  ;;  %vm22344_vm14 = vcmask 523264  }
0x1e4d   : > { %17124 = vmatmul.mubr.msk.f32.vlgmr.msra.gmra.mxu0 %vm22332_vm1, %v20378_v53  ;;  %vm22336_vm1 = vcmp.eq.s32.totalorder %v17973_v4, %v22243_v45 }
0x1e4e   : > { %17152 = vmatprep.mubr.msk.f32.mxu0 %vm22333_vm13, %v9502_v16  ;;  %vm22337_vm13 = vcmp.eq.s32.totalorder %v17982_v7, %v22243_v45 }
0x1eed   : > { %v8800_v28 = vpop.f32.mrf.mxu1  ;;  %v8870_v1 = vpop.f32.mrf.mxu0 }
0x1eee   : > { %v8874_v54 = vmax.f32 %v8800_v28, %v8870_v1 }
0x1eef   : > { %v17034_v61 = vpop.f32.mrf.mxu1  ;;  %v17053_v57 = vpop.f32.mrf.mxu0 }
0x1ef0   : > { %17054 = vmatprep.subr.mxu1 %v8874_v54 }
0x1ef1   : > { %17055 = vmatpush3.msra.mxu1 %v8874_v54 }
0x1ef2   : > { %17057 = vmatmul.mubr.msk.f32.vlgmr.msra.gmra.mxu1 %vm22335_vm9, %v8876_v11  ;;  %17059 = vmatprep.subr.mxu1 %v22005_v3  ;;  %vm22339_vm9 = vcmp.eq.s32.totalorder %v18002_v12, %v22243_v45  ;;  %v9117_v45 = vpop.permute.xlu0 %9116 }
0x1ef3   : > { %17060 = vmatpush3.msk.msra.mxu1 %vm22336_vm1, %v22006_v5  ;;  %17075 = vmatprep.mubr.msk.f32.mxu1 %vm22208_vm12, %v22005_v3  ;;  %vm22340_vm1 = vnez %v21889_v15 }
0x1ef4   : > { %17061 = vmatprep.subr.mxu1 %v22005_v3 }
0x1ef5   : > { %17062 = vmatpush3.msk.msra.mxu1 %vm22337_vm13, %v22006_v5  ;;  %vm22341_vm13 = vnez %v21894_v18 }
0x1ef6   : > { %17063 = vmatprep.subr.mxu1 %v22005_v3 }
0x1ef7   : > { %17064 = vmatpush3.msk.msra.mxu1 %vm22338_vm7, %v22006_v5  ;;  %vm22342_vm7 = vnez %v21898_v20 }
0x1ef8   : > { %17065 = vmatprep.subr.mxu1 %v22005_v3 }
0x1ef9   : > { %17066 = vmatpush3.msk.msra.mxu1 %vm22339_vm9, %v22006_v5  ;;  %vm22343_vm9 = vnez %v21904_v23 }
0x1efa   : > { %17067 = vmatprep.subr.mxu1 %v22005_v3 }
0x1efb   : > { %17068 = vmatpush3.msk.msra.mxu1 %vm22340_vm1, %v22006_v5  ;;  %vm22347_vm1 = vmmov %vm22345_vm5 }
0x1efc   : > { %17069 = vmatprep.subr.mxu1 %v22005_v3 }
0x1efd   : > { %v9108_v43 = vpop.f32.mrf.mxu0  ;;  %17070 = vmatpush3.msk.msra.mxu1 %vm22341_vm13, %v22006_v5  ;;  %vm22346_vm13 = vmmov %vm22345_vm5 }
0x1efe   : > { %17071 = vmatprep.subr.mxu1 %v22005_v3 }
0x1eff   : > { %v17096_v42 = vpop.f32.mrf.mxu0  ;;  %17072 = vmatpush3.msk.msra.mxu1 %vm22342_vm7, %v22006_v5 }
0x1f00   : > { %17073 = vmatprep.subr.mxu1 %v22005_v3 }
0x1f01   : > { %17074 = vmatpush3.msk.msra.mxu1 %vm22343_vm9, %v22006_v5  ;;  %vm22360_vm9 = vcmask 64512  }
0x1f02   : > { %17076 = vmatmul.mubr.msk.f32.vlgmr.msra.gmra.mxu1 %vm22344_vm14, %v20378_v53  ;;  %17097 = vmatprep.subr.mxu1 %v9108_v43  ;;  %vm22349_vm14 = vmmov %vm22347_vm1 }
0x1f03   : > { %17098 = vmatpush3.msra.mxu1 %v9108_v43  ;;  %17099 = vmatprep.mubr.msk.f32.mxu1 %vm22345_vm5, %v9115_v44  ;;  %vm22350_vm5 = vmmov %vm22347_vm1  ;;  %v9349_v44 = vpop.permute.xlu0 %9348 }
0x1f06   : > { %17100 = vmatmul.mubr.msk.f32.vlgmr.msra.gmra.mxu1 %vm22346_vm13, %v9117_v45  ;;  %vm22351_vm13 = vcmp.eq.s32.totalorder %v17973_v4, %v22279_v56 }
0x1f07   : > { %17104 = vmatprep.mubr.msk.f32.mxu1 %vm22347_vm1, %v17738_v13 }
0x1f0d   : > { %v9342_v2 = vpop.f32.mrf.mxu0 }
0x1f0f   : > { %v17125_v49 = vpop.f32.mrf.mxu0 }
0x1fb2   : > { %v20512_v39 = vpop.f32.mrf.mxu1 }
0x1fb4   : > { %v20514_v46 = vpop.f32.mrf.mxu1 }
0x1fc2   : > { %v9038_v30 = vpop.f32.mrf.mxu1 }
0x1fc3   : > { %17102 = vmatprep.subr.mxu1 %v9038_v30 }
0x1fc4   : > { %v17077_v16 = vpop.f32.mrf.mxu1  ;;  %17103 = vmatpush3.msra.mxu1 %v9038_v30  ;;  %v22381_v30 = vld [vmem:[#allocation54_spill] sm:$0xff] }
0x1fc5   : > { %17105 = vmatmul.mubr.msk.f32.vlgmr.msra.gmra.mxu1 %vm22349_vm14, %v22348_v8  ;;  %17126 = vmatprep.subr.mxu1 %v9342_v2  ;;  %vm22352_vm14 = vcmp.eq.s32.totalorder %v17982_v7, %v22279_v56  ;;  %v22383_v16 = vld [vmem:[#allocation56_spill] sm:$0xff]  ;;  %v22385_v8 = vld [vmem:[#allocation58_spill] sm:$0xff] }
0x1fc6   : > { %17127 = vmatpush3.msra.mxu1 %v9342_v2  ;;  %17128 = vmatprep.mubr.msk.f32.mxu1 %vm22350_vm5, %v9347_v59  ;;  %vm22353_vm5 = vcmp.eq.s32.totalorder %v17989_v9, %v22279_v56  ;;  %v17101_v59 = vpop.f32.mrf.mxu1  ;;  %v9504_v2 = vpop.permute.xlu0 %9503 }
0x1fc7   : > { %17131 = vmatprep.subr.mxu1 %v22005_v3 }
0x1fc8   : > { %v9188_v28 = vpop.f32.mrf.mxu1 }
0x1fc9   : > { %17129 = vmatmul.mubr.msk.f32.vlgmr.msra.gmra.mxu1 %vm22347_vm1, %v9349_v44  ;;  %vm22354_vm1 = vcmp.eq.s32.totalorder %v18002_v12, %v22279_v56  ;;  %v9657_v56 = vpop.permute.xlu1 %9656 }
0x1fca   : > { %17132 = vmatpush3.msk.msra.mxu1 %vm22351_vm13, %v22006_v5  ;;  %17147 = vmatprep.mubr.msk.f32.mxu1 %vm22208_vm12, %v22005_v3  ;;  %vm22355_vm13 = vnez %v22152_v29 }
0x1fcb   : > { %17133 = vmatprep.subr.mxu1 %v22005_v3 }
0x1fcc   : > { %17134 = vmatpush3.msk.msra.mxu1 %vm22352_vm14, %v22006_v5  ;;  %vm22356_vm14 = vnez %v22154_v40 }
0x1fcd   : > { %17135 = vmatprep.subr.mxu1 %v22005_v3 }
0x1fce   : > { %17136 = vmatpush3.msk.msra.mxu1 %vm22353_vm5, %v22006_v5  ;;  %vm22357_vm5 = vnez %v22156_v58 }
0x1fcf   : > { %17137 = vmatprep.subr.mxu1 %v22005_v3 }
0x1fd0   : > { %17138 = vmatpush3.msk.msra.mxu1 %vm22354_vm1, %v22006_v5  ;;  %vm22358_vm1 = vnez %v22158_v60 }
0x1fd1   : > { %17139 = vmatprep.subr.mxu1 %v22005_v3 }
0x1fd2   : > { %17140 = vmatpush3.msk.msra.mxu1 %vm22355_vm13, %v22006_v5  ;;  %vm22359_vm13 = vcmask 523264  }
0x1fd3   : > { %17141 = vmatprep.subr.mxu1 %v22005_v3 }
0x1fd4   : > { %17142 = vmatpush3.msk.msra.mxu1 %vm22356_vm14, %v22006_v5 }
0x1fd5   : > { %17143 = vmatprep.subr.mxu1 %v22005_v3 }
0x1fd6   : > { %17144 = vmatpush3.msk.msra.mxu1 %vm22357_vm5, %v22006_v5  ;;  %vm22366_vm5 = vnez %v22162_v50 }
0x1fd7   : > { %17145 = vmatprep.subr.mxu1 %v22005_v3 }
0x1fd8   : > { %17146 = vmatpush3.msk.msra.mxu1 %vm22358_vm1, %v22006_v5  ;;  %vm22361_vm1 = vmmov %vm22360_vm9 }
0x1fd9   : > { %17148 = vmatmul.mubr.msk.f32.vlgmr.msra.gmra.mxu1 %vm22359_vm13, %v20378_v53  ;;  %vm22363_vm13 = vcmp.eq.s32.totalorder %v17982_v7, %v22291_v0 }
0x1fda   : > { %17176 = vmatprep.mubr.msk.f32.mxu1 %vm22360_vm9, %v9657_v56  ;;  %vm22362_vm9 = vcmp.eq.s32.totalorder %v17973_v4, %v22291_v0 }
0x2085   : > { %v17106_v1 = vpop.f32.mrf.mxu1 }
0x2086   : > { %v9273_v61 = vadd.f32 %v17106_v1, %v17101_v59 }
0x2087   : > { %v9267_v54 = vpop.f32.mrf.mxu1 }
0x2088   : > { %v9268_v57 = vadd.f32 %v9267_v54, %v9188_v28  ;;  %v9659_v54 = vpop.permute.xlu0 %9658 }
0x2089   : > { %v17130_v11 = vpop.f32.mrf.mxu1 }
0x208a   : > { %v9430_v43 = vadd.f32 %v17130_v11, %v9273_v61  ;;  %v22397_v11 = vld [vmem:[#allocation51_spill] sm:$0xff] }
0x208b   : > { %v9420_v42 = vpop.f32.mrf.mxu1 }
0x208c   : > { %v9429_v45 = vadd.f32 %v9420_v42, %v9268_v57  ;;  %v22388_v57 = vld [vmem:[#allocation50_spill] sm:$0xff]  ;;  %v22401_v42 = vld [vmem:[#allocation55_spill] sm:$0xff] }
0x2099   : > { %v9497_v13 = vpop.f32.mrf.mxu1 }
0x209a   : > { %17150 = vmatprep.subr.mxu0 %v9497_v13 }
0x209b   : > { %v17149_v49 = vpop.f32.mrf.mxu1  ;;  %17151 = vmatpush3.msra.mxu0 %v9497_v13  ;;  %v9748_v13 = vpop.permute.xlu1 %9747 }
0x209c   : > { %17153 = vmatmul.mubr.msk.f32.vlgmr.msra.gmra.mxu0 %vm22361_vm1, %v9504_v2  ;;  %17155 = vmatprep.subr.mxu0 %v22005_v3  ;;  %vm22364_vm1 = vcmp.eq.s32.totalorder %v17989_v9, %v22291_v0  ;;  %v9753_v2 = vpop.permute.xlu0 %9752 }
0x209d   : > { %17156 = vmatpush3.msk.msra.mxu0 %vm22362_vm9, %v22006_v5  ;;  %17171 = vmatprep.mubr.msk.f32.mxu0 %vm22208_vm12, %v22005_v3  ;;  %vm22365_vm9 = vcmp.eq.s32.totalorder %v18002_v12, %v22291_v0  ;;  %v22370_v0 = vld [vmem:[#allocation49_spill] sm:$0xff] }
0x209e   : > { %17157 = vmatprep.subr.mxu0 %v22005_v3 }
0x209f   : > { %17158 = vmatpush3.msk.msra.mxu0 %vm22363_vm13, %v22006_v5  ;;  %vm22367_vm13 = vnez %v22165_v55  ;;  %v9760_v49 = vpop.permute.xlu1 %9759 }
0x20a0   : > { %17159 = vmatprep.subr.mxu0 %v22005_v3 }
0x20a1   : > { %17160 = vmatpush3.msk.msra.mxu0 %vm22364_vm1, %v22006_v5  ;;  %vm22368_vm1 = vnez %v22167_v52 }
0x20a2   : > { %17161 = vmatprep.subr.mxu0 %v22005_v3 }
0x20a3   : > { %17162 = vmatpush3.msk.msra.mxu0 %vm22365_vm9, %v22006_v5  ;;  %vm22369_vm9 = vcmask 523264  }
0x20a4   : > { %17163 = vmatprep.subr.mxu0 %v22005_v3 }
0x20a5   : > { %17164 = vmatpush3.msk.msra.mxu0 %vm22366_vm5, %v22006_v5  ;;  %vm22371_vm5 = vcmp.eq.s32.totalorder %v17973_v4, %v22370_v0 }
0x20a6   : > { %17165 = vmatprep.subr.mxu0 %v22005_v3 }
0x20a7   : > { %17166 = vmatpush3.msk.msra.mxu0 %vm22367_vm13, %v22006_v5  ;;  %vm22372_vm13 = vmmov %vm22371_vm5 }
0x20a8   : > { %17167 = vmatprep.subr.mxu0 %v22005_v3 }
0x20a9   : > { %17168 = vmatpush3.msk.msra.mxu0 %vm22368_vm1, %v22006_v5  ;;  %vm22373_vm1 = vcmp.eq.s32.totalorder %v17982_v7, %v22370_v0 }
0x20aa   : > { %17169 = vmatprep.subr.mxu0 %v22005_v3 }
0x20ab   : > { %17170 = vmatpush3.msk.msra.mxu0 %vm22299_vm11, %v22006_v5  ;;  %vm22374_vm11 = vmmov %vm22373_vm1 }
0x20ac   : > { %17172 = vmatmul.mubr.msk.f32.vlgmr.msra.gmra.mxu0 %vm22369_vm9, %v20378_v53  ;;  %17198 = vmatprep.subr.msk.mxu0 %vm22371_vm5, %v22006_v5  ;;  %vm22375_vm9 = vcmp.eq.s32.totalorder %v17989_v9, %v22370_v0  ;;  %v22379_v53 = vld [vmem:[#allocation52_spill] sm:$0xff] }
0x20ad   : > { %17199 = vmatpush3.msk.msra.mxu0 %vm22372_vm13, %v22006_v5  ;;  %vm22376_vm5 = vmmov %vm22375_vm9  ;;  %vm22377_vm13 = vcmp.eq.s32.totalorder %v18002_v12, %v22370_v0 }
0x20ae   : > { %17200 = vmatprep.subr.msk.mxu0 %vm22373_vm1, %v22006_v5  ;;  %vm22378_vm1 = vmmov %vm22377_vm13 }
0x20af   : > { %17201 = vmatpush3.msk.msra.mxu0 %vm22374_vm11, %v22006_v5  ;;  %vm22380_vm11 = vnez %v22379_v53 }
0x20b0   : > { %17202 = vmatprep.subr.msk.mxu0 %vm22375_vm9, %v22006_v5  ;;  %vm22382_vm9 = vnez %v22381_v30 }
0x20b1   : > { %17203 = vmatpush3.msk.msra.mxu0 %vm22376_vm5, %v22006_v5  ;;  %vm22384_vm5 = vnez %v22383_v16 }
0x20b2   : > { %17204 = vmatprep.subr.msk.mxu0 %vm22377_vm13, %v22006_v5  ;;  %vm22386_vm13 = vnez %v22385_v8 }
0x20b3   : > { %17205 = vmatpush3.msk.msra.mxu0 %vm22378_vm1, %v22006_v5  ;;  %vm22387_vm1 = vcmask 64512  }
0x20b4   : > { %17206 = vmatprep.subr.msk.mxu0 %vm22380_vm11, %v22006_v5 }
0x20b5   : > { %17207 = vmatpush3.msk.msra.mxu0 %vm22380_vm11, %v22006_v5 }
0x20b6   : > { %17208 = vmatprep.subr.msk.mxu0 %vm22382_vm9, %v22006_v5 }
0x20b7   : > { %17209 = vmatpush3.msk.msra.mxu0 %vm22382_vm9, %v22006_v5  ;;  %vm22391_vm9 = vcmp.eq.s32.totalorder %v17982_v7, %v22388_v57 }
0x20b8   : > { %17210 = vmatprep.subr.msk.mxu0 %vm22384_vm5, %v22006_v5  ;;  %vm22392_vm11 = vmmov %vm22391_vm9 }
0x20b9   : > { %17211 = vmatpush3.msk.msra.mxu0 %vm22384_vm5, %v22006_v5  ;;  %vm22389_vm5 = vcmp.eq.s32.totalorder %v17973_v4, %v22388_v57 }
0x20ba   : > { %17212 = vmatprep.subr.msk.mxu0 %vm22386_vm13, %v22006_v5 }
0x20bb   : > { %17213 = vmatpush3.msk.msra.mxu0 %vm22386_vm13, %v22006_v5  ;;  %vm22390_vm13 = vmmov %vm22389_vm5 }
0x215c   : > { %v17154_v44 = vpop.f32.mrf.mxu0 }
0x215d   : > { %v9585_v56 = vadd.f32 %v17154_v44, %v9430_v43  ;;  %v22399_v43 = vld [vmem:[#allocation53_spill] sm:$0xff] }
0x215e   : > { %v9575_v59 = vpop.f32.mrf.mxu0 }
0x215f   : > { %v9584_v28 = vadd.f32 %v9575_v59, %v9429_v45  ;;  %v22403_v45 = vld [vmem:[#allocation57_spill] sm:$0xff] }
0x216c   : > { %v9652_v1 = vpop.f32.mrf.mxu0 }
0x216d   : > { %17174 = vmatprep.subr.mxu1 %v9652_v1 }
0x216e   : > { %v17173_v61 = vpop.f32.mrf.mxu0  ;;  %17175 = vmatpush3.msra.mxu1 %v9652_v1 }
0x216f   : > { %17177 = vmatmul.mubr.msk.f32.vlgmr.msra.gmra.mxu1 %vm22387_vm1, %v9659_v54  ;;  %17179 = vmatprep.subr.msk.mxu1 %vm22389_vm5, %v22006_v5  ;;  %vm22393_vm1 = vcmp.eq.s32.totalorder %v17989_v9, %v22388_v57  ;;  %v9765_v61 = vpop.permute.xlu0 %9764 }
0x2170   : > { %17180 = vmatpush3.msk.msra.mxu1 %vm22390_vm13, %v22006_v5  ;;  %vm22394_vm5 = vmmov %vm22393_vm1  ;;  %vm22395_vm13 = vcmp.eq.s32.totalorder %v18002_v12, %v22388_v57 }
0x2171   : > { %17181 = vmatprep.subr.msk.mxu1 %vm22391_vm9, %v22006_v5  ;;  %vm22396_vm9 = vmmov %vm22395_vm13 }
0x2172   : > { %17182 = vmatpush3.msk.msra.mxu1 %vm22392_vm11, %v22006_v5  ;;  %vm22398_vm11 = vnez %v22397_v11 }
0x2173   : > { %17183 = vmatprep.subr.msk.mxu1 %vm22393_vm1, %v22006_v5  ;;  %vm22400_vm1 = vnez %v22399_v43 }
0x2174   : > { %17184 = vmatpush3.msk.msra.mxu1 %vm22394_vm5, %v22006_v5  ;;  %vm22402_vm5 = vnez %v22401_v42  ;;  %v9932_v42 = vpop.permute.xlu1 %9931 }
0x2175   : > { %17185 = vmatprep.subr.msk.mxu1 %vm22395_vm13, %v22006_v5  ;;  %vm22404_vm13 = vnez %v22403_v45 }
0x2176   : > { %17186 = vmatpush3.msk.msra.mxu1 %vm22396_vm9, %v22006_v5  ;;  %vm22405_vm9 = vcmask 523264  }
0x2177   : > { %17187 = vmatprep.subr.msk.mxu1 %vm22398_vm11, %v22006_v5 }
0x2178   : > { %17188 = vmatpush3.msk.msra.mxu1 %vm22398_vm11, %v22006_v5  ;;  %v10169_v45 = vpop.permute.xlu1 %10168  ;;  %vm22409_vm11 = vcmask 130048  }
0x2179   : > { %17189 = vmatprep.subr.msk.mxu1 %vm22400_vm1, %v22006_v5  ;;  %vm22410_vm14 = vmmov %vm22409_vm11 }
0x217a   : > { %17190 = vmatpush3.msk.msra.mxu1 %vm22400_vm1, %v22006_v5 }
0x217b   : > { %17191 = vmatprep.subr.msk.mxu1 %vm22402_vm5, %v22006_v5 }
0x217c   : > { %17192 = vmatpush3.msk.msra.mxu1 %vm22402_vm5, %v22006_v5  ;;  %vm22407_vm5 = vmmov %vm22405_vm9  ;;  %v10329_v6 = vpop.permute.xlu1 %10328 }
0x217d   : > { %17193 = vmatprep.subr.msk.mxu1 %vm22404_vm13, %v22006_v5  ;;  %vm22408_vm1 = vmmov %vm22407_vm5 }
0x217e   : > { %17194 = vmatpush3.msk.msra.mxu1 %vm22404_vm13, %v22006_v5  ;;  %vm22406_vm13 = vmmov %vm22405_vm9 }
0x222f   : > { %v17178_v0 = vpop.f32.mrf.mxu1 }
0x2230   : > { %v9740_v44 = vadd.f32 %v17178_v0, %v9585_v56 }
0x2231   : > { %v9730_v59 = vpop.f32.mrf.mxu1 }
0x2232   : > { %v9756_v1 = vmul.f32 %v9753_v2, %v9740_v44  ;;  %v9739_v54 = vadd.f32 %v9730_v59, %v9584_v28  ;;  %v17739_v2 = vld [vmem:[%s18471_s22] sm:$0xff] }
0x2234   : > { %v9755_v57 = vmul.f32 %v9748_v13, %v9739_v54  ;;  %v9768_v43 = vadd.f32 %v9765_v61, %v9756_v1 }
0x2236   : > { %v9767_v11 = vadd.f32 %v9760_v49, %v9755_v57  ;;  %v20717_v16 = vmax.f32 %v9768_v43, 0.0  ;;  %v9934_v43 = vpop.permute.xlu0 %9933 }
0x2238   : > { %v20715_v8 = vmax.f32 %v9767_v11, 0.0 }
0x223a   : > { %17195 = vmatprep.mubr.msk.f32.mxu1 %vm22405_vm9, %v20715_v8  ;;  %17214 = vmatprep.mubr.msk.f32.mxu0 %vm22406_vm13, %v20715_v8  ;;  %vm22411_vm13 = vmmov %vm22409_vm11  ;;  %v10171_v1 = vpop.permute.xlu0 %10170 }
0x223b   : > { %17196 = vmatmul.mubr.msk.f32.vlgmr.msra.gmra.mxu1 %vm22407_vm5, %v20717_v16  ;;  %17215 = vmatmul.mubr.msk.f32.vlgmr.msra.gmra.mxu0 %vm22408_vm1, %v20717_v16  ;;  %vm22412_vm1 = vmmov %vm22409_vm11 }
0x223c   : > { %17221 = vmatprep.mubr.msk.f32.mxu1 %vm22409_vm11, %v9932_v42  ;;  %17254 = vmatprep.mubr.msk.f32.mxu0 %vm22410_vm14, %v10169_v45  ;;  %v17740_v42 = vld [vmem:[%s18471_s22 + $0x8] sm:$0xff]  ;;  %vm22413_vm14 = vmmov %vm22412_vm1 }
0x223d   : > { %vm22414_vm11 = vmmov %vm22407_vm5 }
0x22fb   : > { %v17216_v56 = vpop.f32.mrf.mxu0  ;;  %v17197_v28 = vpop.f32.mrf.mxu1 }
0x22fc   : > { %17217 = vmatprep.subr.mxu1 %v17216_v56 }
0x22fd   : > { %v9920_v11 = vpop.f32.mrf.mxu0  ;;  %17218 = vmatpush3.msra.mxu1 %v17216_v56  ;;  %v9845_v13 = vpop.f32.mrf.mxu1 }
0x22fe   : > { %17219 = vmatprep.subr.mxu1 %v9920_v11  ;;  %v10331_v56 = vpop.permute.xlu0 %10330 }
0x22ff   : > { %17220 = vmatpush3.msra.mxu1 %v9920_v11 }
0x2300   : > { %17222 = vmatmul.mubr.msk.f32.vlgmr.msra.gmra.mxu1 %vm22411_vm13, %v9934_v43  ;;  %17224 = vmatprep.subr.mxu1 %v17197_v28  ;;  %vm22421_vm13 = vnez %v21955_v37 }
0x2301   : > { %17225 = vmatpush3.msra.mxu1 %v17197_v28  ;;  %17228 = vmatprep.mubr.msk.f32.mxu1 %vm22412_vm1, %v17739_v2  ;;  %v22431_v28 = vld [vmem:[#allocation48_spill] sm:$0xff] }
0x2302   : > { %17226 = vmatprep.subr.mxu1 %v9845_v13 }
0x2303   : > { %17227 = vmatpush3.msra.mxu1 %v9845_v13 }
0x2304   : > { %17229 = vmatmul.mubr.msk.f32.vlgmr.msra.gmra.mxu1 %vm22413_vm14, %v17740_v42  ;;  %17231 = vmatprep.subr.msk.mxu1 %vm22309_vm8, %v22006_v5  ;;  %vm22423_vm14 = vnez %v22304_v51  ;;  %v10491_v42 = vpop.permute.xlu0 %10490 }
0x2305   : > { %17232 = vmatpush3.msk.msra.mxu1 %vm22309_vm8, %v22006_v5  ;;  %17247 = vmatprep.mubr.msk.f32.mxu1 %vm22414_vm11, %v20715_v8  ;;  %vm22416_vm8 = vmmov %vm22407_vm5  ;;  %vm22419_vm5 = vnez %v21953_v32  ;;  %vm22424_vm11 = vnez %v21976_v62  ;;  %v10489_v32 = vpop.permute.xlu1 %10488 }
0x2306   : > { %17233 = vmatprep.subr.msk.mxu1 %vm22311_vm4, %v22006_v5  ;;  %vm22420_vm9 = vmmov %vm22416_vm8 }
0x2307   : > { %17234 = vmatpush3.msk.msra.mxu1 %vm22311_vm4, %v22006_v5  ;;  %vm22415_vm4 = vnez %v21991_v41 }
0x2308   : > { %17235 = vmatprep.subr.msk.mxu1 %vm22313_vm2, %v22006_v5 }
0x2309   : > { %17236 = vmatpush3.msk.msra.mxu1 %vm22313_vm2, %v22006_v5  ;;  %vm22417_vm2 = vmmov %vm22412_vm1 }
0x230a   : > { %17237 = vmatprep.subr.msk.mxu1 %vm22315_vm3, %v22006_v5 }
0x230b   : > { %17238 = vmatpush3.msk.msra.mxu1 %vm22315_vm3, %v22006_v5  ;;  %vm22418_vm3 = vmmov %vm22412_vm1  ;;  %vm22422_vm1 = vnez %v21957_v38 }
0x230c   : > { %17239 = vmatprep.subr.msk.mxu1 %vm22069_vm10, %v22006_v5 }
0x230d   : > { %17240 = vmatpush3.msk.msra.mxu1 %vm22069_vm10, %v22006_v5 }
0x230e   : > { %17241 = vmatprep.subr.msk.mxu1 %vm22070_vm0, %v22006_v5 }
0x230f   : > { %17242 = vmatpush3.msk.msra.mxu1 %vm22070_vm0, %v22006_v5 }
0x2310   : > { %17243 = vmatprep.subr.msk.mxu1 %vm22071_vm6, %v22006_v5 }
0x2311   : > { %17244 = vmatpush3.msk.msra.mxu1 %vm22071_vm6, %v22006_v5 }
0x2312   : > { %17245 = vmatprep.subr.msk.mxu1 %vm22415_vm4, %v22006_v5 }
0x2313   : > { %17246 = vmatpush3.msk.msra.mxu1 %vm22415_vm4, %v22006_v5 }
0x2314   : > { %17248 = vmatmul.mubr.msk.f32.vlgmr.msra.gmra.mxu1 %vm22416_vm8, %v20717_v16  ;;  %vm22425_vm8 = vnez %v21980_v10 }
0x2315   : > { %17280 = vmatprep.mubr.msk.f32.mxu1 %vm22417_vm2, %v10329_v6  ;;  %vm22426_vm2 = vnez %v21984_v25 }
0x23c0   : > { %v17223_v31 = vpop.f32.mrf.mxu1 }
0x23c2   : > { %v10005_v48 = vpop.f32.mrf.mxu1 }
0x23c4   : > { %v17230_v14 = vpop.f32.mrf.mxu1 }
0x23c5   : > { %v10090_v45 = vadd.f32 %v17230_v14, %v17223_v31 }
0x23c6   : > { %v10084_v49 = vpop.f32.mrf.mxu1 }
0x23c7   : > { %v10085_v0 = vadd.f32 %v10084_v49, %v10005_v48  ;;  %v10583_v48 = vpop.permute.xlu1 %10582 }
0x23d4   : > { %v17249_v44 = vpop.f32.mrf.mxu1 }
0x23d5   : > { %17250 = vmatprep.subr.mxu0 %v17249_v44 }
0x23d6   : > { %v10159_v59 = vpop.f32.mrf.mxu1  ;;  %17251 = vmatpush3.msra.mxu0 %v17249_v44 }
0x23d7   : > { %17252 = vmatprep.subr.mxu0 %v10159_v59 }
0x23d8   : > { %17253 = vmatpush3.msra.mxu0 %v10159_v59 }
0x23d9   : > { %17255 = vmatmul.mubr.msk.f32.vlgmr.msra.gmra.mxu0 %vm22418_vm3, %v10171_v1  ;;  %17257 = vmatprep.subr.msk.mxu0 %vm22419_vm5, %v22006_v5  ;;  %vm22427_vm3 = vnez %v22084_v26 }
0x23da   : > { %17258 = vmatpush3.msk.msra.mxu0 %vm22419_vm5, %v22006_v5  ;;  %17273 = vmatprep.mubr.msk.f32.mxu0 %vm22420_vm9, %v20715_v8  ;;  %vm22428_vm5 = vmmov %vm22420_vm9  ;;  %vm22429_vm9 = vcmask 130048  }
0x23db   : > { %17259 = vmatprep.subr.msk.mxu0 %vm22421_vm13, %v22006_v5 }
0x23dc   : > { %17260 = vmatpush3.msk.msra.mxu0 %vm22421_vm13, %v22006_v5  ;;  %vm22430_vm13 = vmmov %vm22429_vm9 }
0x23dd   : > { %17261 = vmatprep.subr.msk.mxu0 %vm22422_vm1, %v22006_v5 }
0x23de   : > { %17262 = vmatpush3.msk.msra.mxu0 %vm22422_vm1, %v22006_v5  ;;  %vm22432_vm1 = vcmp.eq.s32.totalorder %v17973_v4, %v22431_v28  ;;  %v22440_v4 = vld [vmem:[#allocation59_spill] sm:$0xff] }
0x23df   : > { %17263 = vmatprep.subr.msk.mxu0 %vm22423_vm14, %v22006_v5 }
0x23e0   : > { %17264 = vmatpush3.msk.msra.mxu0 %vm22423_vm14, %v22006_v5  ;;  %vm22433_vm14 = vmmov %vm22432_vm1 }
0x23e1   : > { %17265 = vmatprep.subr.msk.mxu0 %vm22424_vm11, %v22006_v5 }
0x23e2   : > { %17266 = vmatpush3.msk.msra.mxu0 %vm22424_vm11, %v22006_v5 }
0x23e3   : > { %17267 = vmatprep.subr.msk.mxu0 %vm22425_vm8, %v22006_v5 }
0x23e4   : > { %17268 = vmatpush3.msk.msra.mxu0 %vm22425_vm8, %v22006_v5 }
0x23e5   : > { %17269 = vmatprep.subr.msk.mxu0 %vm22426_vm2, %v22006_v5 }
0x23e6   : > { %17270 = vmatpush3.msk.msra.mxu0 %vm22426_vm2, %v22006_v5 }
0x23e7   : > { %17271 = vmatprep.subr.msk.mxu0 %vm22427_vm3, %v22006_v5 }
0x23e8   : > { %17272 = vmatpush3.msk.msra.mxu0 %vm22427_vm3, %v22006_v5 }
0x23e9   : > { %17274 = vmatmul.mubr.msk.f32.vlgmr.msra.gmra.mxu0 %vm22428_vm5, %v20717_v16 }
0x23ea   : > { %17306 = vmatprep.mubr.msk.f32.mxu0 %vm22429_vm9, %v10489_v32  ;;  %vm22434_vm9 = vcmp.eq.s32.totalorder %v17982_v7, %v22431_v28  ;;  %v22442_v7 = vld [vmem:[#allocation60_spill] sm:$0xff]  ;;  %v8878_v32 = vld [vmem:[%s19361_s26 + $0x8] sm:$0xff] }
0x2499   : > { %v17256_v37 = vpop.f32.mrf.mxu0 }
0x249a   : > { %v10252_v38 = vadd.f32 %v17256_v37, %v10090_v45  ;;  %v8877_v37 = vld [vmem:[%s19361_s26] sm:$0xff]  ;;  %s22461_s26 = sld [smem:[#allocation66_spill]] }
0x249b   : > { %v10242_v51 = vpop.f32.mrf.mxu0 }
0x249c   : > { %v10251_v54 = vadd.f32 %v10242_v51, %v10085_v0  ;;  %v10578_v0 = vpop.permute.xlu0 %10577 }
0x24a9   : > { %v17275_v61 = vpop.f32.mrf.mxu0 }
0x24aa   : > { %17276 = vmatprep.subr.mxu1 %v17275_v61 }
0x24ab   : > { %v10319_v57 = vpop.f32.mrf.mxu0  ;;  %17277 = vmatpush3.msra.mxu1 %v17275_v61 }
0x24ac   : > { %17278 = vmatprep.subr.mxu1 %v10319_v57 }
0x24ad   : > { %17279 = vmatpush3.msra.mxu1 %v10319_v57  ;;  %v10587_v57 = vld [vmem:[%s19369_s8] sm:$0xf]  ;;  %s22458_s8 = sld [smem:[#allocation63_spill]] }
0x24ae   : > { %17281 = vmatmul.mubr.msk.f32.vlgmr.msra.gmra.mxu1 %vm22430_vm13, %v10331_v56  ;;  %17283 = vmatprep.subr.msk.mxu1 %vm22432_vm1, %v22006_v5  ;;  %vm22435_vm13 = vmmov %vm22434_vm9  ;;  %vm22436_vm1 = vcmp.eq.s32.totalorder %v17989_v9, %v22431_v28  ;;  %v22444_v9 = vld [vmem:[#allocation61_spill] sm:$0xff] }
0x24af   : > { %17284 = vmatpush3.msk.msra.mxu1 %vm22433_vm14, %v22006_v5  ;;  %17299 = vmatprep.mubr.msk.f32.mxu1 %vm22428_vm5, %v20715_v8  ;;  %vm22437_vm14 = vmmov %vm22436_vm1  ;;  %vm22438_vm5 = vcmp.eq.s32.totalorder %v18002_v12, %v22431_v28  ;;  %v22446_v12 = vld [vmem:[#allocation62_spill] sm:$0xff]  ;;  %v10588_v56 = vld [vmem:[%s19376_s6] sm:$0xff] }
0x24b0   : > { %17285 = vmatprep.subr.msk.mxu1 %vm22434_vm9, %v22006_v5  ;;  %vm22439_vm9 = vmmov %vm22438_vm5 }
0x24b1   : > { %17286 = vmatpush3.msk.msra.mxu1 %vm22435_vm13, %v22006_v5  ;;  %vm22441_vm13 = vnez %v22440_v4 }
0x24b2   : > { %17287 = vmatprep.subr.msk.mxu1 %vm22436_vm1, %v22006_v5  ;;  %vm22443_vm1 = vnez %v22442_v7 }
0x24b3   : > { %17288 = vmatpush3.msk.msra.mxu1 %vm22437_vm14, %v22006_v5  ;;  %vm22445_vm14 = vnez %v22444_v9 }
0x24b4   : > { %17289 = vmatprep.subr.msk.mxu1 %vm22438_vm5, %v22006_v5  ;;  %vm22447_vm5 = vnez %v22446_v12 }
0x24b5   : > { %17290 = vmatpush3.msk.msra.mxu1 %vm22439_vm9, %v22006_v5  ;;  %vm22448_vm9 = vcmask 523264  }
0x24b6   : > { %17291 = vmatprep.subr.msk.mxu1 %vm22441_vm13, %v22006_v5 }
0x24b7   : > { %17292 = vmatpush3.msk.msra.mxu1 %vm22441_vm13, %v22006_v5 }
0x24b8   : > { %17293 = vmatprep.subr.msk.mxu1 %vm22443_vm1, %v22006_v5 }
0x24b9   : > { %17294 = vmatpush3.msk.msra.mxu1 %vm22443_vm1, %v22006_v5 }
0x24ba   : > { %17295 = vmatprep.subr.msk.mxu1 %vm22445_vm14, %v22006_v5 }
0x24bb   : > { %17296 = vmatpush3.msk.msra.mxu1 %vm22445_vm14, %v22006_v5 }
0x24bc   : > { %17297 = vmatprep.subr.msk.mxu1 %vm22447_vm5, %v22006_v5 }
0x24bd   : > { %17298 = vmatpush3.msk.msra.mxu1 %vm22447_vm5, %v22006_v5  ;;  %vm22450_vm5 = vcmask 261120  }
0x24be   : > { %17300 = vmatmul.mubr.msk.f32.vlgmr.msra.gmra.mxu1 %vm22448_vm9, %v20717_v16  ;;  %17332 = vmatprep.subr.msk.mxu1 %vm22424_vm11, %v22006_v5  ;;  %vm22449_vm9 = vcmask 130048  }
0x24bf   : > { %17333 = vmatpush3.msk.msra.mxu1 %vm22424_vm11, %v22006_v5 }
0x24c0   : > { %17334 = vmatprep.subr.msk.mxu1 %vm22425_vm8, %v22006_v5 }
0x24c1   : > { %17335 = vmatpush3.msk.msra.mxu1 %vm22425_vm8, %v22006_v5 }
0x24c2   : > { %17336 = vmatprep.subr.msk.mxu1 %vm22426_vm2, %v22006_v5 }
0x24c3   : > { %17337 = vmatpush3.msk.msra.mxu1 %vm22426_vm2, %v22006_v5 }
0x24c4   : > { %17338 = vmatprep.subr.msk.mxu1 %vm22427_vm3, %v22006_v5 }
0x24c5   : > { %17339 = vmatpush3.msk.msra.mxu1 %vm22427_vm3, %v22006_v5 }
0x24c6   : > { %17354 = vmatprep.subr.msk.mxu1 %vm22254_vm15, %v22006_v5 }
0x256e   : > { %v17282_v16 = vpop.f32.mrf.mxu1 }
0x256f   : > { %v10412_v8 = vadd.f32 %v17282_v16, %v10252_v38 }
0x2570   : > { %v10402_v11 = vpop.f32.mrf.mxu1 }
0x2571   : > { %v10411_v43 = vadd.f32 %v10402_v11, %v10251_v54  ;;  %v10589_v11 = vld [vmem:[%s19376_s6 + $0x8] sm:$0xff]  ;;  %s22459_s6 = sld [smem:[#allocation64_spill]] }
0x257e   : > { %v17301_v13 = vpop.f32.mrf.mxu1 }
0x257f   : > { %17302 = vmatprep.subr.mxu0 %v17301_v13 }
0x2580   : > { %v10479_v2 = vpop.f32.mrf.mxu1  ;;  %17303 = vmatpush3.msra.mxu0 %v17301_v13 }
0x2581   : > { %17304 = vmatprep.subr.mxu0 %v10479_v2 }
0x2582   : > { %17305 = vmatpush3.msra.mxu0 %v10479_v2 }
0x2583   : > { %17307 = vmatmul.mubr.msk.f32.vlgmr.msra.gmra.mxu0 %vm22449_vm9, %v10491_v42  ;;  %17309 = vmatprep.subr.mxu0 %v22005_v3  ;;  %vm22451_vm9 = vmmov %vm22450_vm5 }
0x2584   : > { %17313 = vmatprep.mubr.msk.f32.mxu0 %vm22208_vm12, %v22005_v3  ;;  %vm22453_vm12 = vcmask 31744  }
0x2585   : > { %vm22456_vm1 = vmmov %vm22453_vm12 }
0x2643   : > { %v17308_v6 = vpop.f32.mrf.mxu0 }
0x2644   : > { %v10572_v31 = vadd.f32 %v17308_v6, %v10412_v8 }
0x2645   : > { %v10562_v14 = vpop.f32.mrf.mxu0 }
0x2646   : > { %v10571_v45 = vadd.f32 %v10562_v14, %v10411_v43  ;;  %v20933_v49 = vadd.f32 %v10583_v48, %v10572_v31 }
0x2648   : > { %v10593_v44 = vsel %vm22450_vm5, %v20933_v49, 0.0  ;;  %v20937_v59 = vadd.f32 %v10578_v0, %v10571_v45  ;;  %vm22452_vm5 = vcmask 130048  }
0x2649   : > { %10594 = vadd.xlane.f32.xlu1 %v10593_v44 }
0x264a   : > { %v10590_v1 = vsel %vm22451_vm9, %v20937_v59, 0.0  ;;  %vm22454_vm9 = vcmask 1043456  }
0x264b   : > { %10591 = vadd.xlane.f32.xlu0 %v10590_v1  ;;  %vm22455_vm14 = vmmov %vm22454_vm9 }
0x265a   : > { %8886 = vperm.xlu1 %17705, %v8878_v32   ;;  %v10941_v32 = vld [vmem:[%s19413_s13 + $0x8] sm:$0xff] }
0x2661   : > { %8881 = vperm.xlu0 %17704, %v8877_v37   ;;  %v10940_v37 = vld [vmem:[%s19413_s13] sm:$0xff]  ;;  %s22462_s13 = sld [smem:[#allocation67_spill]] }
0x26d2   : > { %v10595_v38 = vpop.xlane.xlu1 %10594 }
0x26d3   : > { %v10597_v51 = vmul.f32 0.03125, %v10595_v38  ;;  %v10943_v38 = vld [vmem:[%s19418_s14 + $0x8] sm:$0xff] }
0x26d4   : > { %v10592_v54 = vpop.xlane.xlu0 %10591 }
0x26d5   : > { %v10596_v61 = vmul.f32 0.03125, %v10592_v54  ;;  %17310 = vmatpush3.msra.mxu0 %v10597_v51  ;;  %v10942_v51 = vld [vmem:[%s19418_s14] sm:$0xff]  ;;  %v20984_v54 = vld [vmem:[%s22458_s8 + $0x8] sm:$0xff]  ;;  %s22540_s14 = sld [smem:[#allocation69_spill]] }
0x26d6   : > { %17311 = vmatprep.subr.mxu0 %v22005_v3 }
0x26d7   : > { %17312 = vmatpush3.msra.mxu0 %v10596_v61  ;;  %v20987_v61 = vld [vmem:[%s22458_s8] sm:$0xff] }
0x26d8   : > { %17314 = vmatmul.mubr.msk.f32.vlgmr.msra.gmra.mxu0 %vm22452_vm5, %v10587_v57  ;;  %v11773_v57 = vld [vmem:[%s22459_s6 + $0x8] sm:$0xff] }
0x26d9   : > { %17318 = vmatprep.mubr.msk.f32.mxu0 %vm22453_vm12, %v10588_v56  ;;  %vm22457_vm12 = vnez %v21889_v15  ;;  %v11772_v56 = vld [vmem:[%s22459_s6] sm:$0xff] }
0x2798   : > { %v10667_v28 = vpop.f32.mrf.mxu0 }
0x2799   : > { %v10671_v16 = vmax.f32 %v10667_v28, 0.0  ;;  %v11775_v28 = vld [vmem:[%s22460_s16 + $0x8] sm:$0xff] }
0x279a   : > { %v17315_v8 = vpop.f32.mrf.mxu0 }
0x279b   : > { %17316 = vmatprep.subr.msk.mxu0 %vm22454_vm9, %v10671_v16  ;;  %v21010_v8 = vld [vmem:[%s22461_s26 + $0x8] sm:$0xff] }
0x279c   : > { %17317 = vmatpush3.msk.msra.mxu0 %vm22455_vm14, %v10671_v16  ;;  %v11774_v16 = vld [vmem:[%s22460_s16] sm:$0xff] }
0x279d   : > { %17319 = vmatmul.mubr.msk.f32.vlgmr.msra.gmra.mxu0 %vm22456_vm1, %v10589_v11  ;;  %17321 = vmatprep.subr.msk.mxu0 %vm22069_vm10, %v22006_v5  ;;  %v21013_v11 = vld [vmem:[%s22461_s26] sm:$0xff]  ;;  %vm22463_vm1 = vcmask 261120  }
0x279e   : > { %17322 = vmatpush3.msk.msra.mxu0 %vm22069_vm10, %v22006_v5  ;;  %vm22464_vm14 = vmmov %vm22463_vm1 }
0x279f   : > { %17323 = vmatprep.subr.msk.mxu0 %vm22070_vm0, %v22006_v5  ;;  %vm22465_vm5 = vmmov %vm22463_vm1 }
0x27a0   : > { %17324 = vmatpush3.msk.msra.mxu0 %vm22070_vm0, %v22006_v5  ;;  %vm22466_vm9 = vmmov %vm22463_vm1 }
0x27a1   : > { %17325 = vmatprep.subr.msk.mxu0 %vm22071_vm6, %v22006_v5 }
0x27a2   : > { %17326 = vmatpush3.msk.msra.mxu0 %vm22071_vm6, %v22006_v5 }
0x27a3   : > { %17327 = vmatprep.subr.msk.mxu0 %vm22415_vm4, %v22006_v5 }
0x27a4   : > { %17328 = vmatpush3.msk.msra.mxu0 %vm22415_vm4, %v22006_v5 }
0x27a5   : > { %17343 = vmatprep.subr.msk.mxu0 %vm22457_vm12, %v22006_v5 }
0x285d   : > { %v17320_v43 = vpop.f32.mrf.mxu0 }
0x285e   : > { %v10757_v13 = vsub.f32 0.0, %v17320_v43  ;;  %v12604_v43 = vld [vmem:[%s22462_s13] sm:$0xff] }
0x285f   : > { %v10747_v2 = vpop.f32.mrf.mxu0 }
0x2860   : > { %v10760_v42 = vmul.f32 1.442695, %v10757_v13  ;;  %v10756_v6 = vsub.f32 0.0, %v10747_v2  ;;  %v12605_v13 = vld [vmem:[%s22462_s13 + $0x8] sm:$0xff]  ;;  %v8882_v2 = vpop.permute.xlu0 %8881 }
0x2862   : > { %17722 = vpow2.f32 %v10760_v42  ;;  %v10758_v31 = vmul.f32 1.442695, %v10756_v6  ;;  %v8887_v42 = vpop.permute.xlu1 %8886 }
0x2864   : > { %17724 = vpow2.f32 %v10758_v31 }
0x286f   : > { %v17723_v48 = vpop.eup %17722 }
0x2870   : > { %v10763_v14 = vadd.f32 1.0, %v17723_v48 }
0x2871   : > { %v17725_v45 = vpop.eup %17724 }
0x2872   : > { %17726 = vrcp.f32 %v10763_v14  ;;  %v10762_v0 = vadd.f32 1.0, %v17725_v45  ;;  %v8967_v14 = vadd.f32 %v20512_v39, %v8887_v42  ;;  %v8962_v45 = vadd.f32 %v20514_v46, %v8882_v2 }
0x2874   : > { %17728 = vrcp.f32 %v10762_v0 }
0x287f   : > { %v17727_v44 = vpop.eup %17726 }
0x2880   : > { %10775 = vperm.xlu0 %17704, %v17727_v44  }
0x2881   : > { %v17729_v1 = vpop.eup %17728 }
0x2882   : > { %10770 = vperm.xlu1 %17705, %v17729_v1  }
0x2884   : > { %10951 = vperm.xlu0 %17704, %v10941_v32  }
0x2886   : > { %10946 = vperm.xlu1 %17705, %v10940_v37  }
0x2888   : > { %10963 = vperm.xlu0 %17704, %v10943_v38  }
0x288a   : > { %10958 = vperm.xlu1 %17705, %v10942_v51  }
0x288c   : > { %11132 = vrot.lane.b32.xlu0 %v20984_v54, %s22117_s4 }
0x288e   : > { %11130 = vrot.lane.b32.xlu1 %v20987_v61, %s22117_s4 }
0x2890   : > { %11369 = vrot.lane.b32.xlu0 %v20984_v54, %s22119_s9 }
0x2892   : > { %11367 = vrot.lane.b32.xlu1 %v20987_v61, %s22119_s9 }
0x2894   : > { %11529 = vrot.lane.b32.xlu0 %v20984_v54, %s22120_s25 }
0x2896   : > { %11527 = vrot.lane.b32.xlu1 %v20987_v61, %s22120_s25 }
0x2898   : > { %11689 = vrot.lane.b32.xlu0 %v20984_v54, %s22122_s30 }
0x289a   : > { %11687 = vrot.lane.b32.xlu1 %v20987_v61, %s22122_s30 }
0x289c   : > { %11783 = vperm.xlu0 %17704, %v11773_v57  }
0x289e   : > { %11778 = vperm.xlu1 %17705, %v11772_v56  }
0x28a0   : > { %11795 = vperm.xlu0 %17704, %v11775_v28  }
0x28a2   : > { %11790 = vperm.xlu1 %17705, %v11774_v16  }
0x28a4   : > { %11964 = vrot.lane.b32.xlu0 %v21010_v8, %s22117_s4 }
0x28a6   : > { %11962 = vrot.lane.b32.xlu1 %v21013_v11, %s22117_s4 }
0x28a8   : > { %12201 = vrot.lane.b32.xlu0 %v21010_v8, %s22119_s9 }
0x28aa   : > { %12199 = vrot.lane.b32.xlu1 %v21013_v11, %s22119_s9 }
0x28ac   : > { %12361 = vrot.lane.b32.xlu0 %v21010_v8, %s22120_s25 }
0x28ae   : > { %12359 = vrot.lane.b32.xlu1 %v21013_v11, %s22120_s25  ;;  %s22538_s25 = sld [smem:[#allocation68_spill]] }
0x28b0   : > { %12521 = vrot.lane.b32.xlu0 %v21010_v8, %s22122_s30 }
0x28b2   : > { %12519 = vrot.lane.b32.xlu1 %v21013_v11, %s22122_s30 }
0x28b4   : > { %12608 = vperm.xlu0 %17704, %v12604_v43  }
0x28b6   : > { %12613 = vperm.xlu1 %17705, %v12605_v13  }
0x28fb   : > { %v10776_v6 = vpop.permute.xlu0 %10775 }
0x28fc   : > { %v10779_v31 = vmul.f32 %v10776_v6, %v20933_v49 }
0x28fd   : > { %v10771_v48 = vpop.permute.xlu1 %10770 }
0x28fe   : > { %v10778_v0 = vmul.f32 %v10771_v48, %v20937_v59  ;;  %v10781_v1 = vadd.f32 %v10779_v31, %v8967_v14 }
0x28ff   : > { %v10952_v44 = vpop.permute.xlu0 %10951 }
0x2900   : > { %v10780_v32 = vadd.f32 %v10778_v0, %v8962_v45  ;;  %v10955_v38 = vmul.f32 %v10952_v44, %v10781_v1 }
0x2901   : > { %v10947_v37 = vpop.permute.xlu1 %10946 }
0x2902   : > { %17329 = vmatprep.mubr.msk.f32.mxu0 %vm22463_vm1, %v10780_v32  ;;  %17340 = vmatprep.mubr.msk.f32.mxu1 %vm22464_vm14, %v10780_v32  ;;  %v10954_v51 = vmul.f32 %v10947_v37, %v10780_v32  ;;  %vm22467_vm1 = vnez %v21894_v18  ;;  %vm22468_vm14 = vnez %v21896_v19 }
0x2903   : > { %17330 = vmatmul.mubr.msk.f32.vlgmr.msra.gmra.mxu0 %vm22465_vm5, %v10781_v1  ;;  %17341 = vmatmul.mubr.msk.f32.vlgmr.msra.gmra.mxu1 %vm22466_vm9, %v10781_v1  ;;  %v10964_v49 = vpop.permute.xlu0 %10963  ;;  %vm22471_vm5 = vnez %v21902_v22 }
0x2904   : > { %17344 = vmatpush3.msk.msra.mxu0 %vm22457_vm12, %v22006_v5  ;;  %17355 = vmatpush3.msk.msra.mxu1 %vm22254_vm15, %v22006_v5  ;;  %v10967_v46 = vadd.f32 %v10964_v49, %v10955_v38  ;;  %vm22469_vm15 = vnez %v21900_v21  ;;  %vm22470_vm12 = vnez %v21904_v23  ;;  %v22508_v49 = vld [vmem:[#allocation51_spill] sm:$0xff]  ;;  %v22510_v38 = vld [vmem:[#allocation53_spill] sm:$0xff] }
0x2905   : > { %v10959_v39 = vpop.permute.xlu1 %10958  ;;  %17345 = vmatprep.subr.msk.mxu0 %vm22467_vm1, %v22006_v5  ;;  %17356 = vmatprep.subr.msk.mxu1 %vm22468_vm14, %v22006_v5 }
0x2906   : > { %v10966_v59 = vadd.f32 %v10959_v39, %v10954_v51  ;;  %17346 = vmatpush3.msk.msra.mxu0 %vm22467_vm1, %v22006_v5  ;;  %17357 = vmatpush3.msk.msra.mxu1 %vm22468_vm14, %v22006_v5  ;;  %v21079_v17 = vmax.f32 %v10967_v46, 0.0  ;;  %v22512_v51 = vld [vmem:[#allocation55_spill] sm:$0xff]  ;;  %v22514_v39 = vld [vmem:[#allocation57_spill] sm:$0xff] }
0x2907   : > { %17347 = vmatprep.subr.msk.mxu0 %vm22342_vm7, %v22006_v5  ;;  %17358 = vmatprep.subr.msk.mxu1 %vm22469_vm15, %v22006_v5  ;;  %v11133_v43 = vpop.permute.xlu0 %11132 }
0x2908   : > { %v21065_v15 = vmax.f32 %v10966_v59, 0.0  ;;  %17348 = vmatpush3.msk.msra.mxu0 %vm22342_vm7, %v22006_v5  ;;  %17359 = vmatpush3.msk.msra.mxu1 %vm22469_vm15, %v22006_v5  ;;  %vm22472_vm7 = vmmov %vm22466_vm9  ;;  %vm22476_vm15 = vcmask 130048  }
0x2909   : > { %17349 = vmatprep.subr.msk.mxu0 %vm22470_vm12, %v22006_v5  ;;  %17360 = vmatprep.subr.msk.mxu1 %vm22471_vm5, %v22006_v5  ;;  %vm22473_vm9 = vmmov %vm22472_vm7  ;;  %v11131_v18 = vpop.permute.xlu1 %11130 }
0x290a   : > { %17350 = vmatpush3.msk.msra.mxu0 %vm22470_vm12, %v22006_v5  ;;  %17351 = vmatprep.mubr.msk.f32.mxu0 %vm22472_vm7, %v21065_v15  ;;  %vm22474_vm1 = vmmov %vm22472_vm7 }
0x290b   : > { %17361 = vmatpush3.msk.msra.mxu1 %vm22471_vm5, %v22006_v5  ;;  %17362 = vmatprep.mubr.msk.f32.mxu1 %vm22473_vm9, %v21065_v15  ;;  %vm22475_vm14 = vmmov %vm22474_vm1  ;;  %vm22480_vm9 = vnez %v21907_v33  ;;  %v11370_v31 = vpop.permute.xlu0 %11369 }
0x290c   : > { %17352 = vmatmul.mubr.msk.f32.vlgmr.msra.gmra.mxu0 %vm22474_vm1, %v21079_v17  ;;  %17363 = vmatmul.mubr.msk.f32.vlgmr.msra.gmra.mxu1 %vm22475_vm14, %v21079_v17  ;;  %vm22477_vm12 = vmmov %vm22476_vm15 }
0x290d   : > { %17369 = vmatprep.mubr.msk.f32.mxu0 %vm22476_vm15, %v11131_v18  ;;  %17376 = vmatprep.mubr.msk.f32.mxu1 %vm22477_vm12, %v20987_v61  ;;  %vm22478_vm5 = vmmov %vm22477_vm12  ;;  %v11368_v13 = vpop.permute.xlu1 %11367  ;;  %vm22482_vm15 = vnez %v21909_v34  ;;  %vm22483_vm12 = vnez %v21911_v35 }
0x290e   : > { %vm22479_vm7 = vmmov %vm22478_vm5 }
0x290f   : > { %vm22481_vm14 = vmmov %vm22478_vm5  ;;  %v11530_v1 = vpop.permute.xlu0 %11529 }
0x2911   : > { %v11528_v33 = vpop.permute.xlu1 %11527 }
0x2913   : > { %v11690_v37 = vpop.permute.xlu0 %11689 }
0x2917   : > { %v11784_v46 = vpop.permute.xlu0 %11783 }
0x29c3   : > { %v21098_v19 = vpop.f32.mrf.mxu0  ;;  %v21100_v20 = vpop.f32.mrf.mxu1 }
0x29c4   : > { %v10939_v21 = vmax.f32 %v21098_v19, %v21100_v20  ;;  %v15315_v20 = vld [vmem:[%s19907_s15 + $0x58] sm:$0xff] }
0x29c5   : > { %v21104_v22 = vpop.f32.mrf.mxu0  ;;  %v21106_v23 = vpop.f32.mrf.mxu1 }
0x29c6   : > { %v10938_v57 = vmax.f32 %v21104_v22, %v21106_v23  ;;  %v15309_v23 = vld [vmem:[%s19907_s15 + $0x38] sm:$0xff] }
0x29cc   : > { %v17353_v56 = vpop.f32.mrf.mxu0  ;;  %v17364_v28 = vpop.f32.mrf.mxu1 }
0x29cd   : > { %17365 = vmatprep.subr.mxu0 %v17364_v28  ;;  %17372 = vmatprep.subr.mxu1 %v17353_v56 }
0x29ce   : > { %v11044_v16 = vpop.f32.mrf.mxu0  ;;  %v11119_v61 = vpop.f32.mrf.mxu1  ;;  %17366 = vmatpush3.msra.mxu0 %v17364_v28  ;;  %17373 = vmatpush3.msra.mxu1 %v17353_v56 }
0x29cf   : > { %17367 = vmatprep.subr.mxu0 %v11119_v61  ;;  %17374 = vmatprep.subr.mxu1 %v11044_v16 }
0x29d0   : > { %17368 = vmatpush3.msra.mxu0 %v11119_v61  ;;  %17375 = vmatpush3.msra.mxu1 %v11044_v16  ;;  %v11796_v16 = vpop.permute.xlu0 %11795 }
0x29d1   : > { %17370 = vmatmul.mubr.msk.f32.vlgmr.msra.gmra.mxu0 %vm22478_vm5, %v11133_v43  ;;  %17377 = vmatmul.mubr.msk.f32.vlgmr.msra.gmra.mxu1 %vm22479_vm7, %v20984_v54  ;;  %vm22484_vm5 = vnez %v21913_v36  ;;  %vm22485_vm7 = vmmov %vm22474_vm1  ;;  %v11688_v36 = vpop.permute.xlu1 %11687 }
0x29d2   : > { %17379 = vmatprep.subr.msk.mxu0 %vm22480_vm9, %v22006_v5  ;;  %17387 = vmatprep.mubr.msk.f32.mxu0 %vm22474_vm1, %v21065_v15 }
0x29d3   : > { %17380 = vmatpush3.msk.msra.mxu0 %vm22480_vm9, %v22006_v5  ;;  %17394 = vmatprep.mubr.msk.f32.mxu1 %vm22481_vm14, %v11368_v13  ;;  %vm22486_vm9 = vmmov %vm22481_vm14  ;;  %vm22488_vm14 = vnez %v22152_v29 }
0x29d4   : > { %17381 = vmatprep.subr.msk.mxu0 %vm22482_vm15, %v22006_v5  ;;  %vm22487_vm1 = vmmov %vm22486_vm9 }
0x29d5   : > { %17382 = vmatpush3.msk.msra.mxu0 %vm22482_vm15, %v22006_v5  ;;  %vm22489_vm15 = vmmov %vm22485_vm7  ;;  %v11779_v59 = vpop.permute.xlu1 %11778 }
0x29d6   : > { %17383 = vmatprep.subr.msk.mxu0 %vm22483_vm12, %v22006_v5 }
0x29d7   : > { %17384 = vmatpush3.msk.msra.mxu0 %vm22483_vm12, %v22006_v5  ;;  %vm22490_vm12 = vnez %v22154_v40 }
0x29d8   : > { %17385 = vmatprep.subr.msk.mxu0 %vm22484_vm5, %v22006_v5 }
0x29d9   : > { %17386 = vmatpush3.msk.msra.mxu0 %vm22484_vm5, %v22006_v5  ;;  %vm22491_vm5 = vnez %v22156_v58  ;;  %v11791_v43 = vpop.permute.xlu1 %11790 }
0x29da   : > { %17388 = vmatmul.mubr.msk.f32.vlgmr.msra.gmra.mxu0 %vm22485_vm7, %v21079_v17  ;;  %vm22492_vm7 = vnez %v22158_v60  ;;  %v22503_v60 = vld [vmem:[#allocation56_spill] sm:$0xff] }
0x29db   : > { %17412 = vmatprep.mubr.msk.f32.mxu0 %vm22486_vm9, %v11528_v33  ;;  %vm22493_vm9 = vmmov %vm22489_vm15 }
0x2a91   : > { %v17371_v34 = vpop.f32.mrf.mxu0  ;;  %v17378_v54 = vpop.f32.mrf.mxu1 }
0x2a92   : > { %v11289_v2 = vadd.f32 %v17378_v54, %v17371_v34 }
0x2a93   : > { %v11204_v42 = vpop.f32.mrf.mxu0  ;;  %v11283_v29 = vpop.f32.mrf.mxu1 }
0x2a94   : > { %v11284_v48 = vadd.f32 %v11283_v29, %v11204_v42 }
0x2a9a   : > { %v17389_v35 = vpop.f32.mrf.mxu0 }
0x2a9b   : > { %17390 = vmatprep.subr.mxu1 %v17389_v35 }
0x2a9c   : > { %v11358_v6 = vpop.f32.mrf.mxu0  ;;  %17391 = vmatpush3.msra.mxu1 %v17389_v35 }
0x2a9d   : > { %17392 = vmatprep.subr.mxu1 %v11358_v6 }
0x2a9e   : > { %17393 = vmatpush3.msra.mxu1 %v11358_v6 }
0x2a9f   : > { %17395 = vmatmul.mubr.msk.f32.vlgmr.msra.gmra.mxu1 %vm22487_vm1, %v11370_v31  ;;  %17397 = vmatprep.subr.msk.mxu1 %vm22488_vm14, %v22006_v5 }
0x2aa0   : > { %17398 = vmatpush3.msk.msra.mxu1 %vm22488_vm14, %v22006_v5  ;;  %17405 = vmatprep.mubr.msk.f32.mxu1 %vm22489_vm15, %v21065_v15  ;;  %vm22494_vm14 = vmmov %vm22487_vm1  ;;  %vm22495_vm15 = vnez %v22162_v50  ;;  %v22505_v50 = vld [vmem:[#allocation58_spill] sm:$0xff] }
0x2aa1   : > { %17399 = vmatprep.subr.msk.mxu1 %vm22490_vm12, %v22006_v5 }
0x2aa2   : > { %17400 = vmatpush3.msk.msra.mxu1 %vm22490_vm12, %v22006_v5  ;;  %vm22496_vm12 = vmmov %vm22493_vm9 }
0x2aa3   : > { %17401 = vmatprep.subr.msk.mxu1 %vm22491_vm5, %v22006_v5 }
0x2aa4   : > { %17402 = vmatpush3.msk.msra.mxu1 %vm22491_vm5, %v22006_v5  ;;  %vm22497_vm5 = vnez %v22165_v55 }
0x2aa5   : > { %17403 = vmatprep.subr.msk.mxu1 %vm22492_vm7, %v22006_v5 }
0x2aa6   : > { %17404 = vmatpush3.msk.msra.mxu1 %vm22492_vm7, %v22006_v5  ;;  %vm22498_vm7 = vnez %v22167_v52 }
0x2aa7   : > { %17406 = vmatmul.mubr.msk.f32.vlgmr.msra.gmra.mxu1 %vm22493_vm9, %v21079_v17  ;;  %vm22499_vm9 = vnez %v22169_v47 }
0x2aa8   : > { %17430 = vmatprep.mubr.msk.f32.mxu1 %vm22487_vm1, %v11688_v36  ;;  %vm22500_vm1 = vmmov %vm22496_vm12  ;;  %v11965_v36 = vpop.permute.xlu0 %11964 }
0x2b5f   : > { %v17396_v40 = vpop.f32.mrf.mxu1 }
0x2b60   : > { %v11451_v14 = vadd.f32 %v17396_v40, %v11289_v2  ;;  %v11963_v2 = vpop.permute.xlu1 %11962 }
0x2b61   : > { %v11441_v58 = vpop.f32.mrf.mxu1 }
0x2b62   : > { %v11450_v45 = vadd.f32 %v11441_v58, %v11284_v48 }
0x2b64   : > { %v12200_v29 = vpop.permute.xlu1 %12199 }
0x2b67   : > { %v17407_v0 = vpop.f32.mrf.mxu1 }
0x2b68   : > { %17408 = vmatprep.subr.mxu0 %v17407_v0  ;;  %v12360_v63 = vpop.permute.xlu1 %12359 }
0x2b69   : > { %v11518_v44 = vpop.f32.mrf.mxu1  ;;  %17409 = vmatpush3.msra.mxu0 %v17407_v0 }
0x2b6a   : > { %17410 = vmatprep.subr.mxu0 %v11518_v44 }
0x2b6b   : > { %17411 = vmatpush3.msra.mxu0 %v11518_v44 }
0x2b6c   : > { %17413 = vmatmul.mubr.msk.f32.vlgmr.msra.gmra.mxu0 %vm22494_vm14, %v11530_v1  ;;  %17415 = vmatprep.subr.msk.mxu0 %vm22495_vm15, %v22006_v5  ;;  %vm22501_vm14 = vnez %v22379_v53  ;;  %v12520_v62 = vpop.permute.xlu1 %12519 }
0x2b6d   : > { %17416 = vmatpush3.msk.msra.mxu0 %vm22495_vm15, %v22006_v5  ;;  %17423 = vmatprep.mubr.msk.f32.mxu0 %vm22496_vm12, %v21065_v15  ;;  %vm22502_vm15 = vnez %v22381_v30  ;;  %vm22504_vm12 = vnez %v22503_v60 }
0x2b6e   : > { %17417 = vmatprep.subr.msk.mxu0 %vm22497_vm5, %v22006_v5 }
0x2b6f   : > { %17418 = vmatpush3.msk.msra.mxu0 %vm22497_vm5, %v22006_v5  ;;  %vm22506_vm5 = vnez %v22505_v50 }
0x2b70   : > { %17419 = vmatprep.subr.msk.mxu0 %vm22498_vm7, %v22006_v5 }
0x2b71   : > { %17420 = vmatpush3.msk.msra.mxu0 %vm22498_vm7, %v22006_v5  ;;  %vm22507_vm7 = vcmask 130048  }
0x2b72   : > { %17421 = vmatprep.subr.msk.mxu0 %vm22499_vm9, %v22006_v5 }
0x2b73   : > { %17422 = vmatpush3.msk.msra.mxu0 %vm22499_vm9, %v22006_v5  ;;  %vm22509_vm9 = vnez %v22508_v49 }
0x2b74   : > { %17424 = vmatmul.mubr.msk.f32.vlgmr.msra.gmra.mxu0 %vm22500_vm1, %v21079_v17  ;;  %17444 = vmatprep.subr.msk.mxu0 %vm22501_vm14, %v22006_v5  ;;  %vm22511_vm1 = vnez %v22510_v38 }
0x2b75   : > { %17445 = vmatpush3.msk.msra.mxu0 %vm22501_vm14, %v22006_v5  ;;  %vm22513_vm14 = vnez %v22512_v51 }
0x2b76   : > { %17446 = vmatprep.subr.msk.mxu0 %vm22502_vm15, %v22006_v5 }
0x2b77   : > { %17447 = vmatpush3.msk.msra.mxu0 %vm22502_vm15, %v22006_v5  ;;  %vm22515_vm15 = vnez %v22514_v39  ;;  %v12813_v39 = vld [vmem:[%s22538_s25] sm:$0xff] }
0x2b78   : > { %17448 = vmatprep.subr.msk.mxu0 %vm22504_vm12, %v22006_v5 }
0x2b79   : > { %17449 = vmatpush3.msk.msra.mxu0 %vm22504_vm12, %v22006_v5  ;;  %vm22516_vm12 = vcmask 261120  }
0x2b7a   : > { %17450 = vmatprep.subr.msk.mxu0 %vm22506_vm5, %v22006_v5 }
0x2b7b   : > { %17451 = vmatpush3.msk.msra.mxu0 %vm22506_vm5, %v22006_v5  ;;  %vm22517_vm5 = vmmov %vm22516_vm12 }
0x2c2c   : > { %v17414_v55 = vpop.f32.mrf.mxu0 }
0x2c2d   : > { %v11611_v52 = vadd.f32 %v17414_v55, %v11451_v14  ;;  %v12202_v14 = vpop.permute.xlu0 %12201 }
0x2c2e   : > { %v11601_v47 = vpop.f32.mrf.mxu0 }
0x2c2f   : > { %v11610_v53 = vadd.f32 %v11601_v47, %v11450_v45  ;;  %v12614_v47 = vpop.permute.xlu1 %12613 }
0x2c31   : > { %v12362_v60 = vpop.permute.xlu0 %12361 }
0x2c34   : > { %v17425_v30 = vpop.f32.mrf.mxu0 }
0x2c35   : > { %17426 = vmatprep.subr.mxu1 %v17425_v30 }
0x2c36   : > { %v11678_v32 = vpop.f32.mrf.mxu0  ;;  %17427 = vmatpush3.msra.mxu1 %v17425_v30 }
0x2c37   : > { %17428 = vmatprep.subr.mxu1 %v11678_v32 }
0x2c38   : > { %17429 = vmatpush3.msra.mxu1 %v11678_v32 }
0x2c39   : > { %17431 = vmatmul.mubr.msk.f32.vlgmr.msra.gmra.mxu1 %vm22507_vm7, %v11690_v37  ;;  %17433 = vmatprep.subr.msk.mxu1 %vm22509_vm9, %v22006_v5  ;;  %vm22518_vm7 = vmmov %vm22517_vm5 }
0x2c3a   : > { %17434 = vmatpush3.msk.msra.mxu1 %vm22509_vm9, %v22006_v5  ;;  %vm22519_vm9 = vmmov %vm22517_vm5 }
0x2c3b   : > { %17435 = vmatprep.subr.msk.mxu1 %vm22511_vm1, %v22006_v5 }
0x2c3c   : > { %17436 = vmatpush3.msk.msra.mxu1 %vm22511_vm1, %v22006_v5  ;;  %vm22520_vm1 = vcmask 130048  }
0x2c3d   : > { %17437 = vmatprep.subr.msk.mxu1 %vm22513_vm14, %v22006_v5 }
0x2c3e   : > { %17438 = vmatpush3.msk.msra.mxu1 %vm22513_vm14, %v22006_v5  ;;  %vm22521_vm14 = vmmov %vm22520_vm1 }
0x2c3f   : > { %17439 = vmatprep.subr.msk.mxu1 %vm22515_vm15, %v22006_v5 }
0x2c40   : > { %17440 = vmatpush3.msk.msra.mxu1 %vm22515_vm15, %v22006_v5  ;;  %vm22522_vm15 = vmmov %vm22520_vm1 }
0x2cf9   : > { %v17432_v15 = vpop.f32.mrf.mxu1 }
0x2cfa   : > { %v11771_v17 = vadd.f32 %v17432_v15, %v11611_v52 }
0x2cfb   : > { %v11761_v18 = vpop.f32.mrf.mxu1 }
0x2cfc   : > { %v11787_v56 = vmul.f32 %v11784_v46, %v11771_v17  ;;  %v11770_v28 = vadd.f32 %v11761_v18, %v11610_v53  ;;  %v12815_v46 = vld [vmem:[%s19835_s17] sm:$0xff] }
0x2cfe   : > { %v11786_v61 = vmul.f32 %v11779_v59, %v11770_v28  ;;  %v11799_v13 = vadd.f32 %v11796_v16, %v11787_v56  ;;  %v12814_v59 = vld [vmem:[%s22538_s25 + $0x8] sm:$0xff]  ;;  %v12618_v56 = vld [vmem:[%s22540_s14] sm:$0xf] }
0x2cff   : > { %v12619_v16 = vld [vmem:[%s19873_s29] sm:$0xff] }
0x2d00   : > { %v11798_v33 = vadd.f32 %v11791_v43, %v11786_v61  ;;  %v21253_v54 = vmax.f32 %v11799_v13, 0.0 }
0x2d02   : > { %v21251_v34 = vmax.f32 %v11798_v33, 0.0  ;;  %v12620_v33 = vld [vmem:[%s19873_s29 + $0x8] sm:$0xff] }
0x2d04   : > { %17441 = vmatprep.mubr.msk.f32.mxu1 %vm22516_vm12, %v21251_v34  ;;  %17452 = vmatprep.mubr.msk.f32.mxu0 %vm22517_vm5, %v21251_v34  ;;  %vm22523_vm12 = vmmov %vm22520_vm1 }
0x2d05   : > { %17442 = vmatmul.mubr.msk.f32.vlgmr.msra.gmra.mxu1 %vm22518_vm7, %v21253_v54  ;;  %17453 = vmatmul.mubr.msk.f32.vlgmr.msra.gmra.mxu0 %vm22519_vm9, %v21253_v54  ;;  %vm22524_vm7 = vmmov %vm22520_vm1  ;;  %vm22533_vm9 = vnez %v22442_v7 }
0x2d06   : > { %17459 = vmatprep.mubr.msk.f32.mxu1 %vm22520_vm1, %v11963_v2  ;;  %17466 = vmatprep.mubr.msk.f32.mxu0 %vm22521_vm14, %v21013_v11  ;;  %v22548_v2 = vld [vmem:[#allocation34_spill] sm:$0xff] }
0x2dc5   : > { %v17443_v42 = vpop.f32.mrf.mxu1  ;;  %v17454_v35 = vpop.f32.mrf.mxu0 }
0x2dc6   : > { %17455 = vmatprep.subr.mxu1 %v17454_v35  ;;  %17462 = vmatprep.subr.mxu0 %v17443_v42 }
0x2dc7   : > { %v11876_v6 = vpop.f32.mrf.mxu1  ;;  %v11951_v31 = vpop.f32.mrf.mxu0  ;;  %17456 = vmatpush3.msra.mxu1 %v17454_v35  ;;  %17463 = vmatpush3.msra.mxu0 %v17443_v42  ;;  %v22549_v42 = vmax.f32 %v22548_v2, 0.0  ;;  %v15326_v2 = vld [vmem:[%s19907_s15 + $0x90] sm:$0xff] }
0x2dc8   : > { %17457 = vmatprep.subr.mxu1 %v11951_v31  ;;  %17464 = vmatprep.subr.mxu0 %v11876_v6 }
0x2dc9   : > { %17458 = vmatpush3.msra.mxu1 %v11951_v31  ;;  %17465 = vmatpush3.msra.mxu0 %v11876_v6  ;;  %v12920_v35 = vrot.slane %v22549_v42, 1  ;;  %v15336_v42 = vld [vmem:[%s19907_s15 + $0xc8] sm:$0xff] }
0x2dca   : > { %17460 = vmatmul.mubr.msk.f32.vlgmr.msra.gmra.mxu1 %vm22522_vm15, %v11965_v36  ;;  %17467 = vmatmul.mubr.msk.f32.vlgmr.msra.gmra.mxu0 %vm22523_vm12, %v21010_v8  ;;  %vm22539_vm12 = vmmov 0  }
0x2dcb   : > { %17469 = vmatprep.subr.msk.mxu1 %vm22069_vm10, %v22006_v5  ;;  %17477 = vmatprep.mubr.msk.f32.mxu1 %vm22517_vm5, %v21251_v34 }
0x2dcc   : > { %17470 = vmatpush3.msk.msra.mxu1 %vm22069_vm10, %v22006_v5  ;;  %17484 = vmatprep.mubr.msk.f32.mxu0 %vm22524_vm7, %v12200_v29  ;;  %vm22525_vm10 = vmmov %vm22517_vm5 }
0x2dcd   : > { %17471 = vmatprep.subr.msk.mxu1 %vm22070_vm0, %v22006_v5 }
0x2dce   : > { %17472 = vmatpush3.msk.msra.mxu1 %vm22070_vm0, %v22006_v5  ;;  %vm22526_vm0 = vmmov %vm22520_vm1  ;;  %vm22534_vm1 = vnez %v22444_v9  ;;  %v12522_v9 = vpop.permute.xlu0 %12521 }
0x2dcf   : > { %17473 = vmatprep.subr.msk.mxu1 %vm22071_vm6, %v22006_v5  ;;  %vm22537_vm15 = vmmov %vm22526_vm0 }
0x2dd0   : > { %17474 = vmatpush3.msk.msra.mxu1 %vm22071_vm6, %v22006_v5  ;;  %vm22527_vm6 = vmmov %vm22526_vm0 }
0x2dd1   : > { %17475 = vmatprep.subr.msk.mxu1 %vm22415_vm4, %v22006_v5  ;;  %vm22542_vm7 = vmmov %vm22526_vm0 }
0x2dd2   : > { %17476 = vmatpush3.msk.msra.mxu1 %vm22415_vm4, %v22006_v5  ;;  %vm22528_vm4 = vmmov %vm22517_vm5  ;;  %v12609_v37 = vpop.permute.xlu0 %12608 }
0x2dd3   : > { %17478 = vmatmul.mubr.msk.f32.vlgmr.msra.gmra.mxu1 %vm22525_vm10, %v21253_v54  ;;  %vm22541_vm5 = vmmov %vm22526_vm0 }
0x2dd4   : > { %17502 = vmatprep.mubr.msk.f32.mxu1 %vm22526_vm0, %v12360_v63  ;;  %vm22543_vm10 = vmmov %vm22526_vm0 }
0x2e8a   : > { %v17461_v24 = vpop.f32.mrf.mxu1  ;;  %v17468_v8 = vpop.f32.mrf.mxu0 }
0x2e8b   : > { %v12121_v11 = vadd.f32 %v17468_v8, %v17461_v24 }
0x2e8c   : > { %v12036_v40 = vpop.f32.mrf.mxu1  ;;  %v12115_v10 = vpop.f32.mrf.mxu0 }
0x2e8d   : > { %v12116_v58 = vadd.f32 %v12115_v10, %v12036_v40  ;;  %v12846_v10 = vld [vmem:[%s19907_s15 + $0x8] sm:$0xff] }
0x2e93   : > { %v17479_v27 = vpop.f32.mrf.mxu1 }
0x2e94   : > { %17480 = vmatprep.subr.mxu0 %v17479_v27 }
0x2e95   : > { %v12190_v48 = vpop.f32.mrf.mxu1  ;;  %17481 = vmatpush3.msra.mxu0 %v17479_v27 }
0x2e96   : > { %17482 = vmatprep.subr.mxu0 %v12190_v48 }
0x2e97   : > { %17483 = vmatpush3.msra.mxu0 %v12190_v48 }
0x2e98   : > { %17485 = vmatmul.mubr.msk.f32.vlgmr.msra.gmra.mxu0 %vm22527_vm6, %v12202_v14  ;;  %17487 = vmatprep.subr.msk.mxu0 %vm22424_vm11, %v22006_v5  ;;  %vm22545_vm6 = vcmask 1043456  }
0x2e99   : > { %17488 = vmatpush3.msk.msra.mxu0 %vm22424_vm11, %v22006_v5  ;;  %17495 = vmatprep.mubr.msk.f32.mxu0 %vm22528_vm4, %v21251_v34  ;;  %vm22529_vm11 = vmmov %vm22528_vm4 }
0x2e9a   : > { %17489 = vmatprep.subr.msk.mxu0 %vm22425_vm8, %v22006_v5 }
0x2e9b   : > { %17490 = vmatpush3.msk.msra.mxu0 %vm22425_vm8, %v22006_v5  ;;  %vm22530_vm8 = vmmov %vm22526_vm0 }
0x2e9c   : > { %17491 = vmatprep.subr.msk.mxu0 %vm22426_vm2, %v22006_v5 }
0x2e9d   : > { %17492 = vmatpush3.msk.msra.mxu0 %vm22426_vm2, %v22006_v5  ;;  %vm22531_vm2 = vmmov %vm22526_vm0  ;;  %vm22544_vm0 = vcmask 31744  }
0x2e9e   : > { %17493 = vmatprep.subr.msk.mxu0 %vm22427_vm3, %v22006_v5 }
0x2e9f   : > { %17494 = vmatpush3.msk.msra.mxu0 %vm22427_vm3, %v22006_v5  ;;  %vm22532_vm3 = vmmov %vm22528_vm4 }
0x2ea0   : > { %17496 = vmatmul.mubr.msk.f32.vlgmr.msra.gmra.mxu0 %vm22529_vm11, %v21253_v54  ;;  %vm22536_vm14 = vmmov %vm22532_vm3 }
0x2ea1   : > { %17520 = vmatprep.mubr.msk.f32.mxu0 %vm22530_vm8, %v12520_v62  ;;  %vm22546_vm4 = vmmov %vm22545_vm6 }
0x2ea2   : > { %vm22547_vm11 = vmmov %vm22544_vm0 }
0x2ea3   : > { %vm22550_vm8 = vmmov %vm22531_vm2 }
0x2f58   : > { %v17486_v41 = vpop.f32.mrf.mxu0 }
0x2f59   : > { %v12283_v45 = vadd.f32 %v17486_v41, %v12121_v11 }
0x2f5a   : > { %v12273_v25 = vpop.f32.mrf.mxu0 }
0x2f5b   : > { %v12282_v0 = vadd.f32 %v12273_v25, %v12116_v58  ;;  %v12845_v58 = vld [vmem:[%s19907_s15] sm:$0xff]  ;;  %v12816_v25 = vld [vmem:[%s19835_s17 + $0x8] sm:$0xff] }
0x2f60   : > { %v17497_v44 = vpop.f32.mrf.mxu0 }
0x2f61   : > { %17498 = vmatprep.subr.mxu1 %v17497_v44 }
0x2f62   : > { %v12350_v1 = vpop.f32.mrf.mxu0  ;;  %17499 = vmatpush3.msra.mxu1 %v17497_v44 }
0x2f63   : > { %17500 = vmatprep.subr.mxu1 %v12350_v1 }
0x2f64   : > { %17501 = vmatpush3.msra.mxu1 %v12350_v1 }
0x2f65   : > { %17503 = vmatmul.mubr.msk.f32.vlgmr.msra.gmra.mxu1 %vm22531_vm2, %v12362_v60  ;;  %17505 = vmatprep.subr.msk.mxu1 %vm22441_vm13, %v22006_v5 }
0x2f66   : > { %17506 = vmatpush3.msk.msra.mxu1 %vm22441_vm13, %v22006_v5  ;;  %17513 = vmatprep.mubr.msk.f32.mxu1 %vm22532_vm3, %v21251_v34  ;;  %vm22535_vm13 = vnez %v22446_v12  ;;  %v12844_v34 = vld [vmem:[%s19881_s19 + $0x8] sm:$0xff]  ;;  %vm22551_vm3 = vmmov %vm22531_vm2 }
0x2f67   : > { %17507 = vmatprep.subr.msk.mxu1 %vm22533_vm9, %v22006_v5 }
0x2f68   : > { %17508 = vmatpush3.msk.msra.mxu1 %vm22533_vm9, %v22006_v5  ;;  %vm22552_vm9 = vmmov %vm22531_vm2 }
0x2f69   : > { %17509 = vmatprep.subr.msk.mxu1 %vm22534_vm1, %v22006_v5 }
0x2f6a   : > { %17510 = vmatpush3.msk.msra.mxu1 %vm22534_vm1, %v22006_v5  ;;  %vm22553_vm1 = vmmov %vm22531_vm2 }
0x2f6b   : > { %17511 = vmatprep.subr.msk.mxu1 %vm22535_vm13, %v22006_v5 }
0x2f6c   : > { %17512 = vmatpush3.msk.msra.mxu1 %vm22535_vm13, %v22006_v5  ;;  %vm22554_vm13 = vmmov %vm22553_vm1 }
0x2f6d   : > { %17514 = vmatmul.mubr.msk.f32.vlgmr.msra.gmra.mxu1 %vm22536_vm14, %v21253_v54  ;;  %v12843_v54 = vld [vmem:[%s19881_s19] sm:$0xff]  ;;  %vm22555_vm14 = vmmov %vm22553_vm1 }
0x2f6e   : > { %17532 = vmatprep.mubr.msk.f32.mxu1 %vm22544_vm0, %v12619_v16  ;;  %vm22560_vm0 = vmmov %vm22553_vm1 }
0x3025   : > { %v17504_v26 = vpop.f32.mrf.mxu1 }
0x3026   : > { %v12443_v4 = vadd.f32 %v17504_v26, %v12283_v45  ;;  %v15306_v45 = vld [vmem:[%s19907_s15 + $0x28] sm:$0xff] }
0x3027   : > { %v12433_v7 = vpop.f32.mrf.mxu1 }
0x3028   : > { %v12442_v50 = vadd.f32 %v12433_v7, %v12282_v0  ;;  %v15305_v0 = vld [vmem:[%s19907_s15 + $0x20] sm:$0xff] }
0x302d   : > { %v17515_v55 = vpop.f32.mrf.mxu1 }
0x302e   : > { %17516 = vmatprep.subr.mxu0 %v17515_v55 }
0x302f   : > { %v12510_v52 = vpop.f32.mrf.mxu1  ;;  %17517 = vmatpush3.msra.mxu0 %v17515_v55 }
0x3030   : > { %17518 = vmatprep.subr.mxu0 %v12510_v52 }
0x3031   : > { %17519 = vmatpush3.msra.mxu0 %v12510_v52 }
0x3032   : > { %17521 = vmatmul.mubr.msk.f32.vlgmr.msra.gmra.mxu0 %vm22537_vm15, %v12522_v9  ;;  %17523 = vmatprep.subr.mxu0 %v22005_v3  ;;  %v15303_v9 = vld [vmem:[%s19907_s15 + $0x18] sm:$0xff]  ;;  %vm22556_vm15 = vmmov %vm22553_vm1 }
0x3033   : > { %17527 = vmatprep.mubr.msk.f32.mxu0 %vm22539_vm12, %v22005_v3 }
0x30f2   : > { %v17522_v5 = vpop.f32.mrf.mxu0 }
0x30f3   : > { %v12603_v12 = vadd.f32 %v17522_v5, %v12443_v4 }
0x30f4   : > { %v12593_v53 = vpop.f32.mrf.mxu0 }
0x30f5   : > { %v21362_v30 = vadd.f32 %v12614_v47, %v12603_v12  ;;  %v12602_v32 = vadd.f32 %v12593_v53, %v12442_v50  ;;  %v15302_v12 = vld [vmem:[%s19907_s15 + $0x10] sm:$0xff]  ;;  %v15312_v47 = vld [vmem:[%s19907_s15 + $0x48] sm:$0xff] }
0x30f7   : > { %v21364_v49 = vadd.f32 %v12609_v37, %v12602_v32  ;;  %v12624_v38 = vsel %vm22541_vm5, %v21362_v30, 0.0  ;;  %v15308_v37 = vld [vmem:[%s19907_s15 + $0x30] sm:$0xff]  ;;  %vm22557_vm5 = vmmov %vm22553_vm1 }
0x30f8   : > { %12625 = vadd.xlane.f32.xlu1 %v12624_v38 }
0x30f9   : > { %v12621_v51 = vsel %vm22542_vm7, %v21364_v49, 0.0  ;;  %vm22558_vm7 = vmmov %vm22553_vm1 }
0x30fa   : > { %12622 = vadd.xlane.f32.xlu0 %v12621_v51  ;;  %v15317_v51 = vld [vmem:[%s19907_s15 + $0x60] sm:$0xff] }
0x3109   : > { %12819 = vperm.xlu1 %17705, %v12813_v39  }
0x310d   : > { %12831 = vperm.xlu1 %17705, %v12815_v46   ;;  %v15314_v46 = vld [vmem:[%s19907_s15 + $0x50] sm:$0xff] }
0x3111   : > { %12824 = vperm.xlu1 %17705, %v12814_v59  }
0x3181   : > { %v12626_v15 = vpop.xlane.xlu1 %12625 }
0x3182   : > { %v12628_v17 = vmul.f32 0.0625, %v12626_v15  ;;  %v15324_v15 = vld [vmem:[%s19907_s15 + $0x88] sm:$0xff] }
0x3183   : > { %v12623_v18 = vpop.xlane.xlu0 %12622 }
0x3184   : > { %v12627_v28 = vmul.f32 0.0625, %v12623_v18  ;;  %17524 = vmatpush3.msra.mxu0 %v12628_v17 }
0x3185   : > { %17525 = vmatprep.subr.mxu0 %v22005_v3  ;;  %v12820_v44 = vpop.permute.xlu1 %12819 }
0x3186   : > { %17526 = vmatpush3.msra.mxu0 %v12627_v28  ;;  %v15323_v28 = vld [vmem:[%s19907_s15 + $0x80] sm:$0xff] }
0x3187   : > { %17528 = vmatmul.mubr.msk.f32.vlgmr.msra.gmra.mxu0 %vm22543_vm10, %v12618_v56  ;;  %17535 = vmatprep.subr.mxu0 %v22005_v3  ;;  %v15321_v56 = vld [vmem:[%s19907_s15 + $0x78] sm:$0xff]  ;;  %vm22559_vm10 = vmmov %vm22553_vm1 }
0x3188   : > { %17539 = vmatprep.mubr.msk.f32.mxu0 %vm22539_vm12, %v22005_v3  ;;  %17536 = vmatpush3.msra.mxu0 %v12846_v10  ;;  %v15344_v10 = vld [vmem:[%s19907_s15 + $0xf0] sm:$0xff] }
0x3189   : > { %17537 = vmatprep.subr.mxu0 %v22005_v3  ;;  %v12832_v7 = vpop.permute.xlu1 %12831 }
0x318a   : > { %17538 = vmatpush3.msra.mxu0 %v12845_v58 }
0x318b   : > { %17549 = vmatprep.subr.mxu0 %v22005_v3 }
0x318d   : > { %v12825_v38 = vpop.permute.xlu1 %12824 }
0x3247   : > { %v12698_v61 = vpop.f32.mrf.mxu0 }
0x3248   : > { %v12702_v43 = vmax.f32 %v12698_v61, 0.0  ;;  %v15320_v61 = vld [vmem:[%s19907_s15 + $0x70] sm:$0xff] }
0x3249   : > { %v17529_v13 = vpop.f32.mrf.mxu0 }
0x324a   : > { %17530 = vmatprep.subr.msk.mxu1 %vm22545_vm6, %v12702_v43  ;;  %vm22561_vm6 = vmmov %vm22560_vm0 }
0x324b   : > { %17531 = vmatpush3.msk.msra.mxu1 %vm22546_vm4, %v12702_v43  ;;  %v15330_v43 = vld [vmem:[%s19907_s15 + $0xa8] sm:$0xff]  ;;  %vm22562_vm4 = vmmov %vm22560_vm0 }
0x324c   : > { %17533 = vmatmul.mubr.msk.f32.vlgmr.msra.gmra.mxu1 %vm22547_vm11, %v12620_v33  ;;  %17542 = vmatprep.subr.mxu1 %v22005_v3  ;;  %v15327_v33 = vld [vmem:[%s19907_s15 + $0x98] sm:$0xff]  ;;  %vm22563_vm11 = vmmov %vm22560_vm0 }
0x324d   : > { %17543 = vmatpush3.msra.mxu1 %v12844_v34  ;;  %17546 = vmatprep.mubr.msk.f32.mxu1 %vm22539_vm12, %v22005_v3  ;;  %v15329_v34 = vld [vmem:[%s19907_s15 + $0xa0] sm:$0xff] }
0x324e   : > { %17544 = vmatprep.subr.mxu1 %v22005_v3 }
0x324f   : > { %17545 = vmatpush3.msra.mxu1 %v12843_v54 }
0x3250   : > { %17547 = vmatmul.mubr.msk.f32.vlgmr.msra.gmra.mxu1 %vm22550_vm8, %v12920_v35  ;;  %17556 = vmatprep.subr.mxu1 %v22005_v3  ;;  %vm22564_vm8 = vmmov %vm22560_vm0 }
0x3251   : > { %17560 = vmatprep.mubr.msk.f32.mxu1 %vm22539_vm12, %v22005_v3  ;;  %17557 = vmatpush3.msra.mxu1 %v15306_v45 }
0x3252   : > { %17558 = vmatprep.subr.mxu1 %v22005_v3 }
0x3253   : > { %17559 = vmatpush3.msra.mxu1 %v15305_v0 }
0x3254   : > { %17570 = vmatprep.subr.mxu1 %v22005_v3 }
0x330c   : > { %v17534_v6 = vpop.f32.mrf.mxu1 }
0x330d   : > { %v12788_v31 = vsub.f32 0.0, %v17534_v6  ;;  %v15333_v6 = vld [vmem:[%s19907_s15 + $0xb8] sm:$0xff] }
0x330e   : > { %v12778_v36 = vpop.f32.mrf.mxu1 }
0x330f   : > { %v12791_v29 = vmul.f32 1.442695, %v12788_v31  ;;  %v12787_v63 = vsub.f32 0.0, %v12778_v36  ;;  %v15335_v31 = vld [vmem:[%s19907_s15 + $0xc0] sm:$0xff] }
0x3310   : > { %v21397_v24 = vpop.f32.mrf.mxu1 }
0x3311   : > { %v12789_v8 = vmul.f32 1.442695, %v12787_v63  ;;  %17730 = vpow2.f32 %v12791_v29  ;;  %v15332_v29 = vld [vmem:[%s19907_s15 + $0xb0] sm:$0xff]  ;;  %v15342_v63 = vld [vmem:[%s19907_s15 + $0xe8] sm:$0xff] }
0x3312   : > { %v17548_v11 = vpop.f32.mrf.mxu1 }
0x3313   : > { %17732 = vpow2.f32 %v12789_v8  ;;  %v15339_v11 = vld [vmem:[%s19907_s15 + $0xd8] sm:$0xff] }
0x331e   : > { %v17731_v40 = vpop.eup %17730 }
0x331f   : > { %v12794_v14 = vadd.f32 1.0, %v17731_v40  ;;  %v15341_v40 = vld [vmem:[%s19907_s15 + $0xe0] sm:$0xff] }
0x3320   : > { %v17733_v27 = vpop.eup %17732 }
0x3321   : > { %v12793_v48 = vadd.f32 1.0, %v17733_v27 }
0x3323   : > { %17734 = vrcp.f32 %v12793_v48  ;;  %v15338_v48 = vld [vmem:[%s19907_s15 + $0xd0] sm:$0xff] }
0x3324   : > { %17736 = vrcp.f32 %v12794_v14 }
0x3330   : > { %v17735_v62 = vpop.eup %17734 }
0x3331   : > { %12801 = vperm.xlu0 %17704, %v17735_v62   ;;  %v17737_v41 = vpop.eup %17736  ;;  %v15345_v62 = vld [vmem:[%s19907_s15 + $0xf8] sm:$0xff] }
0x3335   : > { %12806 = vperm.xlu0 %17704, %v17737_v41  }
0x3339   : > { %12836 = vperm.xlu0 %17704, %v12816_v25  }
0x33ac   : > { %v12802_v1 = vpop.permute.xlu0 %12801 }
0x33ad   : > { %v12809_v60 = vmul.f32 %v12802_v1, %v21364_v49  ;;  %v15318_v49 = vld [vmem:[%s19907_s15 + $0x68] sm:$0xff] }
0x33af   : > { %v12811_v26 = vadd.f32 %v12809_v60, %v10938_v57  ;;  %v15311_v57 = vld [vmem:[%s19907_s15 + $0x40] sm:$0xff] }
0x33b0   : > { %v12807_v52 = vpop.permute.xlu0 %12806 }
0x33b1   : > { %v12827_v4 = vmul.f32 %v12820_v44, %v12811_v26  ;;  %v12810_v53 = vmul.f32 %v12807_v52, %v21362_v30 }
0x33b3   : > { %v12839_v50 = vadd.f32 %v12832_v7, %v12827_v4  ;;  %v12812_v30 = vadd.f32 %v12810_v53, %v10939_v21 }
0x33b4   : > { %v12837_v59 = vpop.permute.xlu0 %12836 }
0x33b5   : > { %v21412_v55 = vmax.f32 %v12839_v50, 0.0  ;;  %v12828_v21 = vmul.f32 %v12825_v38, %v12812_v30 }
0x33b7   : > { %17540 = vmatmul.mubr.msk.f32.vlgmr.msra.gmra.mxu0 %vm22531_vm2, %v21412_v55  ;;  %v13071_v5 = vrot.slane %v21412_v55, 2  ;;  %v12995_v22 = vrot.slane %v21412_v55, 1  ;;  %v13223_v32 = vrot.slane %v21412_v55, 4  ;;  %v13147_v19 = vrot.slane %v21412_v55, 3  ;;  %vm22565_vm2 = vmmov %vm22560_vm0 }
0x33b8   : > { %17550 = vmatpush3.msra.mxu0 %v15303_v9  ;;  %17553 = vmatprep.mubr.msk.f32.mxu0 %vm22539_vm12, %v22005_v3  ;;  %v13375_v39 = vrot.slane %v21412_v55, 6  ;;  %v12840_v17 = vadd.f32 %v12837_v59, %v12828_v21  ;;  %v13299_v18 = vrot.slane %v21412_v55, 5  ;;  %v13451_v13 = vrot.slane %v21412_v55, 7 }
0x33b9   : > { %17551 = vmatprep.subr.mxu0 %v22005_v3  ;;  %17561 = vmatmul.mubr.msk.f32.vlgmr.msra.gmra.mxu1 %vm22551_vm3, %v13071_v5 }
0x33ba   : > { %17552 = vmatpush3.msra.mxu0 %v15302_v12  ;;  %17571 = vmatpush3.msra.mxu1 %v15312_v47  ;;  %v21465_v16 = vmax.f32 %v12840_v17, 0.0 }
0x33bb   : > { %17554 = vmatmul.mubr.msk.f32.vlgmr.msra.gmra.mxu0 %vm22552_vm9, %v12995_v22  ;;  %17563 = vmatprep.subr.mxu0 %v22005_v3 }
0x33bc   : > { %17572 = vmatprep.subr.mxu1 %v22005_v3  ;;  %17564 = vmatpush3.msra.mxu0 %v15309_v23  ;;  %v13679_v54 = vrot.slane %v21465_v16, 2  ;;  %v13603_v35 = vrot.slane %v21465_v16, 1  ;;  %v13831_v36 = vrot.slane %v21465_v16, 4  ;;  %v13755_v8 = vrot.slane %v21465_v16, 3 }
0x33bd   : > { %17573 = vmatpush3.msra.mxu1 %v15311_v57  ;;  %17574 = vmatprep.mubr.msk.f32.mxu1 %vm22539_vm12, %v22005_v3  ;;  %v13983_v27 = vrot.slane %v21465_v16, 6  ;;  %v13907_v14 = vrot.slane %v21465_v16, 5  ;;  %v14059_v41 = vrot.slane %v21465_v16, 7 }
0x33be   : > { %17565 = vmatprep.subr.mxu0 %v22005_v3  ;;  %17575 = vmatmul.mubr.msk.f32.vlgmr.msra.gmra.mxu1 %vm22553_vm1, %v13223_v32 }
0x33bf   : > { %17584 = vmatprep.subr.mxu1 %v22005_v3  ;;  %17566 = vmatpush3.msra.mxu0 %v15308_v37 }
0x33c0   : > { %17567 = vmatprep.mubr.msk.f32.mxu0 %vm22539_vm12, %v22005_v3  ;;  %17585 = vmatpush3.msra.mxu1 %v15318_v49 }
0x33c1   : > { %17568 = vmatmul.mubr.msk.f32.vlgmr.msra.gmra.mxu0 %vm22554_vm13, %v13147_v19  ;;  %17577 = vmatprep.subr.mxu0 %v22005_v3 }
0x33c2   : > { %17586 = vmatprep.subr.mxu1 %v22005_v3  ;;  %17578 = vmatpush3.msra.mxu0 %v15315_v20 }
0x33c3   : > { %17587 = vmatpush3.msra.mxu1 %v15317_v51  ;;  %17588 = vmatprep.mubr.msk.f32.mxu1 %vm22539_vm12, %v22005_v3 }
0x33c4   : > { %17579 = vmatprep.subr.mxu0 %v22005_v3  ;;  %17589 = vmatmul.mubr.msk.f32.vlgmr.msra.gmra.mxu1 %vm22555_vm14, %v13375_v39 }
0x33c5   : > { %17598 = vmatprep.subr.mxu1 %v22005_v3  ;;  %17580 = vmatpush3.msra.mxu0 %v15314_v46 }
0x33c6   : > { %17581 = vmatprep.mubr.msk.f32.mxu0 %vm22539_vm12, %v22005_v3  ;;  %17599 = vmatpush3.msra.mxu1 %v15324_v15 }
0x33c7   : > { %17582 = vmatmul.mubr.msk.f32.vlgmr.msra.gmra.mxu0 %vm22556_vm15, %v13299_v18  ;;  %17591 = vmatprep.subr.mxu0 %v22005_v3 }
0x33c8   : > { %17600 = vmatprep.subr.mxu1 %v22005_v3  ;;  %17592 = vmatpush3.msra.mxu0 %v15321_v56 }
0x33c9   : > { %17601 = vmatpush3.msra.mxu1 %v15323_v28  ;;  %17602 = vmatprep.mubr.msk.f32.mxu1 %vm22539_vm12, %v22005_v3 }
0x33ca   : > { %17593 = vmatprep.subr.mxu0 %v22005_v3  ;;  %17603 = vmatmul.mubr.msk.f32.vlgmr.msra.gmra.mxu1 %vm22557_vm5, %v21465_v16 }
0x33cb   : > { %17612 = vmatprep.subr.mxu1 %v22005_v3  ;;  %17594 = vmatpush3.msra.mxu0 %v15320_v61 }
0x33cc   : > { %17595 = vmatprep.mubr.msk.f32.mxu0 %vm22539_vm12, %v22005_v3  ;;  %17613 = vmatpush3.msra.mxu1 %v15330_v43 }
0x33cd   : > { %17596 = vmatmul.mubr.msk.f32.vlgmr.msra.gmra.mxu0 %vm22558_vm7, %v13451_v13  ;;  %17605 = vmatprep.subr.mxu0 %v22005_v3 }
0x33ce   : > { %17614 = vmatprep.subr.mxu1 %v22005_v3  ;;  %17606 = vmatpush3.msra.mxu0 %v15327_v33 }
0x33cf   : > { %17615 = vmatpush3.msra.mxu1 %v15329_v34  ;;  %17616 = vmatprep.mubr.msk.f32.mxu1 %vm22539_vm12, %v22005_v3 }
0x33d0   : > { %17607 = vmatprep.subr.mxu0 %v22005_v3  ;;  %17617 = vmatmul.mubr.msk.f32.vlgmr.msra.gmra.mxu1 %vm22559_vm10, %v13679_v54  ;;  %v14133_v54 = vld [vmem:[%s20159_s0] sm:$0x1] }
0x33d1   : > { %17626 = vmatprep.subr.mxu1 %v22005_v3  ;;  %17608 = vmatpush3.msra.mxu0 %v15326_v2 }
0x33d2   : > { %17609 = vmatprep.mubr.msk.f32.mxu0 %vm22539_vm12, %v22005_v3  ;;  %17627 = vmatpush3.msra.mxu1 %v15336_v42 }
0x33d3   : > { %17610 = vmatmul.mubr.msk.f32.vlgmr.msra.gmra.mxu0 %vm22560_vm0, %v13603_v35  ;;  %17619 = vmatprep.subr.mxu0 %v22005_v3 }
0x33d4   : > { %17628 = vmatprep.subr.mxu1 %v22005_v3  ;;  %17620 = vmatpush3.msra.mxu0 %v15333_v6 }
0x33d5   : > { %17629 = vmatpush3.msra.mxu1 %v15335_v31  ;;  %17630 = vmatprep.mubr.msk.f32.mxu1 %vm22539_vm12, %v22005_v3 }
0x33d6   : > { %17621 = vmatprep.subr.mxu0 %v22005_v3  ;;  %17631 = vmatmul.mubr.msk.f32.vlgmr.msra.gmra.mxu1 %vm22561_vm6, %v13831_v36 }
0x33d7   : > { %17640 = vmatprep.subr.mxu1 %v22005_v3  ;;  %17622 = vmatpush3.msra.mxu0 %v15332_v29 }
0x33d8   : > { %17623 = vmatprep.mubr.msk.f32.mxu0 %vm22539_vm12, %v22005_v3  ;;  %17641 = vmatpush3.msra.mxu1 %v15342_v63 }
0x33d9   : > { %17624 = vmatmul.mubr.msk.f32.vlgmr.msra.gmra.mxu0 %vm22562_vm4, %v13755_v8  ;;  %17633 = vmatprep.subr.mxu0 %v22005_v3 }
0x33da   : > { %17642 = vmatprep.subr.mxu1 %v22005_v3  ;;  %17634 = vmatpush3.msra.mxu0 %v15339_v11 }
0x33db   : > { %17643 = vmatpush3.msra.mxu1 %v15341_v40  ;;  %17644 = vmatprep.mubr.msk.f32.mxu1 %vm22539_vm12, %v22005_v3 }
0x33dc   : > { %17635 = vmatprep.subr.mxu0 %v22005_v3  ;;  %17645 = vmatmul.mubr.msk.f32.vlgmr.msra.gmra.mxu1 %vm22563_vm11, %v13983_v27 }
0x33dd   : > { %17636 = vmatpush3.msra.mxu0 %v15338_v48  ;;  %17637 = vmatprep.mubr.msk.f32.mxu0 %vm22539_vm12, %v22005_v3 }
0x33de   : > { %17638 = vmatmul.mubr.msk.f32.vlgmr.msra.gmra.mxu0 %vm22564_vm8, %v13907_v14  ;;  %17647 = vmatprep.subr.mxu0 %v22005_v3 }
0x33df   : > { %17648 = vmatpush3.msra.mxu0 %v15345_v62  ;;  %17651 = vmatprep.mubr.msk.f32.mxu0 %vm22539_vm12, %v22005_v3  ;;  %vm22566_vm12 = vcmask 32768  }
0x33e0   : > { %17649 = vmatprep.subr.mxu0 %v22005_v3 }
0x33e1   : > { %17650 = vmatpush3.msra.mxu0 %v15344_v10 }
0x33e2   : > { %17652 = vmatmul.mubr.msk.f32.vlgmr.msra.gmra.mxu0 %vm22565_vm2, %v14059_v41 }
0x3477   : > { %v12916_v58 = vpop.f32.mrf.mxu0 }
0x3478   : > { %v12990_v0 = vadd.f32 %v21397_v24, %v12916_v58 }
0x3479   : > { %v17541_v45 = vpop.f32.mrf.mxu0  ;;  %v13140_v25 = vpop.f32.mrf.mxu1 }
0x347b   : > { %v13064_v44 = vpop.f32.mrf.mxu0  ;;  %v17562_v1 = vpop.f32.mrf.mxu1 }
0x347c   : > { %v13068_v60 = vadd.f32 %v13064_v44, %v12990_v0 }
0x347d   : > { %v17555_v26 = vpop.f32.mrf.mxu0 }
0x347e   : > { %v13292_v4 = vpop.f32.mrf.mxu1  ;;  %v13144_v7 = vadd.f32 %v13140_v25, %v13068_v60 }
0x3480   : > { %v17576_v50 = vpop.f32.mrf.mxu1 }
0x3481   : > { %v13216_v55 = vpop.f32.mrf.mxu0 }
0x3482   : > { %v13220_v52 = vadd.f32 %v13216_v55, %v13144_v7 }
0x3483   : > { %v17569_v3 = vpop.f32.mrf.mxu0 }
0x3484   : > { %v13444_v9 = vpop.f32.mrf.mxu1  ;;  %v13296_v5 = vadd.f32 %v13292_v4, %v13220_v52 }
0x3486   : > { %v17590_v12 = vpop.f32.mrf.mxu1 }
0x3487   : > { %v13368_v47 = vpop.f32.mrf.mxu0 }
0x3488   : > { %v13372_v53 = vadd.f32 %v13368_v47, %v13296_v5 }
0x3489   : > { %v17583_v22 = vpop.f32.mrf.mxu0 }
0x348a   : > { %v13596_v23 = vpop.f32.mrf.mxu1  ;;  %v13448_v57 = vadd.f32 %v13444_v9, %v13372_v53 }
0x348c   : > { %v17604_v30 = vpop.f32.mrf.mxu1 }
0x348d   : > { %v13520_v24 = vpop.f32.mrf.mxu0 }
0x348e   : > { %v13524_v32 = vadd.f32 %v13520_v24, %v13448_v57 }
0x348f   : > { %v17597_v37 = vpop.f32.mrf.mxu0 }
0x3490   : > { %v13748_v49 = vpop.f32.mrf.mxu1  ;;  %v13600_v38 = vadd.f32 %v13596_v23, %v13524_v32 }
0x3492   : > { %v17618_v19 = vpop.f32.mrf.mxu1 }
0x3493   : > { %v13672_v20 = vpop.f32.mrf.mxu0 }
0x3494   : > { %v13676_v21 = vadd.f32 %v13672_v20, %v13600_v38 }
0x3495   : > { %v17611_v51 = vpop.f32.mrf.mxu0 }
0x3496   : > { %v13900_v39 = vpop.f32.mrf.mxu1  ;;  %v13752_v46 = vadd.f32 %v13748_v49, %v13676_v21 }
0x3498   : > { %v17632_v59 = vpop.f32.mrf.mxu1 }
0x3499   : > { %v13824_v15 = vpop.f32.mrf.mxu0 }
0x349a   : > { %v13828_v17 = vadd.f32 %v13824_v15, %v13752_v46 }
0x349b   : > { %v17625_v18 = vpop.f32.mrf.mxu0 }
0x349c   : > { %v14052_v56 = vpop.f32.mrf.mxu1  ;;  %v13904_v28 = vadd.f32 %v13900_v39, %v13828_v17 }
0x349e   : > { %v13976_v16 = vpop.f32.mrf.mxu0  ;;  %v17646_v61 = vpop.f32.mrf.mxu1 }
0x349f   : > { %v13980_v43 = vadd.f32 %v13976_v16, %v13904_v28 }
0x34a0   : > { %v17639_v13 = vpop.f32.mrf.mxu0 }
0x34a1   : > { %v14056_v33 = vadd.f32 %v14052_v56, %v13980_v43 }
0x34a2   : > { %v14128_v34 = vpop.f32.mrf.mxu0 }
0x34a3   : > { %v14132_v2 = vadd.f32 %v14128_v34, %v14056_v33 }
0x34a4   : > { %v17653_v42 = vpop.f32.mrf.mxu0 }
0x34a5   : > { %v14134_v35 = vadd.f32 %v14133_v54, %v14132_v2 }
0x34a7   : > { %14135 = vst.msk [vmem:[%s20165_s1 + $0x1] sm:$0x1] %vm22566_vm12, %v14134_v35 }
0x34a8 PF: > { %s22567_s30 = sld [smem:[#allocation28_spill]] }
0x34ae   : > { %s71_s15 = sadd.s32 1, %s22567_s30  }
0x34af   : > { %p68_p4 = scmp.ge.s32.totalorder %s71_s15, 4  }
0x34b1   :  { %70 = sbr.rel (!%p68_p4) target bundleno = 65 (0x41), region = 297 }

</bundles_post_ra>
